<compile_context>
chip_gen: v7x
topology: tpu7x:2x2x1
jax: 0.10.0
libtpu: 0.0.40
codegen_flags: <defaults>
</compile_context>

<pallas_src>
import functools

import jax
import jax.numpy as jnp
import numpy as np
from jax import lax
from jax.experimental import pallas as pl
from jax.experimental.pallas import tpu as pltpu


# ----------------------------------------------------------------------------
# Host-side constant 0/1 matrices (built once per trace, VMEM-resident).
# ----------------------------------------------------------------------------
def _pool_select_matrix(H, W):
    """(H*W, Ho*Wo): column q is one-hot at the top-left pixel of 2x2 window q."""
    Ho, Wo = H // 2, W // 2
    q = np.arange(Ho * Wo)
    p = (2 * (q // Wo)) * W + 2 * (q % Wo)
    m = np.zeros((H * W, Ho * Wo), np.float32)
    m[p, q] = 1.0
    return m


def _upsample_matrix(H, W):
    """(H*W, 4*H*W): column q is one-hot at the nearest-neighbour parent of q."""
    H2, W2 = 2 * H, 2 * W
    q = np.arange(H2 * W2)
    p = (q // W2 // 2) * W + (q % W2) // 2
    m = np.zeros((H * W, H2 * W2), np.float32)
    m[p, q] = 1.0
    return m


def _conv_matrix(w, b, cin_pad=None):
    """HWIO (kh,kw,cin,cout) + (cout,) -> (cout, kh*kw*cin[_pad] + 8).

    Column layout matches the in-kernel im2col strip: kh*kw blocks of cin
    channels (taps in (dy, dx) row-major order) followed by an 8-wide bias
    block whose first column multiplies the in-kernel ones-row.
    """
    kh, kw, cin, cout = w.shape
    if cin_pad is not None and cin_pad != cin:
        w = jnp.concatenate(
            [w, jnp.zeros((kh, kw, cin_pad - cin, cout), w.dtype)], axis=2)
        cin = cin_pad
    w2 = w.reshape(kh * kw, cin, cout).transpose(2, 0, 1).reshape(cout, kh * kw * cin)
    bias_block = jnp.concatenate(
        [b.reshape(cout, 1), jnp.zeros((cout, 7), w.dtype)], axis=1)
    return jnp.concatenate([w2, bias_block], axis=1)


# ----------------------------------------------------------------------------
# Fused UNET1 kernel (one image per grid step; everything VMEM-resident).
# ----------------------------------------------------------------------------
def _build_unet_kernel(H, W, n_levels, mxu_dtype):
    def kernel(*refs):
        it = iter(refs)
        x_ref = next(it)
        pool_refs = [next(it) for _ in range(n_levels - 1)]
        up_refs = [next(it) for _ in range(n_levels - 1)]
        enc_refs = [next(it) for _ in range(2 * n_levels)]
        dec_refs = [next(it) for _ in range(3 * (n_levels - 1))]
        wf_ref = next(it)
        out_ref = next(it)

        mask_cache = {}
        bias_cache = {}

        def tap_mask(Hl, Wl, dy, dx):
            """(1, Hl*Wl) bool: pixel (h+dy, w+dx) is in bounds."""
            key = (Hl, Wl, dy, dx)
            if key not in mask_cache:
                Rl = Hl * Wl
                col = lax.broadcasted_iota(jnp.int32, (1, Rl), 1)
                if (Wl & (Wl - 1)) == 0:          # power-of-two fast path
                    ww = col & (Wl - 1)
                    hh = col >> (Wl.bit_length() - 1)
                else:
                    ww = col % Wl
                    hh = col // Wl
                mask_cache[key] = ((hh + dy >= 0) & (hh + dy < Hl) &
                                   (ww + dx >= 0) & (ww + dx < Wl))
            return mask_cache[key]

        def bias_rows(Rl):
            """(8, Rl) f32: row 0 = ones (bias row), rows 1..7 = zeros (keeps the
            im2col strip sublane-aligned)."""
            if Rl not in bias_cache:
                r = lax.broadcasted_iota(jnp.int32, (8, Rl), 0)
                bias_cache[Rl] = (r == 0).astype(jnp.float32)
            return bias_cache[Rl]

        def shift(x, off, Rl):
            # shifted[:, p] == x[:, p + off] wherever p + off is in [0, Rl);
            # wrapped lanes are only read at positions that the caller masks /
            # zero-selects, so the circular wrap is harmless.
            return jnp.roll(x, -off, axis=1)

        def mxu(v):
            return v if mxu_dtype == jnp.float32 else v.astype(mxu_dtype)

        def conv3x3(x, w_ref, Hl, Wl):
            """SAME 3x3 conv + bias + ReLU: one im2col strip, one MXU matmul."""
            Rl = Hl * Wl
            taps = []
            for dy in (-1, 0, 1):
                for dx in (-1, 0, 1):
                    if dy == 0 and dx == 0:
                        taps.append(x)
                    else:
                        xs = shift(x, dy * Wl + dx, Rl)
                        taps.append(jnp.where(tap_mask(Hl, Wl, dy, dx), xs,
                                              jnp.zeros_like(xs)))
            cols = jnp.concatenate(taps + [bias_rows(Rl)], axis=0)
            acc = jnp.dot(w_ref[...], mxu(cols),
                          preferred_element_type=jnp.float32)
            return jnp.maximum(acc, 0.0)

        def maxpool2x2(x, Hl, Wl, sel_ref):
            Rl = Hl * Wl
            m = x
            for off in (1, Wl, Wl + 1):
                m = jnp.maximum(m, shift(x, off, Rl))
            # 0/1 selection matmul keeps only the top-left pixel of each 2x2
            # window (every other column of `m` hits an all-zero row of sel).
            return jnp.dot(mxu(m), sel_ref[...],
                           preferred_element_type=jnp.float32)

        def upsample2x(x, rep_ref):
            return jnp.dot(mxu(x), rep_ref[...],
                           preferred_element_type=jnp.float32)

        # ------------------------------- encoder ------------------------------
        y = x_ref[0].astype(jnp.float32)              # (Cin_pad, H*W)
        skips = []
        for l in range(n_levels):
            Hl, Wl = H >> l, W >> l
            if l > 0:
                y = maxpool2x2(y, H >> (l - 1), W >> (l - 1), pool_refs[l - 1])
            y = conv3x3(y, enc_refs[2 * l], Hl, Wl)
            # TODO(synk): F.dropout(p=0.1/0.3/0.2) is stochastic under PyTorch's
            # training-mode default; applied as identity (eval semantics) here.
            y = conv3x3(y, enc_refs[2 * l + 1], Hl, Wl)
            if l < n_levels - 1:
                skips.append(y)
        skips = skips[::-1]

        # ------------------------------- decoder ------------------------------
        for l in range(n_levels - 1):
            lvl = n_levels - 2 - l                    # resolution after upsample
            Hl, Wl = H >> lvl, W >> lvl
            y = upsample2x(y, up_refs[l])
            y = conv3x3(y, dec_refs[3 * l], Hl, Wl)
            y = jnp.concatenate([skips[l], y], axis=0)   # channel concat (skip first)
            y = conv3x3(y, dec_refs[3 * l + 1], Hl, Wl)
            y = conv3x3(y, dec_refs[3 * l + 2], Hl, Wl)

        # ------------------------- final 1x1 conv + sigmoid --------------------
        Rl = H * W
        cols = jnp.concatenate([y, bias_rows(Rl)], axis=0)
        logits = jnp.dot(wf_ref[...], mxu(cols), preferred_element_type=jnp.float32)
        out_ref[...] = (1.0 / (1.0 + jnp.exp(-logits))).reshape(1, 1, Rl)

    return kernel


# ----------------------------------------------------------------------------
# Wrapper: one fused pallas_call for the whole network.
# ----------------------------------------------------------------------------
def unet1_forward(params, x_nchw, n_levels, compute_dtype=jnp.bfloat16):
    N, Cin, H, W = x_nchw.shape
    assert H % (1 << (n_levels - 1)) == 0 and W % (1 << (n_levels - 1)) == 0
    # Sublane-aligned channel counts keep all in-kernel concats tile-aligned.
    for w, _ in params["enc"] + params["dec"]:
        assert w.shape[3] % 8 == 0, "internal channel counts must be multiples of 8"

    # Pad input channels up to a multiple of 8 with zero channels (matched by
    # zero weight columns -> mathematically identical).
    cin_pad = ((Cin + 7) // 8) * 8
    x3 = x_nchw.reshape(N, Cin, H * W).astype(jnp.float32)
    if cin_pad != Cin:
        x3 = jnp.concatenate(
            [x3, jnp.zeros((N, cin_pad - Cin, H * W), jnp.float32)], axis=1)

    flat_inputs = [x3]
    in_specs = [pl.BlockSpec((1, cin_pad, H * W), lambda n: (n, 0, 0))]

    def add_shared(arr):
        arr = jnp.asarray(arr, compute_dtype)
        nd = arr.ndim
        flat_inputs.append(arr)
        in_specs.append(pl.BlockSpec(arr.shape, lambda n, nd=nd: (0,) * nd))

    # 1) pooling-selection / upsample-replication matrices (exact 0/1 values)
    for l in range(1, n_levels):
        add_shared(_pool_select_matrix(H >> (l - 1), W >> (l - 1)))
    for l in range(n_levels - 1):
        add_shared(_upsample_matrix(H >> (n_levels - 1 - l), W >> (n_levels - 1 - l)))

    # 2) conv weights with bias folded in (first encoder conv padded to cin_pad)
    for i, (w, b) in enumerate(params["enc"]):
        add_shared(_conv_matrix(w, b, cin_pad=cin_pad if i == 0 else None))
    for w, b in params["dec"]:
        add_shared(_conv_matrix(w, b))
    wf, bf = params["final"]
    add_shared(_conv_matrix(wf, bf))

    out = pl.pallas_call(
        _build_unet_kernel(H, W, n_levels, compute_dtype),
        out_shape=jax.ShapeDtypeStruct((N, 1, H * W), jnp.float32),
        grid=(N,),
        in_specs=in_specs,
        out_specs=pl.BlockSpec((1, 1, H * W), lambda n: (n, 0, 0)),
        compiler_params=pltpu.CompilerParams(dimension_semantics=("parallel",)),
    )(*flat_inputs)

    return out.reshape(N, 1, H, W)                    # (N, 1, H, W)


# ----------------------------------------------------------------------------
# Parameters (deterministic, synthetic; HWIO weight layout)
# ----------------------------------------------------------------------------
def init_params(key, n_chan_input, n_levels, start_power, exponent=2,
                k_enc=3, k_dec=3, k_up=3):
    chans1 = [n_chan_input] + [exponent ** p for p in range(start_power, start_power + n_levels)]
    chans2 = chans1[::-1][:-1]

    def conv_init(k, kh, kw, cin, cout):
        kw_, kb_ = jax.random.split(k)
        fan_in = kh * kw * cin
        w = jax.random.normal(kw_, (kh, kw, cin, cout), jnp.float32) / jnp.sqrt(float(fan_in))
        b = jax.random.normal(kb_, (cout,), jnp.float32) * 0.01
        return w, b

    n_keys = 2 * n_levels + 3 * (n_levels - 1) + 1
    keys = jax.random.split(key, n_keys)
    ki = 0
    params = {"enc": [], "dec": []}
    for l in range(n_levels):
        params["enc"].append(conv_init(keys[ki], k_enc, k_enc, chans1[l], chans1[l + 1])); ki += 1
        params["enc"].append(conv_init(keys[ki], k_enc, k_enc, chans1[l + 1], chans1[l + 1])); ki += 1
    for l in range(n_levels - 1):
        params["dec"].append(conv_init(keys[ki], k_up, k_up, chans2[l], chans2[l + 1])); ki += 1
        params["dec"].append(conv_init(keys[ki], k_dec, k_dec, chans2[l], chans2[l + 1])); ki += 1
        params["dec"].append(conv_init(keys[ki], k_dec, k_dec, chans2[l + 1], chans2[l + 1])); ki += 1
    params["final"] = conv_init(keys[ki], 1, 1, chans2[-1], 1)
    return params


# ----------------------------------------------------------------------------
# Pure-JAX reference (exact f32, for the correctness check)
# ----------------------------------------------------------------------------
def _conv_ref(x, w, b, padding):
    out = lax.conv_general_dilated(x, w, (1, 1), padding,
                                   dimension_numbers=("NHWC", "HWIO", "NHWC"),
                                   precision=lax.Precision.HIGHEST)
    return out + b.reshape(1, 1, 1, -1)


def unet1_reference(params, x_nchw, n_levels):
    relu = lambda t: jnp.maximum(t, 0.0)
    sig = lambda t: 1.0 / (1.0 + jnp.exp(-t))
    y = jnp.transpose(x_nchw, (0, 2, 3, 1)).astype(jnp.float32)
    enc_fea = []
    for l in range(n_levels):
        if l > 0:
            y = lax.reduce_window(y, -jnp.inf, lax.max, (1, 2, 2, 1), (1, 2, 2, 1), "VALID")
        w, b = params["enc"][2 * l]
        y = relu(_conv_ref(y, w, b, "SAME"))
        w, b = params["enc"][2 * l + 1]
        y = relu(_conv_ref(y, w, b, "SAME"))
        if l < n_levels - 1:
            enc_fea.append(y)
    enc_fea = enc_fea[::-1]
    for l in range(n_levels - 1):
        y = jnp.repeat(jnp.repeat(y, 2, axis=1), 2, axis=2)
        w, b = params["dec"][3 * l]
        y = relu(_conv_ref(y, w, b, "SAME"))
        y = jnp.concatenate([enc_fea[l], y], axis=-1)
        w, b = params["dec"][3 * l + 1]
        y = relu(_conv_ref(y, w, b, "SAME"))
        w, b = params["dec"][3 * l + 2]
        y = relu(_conv_ref(y, w, b, "SAME"))
    w, b = params["final"]
    y = sig(_conv_ref(y, w, b, "VALID"))
    return jnp.transpose(y, (0, 3, 1, 2))


# ----------------------------------------------------------------------------
if __name__ == "__main__":
    key = jax.random.PRNGKey(0)
    kx, kp = jax.random.split(key)

    # UNET1(n_chan_input=4, n_levels=3, start_power=3) -> channels [4, 8, 16, 32]
    N, C_in, H, W = 2, 4, 16, 16
    n_levels, start_power = 3, 3

    x = jax.random.normal(kx, (N, C_in, H, W), dtype=jnp.float32)
    params = init_params(kp, C_in, n_levels, start_power)

    fwd = jax.jit(functools.partial(unet1_forward, n_levels=n_levels))
    out = jax.block_until_ready(fwd(params, x))

    ref = jax.block_until_ready(unet1_reference(params, x, n_levels))

    assert out.shape == (N, 1, H, W), out.shape
    # bf16 MXU operands (f32 accumulation) vs an exact-f32 reference over 13
    # conv layers: sigmoid outputs agree to a few 1e-3 typically; 5e-2 absolute
    # is a safe structural-correctness bound (structural bugs give >0.1 errors).
    np.testing.assert_allclose(np.asarray(out), np.asarray(ref), atol=5e-2, rtol=0.0)

    print("KERNEL_OK")
</pallas_src>

<mosaic_0001>
module attributes {stable_mosaic.version = 11 : i64} {
  func.func @kernel(%arg0: i32, %arg1: memref<1x8x256xf32, #tpu.memory_space<vmem>>, %arg2: memref<256x64xbf16, #tpu.memory_space<vmem>>, %arg3: memref<64x16xbf16, #tpu.memory_space<vmem>>, %arg4: memref<16x64xbf16, #tpu.memory_space<vmem>>, %arg5: memref<64x256xbf16, #tpu.memory_space<vmem>>, %arg6: memref<8x80xbf16, #tpu.memory_space<vmem>>, %arg7: memref<8x80xbf16, #tpu.memory_space<vmem>>, %arg8: memref<16x80xbf16, #tpu.memory_space<vmem>>, %arg9: memref<16x152xbf16, #tpu.memory_space<vmem>>, %arg10: memref<32x152xbf16, #tpu.memory_space<vmem>>, %arg11: memref<32x296xbf16, #tpu.memory_space<vmem>>, %arg12: memref<16x296xbf16, #tpu.memory_space<vmem>>, %arg13: memref<16x296xbf16, #tpu.memory_space<vmem>>, %arg14: memref<16x152xbf16, #tpu.memory_space<vmem>>, %arg15: memref<8x152xbf16, #tpu.memory_space<vmem>>, %arg16: memref<8x152xbf16, #tpu.memory_space<vmem>>, %arg17: memref<8x80xbf16, #tpu.memory_space<vmem>>, %arg18: memref<1x16xbf16, #tpu.memory_space<vmem>>, %arg19: memref<1x1x256xf32, #tpu.memory_space<vmem>>) attributes {dimension_semantics = [#tpu.dimension_semantics<parallel>], iteration_bounds = array<i64: 2>, scalar_prefetch = 0 : i64, scratch_operands = 0 : i64, tpu.core_type = #tpu.core_type<tc>, window_params = [{transform_indices = @transform_0, window_bounds = array<i64: 1, 8, 256>}, {pipeline_mode = #tpu.pipeline_mode<synchronous>, transform_indices = @transform_1, window_bounds = array<i64: 256, 64>}, {pipeline_mode = #tpu.pipeline_mode<synchronous>, transform_indices = @transform_2, window_bounds = array<i64: 64, 16>}, {pipeline_mode = #tpu.pipeline_mode<synchronous>, transform_indices = @transform_3, window_bounds = array<i64: 16, 64>}, {pipeline_mode = #tpu.pipeline_mode<synchronous>, transform_indices = @transform_4, window_bounds = array<i64: 64, 256>}, {pipeline_mode = #tpu.pipeline_mode<synchronous>, transform_indices = @transform_5, window_bounds = array<i64: 8, 80>}, {pipeline_mode = #tpu.pipeline_mode<synchronous>, transform_indices = @transform_6, window_bounds = array<i64: 8, 80>}, {pipeline_mode = #tpu.pipeline_mode<synchronous>, transform_indices = @transform_7, window_bounds = array<i64: 16, 80>}, {pipeline_mode = #tpu.pipeline_mode<synchronous>, transform_indices = @transform_8, window_bounds = array<i64: 16, 152>}, {pipeline_mode = #tpu.pipeline_mode<synchronous>, transform_indices = @transform_9, window_bounds = array<i64: 32, 152>}, {pipeline_mode = #tpu.pipeline_mode<synchronous>, transform_indices = @transform_10, window_bounds = array<i64: 32, 296>}, {pipeline_mode = #tpu.pipeline_mode<synchronous>, transform_indices = @transform_11, window_bounds = array<i64: 16, 296>}, {pipeline_mode = #tpu.pipeline_mode<synchronous>, transform_indices = @transform_12, window_bounds = array<i64: 16, 296>}, {pipeline_mode = #tpu.pipeline_mode<synchronous>, transform_indices = @transform_13, window_bounds = array<i64: 16, 152>}, {pipeline_mode = #tpu.pipeline_mode<synchronous>, transform_indices = @transform_14, window_bounds = array<i64: 8, 152>}, {pipeline_mode = #tpu.pipeline_mode<synchronous>, transform_indices = @transform_15, window_bounds = array<i64: 8, 152>}, {pipeline_mode = #tpu.pipeline_mode<synchronous>, transform_indices = @transform_16, window_bounds = array<i64: 8, 80>}, {pipeline_mode = #tpu.pipeline_mode<synchronous>, transform_indices = @transform_17, window_bounds = array<i64: 1, 16>}, {transform_indices = @transform_18, window_bounds = array<i64: 1, 1, 256>}]} {
    %c0 = arith.constant 0 : index
    %c0_0 = arith.constant 0 : index
    %c0_1 = arith.constant 0 : index
    %0 = vector.load %arg1[%c0, %c0_0, %c0_1] : memref<1x8x256xf32, #tpu.memory_space<vmem>>, vector<1x8x256xf32>
    %1 = vector.shape_cast %0 : vector<1x8x256xf32> to vector<8x256xf32>
    %2 = vector.extract_strided_slice %1 {offsets = [0, 239], sizes = [8, 17], strides = [1, 1]} : vector<8x256xf32> to vector<8x17xf32>
    %3 = vector.extract_strided_slice %1 {offsets = [0, 0], sizes = [8, 239], strides = [1, 1]} : vector<8x256xf32> to vector<8x239xf32>
    %4 = tpu.concatenate %2, %3 in 1 : vector<8x17xf32>, vector<8x239xf32> -> vector<8x256xf32>
    %5 = tpu.iota {dimensions = array<i32: 1>} : vector<1x256xi32>
    %c15_i32 = arith.constant 15 : i32
    %6 = vector.broadcast %c15_i32 : i32 to vector<1x256xi32>
    %7 = arith.andi %5, %6 : vector<1x256xi32>
    %c4_i32 = arith.constant 4 : i32
    %8 = vector.broadcast %c4_i32 : i32 to vector<1x256xi32>
    %9 = arith.shrsi %5, %8 : vector<1x256xi32>
    %c-1_i32 = arith.constant -1 : i32
    %10 = vector.broadcast %c-1_i32 : i32 to vector<1x256xi32>
    %11 = arith.addi %9, %10 : vector<1x256xi32>
    %c0_i32 = arith.constant 0 : i32
    %12 = vector.broadcast %c0_i32 : i32 to vector<1x256xi32>
    %13 = arith.cmpi sge, %11, %12 : vector<1x256xi32>
    %c-1_i32_2 = arith.constant -1 : i32
    %14 = vector.broadcast %c-1_i32_2 : i32 to vector<1x256xi32>
    %15 = arith.addi %9, %14 : vector<1x256xi32>
    %c16_i32 = arith.constant 16 : i32
    %16 = vector.broadcast %c16_i32 : i32 to vector<1x256xi32>
    %17 = arith.cmpi slt, %15, %16 : vector<1x256xi32>
    %18 = arith.andi %13, %17 : vector<1x256xi1>
    %c-1_i32_3 = arith.constant -1 : i32
    %19 = vector.broadcast %c-1_i32_3 : i32 to vector<1x256xi32>
    %20 = arith.addi %7, %19 : vector<1x256xi32>
    %c0_i32_4 = arith.constant 0 : i32
    %21 = vector.broadcast %c0_i32_4 : i32 to vector<1x256xi32>
    %22 = arith.cmpi sge, %20, %21 : vector<1x256xi32>
    %23 = arith.andi %18, %22 : vector<1x256xi1>
    %c-1_i32_5 = arith.constant -1 : i32
    %24 = vector.broadcast %c-1_i32_5 : i32 to vector<1x256xi32>
    %25 = arith.addi %7, %24 : vector<1x256xi32>
    %c16_i32_6 = arith.constant 16 : i32
    %26 = vector.broadcast %c16_i32_6 : i32 to vector<1x256xi32>
    %27 = arith.cmpi slt, %25, %26 : vector<1x256xi32>
    %28 = arith.andi %23, %27 : vector<1x256xi1>
    %cst = arith.constant 0.000000e+00 : f32
    %29 = vector.broadcast %cst : f32 to vector<8x256xf32>
    %30 = vector.shape_cast %28 : vector<1x256xi1> to vector<1x256xi1>
    %31 = vector.broadcast %30 : vector<1x256xi1> to vector<8x256xi1>
    %32 = arith.select %31, %4, %29 : vector<8x256xi1>, vector<8x256xf32>
    %33 = vector.extract_strided_slice %1 {offsets = [0, 240], sizes = [8, 16], strides = [1, 1]} : vector<8x256xf32> to vector<8x16xf32>
    %34 = vector.extract_strided_slice %1 {offsets = [0, 0], sizes = [8, 240], strides = [1, 1]} : vector<8x256xf32> to vector<8x240xf32>
    %35 = tpu.concatenate %33, %34 in 1 : vector<8x16xf32>, vector<8x240xf32> -> vector<8x256xf32>
    %36 = tpu.iota {dimensions = array<i32: 1>} : vector<1x256xi32>
    %c15_i32_7 = arith.constant 15 : i32
    %37 = vector.broadcast %c15_i32_7 : i32 to vector<1x256xi32>
    %38 = arith.andi %36, %37 : vector<1x256xi32>
    %c4_i32_8 = arith.constant 4 : i32
    %39 = vector.broadcast %c4_i32_8 : i32 to vector<1x256xi32>
    %40 = arith.shrsi %36, %39 : vector<1x256xi32>
    %c-1_i32_9 = arith.constant -1 : i32
    %41 = vector.broadcast %c-1_i32_9 : i32 to vector<1x256xi32>
    %42 = arith.addi %40, %41 : vector<1x256xi32>
    %c0_i32_10 = arith.constant 0 : i32
    %43 = vector.broadcast %c0_i32_10 : i32 to vector<1x256xi32>
    %44 = arith.cmpi sge, %42, %43 : vector<1x256xi32>
    %c-1_i32_11 = arith.constant -1 : i32
    %45 = vector.broadcast %c-1_i32_11 : i32 to vector<1x256xi32>
    %46 = arith.addi %40, %45 : vector<1x256xi32>
    %c16_i32_12 = arith.constant 16 : i32
    %47 = vector.broadcast %c16_i32_12 : i32 to vector<1x256xi32>
    %48 = arith.cmpi slt, %46, %47 : vector<1x256xi32>
    %49 = arith.andi %44, %48 : vector<1x256xi1>
    %c0_i32_13 = arith.constant 0 : i32
    %50 = vector.broadcast %c0_i32_13 : i32 to vector<1x256xi32>
    %51 = arith.addi %38, %50 : vector<1x256xi32>
    %c0_i32_14 = arith.constant 0 : i32
    %52 = vector.broadcast %c0_i32_14 : i32 to vector<1x256xi32>
    %53 = arith.cmpi sge, %51, %52 : vector<1x256xi32>
    %54 = arith.andi %49, %53 : vector<1x256xi1>
    %c0_i32_15 = arith.constant 0 : i32
    %55 = vector.broadcast %c0_i32_15 : i32 to vector<1x256xi32>
    %56 = arith.addi %38, %55 : vector<1x256xi32>
    %c16_i32_16 = arith.constant 16 : i32
    %57 = vector.broadcast %c16_i32_16 : i32 to vector<1x256xi32>
    %58 = arith.cmpi slt, %56, %57 : vector<1x256xi32>
    %59 = arith.andi %54, %58 : vector<1x256xi1>
    %cst_17 = arith.constant 0.000000e+00 : f32
    %60 = vector.broadcast %cst_17 : f32 to vector<8x256xf32>
    %61 = vector.shape_cast %59 : vector<1x256xi1> to vector<1x256xi1>
    %62 = vector.broadcast %61 : vector<1x256xi1> to vector<8x256xi1>
    %63 = arith.select %62, %35, %60 : vector<8x256xi1>, vector<8x256xf32>
    %64 = vector.extract_strided_slice %1 {offsets = [0, 241], sizes = [8, 15], strides = [1, 1]} : vector<8x256xf32> to vector<8x15xf32>
    %65 = vector.extract_strided_slice %1 {offsets = [0, 0], sizes = [8, 241], strides = [1, 1]} : vector<8x256xf32> to vector<8x241xf32>
    %66 = tpu.concatenate %64, %65 in 1 : vector<8x15xf32>, vector<8x241xf32> -> vector<8x256xf32>
    %67 = tpu.iota {dimensions = array<i32: 1>} : vector<1x256xi32>
    %c15_i32_18 = arith.constant 15 : i32
    %68 = vector.broadcast %c15_i32_18 : i32 to vector<1x256xi32>
    %69 = arith.andi %67, %68 : vector<1x256xi32>
    %c4_i32_19 = arith.constant 4 : i32
    %70 = vector.broadcast %c4_i32_19 : i32 to vector<1x256xi32>
    %71 = arith.shrsi %67, %70 : vector<1x256xi32>
    %c-1_i32_20 = arith.constant -1 : i32
    %72 = vector.broadcast %c-1_i32_20 : i32 to vector<1x256xi32>
    %73 = arith.addi %71, %72 : vector<1x256xi32>
    %c0_i32_21 = arith.constant 0 : i32
    %74 = vector.broadcast %c0_i32_21 : i32 to vector<1x256xi32>
    %75 = arith.cmpi sge, %73, %74 : vector<1x256xi32>
    %c-1_i32_22 = arith.constant -1 : i32
    %76 = vector.broadcast %c-1_i32_22 : i32 to vector<1x256xi32>
    %77 = arith.addi %71, %76 : vector<1x256xi32>
    %c16_i32_23 = arith.constant 16 : i32
    %78 = vector.broadcast %c16_i32_23 : i32 to vector<1x256xi32>
    %79 = arith.cmpi slt, %77, %78 : vector<1x256xi32>
    %80 = arith.andi %75, %79 : vector<1x256xi1>
    %c1_i32 = arith.constant 1 : i32
    %81 = vector.broadcast %c1_i32 : i32 to vector<1x256xi32>
    %82 = arith.addi %69, %81 : vector<1x256xi32>
    %c0_i32_24 = arith.constant 0 : i32
    %83 = vector.broadcast %c0_i32_24 : i32 to vector<1x256xi32>
    %84 = arith.cmpi sge, %82, %83 : vector<1x256xi32>
    %85 = arith.andi %80, %84 : vector<1x256xi1>
    %c1_i32_25 = arith.constant 1 : i32
    %86 = vector.broadcast %c1_i32_25 : i32 to vector<1x256xi32>
    %87 = arith.addi %69, %86 : vector<1x256xi32>
    %c16_i32_26 = arith.constant 16 : i32
    %88 = vector.broadcast %c16_i32_26 : i32 to vector<1x256xi32>
    %89 = arith.cmpi slt, %87, %88 : vector<1x256xi32>
    %90 = arith.andi %85, %89 : vector<1x256xi1>
    %cst_27 = arith.constant 0.000000e+00 : f32
    %91 = vector.broadcast %cst_27 : f32 to vector<8x256xf32>
    %92 = vector.shape_cast %90 : vector<1x256xi1> to vector<1x256xi1>
    %93 = vector.broadcast %92 : vector<1x256xi1> to vector<8x256xi1>
    %94 = arith.select %93, %66, %91 : vector<8x256xi1>, vector<8x256xf32>
    %95 = vector.extract_strided_slice %1 {offsets = [0, 255], sizes = [8, 1], strides = [1, 1]} : vector<8x256xf32> to vector<8x1xf32>
    %96 = vector.extract_strided_slice %1 {offsets = [0, 0], sizes = [8, 255], strides = [1, 1]} : vector<8x256xf32> to vector<8x255xf32>
    %97 = tpu.concatenate %95, %96 in 1 : vector<8x1xf32>, vector<8x255xf32> -> vector<8x256xf32>
    %98 = tpu.iota {dimensions = array<i32: 1>} : vector<1x256xi32>
    %c15_i32_28 = arith.constant 15 : i32
    %99 = vector.broadcast %c15_i32_28 : i32 to vector<1x256xi32>
    %100 = arith.andi %98, %99 : vector<1x256xi32>
    %c4_i32_29 = arith.constant 4 : i32
    %101 = vector.broadcast %c4_i32_29 : i32 to vector<1x256xi32>
    %102 = arith.shrsi %98, %101 : vector<1x256xi32>
    %c0_i32_30 = arith.constant 0 : i32
    %103 = vector.broadcast %c0_i32_30 : i32 to vector<1x256xi32>
    %104 = arith.addi %102, %103 : vector<1x256xi32>
    %c0_i32_31 = arith.constant 0 : i32
    %105 = vector.broadcast %c0_i32_31 : i32 to vector<1x256xi32>
    %106 = arith.cmpi sge, %104, %105 : vector<1x256xi32>
    %c0_i32_32 = arith.constant 0 : i32
    %107 = vector.broadcast %c0_i32_32 : i32 to vector<1x256xi32>
    %108 = arith.addi %102, %107 : vector<1x256xi32>
    %c16_i32_33 = arith.constant 16 : i32
    %109 = vector.broadcast %c16_i32_33 : i32 to vector<1x256xi32>
    %110 = arith.cmpi slt, %108, %109 : vector<1x256xi32>
    %111 = arith.andi %106, %110 : vector<1x256xi1>
    %c-1_i32_34 = arith.constant -1 : i32
    %112 = vector.broadcast %c-1_i32_34 : i32 to vector<1x256xi32>
    %113 = arith.addi %100, %112 : vector<1x256xi32>
    %c0_i32_35 = arith.constant 0 : i32
    %114 = vector.broadcast %c0_i32_35 : i32 to vector<1x256xi32>
    %115 = arith.cmpi sge, %113, %114 : vector<1x256xi32>
    %116 = arith.andi %111, %115 : vector<1x256xi1>
    %c-1_i32_36 = arith.constant -1 : i32
    %117 = vector.broadcast %c-1_i32_36 : i32 to vector<1x256xi32>
    %118 = arith.addi %100, %117 : vector<1x256xi32>
    %c16_i32_37 = arith.constant 16 : i32
    %119 = vector.broadcast %c16_i32_37 : i32 to vector<1x256xi32>
    %120 = arith.cmpi slt, %118, %119 : vector<1x256xi32>
    %121 = arith.andi %116, %120 : vector<1x256xi1>
    %cst_38 = arith.constant 0.000000e+00 : f32
    %122 = vector.broadcast %cst_38 : f32 to vector<8x256xf32>
    %123 = vector.shape_cast %121 : vector<1x256xi1> to vector<1x256xi1>
    %124 = vector.broadcast %123 : vector<1x256xi1> to vector<8x256xi1>
    %125 = arith.select %124, %97, %122 : vector<8x256xi1>, vector<8x256xf32>
    %126 = vector.extract_strided_slice %1 {offsets = [0, 1], sizes = [8, 255], strides = [1, 1]} : vector<8x256xf32> to vector<8x255xf32>
    %127 = vector.extract_strided_slice %1 {offsets = [0, 0], sizes = [8, 1], strides = [1, 1]} : vector<8x256xf32> to vector<8x1xf32>
    %128 = tpu.concatenate %126, %127 in 1 : vector<8x255xf32>, vector<8x1xf32> -> vector<8x256xf32>
    %129 = tpu.iota {dimensions = array<i32: 1>} : vector<1x256xi32>
    %c15_i32_39 = arith.constant 15 : i32
    %130 = vector.broadcast %c15_i32_39 : i32 to vector<1x256xi32>
    %131 = arith.andi %129, %130 : vector<1x256xi32>
    %c4_i32_40 = arith.constant 4 : i32
    %132 = vector.broadcast %c4_i32_40 : i32 to vector<1x256xi32>
    %133 = arith.shrsi %129, %132 : vector<1x256xi32>
    %c0_i32_41 = arith.constant 0 : i32
    %134 = vector.broadcast %c0_i32_41 : i32 to vector<1x256xi32>
    %135 = arith.addi %133, %134 : vector<1x256xi32>
    %c0_i32_42 = arith.constant 0 : i32
    %136 = vector.broadcast %c0_i32_42 : i32 to vector<1x256xi32>
    %137 = arith.cmpi sge, %135, %136 : vector<1x256xi32>
    %c0_i32_43 = arith.constant 0 : i32
    %138 = vector.broadcast %c0_i32_43 : i32 to vector<1x256xi32>
    %139 = arith.addi %133, %138 : vector<1x256xi32>
    %c16_i32_44 = arith.constant 16 : i32
    %140 = vector.broadcast %c16_i32_44 : i32 to vector<1x256xi32>
    %141 = arith.cmpi slt, %139, %140 : vector<1x256xi32>
    %142 = arith.andi %137, %141 : vector<1x256xi1>
    %c1_i32_45 = arith.constant 1 : i32
    %143 = vector.broadcast %c1_i32_45 : i32 to vector<1x256xi32>
    %144 = arith.addi %131, %143 : vector<1x256xi32>
    %c0_i32_46 = arith.constant 0 : i32
    %145 = vector.broadcast %c0_i32_46 : i32 to vector<1x256xi32>
    %146 = arith.cmpi sge, %144, %145 : vector<1x256xi32>
    %147 = arith.andi %142, %146 : vector<1x256xi1>
    %c1_i32_47 = arith.constant 1 : i32
    %148 = vector.broadcast %c1_i32_47 : i32 to vector<1x256xi32>
    %149 = arith.addi %131, %148 : vector<1x256xi32>
    %c16_i32_48 = arith.constant 16 : i32
    %150 = vector.broadcast %c16_i32_48 : i32 to vector<1x256xi32>
    %151 = arith.cmpi slt, %149, %150 : vector<1x256xi32>
    %152 = arith.andi %147, %151 : vector<1x256xi1>
    %cst_49 = arith.constant 0.000000e+00 : f32
    %153 = vector.broadcast %cst_49 : f32 to vector<8x256xf32>
    %154 = vector.shape_cast %152 : vector<1x256xi1> to vector<1x256xi1>
    %155 = vector.broadcast %154 : vector<1x256xi1> to vector<8x256xi1>
    %156 = arith.select %155, %128, %153 : vector<8x256xi1>, vector<8x256xf32>
    %157 = vector.extract_strided_slice %1 {offsets = [0, 15], sizes = [8, 241], strides = [1, 1]} : vector<8x256xf32> to vector<8x241xf32>
    %158 = vector.extract_strided_slice %1 {offsets = [0, 0], sizes = [8, 15], strides = [1, 1]} : vector<8x256xf32> to vector<8x15xf32>
    %159 = tpu.concatenate %157, %158 in 1 : vector<8x241xf32>, vector<8x15xf32> -> vector<8x256xf32>
    %160 = tpu.iota {dimensions = array<i32: 1>} : vector<1x256xi32>
    %c15_i32_50 = arith.constant 15 : i32
    %161 = vector.broadcast %c15_i32_50 : i32 to vector<1x256xi32>
    %162 = arith.andi %160, %161 : vector<1x256xi32>
    %c4_i32_51 = arith.constant 4 : i32
    %163 = vector.broadcast %c4_i32_51 : i32 to vector<1x256xi32>
    %164 = arith.shrsi %160, %163 : vector<1x256xi32>
    %c1_i32_52 = arith.constant 1 : i32
    %165 = vector.broadcast %c1_i32_52 : i32 to vector<1x256xi32>
    %166 = arith.addi %164, %165 : vector<1x256xi32>
    %c0_i32_53 = arith.constant 0 : i32
    %167 = vector.broadcast %c0_i32_53 : i32 to vector<1x256xi32>
    %168 = arith.cmpi sge, %166, %167 : vector<1x256xi32>
    %c1_i32_54 = arith.constant 1 : i32
    %169 = vector.broadcast %c1_i32_54 : i32 to vector<1x256xi32>
    %170 = arith.addi %164, %169 : vector<1x256xi32>
    %c16_i32_55 = arith.constant 16 : i32
    %171 = vector.broadcast %c16_i32_55 : i32 to vector<1x256xi32>
    %172 = arith.cmpi slt, %170, %171 : vector<1x256xi32>
    %173 = arith.andi %168, %172 : vector<1x256xi1>
    %c-1_i32_56 = arith.constant -1 : i32
    %174 = vector.broadcast %c-1_i32_56 : i32 to vector<1x256xi32>
    %175 = arith.addi %162, %174 : vector<1x256xi32>
    %c0_i32_57 = arith.constant 0 : i32
    %176 = vector.broadcast %c0_i32_57 : i32 to vector<1x256xi32>
    %177 = arith.cmpi sge, %175, %176 : vector<1x256xi32>
    %178 = arith.andi %173, %177 : vector<1x256xi1>
    %c-1_i32_58 = arith.constant -1 : i32
    %179 = vector.broadcast %c-1_i32_58 : i32 to vector<1x256xi32>
    %180 = arith.addi %162, %179 : vector<1x256xi32>
    %c16_i32_59 = arith.constant 16 : i32
    %181 = vector.broadcast %c16_i32_59 : i32 to vector<1x256xi32>
    %182 = arith.cmpi slt, %180, %181 : vector<1x256xi32>
    %183 = arith.andi %178, %182 : vector<1x256xi1>
    %cst_60 = arith.constant 0.000000e+00 : f32
    %184 = vector.broadcast %cst_60 : f32 to vector<8x256xf32>
    %185 = vector.shape_cast %183 : vector<1x256xi1> to vector<1x256xi1>
    %186 = vector.broadcast %185 : vector<1x256xi1> to vector<8x256xi1>
    %187 = arith.select %186, %159, %184 : vector<8x256xi1>, vector<8x256xf32>
    %188 = vector.extract_strided_slice %1 {offsets = [0, 16], sizes = [8, 240], strides = [1, 1]} : vector<8x256xf32> to vector<8x240xf32>
    %189 = vector.extract_strided_slice %1 {offsets = [0, 0], sizes = [8, 16], strides = [1, 1]} : vector<8x256xf32> to vector<8x16xf32>
    %190 = tpu.concatenate %188, %189 in 1 : vector<8x240xf32>, vector<8x16xf32> -> vector<8x256xf32>
    %191 = tpu.iota {dimensions = array<i32: 1>} : vector<1x256xi32>
    %c15_i32_61 = arith.constant 15 : i32
    %192 = vector.broadcast %c15_i32_61 : i32 to vector<1x256xi32>
    %193 = arith.andi %191, %192 : vector<1x256xi32>
    %c4_i32_62 = arith.constant 4 : i32
    %194 = vector.broadcast %c4_i32_62 : i32 to vector<1x256xi32>
    %195 = arith.shrsi %191, %194 : vector<1x256xi32>
    %c1_i32_63 = arith.constant 1 : i32
    %196 = vector.broadcast %c1_i32_63 : i32 to vector<1x256xi32>
    %197 = arith.addi %195, %196 : vector<1x256xi32>
    %c0_i32_64 = arith.constant 0 : i32
    %198 = vector.broadcast %c0_i32_64 : i32 to vector<1x256xi32>
    %199 = arith.cmpi sge, %197, %198 : vector<1x256xi32>
    %c1_i32_65 = arith.constant 1 : i32
    %200 = vector.broadcast %c1_i32_65 : i32 to vector<1x256xi32>
    %201 = arith.addi %195, %200 : vector<1x256xi32>
    %c16_i32_66 = arith.constant 16 : i32
    %202 = vector.broadcast %c16_i32_66 : i32 to vector<1x256xi32>
    %203 = arith.cmpi slt, %201, %202 : vector<1x256xi32>
    %204 = arith.andi %199, %203 : vector<1x256xi1>
    %c0_i32_67 = arith.constant 0 : i32
    %205 = vector.broadcast %c0_i32_67 : i32 to vector<1x256xi32>
    %206 = arith.addi %193, %205 : vector<1x256xi32>
    %c0_i32_68 = arith.constant 0 : i32
    %207 = vector.broadcast %c0_i32_68 : i32 to vector<1x256xi32>
    %208 = arith.cmpi sge, %206, %207 : vector<1x256xi32>
    %209 = arith.andi %204, %208 : vector<1x256xi1>
    %c0_i32_69 = arith.constant 0 : i32
    %210 = vector.broadcast %c0_i32_69 : i32 to vector<1x256xi32>
    %211 = arith.addi %193, %210 : vector<1x256xi32>
    %c16_i32_70 = arith.constant 16 : i32
    %212 = vector.broadcast %c16_i32_70 : i32 to vector<1x256xi32>
    %213 = arith.cmpi slt, %211, %212 : vector<1x256xi32>
    %214 = arith.andi %209, %213 : vector<1x256xi1>
    %cst_71 = arith.constant 0.000000e+00 : f32
    %215 = vector.broadcast %cst_71 : f32 to vector<8x256xf32>
    %216 = vector.shape_cast %214 : vector<1x256xi1> to vector<1x256xi1>
    %217 = vector.broadcast %216 : vector<1x256xi1> to vector<8x256xi1>
    %218 = arith.select %217, %190, %215 : vector<8x256xi1>, vector<8x256xf32>
    %219 = vector.extract_strided_slice %1 {offsets = [0, 17], sizes = [8, 239], strides = [1, 1]} : vector<8x256xf32> to vector<8x239xf32>
    %220 = vector.extract_strided_slice %1 {offsets = [0, 0], sizes = [8, 17], strides = [1, 1]} : vector<8x256xf32> to vector<8x17xf32>
    %221 = tpu.concatenate %219, %220 in 1 : vector<8x239xf32>, vector<8x17xf32> -> vector<8x256xf32>
    %222 = tpu.iota {dimensions = array<i32: 1>} : vector<1x256xi32>
    %c15_i32_72 = arith.constant 15 : i32
    %223 = vector.broadcast %c15_i32_72 : i32 to vector<1x256xi32>
    %224 = arith.andi %222, %223 : vector<1x256xi32>
    %c4_i32_73 = arith.constant 4 : i32
    %225 = vector.broadcast %c4_i32_73 : i32 to vector<1x256xi32>
    %226 = arith.shrsi %222, %225 : vector<1x256xi32>
    %c1_i32_74 = arith.constant 1 : i32
    %227 = vector.broadcast %c1_i32_74 : i32 to vector<1x256xi32>
    %228 = arith.addi %226, %227 : vector<1x256xi32>
    %c0_i32_75 = arith.constant 0 : i32
    %229 = vector.broadcast %c0_i32_75 : i32 to vector<1x256xi32>
    %230 = arith.cmpi sge, %228, %229 : vector<1x256xi32>
    %c1_i32_76 = arith.constant 1 : i32
    %231 = vector.broadcast %c1_i32_76 : i32 to vector<1x256xi32>
    %232 = arith.addi %226, %231 : vector<1x256xi32>
    %c16_i32_77 = arith.constant 16 : i32
    %233 = vector.broadcast %c16_i32_77 : i32 to vector<1x256xi32>
    %234 = arith.cmpi slt, %232, %233 : vector<1x256xi32>
    %235 = arith.andi %230, %234 : vector<1x256xi1>
    %c1_i32_78 = arith.constant 1 : i32
    %236 = vector.broadcast %c1_i32_78 : i32 to vector<1x256xi32>
    %237 = arith.addi %224, %236 : vector<1x256xi32>
    %c0_i32_79 = arith.constant 0 : i32
    %238 = vector.broadcast %c0_i32_79 : i32 to vector<1x256xi32>
    %239 = arith.cmpi sge, %237, %238 : vector<1x256xi32>
    %240 = arith.andi %235, %239 : vector<1x256xi1>
    %c1_i32_80 = arith.constant 1 : i32
    %241 = vector.broadcast %c1_i32_80 : i32 to vector<1x256xi32>
    %242 = arith.addi %224, %241 : vector<1x256xi32>
    %c16_i32_81 = arith.constant 16 : i32
    %243 = vector.broadcast %c16_i32_81 : i32 to vector<1x256xi32>
    %244 = arith.cmpi slt, %242, %243 : vector<1x256xi32>
    %245 = arith.andi %240, %244 : vector<1x256xi1>
    %cst_82 = arith.constant 0.000000e+00 : f32
    %246 = vector.broadcast %cst_82 : f32 to vector<8x256xf32>
    %247 = vector.shape_cast %245 : vector<1x256xi1> to vector<1x256xi1>
    %248 = vector.broadcast %247 : vector<1x256xi1> to vector<8x256xi1>
    %249 = arith.select %248, %221, %246 : vector<8x256xi1>, vector<8x256xf32>
    %250 = tpu.iota {dimensions = array<i32: 0>} : vector<8x256xi32>
    %c0_i32_83 = arith.constant 0 : i32
    %251 = vector.broadcast %c0_i32_83 : i32 to vector<8x256xi32>
    %252 = arith.cmpi eq, %250, %251 : vector<8x256xi32>
    %253 = arith.extui %252 : vector<8x256xi1> to vector<8x256xi32>
    %254 = arith.sitofp %253 : vector<8x256xi32> to vector<8x256xf32>
    %255 = tpu.concatenate %32, %63, %94, %125, %1, %156, %187, %218, %249, %254 in 0 : vector<8x256xf32>, vector<8x256xf32>, vector<8x256xf32>, vector<8x256xf32>, vector<8x256xf32>, vector<8x256xf32>, vector<8x256xf32>, vector<8x256xf32>, vector<8x256xf32>, vector<8x256xf32> -> vector<80x256xf32>
    %c0_84 = arith.constant 0 : index
    %c0_85 = arith.constant 0 : index
    %256 = vector.load %arg6[%c0_84, %c0_85] : memref<8x80xbf16, #tpu.memory_space<vmem>>, vector<8x80xbf16>
    %257 = arith.truncf %255 : vector<80x256xf32> to vector<80x256xbf16>
    %cst_86 = arith.constant dense<0.000000e+00> : vector<8x256xf32>
    %258 = tpu.matmul %256, %257, %cst_86 {dimension_numbers = #tpu.dot_dimension_numbers<[1], [0], [0], [1], [0, 0, 1, 1], [], []>} : vector<8x80xbf16>, vector<80x256xbf16>, vector<8x256xf32> -> vector<8x256xf32>
    %cst_87 = arith.constant 0.000000e+00 : f32
    %259 = vector.broadcast %cst_87 : f32 to vector<8x256xf32>
    %260 = arith.maximumf %258, %259 : vector<8x256xf32>
    %261 = vector.extract_strided_slice %260 {offsets = [0, 239], sizes = [8, 17], strides = [1, 1]} : vector<8x256xf32> to vector<8x17xf32>
    %262 = vector.extract_strided_slice %260 {offsets = [0, 0], sizes = [8, 239], strides = [1, 1]} : vector<8x256xf32> to vector<8x239xf32>
    %263 = tpu.concatenate %261, %262 in 1 : vector<8x17xf32>, vector<8x239xf32> -> vector<8x256xf32>
    %cst_88 = arith.constant 0.000000e+00 : f32
    %264 = vector.broadcast %cst_88 : f32 to vector<8x256xf32>
    %265 = vector.shape_cast %28 : vector<1x256xi1> to vector<1x256xi1>
    %266 = vector.broadcast %265 : vector<1x256xi1> to vector<8x256xi1>
    %267 = arith.select %266, %263, %264 : vector<8x256xi1>, vector<8x256xf32>
    %268 = vector.extract_strided_slice %260 {offsets = [0, 240], sizes = [8, 16], strides = [1, 1]} : vector<8x256xf32> to vector<8x16xf32>
    %269 = vector.extract_strided_slice %260 {offsets = [0, 0], sizes = [8, 240], strides = [1, 1]} : vector<8x256xf32> to vector<8x240xf32>
    %270 = tpu.concatenate %268, %269 in 1 : vector<8x16xf32>, vector<8x240xf32> -> vector<8x256xf32>
    %cst_89 = arith.constant 0.000000e+00 : f32
    %271 = vector.broadcast %cst_89 : f32 to vector<8x256xf32>
    %272 = vector.shape_cast %59 : vector<1x256xi1> to vector<1x256xi1>
    %273 = vector.broadcast %272 : vector<1x256xi1> to vector<8x256xi1>
    %274 = arith.select %273, %270, %271 : vector<8x256xi1>, vector<8x256xf32>
    %275 = vector.extract_strided_slice %260 {offsets = [0, 241], sizes = [8, 15], strides = [1, 1]} : vector<8x256xf32> to vector<8x15xf32>
    %276 = vector.extract_strided_slice %260 {offsets = [0, 0], sizes = [8, 241], strides = [1, 1]} : vector<8x256xf32> to vector<8x241xf32>
    %277 = tpu.concatenate %275, %276 in 1 : vector<8x15xf32>, vector<8x241xf32> -> vector<8x256xf32>
    %cst_90 = arith.constant 0.000000e+00 : f32
    %278 = vector.broadcast %cst_90 : f32 to vector<8x256xf32>
    %279 = vector.shape_cast %90 : vector<1x256xi1> to vector<1x256xi1>
    %280 = vector.broadcast %279 : vector<1x256xi1> to vector<8x256xi1>
    %281 = arith.select %280, %277, %278 : vector<8x256xi1>, vector<8x256xf32>
    %282 = vector.extract_strided_slice %260 {offsets = [0, 255], sizes = [8, 1], strides = [1, 1]} : vector<8x256xf32> to vector<8x1xf32>
    %283 = vector.extract_strided_slice %260 {offsets = [0, 0], sizes = [8, 255], strides = [1, 1]} : vector<8x256xf32> to vector<8x255xf32>
    %284 = tpu.concatenate %282, %283 in 1 : vector<8x1xf32>, vector<8x255xf32> -> vector<8x256xf32>
    %cst_91 = arith.constant 0.000000e+00 : f32
    %285 = vector.broadcast %cst_91 : f32 to vector<8x256xf32>
    %286 = vector.shape_cast %121 : vector<1x256xi1> to vector<1x256xi1>
    %287 = vector.broadcast %286 : vector<1x256xi1> to vector<8x256xi1>
    %288 = arith.select %287, %284, %285 : vector<8x256xi1>, vector<8x256xf32>
    %289 = vector.extract_strided_slice %260 {offsets = [0, 1], sizes = [8, 255], strides = [1, 1]} : vector<8x256xf32> to vector<8x255xf32>
    %290 = vector.extract_strided_slice %260 {offsets = [0, 0], sizes = [8, 1], strides = [1, 1]} : vector<8x256xf32> to vector<8x1xf32>
    %291 = tpu.concatenate %289, %290 in 1 : vector<8x255xf32>, vector<8x1xf32> -> vector<8x256xf32>
    %cst_92 = arith.constant 0.000000e+00 : f32
    %292 = vector.broadcast %cst_92 : f32 to vector<8x256xf32>
    %293 = vector.shape_cast %152 : vector<1x256xi1> to vector<1x256xi1>
    %294 = vector.broadcast %293 : vector<1x256xi1> to vector<8x256xi1>
    %295 = arith.select %294, %291, %292 : vector<8x256xi1>, vector<8x256xf32>
    %296 = vector.extract_strided_slice %260 {offsets = [0, 15], sizes = [8, 241], strides = [1, 1]} : vector<8x256xf32> to vector<8x241xf32>
    %297 = vector.extract_strided_slice %260 {offsets = [0, 0], sizes = [8, 15], strides = [1, 1]} : vector<8x256xf32> to vector<8x15xf32>
    %298 = tpu.concatenate %296, %297 in 1 : vector<8x241xf32>, vector<8x15xf32> -> vector<8x256xf32>
    %cst_93 = arith.constant 0.000000e+00 : f32
    %299 = vector.broadcast %cst_93 : f32 to vector<8x256xf32>
    %300 = vector.shape_cast %183 : vector<1x256xi1> to vector<1x256xi1>
    %301 = vector.broadcast %300 : vector<1x256xi1> to vector<8x256xi1>
    %302 = arith.select %301, %298, %299 : vector<8x256xi1>, vector<8x256xf32>
    %303 = vector.extract_strided_slice %260 {offsets = [0, 16], sizes = [8, 240], strides = [1, 1]} : vector<8x256xf32> to vector<8x240xf32>
    %304 = vector.extract_strided_slice %260 {offsets = [0, 0], sizes = [8, 16], strides = [1, 1]} : vector<8x256xf32> to vector<8x16xf32>
    %305 = tpu.concatenate %303, %304 in 1 : vector<8x240xf32>, vector<8x16xf32> -> vector<8x256xf32>
    %cst_94 = arith.constant 0.000000e+00 : f32
    %306 = vector.broadcast %cst_94 : f32 to vector<8x256xf32>
    %307 = vector.shape_cast %214 : vector<1x256xi1> to vector<1x256xi1>
    %308 = vector.broadcast %307 : vector<1x256xi1> to vector<8x256xi1>
    %309 = arith.select %308, %305, %306 : vector<8x256xi1>, vector<8x256xf32>
    %310 = vector.extract_strided_slice %260 {offsets = [0, 17], sizes = [8, 239], strides = [1, 1]} : vector<8x256xf32> to vector<8x239xf32>
    %311 = vector.extract_strided_slice %260 {offsets = [0, 0], sizes = [8, 17], strides = [1, 1]} : vector<8x256xf32> to vector<8x17xf32>
    %312 = tpu.concatenate %310, %311 in 1 : vector<8x239xf32>, vector<8x17xf32> -> vector<8x256xf32>
    %cst_95 = arith.constant 0.000000e+00 : f32
    %313 = vector.broadcast %cst_95 : f32 to vector<8x256xf32>
    %314 = vector.shape_cast %245 : vector<1x256xi1> to vector<1x256xi1>
    %315 = vector.broadcast %314 : vector<1x256xi1> to vector<8x256xi1>
    %316 = arith.select %315, %312, %313 : vector<8x256xi1>, vector<8x256xf32>
    %317 = tpu.concatenate %267, %274, %281, %288, %260, %295, %302, %309, %316, %254 in 0 : vector<8x256xf32>, vector<8x256xf32>, vector<8x256xf32>, vector<8x256xf32>, vector<8x256xf32>, vector<8x256xf32>, vector<8x256xf32>, vector<8x256xf32>, vector<8x256xf32>, vector<8x256xf32> -> vector<80x256xf32>
    %c0_96 = arith.constant 0 : index
    %c0_97 = arith.constant 0 : index
    %318 = vector.load %arg7[%c0_96, %c0_97] : memref<8x80xbf16, #tpu.memory_space<vmem>>, vector<8x80xbf16>
    %319 = arith.truncf %317 : vector<80x256xf32> to vector<80x256xbf16>
    %cst_98 = arith.constant dense<0.000000e+00> : vector<8x256xf32>
    %320 = tpu.matmul %318, %319, %cst_98 {dimension_numbers = #tpu.dot_dimension_numbers<[1], [0], [0], [1], [0, 0, 1, 1], [], []>} : vector<8x80xbf16>, vector<80x256xbf16>, vector<8x256xf32> -> vector<8x256xf32>
    %cst_99 = arith.constant 0.000000e+00 : f32
    %321 = vector.broadcast %cst_99 : f32 to vector<8x256xf32>
    %322 = arith.maximumf %320, %321 : vector<8x256xf32>
    %323 = vector.extract_strided_slice %322 {offsets = [0, 1], sizes = [8, 255], strides = [1, 1]} : vector<8x256xf32> to vector<8x255xf32>
    %324 = vector.extract_strided_slice %322 {offsets = [0, 0], sizes = [8, 1], strides = [1, 1]} : vector<8x256xf32> to vector<8x1xf32>
    %325 = tpu.concatenate %323, %324 in 1 : vector<8x255xf32>, vector<8x1xf32> -> vector<8x256xf32>
    %326 = arith.maximumf %322, %325 : vector<8x256xf32>
    %327 = vector.extract_strided_slice %322 {offsets = [0, 16], sizes = [8, 240], strides = [1, 1]} : vector<8x256xf32> to vector<8x240xf32>
    %328 = vector.extract_strided_slice %322 {offsets = [0, 0], sizes = [8, 16], strides = [1, 1]} : vector<8x256xf32> to vector<8x16xf32>
    %329 = tpu.concatenate %327, %328 in 1 : vector<8x240xf32>, vector<8x16xf32> -> vector<8x256xf32>
    %330 = arith.maximumf %326, %329 : vector<8x256xf32>
    %331 = vector.extract_strided_slice %322 {offsets = [0, 17], sizes = [8, 239], strides = [1, 1]} : vector<8x256xf32> to vector<8x239xf32>
    %332 = vector.extract_strided_slice %322 {offsets = [0, 0], sizes = [8, 17], strides = [1, 1]} : vector<8x256xf32> to vector<8x17xf32>
    %333 = tpu.concatenate %331, %332 in 1 : vector<8x239xf32>, vector<8x17xf32> -> vector<8x256xf32>
    %334 = arith.maximumf %330, %333 : vector<8x256xf32>
    %335 = arith.truncf %334 : vector<8x256xf32> to vector<8x256xbf16>
    %c0_100 = arith.constant 0 : index
    %c0_101 = arith.constant 0 : index
    %336 = vector.load %arg2[%c0_100, %c0_101] : memref<256x64xbf16, #tpu.memory_space<vmem>>, vector<256x64xbf16>
    %cst_102 = arith.constant dense<0.000000e+00> : vector<8x64xf32>
    %337 = tpu.matmul %335, %336, %cst_102 {dimension_numbers = #tpu.dot_dimension_numbers<[1], [0], [0], [1], [0, 0, 1, 1], [], []>} : vector<8x256xbf16>, vector<256x64xbf16>, vector<8x64xf32> -> vector<8x64xf32>
    %338 = vector.extract_strided_slice %337 {offsets = [0, 55], sizes = [8, 9], strides = [1, 1]} : vector<8x64xf32> to vector<8x9xf32>
    %339 = vector.extract_strided_slice %337 {offsets = [0, 0], sizes = [8, 55], strides = [1, 1]} : vector<8x64xf32> to vector<8x55xf32>
    %340 = tpu.concatenate %338, %339 in 1 : vector<8x9xf32>, vector<8x55xf32> -> vector<8x64xf32>
    %341 = tpu.iota {dimensions = array<i32: 1>} : vector<1x64xi32>
    %c7_i32 = arith.constant 7 : i32
    %342 = vector.broadcast %c7_i32 : i32 to vector<1x64xi32>
    %343 = arith.andi %341, %342 : vector<1x64xi32>
    %c3_i32 = arith.constant 3 : i32
    %344 = vector.broadcast %c3_i32 : i32 to vector<1x64xi32>
    %345 = arith.shrsi %341, %344 : vector<1x64xi32>
    %c-1_i32_103 = arith.constant -1 : i32
    %346 = vector.broadcast %c-1_i32_103 : i32 to vector<1x64xi32>
    %347 = arith.addi %345, %346 : vector<1x64xi32>
    %c0_i32_104 = arith.constant 0 : i32
    %348 = vector.broadcast %c0_i32_104 : i32 to vector<1x64xi32>
    %349 = arith.cmpi sge, %347, %348 : vector<1x64xi32>
    %c-1_i32_105 = arith.constant -1 : i32
    %350 = vector.broadcast %c-1_i32_105 : i32 to vector<1x64xi32>
    %351 = arith.addi %345, %350 : vector<1x64xi32>
    %c8_i32 = arith.constant 8 : i32
    %352 = vector.broadcast %c8_i32 : i32 to vector<1x64xi32>
    %353 = arith.cmpi slt, %351, %352 : vector<1x64xi32>
    %354 = arith.andi %349, %353 : vector<1x64xi1>
    %c-1_i32_106 = arith.constant -1 : i32
    %355 = vector.broadcast %c-1_i32_106 : i32 to vector<1x64xi32>
    %356 = arith.addi %343, %355 : vector<1x64xi32>
    %c0_i32_107 = arith.constant 0 : i32
    %357 = vector.broadcast %c0_i32_107 : i32 to vector<1x64xi32>
    %358 = arith.cmpi sge, %356, %357 : vector<1x64xi32>
    %359 = arith.andi %354, %358 : vector<1x64xi1>
    %c-1_i32_108 = arith.constant -1 : i32
    %360 = vector.broadcast %c-1_i32_108 : i32 to vector<1x64xi32>
    %361 = arith.addi %343, %360 : vector<1x64xi32>
    %c8_i32_109 = arith.constant 8 : i32
    %362 = vector.broadcast %c8_i32_109 : i32 to vector<1x64xi32>
    %363 = arith.cmpi slt, %361, %362 : vector<1x64xi32>
    %364 = arith.andi %359, %363 : vector<1x64xi1>
    %cst_110 = arith.constant 0.000000e+00 : f32
    %365 = vector.broadcast %cst_110 : f32 to vector<8x64xf32>
    %366 = vector.shape_cast %364 : vector<1x64xi1> to vector<1x64xi1>
    %367 = vector.broadcast %366 : vector<1x64xi1> to vector<8x64xi1>
    %368 = arith.select %367, %340, %365 : vector<8x64xi1>, vector<8x64xf32>
    %369 = vector.extract_strided_slice %337 {offsets = [0, 56], sizes = [8, 8], strides = [1, 1]} : vector<8x64xf32> to vector<8x8xf32>
    %370 = vector.extract_strided_slice %337 {offsets = [0, 0], sizes = [8, 56], strides = [1, 1]} : vector<8x64xf32> to vector<8x56xf32>
    %371 = tpu.concatenate %369, %370 in 1 : vector<8x8xf32>, vector<8x56xf32> -> vector<8x64xf32>
    %372 = tpu.iota {dimensions = array<i32: 1>} : vector<1x64xi32>
    %c7_i32_111 = arith.constant 7 : i32
    %373 = vector.broadcast %c7_i32_111 : i32 to vector<1x64xi32>
    %374 = arith.andi %372, %373 : vector<1x64xi32>
    %c3_i32_112 = arith.constant 3 : i32
    %375 = vector.broadcast %c3_i32_112 : i32 to vector<1x64xi32>
    %376 = arith.shrsi %372, %375 : vector<1x64xi32>
    %c-1_i32_113 = arith.constant -1 : i32
    %377 = vector.broadcast %c-1_i32_113 : i32 to vector<1x64xi32>
    %378 = arith.addi %376, %377 : vector<1x64xi32>
    %c0_i32_114 = arith.constant 0 : i32
    %379 = vector.broadcast %c0_i32_114 : i32 to vector<1x64xi32>
    %380 = arith.cmpi sge, %378, %379 : vector<1x64xi32>
    %c-1_i32_115 = arith.constant -1 : i32
    %381 = vector.broadcast %c-1_i32_115 : i32 to vector<1x64xi32>
    %382 = arith.addi %376, %381 : vector<1x64xi32>
    %c8_i32_116 = arith.constant 8 : i32
    %383 = vector.broadcast %c8_i32_116 : i32 to vector<1x64xi32>
    %384 = arith.cmpi slt, %382, %383 : vector<1x64xi32>
    %385 = arith.andi %380, %384 : vector<1x64xi1>
    %c0_i32_117 = arith.constant 0 : i32
    %386 = vector.broadcast %c0_i32_117 : i32 to vector<1x64xi32>
    %387 = arith.addi %374, %386 : vector<1x64xi32>
    %c0_i32_118 = arith.constant 0 : i32
    %388 = vector.broadcast %c0_i32_118 : i32 to vector<1x64xi32>
    %389 = arith.cmpi sge, %387, %388 : vector<1x64xi32>
    %390 = arith.andi %385, %389 : vector<1x64xi1>
    %c0_i32_119 = arith.constant 0 : i32
    %391 = vector.broadcast %c0_i32_119 : i32 to vector<1x64xi32>
    %392 = arith.addi %374, %391 : vector<1x64xi32>
    %c8_i32_120 = arith.constant 8 : i32
    %393 = vector.broadcast %c8_i32_120 : i32 to vector<1x64xi32>
    %394 = arith.cmpi slt, %392, %393 : vector<1x64xi32>
    %395 = arith.andi %390, %394 : vector<1x64xi1>
    %cst_121 = arith.constant 0.000000e+00 : f32
    %396 = vector.broadcast %cst_121 : f32 to vector<8x64xf32>
    %397 = vector.shape_cast %395 : vector<1x64xi1> to vector<1x64xi1>
    %398 = vector.broadcast %397 : vector<1x64xi1> to vector<8x64xi1>
    %399 = arith.select %398, %371, %396 : vector<8x64xi1>, vector<8x64xf32>
    %400 = vector.extract_strided_slice %337 {offsets = [0, 57], sizes = [8, 7], strides = [1, 1]} : vector<8x64xf32> to vector<8x7xf32>
    %401 = vector.extract_strided_slice %337 {offsets = [0, 0], sizes = [8, 57], strides = [1, 1]} : vector<8x64xf32> to vector<8x57xf32>
    %402 = tpu.concatenate %400, %401 in 1 : vector<8x7xf32>, vector<8x57xf32> -> vector<8x64xf32>
    %403 = tpu.iota {dimensions = array<i32: 1>} : vector<1x64xi32>
    %c7_i32_122 = arith.constant 7 : i32
    %404 = vector.broadcast %c7_i32_122 : i32 to vector<1x64xi32>
    %405 = arith.andi %403, %404 : vector<1x64xi32>
    %c3_i32_123 = arith.constant 3 : i32
    %406 = vector.broadcast %c3_i32_123 : i32 to vector<1x64xi32>
    %407 = arith.shrsi %403, %406 : vector<1x64xi32>
    %c-1_i32_124 = arith.constant -1 : i32
    %408 = vector.broadcast %c-1_i32_124 : i32 to vector<1x64xi32>
    %409 = arith.addi %407, %408 : vector<1x64xi32>
    %c0_i32_125 = arith.constant 0 : i32
    %410 = vector.broadcast %c0_i32_125 : i32 to vector<1x64xi32>
    %411 = arith.cmpi sge, %409, %410 : vector<1x64xi32>
    %c-1_i32_126 = arith.constant -1 : i32
    %412 = vector.broadcast %c-1_i32_126 : i32 to vector<1x64xi32>
    %413 = arith.addi %407, %412 : vector<1x64xi32>
    %c8_i32_127 = arith.constant 8 : i32
    %414 = vector.broadcast %c8_i32_127 : i32 to vector<1x64xi32>
    %415 = arith.cmpi slt, %413, %414 : vector<1x64xi32>
    %416 = arith.andi %411, %415 : vector<1x64xi1>
    %c1_i32_128 = arith.constant 1 : i32
    %417 = vector.broadcast %c1_i32_128 : i32 to vector<1x64xi32>
    %418 = arith.addi %405, %417 : vector<1x64xi32>
    %c0_i32_129 = arith.constant 0 : i32
    %419 = vector.broadcast %c0_i32_129 : i32 to vector<1x64xi32>
    %420 = arith.cmpi sge, %418, %419 : vector<1x64xi32>
    %421 = arith.andi %416, %420 : vector<1x64xi1>
    %c1_i32_130 = arith.constant 1 : i32
    %422 = vector.broadcast %c1_i32_130 : i32 to vector<1x64xi32>
    %423 = arith.addi %405, %422 : vector<1x64xi32>
    %c8_i32_131 = arith.constant 8 : i32
    %424 = vector.broadcast %c8_i32_131 : i32 to vector<1x64xi32>
    %425 = arith.cmpi slt, %423, %424 : vector<1x64xi32>
    %426 = arith.andi %421, %425 : vector<1x64xi1>
    %cst_132 = arith.constant 0.000000e+00 : f32
    %427 = vector.broadcast %cst_132 : f32 to vector<8x64xf32>
    %428 = vector.shape_cast %426 : vector<1x64xi1> to vector<1x64xi1>
    %429 = vector.broadcast %428 : vector<1x64xi1> to vector<8x64xi1>
    %430 = arith.select %429, %402, %427 : vector<8x64xi1>, vector<8x64xf32>
    %431 = vector.extract_strided_slice %337 {offsets = [0, 63], sizes = [8, 1], strides = [1, 1]} : vector<8x64xf32> to vector<8x1xf32>
    %432 = vector.extract_strided_slice %337 {offsets = [0, 0], sizes = [8, 63], strides = [1, 1]} : vector<8x64xf32> to vector<8x63xf32>
    %433 = tpu.concatenate %431, %432 in 1 : vector<8x1xf32>, vector<8x63xf32> -> vector<8x64xf32>
    %434 = tpu.iota {dimensions = array<i32: 1>} : vector<1x64xi32>
    %c7_i32_133 = arith.constant 7 : i32
    %435 = vector.broadcast %c7_i32_133 : i32 to vector<1x64xi32>
    %436 = arith.andi %434, %435 : vector<1x64xi32>
    %c3_i32_134 = arith.constant 3 : i32
    %437 = vector.broadcast %c3_i32_134 : i32 to vector<1x64xi32>
    %438 = arith.shrsi %434, %437 : vector<1x64xi32>
    %c0_i32_135 = arith.constant 0 : i32
    %439 = vector.broadcast %c0_i32_135 : i32 to vector<1x64xi32>
    %440 = arith.addi %438, %439 : vector<1x64xi32>
    %c0_i32_136 = arith.constant 0 : i32
    %441 = vector.broadcast %c0_i32_136 : i32 to vector<1x64xi32>
    %442 = arith.cmpi sge, %440, %441 : vector<1x64xi32>
    %c0_i32_137 = arith.constant 0 : i32
    %443 = vector.broadcast %c0_i32_137 : i32 to vector<1x64xi32>
    %444 = arith.addi %438, %443 : vector<1x64xi32>
    %c8_i32_138 = arith.constant 8 : i32
    %445 = vector.broadcast %c8_i32_138 : i32 to vector<1x64xi32>
    %446 = arith.cmpi slt, %444, %445 : vector<1x64xi32>
    %447 = arith.andi %442, %446 : vector<1x64xi1>
    %c-1_i32_139 = arith.constant -1 : i32
    %448 = vector.broadcast %c-1_i32_139 : i32 to vector<1x64xi32>
    %449 = arith.addi %436, %448 : vector<1x64xi32>
    %c0_i32_140 = arith.constant 0 : i32
    %450 = vector.broadcast %c0_i32_140 : i32 to vector<1x64xi32>
    %451 = arith.cmpi sge, %449, %450 : vector<1x64xi32>
    %452 = arith.andi %447, %451 : vector<1x64xi1>
    %c-1_i32_141 = arith.constant -1 : i32
    %453 = vector.broadcast %c-1_i32_141 : i32 to vector<1x64xi32>
    %454 = arith.addi %436, %453 : vector<1x64xi32>
    %c8_i32_142 = arith.constant 8 : i32
    %455 = vector.broadcast %c8_i32_142 : i32 to vector<1x64xi32>
    %456 = arith.cmpi slt, %454, %455 : vector<1x64xi32>
    %457 = arith.andi %452, %456 : vector<1x64xi1>
    %cst_143 = arith.constant 0.000000e+00 : f32
    %458 = vector.broadcast %cst_143 : f32 to vector<8x64xf32>
    %459 = vector.shape_cast %457 : vector<1x64xi1> to vector<1x64xi1>
    %460 = vector.broadcast %459 : vector<1x64xi1> to vector<8x64xi1>
    %461 = arith.select %460, %433, %458 : vector<8x64xi1>, vector<8x64xf32>
    %462 = vector.extract_strided_slice %337 {offsets = [0, 1], sizes = [8, 63], strides = [1, 1]} : vector<8x64xf32> to vector<8x63xf32>
    %463 = vector.extract_strided_slice %337 {offsets = [0, 0], sizes = [8, 1], strides = [1, 1]} : vector<8x64xf32> to vector<8x1xf32>
    %464 = tpu.concatenate %462, %463 in 1 : vector<8x63xf32>, vector<8x1xf32> -> vector<8x64xf32>
    %465 = tpu.iota {dimensions = array<i32: 1>} : vector<1x64xi32>
    %c7_i32_144 = arith.constant 7 : i32
    %466 = vector.broadcast %c7_i32_144 : i32 to vector<1x64xi32>
    %467 = arith.andi %465, %466 : vector<1x64xi32>
    %c3_i32_145 = arith.constant 3 : i32
    %468 = vector.broadcast %c3_i32_145 : i32 to vector<1x64xi32>
    %469 = arith.shrsi %465, %468 : vector<1x64xi32>
    %c0_i32_146 = arith.constant 0 : i32
    %470 = vector.broadcast %c0_i32_146 : i32 to vector<1x64xi32>
    %471 = arith.addi %469, %470 : vector<1x64xi32>
    %c0_i32_147 = arith.constant 0 : i32
    %472 = vector.broadcast %c0_i32_147 : i32 to vector<1x64xi32>
    %473 = arith.cmpi sge, %471, %472 : vector<1x64xi32>
    %c0_i32_148 = arith.constant 0 : i32
    %474 = vector.broadcast %c0_i32_148 : i32 to vector<1x64xi32>
    %475 = arith.addi %469, %474 : vector<1x64xi32>
    %c8_i32_149 = arith.constant 8 : i32
    %476 = vector.broadcast %c8_i32_149 : i32 to vector<1x64xi32>
    %477 = arith.cmpi slt, %475, %476 : vector<1x64xi32>
    %478 = arith.andi %473, %477 : vector<1x64xi1>
    %c1_i32_150 = arith.constant 1 : i32
    %479 = vector.broadcast %c1_i32_150 : i32 to vector<1x64xi32>
    %480 = arith.addi %467, %479 : vector<1x64xi32>
    %c0_i32_151 = arith.constant 0 : i32
    %481 = vector.broadcast %c0_i32_151 : i32 to vector<1x64xi32>
    %482 = arith.cmpi sge, %480, %481 : vector<1x64xi32>
    %483 = arith.andi %478, %482 : vector<1x64xi1>
    %c1_i32_152 = arith.constant 1 : i32
    %484 = vector.broadcast %c1_i32_152 : i32 to vector<1x64xi32>
    %485 = arith.addi %467, %484 : vector<1x64xi32>
    %c8_i32_153 = arith.constant 8 : i32
    %486 = vector.broadcast %c8_i32_153 : i32 to vector<1x64xi32>
    %487 = arith.cmpi slt, %485, %486 : vector<1x64xi32>
    %488 = arith.andi %483, %487 : vector<1x64xi1>
    %cst_154 = arith.constant 0.000000e+00 : f32
    %489 = vector.broadcast %cst_154 : f32 to vector<8x64xf32>
    %490 = vector.shape_cast %488 : vector<1x64xi1> to vector<1x64xi1>
    %491 = vector.broadcast %490 : vector<1x64xi1> to vector<8x64xi1>
    %492 = arith.select %491, %464, %489 : vector<8x64xi1>, vector<8x64xf32>
    %493 = vector.extract_strided_slice %337 {offsets = [0, 7], sizes = [8, 57], strides = [1, 1]} : vector<8x64xf32> to vector<8x57xf32>
    %494 = vector.extract_strided_slice %337 {offsets = [0, 0], sizes = [8, 7], strides = [1, 1]} : vector<8x64xf32> to vector<8x7xf32>
    %495 = tpu.concatenate %493, %494 in 1 : vector<8x57xf32>, vector<8x7xf32> -> vector<8x64xf32>
    %496 = tpu.iota {dimensions = array<i32: 1>} : vector<1x64xi32>
    %c7_i32_155 = arith.constant 7 : i32
    %497 = vector.broadcast %c7_i32_155 : i32 to vector<1x64xi32>
    %498 = arith.andi %496, %497 : vector<1x64xi32>
    %c3_i32_156 = arith.constant 3 : i32
    %499 = vector.broadcast %c3_i32_156 : i32 to vector<1x64xi32>
    %500 = arith.shrsi %496, %499 : vector<1x64xi32>
    %c1_i32_157 = arith.constant 1 : i32
    %501 = vector.broadcast %c1_i32_157 : i32 to vector<1x64xi32>
    %502 = arith.addi %500, %501 : vector<1x64xi32>
    %c0_i32_158 = arith.constant 0 : i32
    %503 = vector.broadcast %c0_i32_158 : i32 to vector<1x64xi32>
    %504 = arith.cmpi sge, %502, %503 : vector<1x64xi32>
    %c1_i32_159 = arith.constant 1 : i32
    %505 = vector.broadcast %c1_i32_159 : i32 to vector<1x64xi32>
    %506 = arith.addi %500, %505 : vector<1x64xi32>
    %c8_i32_160 = arith.constant 8 : i32
    %507 = vector.broadcast %c8_i32_160 : i32 to vector<1x64xi32>
    %508 = arith.cmpi slt, %506, %507 : vector<1x64xi32>
    %509 = arith.andi %504, %508 : vector<1x64xi1>
    %c-1_i32_161 = arith.constant -1 : i32
    %510 = vector.broadcast %c-1_i32_161 : i32 to vector<1x64xi32>
    %511 = arith.addi %498, %510 : vector<1x64xi32>
    %c0_i32_162 = arith.constant 0 : i32
    %512 = vector.broadcast %c0_i32_162 : i32 to vector<1x64xi32>
    %513 = arith.cmpi sge, %511, %512 : vector<1x64xi32>
    %514 = arith.andi %509, %513 : vector<1x64xi1>
    %c-1_i32_163 = arith.constant -1 : i32
    %515 = vector.broadcast %c-1_i32_163 : i32 to vector<1x64xi32>
    %516 = arith.addi %498, %515 : vector<1x64xi32>
    %c8_i32_164 = arith.constant 8 : i32
    %517 = vector.broadcast %c8_i32_164 : i32 to vector<1x64xi32>
    %518 = arith.cmpi slt, %516, %517 : vector<1x64xi32>
    %519 = arith.andi %514, %518 : vector<1x64xi1>
    %cst_165 = arith.constant 0.000000e+00 : f32
    %520 = vector.broadcast %cst_165 : f32 to vector<8x64xf32>
    %521 = vector.shape_cast %519 : vector<1x64xi1> to vector<1x64xi1>
    %522 = vector.broadcast %521 : vector<1x64xi1> to vector<8x64xi1>
    %523 = arith.select %522, %495, %520 : vector<8x64xi1>, vector<8x64xf32>
    %524 = vector.extract_strided_slice %337 {offsets = [0, 8], sizes = [8, 56], strides = [1, 1]} : vector<8x64xf32> to vector<8x56xf32>
    %525 = vector.extract_strided_slice %337 {offsets = [0, 0], sizes = [8, 8], strides = [1, 1]} : vector<8x64xf32> to vector<8x8xf32>
    %526 = tpu.concatenate %524, %525 in 1 : vector<8x56xf32>, vector<8x8xf32> -> vector<8x64xf32>
    %527 = tpu.iota {dimensions = array<i32: 1>} : vector<1x64xi32>
    %c7_i32_166 = arith.constant 7 : i32
    %528 = vector.broadcast %c7_i32_166 : i32 to vector<1x64xi32>
    %529 = arith.andi %527, %528 : vector<1x64xi32>
    %c3_i32_167 = arith.constant 3 : i32
    %530 = vector.broadcast %c3_i32_167 : i32 to vector<1x64xi32>
    %531 = arith.shrsi %527, %530 : vector<1x64xi32>
    %c1_i32_168 = arith.constant 1 : i32
    %532 = vector.broadcast %c1_i32_168 : i32 to vector<1x64xi32>
    %533 = arith.addi %531, %532 : vector<1x64xi32>
    %c0_i32_169 = arith.constant 0 : i32
    %534 = vector.broadcast %c0_i32_169 : i32 to vector<1x64xi32>
    %535 = arith.cmpi sge, %533, %534 : vector<1x64xi32>
    %c1_i32_170 = arith.constant 1 : i32
    %536 = vector.broadcast %c1_i32_170 : i32 to vector<1x64xi32>
    %537 = arith.addi %531, %536 : vector<1x64xi32>
    %c8_i32_171 = arith.constant 8 : i32
    %538 = vector.broadcast %c8_i32_171 : i32 to vector<1x64xi32>
    %539 = arith.cmpi slt, %537, %538 : vector<1x64xi32>
    %540 = arith.andi %535, %539 : vector<1x64xi1>
    %c0_i32_172 = arith.constant 0 : i32
    %541 = vector.broadcast %c0_i32_172 : i32 to vector<1x64xi32>
    %542 = arith.addi %529, %541 : vector<1x64xi32>
    %c0_i32_173 = arith.constant 0 : i32
    %543 = vector.broadcast %c0_i32_173 : i32 to vector<1x64xi32>
    %544 = arith.cmpi sge, %542, %543 : vector<1x64xi32>
    %545 = arith.andi %540, %544 : vector<1x64xi1>
    %c0_i32_174 = arith.constant 0 : i32
    %546 = vector.broadcast %c0_i32_174 : i32 to vector<1x64xi32>
    %547 = arith.addi %529, %546 : vector<1x64xi32>
    %c8_i32_175 = arith.constant 8 : i32
    %548 = vector.broadcast %c8_i32_175 : i32 to vector<1x64xi32>
    %549 = arith.cmpi slt, %547, %548 : vector<1x64xi32>
    %550 = arith.andi %545, %549 : vector<1x64xi1>
    %cst_176 = arith.constant 0.000000e+00 : f32
    %551 = vector.broadcast %cst_176 : f32 to vector<8x64xf32>
    %552 = vector.shape_cast %550 : vector<1x64xi1> to vector<1x64xi1>
    %553 = vector.broadcast %552 : vector<1x64xi1> to vector<8x64xi1>
    %554 = arith.select %553, %526, %551 : vector<8x64xi1>, vector<8x64xf32>
    %555 = vector.extract_strided_slice %337 {offsets = [0, 9], sizes = [8, 55], strides = [1, 1]} : vector<8x64xf32> to vector<8x55xf32>
    %556 = vector.extract_strided_slice %337 {offsets = [0, 0], sizes = [8, 9], strides = [1, 1]} : vector<8x64xf32> to vector<8x9xf32>
    %557 = tpu.concatenate %555, %556 in 1 : vector<8x55xf32>, vector<8x9xf32> -> vector<8x64xf32>
    %558 = tpu.iota {dimensions = array<i32: 1>} : vector<1x64xi32>
    %c7_i32_177 = arith.constant 7 : i32
    %559 = vector.broadcast %c7_i32_177 : i32 to vector<1x64xi32>
    %560 = arith.andi %558, %559 : vector<1x64xi32>
    %c3_i32_178 = arith.constant 3 : i32
    %561 = vector.broadcast %c3_i32_178 : i32 to vector<1x64xi32>
    %562 = arith.shrsi %558, %561 : vector<1x64xi32>
    %c1_i32_179 = arith.constant 1 : i32
    %563 = vector.broadcast %c1_i32_179 : i32 to vector<1x64xi32>
    %564 = arith.addi %562, %563 : vector<1x64xi32>
    %c0_i32_180 = arith.constant 0 : i32
    %565 = vector.broadcast %c0_i32_180 : i32 to vector<1x64xi32>
    %566 = arith.cmpi sge, %564, %565 : vector<1x64xi32>
    %c1_i32_181 = arith.constant 1 : i32
    %567 = vector.broadcast %c1_i32_181 : i32 to vector<1x64xi32>
    %568 = arith.addi %562, %567 : vector<1x64xi32>
    %c8_i32_182 = arith.constant 8 : i32
    %569 = vector.broadcast %c8_i32_182 : i32 to vector<1x64xi32>
    %570 = arith.cmpi slt, %568, %569 : vector<1x64xi32>
    %571 = arith.andi %566, %570 : vector<1x64xi1>
    %c1_i32_183 = arith.constant 1 : i32
    %572 = vector.broadcast %c1_i32_183 : i32 to vector<1x64xi32>
    %573 = arith.addi %560, %572 : vector<1x64xi32>
    %c0_i32_184 = arith.constant 0 : i32
    %574 = vector.broadcast %c0_i32_184 : i32 to vector<1x64xi32>
    %575 = arith.cmpi sge, %573, %574 : vector<1x64xi32>
    %576 = arith.andi %571, %575 : vector<1x64xi1>
    %c1_i32_185 = arith.constant 1 : i32
    %577 = vector.broadcast %c1_i32_185 : i32 to vector<1x64xi32>
    %578 = arith.addi %560, %577 : vector<1x64xi32>
    %c8_i32_186 = arith.constant 8 : i32
    %579 = vector.broadcast %c8_i32_186 : i32 to vector<1x64xi32>
    %580 = arith.cmpi slt, %578, %579 : vector<1x64xi32>
    %581 = arith.andi %576, %580 : vector<1x64xi1>
    %cst_187 = arith.constant 0.000000e+00 : f32
    %582 = vector.broadcast %cst_187 : f32 to vector<8x64xf32>
    %583 = vector.shape_cast %581 : vector<1x64xi1> to vector<1x64xi1>
    %584 = vector.broadcast %583 : vector<1x64xi1> to vector<8x64xi1>
    %585 = arith.select %584, %557, %582 : vector<8x64xi1>, vector<8x64xf32>
    %586 = tpu.iota {dimensions = array<i32: 0>} : vector<8x64xi32>
    %c0_i32_188 = arith.constant 0 : i32
    %587 = vector.broadcast %c0_i32_188 : i32 to vector<8x64xi32>
    %588 = arith.cmpi eq, %586, %587 : vector<8x64xi32>
    %589 = arith.extui %588 : vector<8x64xi1> to vector<8x64xi32>
    %590 = arith.sitofp %589 : vector<8x64xi32> to vector<8x64xf32>
    %591 = tpu.concatenate %368, %399, %430, %461, %337, %492, %523, %554, %585, %590 in 0 : vector<8x64xf32>, vector<8x64xf32>, vector<8x64xf32>, vector<8x64xf32>, vector<8x64xf32>, vector<8x64xf32>, vector<8x64xf32>, vector<8x64xf32>, vector<8x64xf32>, vector<8x64xf32> -> vector<80x64xf32>
    %c0_189 = arith.constant 0 : index
    %c0_190 = arith.constant 0 : index
    %592 = vector.load %arg8[%c0_189, %c0_190] : memref<16x80xbf16, #tpu.memory_space<vmem>>, vector<16x80xbf16>
    %593 = arith.truncf %591 : vector<80x64xf32> to vector<80x64xbf16>
    %cst_191 = arith.constant dense<0.000000e+00> : vector<16x64xf32>
    %594 = tpu.matmul %592, %593, %cst_191 {dimension_numbers = #tpu.dot_dimension_numbers<[1], [0], [0], [1], [0, 0, 1, 1], [], []>} : vector<16x80xbf16>, vector<80x64xbf16>, vector<16x64xf32> -> vector<16x64xf32>
    %cst_192 = arith.constant 0.000000e+00 : f32
    %595 = vector.broadcast %cst_192 : f32 to vector<16x64xf32>
    %596 = arith.maximumf %594, %595 : vector<16x64xf32>
    %597 = vector.extract_strided_slice %596 {offsets = [0, 55], sizes = [16, 9], strides = [1, 1]} : vector<16x64xf32> to vector<16x9xf32>
    %598 = vector.extract_strided_slice %596 {offsets = [0, 0], sizes = [16, 55], strides = [1, 1]} : vector<16x64xf32> to vector<16x55xf32>
    %599 = tpu.concatenate %597, %598 in 1 : vector<16x9xf32>, vector<16x55xf32> -> vector<16x64xf32>
    %cst_193 = arith.constant 0.000000e+00 : f32
    %600 = vector.broadcast %cst_193 : f32 to vector<16x64xf32>
    %601 = vector.shape_cast %364 : vector<1x64xi1> to vector<1x64xi1>
    %602 = vector.broadcast %601 : vector<1x64xi1> to vector<16x64xi1>
    %603 = arith.select %602, %599, %600 : vector<16x64xi1>, vector<16x64xf32>
    %604 = vector.extract_strided_slice %596 {offsets = [0, 56], sizes = [16, 8], strides = [1, 1]} : vector<16x64xf32> to vector<16x8xf32>
    %605 = vector.extract_strided_slice %596 {offsets = [0, 0], sizes = [16, 56], strides = [1, 1]} : vector<16x64xf32> to vector<16x56xf32>
    %606 = tpu.concatenate %604, %605 in 1 : vector<16x8xf32>, vector<16x56xf32> -> vector<16x64xf32>
    %cst_194 = arith.constant 0.000000e+00 : f32
    %607 = vector.broadcast %cst_194 : f32 to vector<16x64xf32>
    %608 = vector.shape_cast %395 : vector<1x64xi1> to vector<1x64xi1>
    %609 = vector.broadcast %608 : vector<1x64xi1> to vector<16x64xi1>
    %610 = arith.select %609, %606, %607 : vector<16x64xi1>, vector<16x64xf32>
    %611 = vector.extract_strided_slice %596 {offsets = [0, 57], sizes = [16, 7], strides = [1, 1]} : vector<16x64xf32> to vector<16x7xf32>
    %612 = vector.extract_strided_slice %596 {offsets = [0, 0], sizes = [16, 57], strides = [1, 1]} : vector<16x64xf32> to vector<16x57xf32>
    %613 = tpu.concatenate %611, %612 in 1 : vector<16x7xf32>, vector<16x57xf32> -> vector<16x64xf32>
    %cst_195 = arith.constant 0.000000e+00 : f32
    %614 = vector.broadcast %cst_195 : f32 to vector<16x64xf32>
    %615 = vector.shape_cast %426 : vector<1x64xi1> to vector<1x64xi1>
    %616 = vector.broadcast %615 : vector<1x64xi1> to vector<16x64xi1>
    %617 = arith.select %616, %613, %614 : vector<16x64xi1>, vector<16x64xf32>
    %618 = vector.extract_strided_slice %596 {offsets = [0, 63], sizes = [16, 1], strides = [1, 1]} : vector<16x64xf32> to vector<16x1xf32>
    %619 = vector.extract_strided_slice %596 {offsets = [0, 0], sizes = [16, 63], strides = [1, 1]} : vector<16x64xf32> to vector<16x63xf32>
    %620 = tpu.concatenate %618, %619 in 1 : vector<16x1xf32>, vector<16x63xf32> -> vector<16x64xf32>
    %cst_196 = arith.constant 0.000000e+00 : f32
    %621 = vector.broadcast %cst_196 : f32 to vector<16x64xf32>
    %622 = vector.shape_cast %457 : vector<1x64xi1> to vector<1x64xi1>
    %623 = vector.broadcast %622 : vector<1x64xi1> to vector<16x64xi1>
    %624 = arith.select %623, %620, %621 : vector<16x64xi1>, vector<16x64xf32>
    %625 = vector.extract_strided_slice %596 {offsets = [0, 1], sizes = [16, 63], strides = [1, 1]} : vector<16x64xf32> to vector<16x63xf32>
    %626 = vector.extract_strided_slice %596 {offsets = [0, 0], sizes = [16, 1], strides = [1, 1]} : vector<16x64xf32> to vector<16x1xf32>
    %627 = tpu.concatenate %625, %626 in 1 : vector<16x63xf32>, vector<16x1xf32> -> vector<16x64xf32>
    %cst_197 = arith.constant 0.000000e+00 : f32
    %628 = vector.broadcast %cst_197 : f32 to vector<16x64xf32>
    %629 = vector.shape_cast %488 : vector<1x64xi1> to vector<1x64xi1>
    %630 = vector.broadcast %629 : vector<1x64xi1> to vector<16x64xi1>
    %631 = arith.select %630, %627, %628 : vector<16x64xi1>, vector<16x64xf32>
    %632 = vector.extract_strided_slice %596 {offsets = [0, 7], sizes = [16, 57], strides = [1, 1]} : vector<16x64xf32> to vector<16x57xf32>
    %633 = vector.extract_strided_slice %596 {offsets = [0, 0], sizes = [16, 7], strides = [1, 1]} : vector<16x64xf32> to vector<16x7xf32>
    %634 = tpu.concatenate %632, %633 in 1 : vector<16x57xf32>, vector<16x7xf32> -> vector<16x64xf32>
    %cst_198 = arith.constant 0.000000e+00 : f32
    %635 = vector.broadcast %cst_198 : f32 to vector<16x64xf32>
    %636 = vector.shape_cast %519 : vector<1x64xi1> to vector<1x64xi1>
    %637 = vector.broadcast %636 : vector<1x64xi1> to vector<16x64xi1>
    %638 = arith.select %637, %634, %635 : vector<16x64xi1>, vector<16x64xf32>
    %639 = vector.extract_strided_slice %596 {offsets = [0, 8], sizes = [16, 56], strides = [1, 1]} : vector<16x64xf32> to vector<16x56xf32>
    %640 = vector.extract_strided_slice %596 {offsets = [0, 0], sizes = [16, 8], strides = [1, 1]} : vector<16x64xf32> to vector<16x8xf32>
    %641 = tpu.concatenate %639, %640 in 1 : vector<16x56xf32>, vector<16x8xf32> -> vector<16x64xf32>
    %cst_199 = arith.constant 0.000000e+00 : f32
    %642 = vector.broadcast %cst_199 : f32 to vector<16x64xf32>
    %643 = vector.shape_cast %550 : vector<1x64xi1> to vector<1x64xi1>
    %644 = vector.broadcast %643 : vector<1x64xi1> to vector<16x64xi1>
    %645 = arith.select %644, %641, %642 : vector<16x64xi1>, vector<16x64xf32>
    %646 = vector.extract_strided_slice %596 {offsets = [0, 9], sizes = [16, 55], strides = [1, 1]} : vector<16x64xf32> to vector<16x55xf32>
    %647 = vector.extract_strided_slice %596 {offsets = [0, 0], sizes = [16, 9], strides = [1, 1]} : vector<16x64xf32> to vector<16x9xf32>
    %648 = tpu.concatenate %646, %647 in 1 : vector<16x55xf32>, vector<16x9xf32> -> vector<16x64xf32>
    %cst_200 = arith.constant 0.000000e+00 : f32
    %649 = vector.broadcast %cst_200 : f32 to vector<16x64xf32>
    %650 = vector.shape_cast %581 : vector<1x64xi1> to vector<1x64xi1>
    %651 = vector.broadcast %650 : vector<1x64xi1> to vector<16x64xi1>
    %652 = arith.select %651, %648, %649 : vector<16x64xi1>, vector<16x64xf32>
    %653 = tpu.concatenate %603, %610, %617, %624, %596, %631, %638, %645, %652, %590 in 0 : vector<16x64xf32>, vector<16x64xf32>, vector<16x64xf32>, vector<16x64xf32>, vector<16x64xf32>, vector<16x64xf32>, vector<16x64xf32>, vector<16x64xf32>, vector<16x64xf32>, vector<8x64xf32> -> vector<152x64xf32>
    %c0_201 = arith.constant 0 : index
    %c0_202 = arith.constant 0 : index
    %654 = vector.load %arg9[%c0_201, %c0_202] : memref<16x152xbf16, #tpu.memory_space<vmem>>, vector<16x152xbf16>
    %655 = arith.truncf %653 : vector<152x64xf32> to vector<152x64xbf16>
    %cst_203 = arith.constant dense<0.000000e+00> : vector<16x64xf32>
    %656 = tpu.matmul %654, %655, %cst_203 {dimension_numbers = #tpu.dot_dimension_numbers<[1], [0], [0], [1], [0, 0, 1, 1], [], []>} : vector<16x152xbf16>, vector<152x64xbf16>, vector<16x64xf32> -> vector<16x64xf32>
    %cst_204 = arith.constant 0.000000e+00 : f32
    %657 = vector.broadcast %cst_204 : f32 to vector<16x64xf32>
    %658 = arith.maximumf %656, %657 : vector<16x64xf32>
    %659 = vector.extract_strided_slice %658 {offsets = [0, 1], sizes = [16, 63], strides = [1, 1]} : vector<16x64xf32> to vector<16x63xf32>
    %660 = vector.extract_strided_slice %658 {offsets = [0, 0], sizes = [16, 1], strides = [1, 1]} : vector<16x64xf32> to vector<16x1xf32>
    %661 = tpu.concatenate %659, %660 in 1 : vector<16x63xf32>, vector<16x1xf32> -> vector<16x64xf32>
    %662 = arith.maximumf %658, %661 : vector<16x64xf32>
    %663 = vector.extract_strided_slice %658 {offsets = [0, 8], sizes = [16, 56], strides = [1, 1]} : vector<16x64xf32> to vector<16x56xf32>
    %664 = vector.extract_strided_slice %658 {offsets = [0, 0], sizes = [16, 8], strides = [1, 1]} : vector<16x64xf32> to vector<16x8xf32>
    %665 = tpu.concatenate %663, %664 in 1 : vector<16x56xf32>, vector<16x8xf32> -> vector<16x64xf32>
    %666 = arith.maximumf %662, %665 : vector<16x64xf32>
    %667 = vector.extract_strided_slice %658 {offsets = [0, 9], sizes = [16, 55], strides = [1, 1]} : vector<16x64xf32> to vector<16x55xf32>
    %668 = vector.extract_strided_slice %658 {offsets = [0, 0], sizes = [16, 9], strides = [1, 1]} : vector<16x64xf32> to vector<16x9xf32>
    %669 = tpu.concatenate %667, %668 in 1 : vector<16x55xf32>, vector<16x9xf32> -> vector<16x64xf32>
    %670 = arith.maximumf %666, %669 : vector<16x64xf32>
    %671 = arith.truncf %670 : vector<16x64xf32> to vector<16x64xbf16>
    %c0_205 = arith.constant 0 : index
    %c0_206 = arith.constant 0 : index
    %672 = vector.load %arg3[%c0_205, %c0_206] : memref<64x16xbf16, #tpu.memory_space<vmem>>, vector<64x16xbf16>
    %cst_207 = arith.constant dense<0.000000e+00> : vector<16x16xf32>
    %673 = tpu.matmul %671, %672, %cst_207 {dimension_numbers = #tpu.dot_dimension_numbers<[1], [0], [0], [1], [0, 0, 1, 1], [], []>} : vector<16x64xbf16>, vector<64x16xbf16>, vector<16x16xf32> -> vector<16x16xf32>
    %674 = vector.extract_strided_slice %673 {offsets = [0, 11], sizes = [16, 5], strides = [1, 1]} : vector<16x16xf32> to vector<16x5xf32>
    %675 = vector.extract_strided_slice %673 {offsets = [0, 0], sizes = [16, 11], strides = [1, 1]} : vector<16x16xf32> to vector<16x11xf32>
    %676 = tpu.concatenate %674, %675 in 1 : vector<16x5xf32>, vector<16x11xf32> -> vector<16x16xf32>
    %677 = tpu.iota {dimensions = array<i32: 1>} : vector<1x16xi32>
    %c3_i32_208 = arith.constant 3 : i32
    %678 = vector.broadcast %c3_i32_208 : i32 to vector<1x16xi32>
    %679 = arith.andi %677, %678 : vector<1x16xi32>
    %c2_i32 = arith.constant 2 : i32
    %680 = vector.broadcast %c2_i32 : i32 to vector<1x16xi32>
    %681 = arith.shrsi %677, %680 : vector<1x16xi32>
    %c-1_i32_209 = arith.constant -1 : i32
    %682 = vector.broadcast %c-1_i32_209 : i32 to vector<1x16xi32>
    %683 = arith.addi %681, %682 : vector<1x16xi32>
    %c0_i32_210 = arith.constant 0 : i32
    %684 = vector.broadcast %c0_i32_210 : i32 to vector<1x16xi32>
    %685 = arith.cmpi sge, %683, %684 : vector<1x16xi32>
    %c-1_i32_211 = arith.constant -1 : i32
    %686 = vector.broadcast %c-1_i32_211 : i32 to vector<1x16xi32>
    %687 = arith.addi %681, %686 : vector<1x16xi32>
    %c4_i32_212 = arith.constant 4 : i32
    %688 = vector.broadcast %c4_i32_212 : i32 to vector<1x16xi32>
    %689 = arith.cmpi slt, %687, %688 : vector<1x16xi32>
    %690 = arith.andi %685, %689 : vector<1x16xi1>
    %c-1_i32_213 = arith.constant -1 : i32
    %691 = vector.broadcast %c-1_i32_213 : i32 to vector<1x16xi32>
    %692 = arith.addi %679, %691 : vector<1x16xi32>
    %c0_i32_214 = arith.constant 0 : i32
    %693 = vector.broadcast %c0_i32_214 : i32 to vector<1x16xi32>
    %694 = arith.cmpi sge, %692, %693 : vector<1x16xi32>
    %695 = arith.andi %690, %694 : vector<1x16xi1>
    %c-1_i32_215 = arith.constant -1 : i32
    %696 = vector.broadcast %c-1_i32_215 : i32 to vector<1x16xi32>
    %697 = arith.addi %679, %696 : vector<1x16xi32>
    %c4_i32_216 = arith.constant 4 : i32
    %698 = vector.broadcast %c4_i32_216 : i32 to vector<1x16xi32>
    %699 = arith.cmpi slt, %697, %698 : vector<1x16xi32>
    %700 = arith.andi %695, %699 : vector<1x16xi1>
    %cst_217 = arith.constant 0.000000e+00 : f32
    %701 = vector.broadcast %cst_217 : f32 to vector<16x16xf32>
    %702 = vector.shape_cast %700 : vector<1x16xi1> to vector<1x16xi1>
    %703 = vector.broadcast %702 : vector<1x16xi1> to vector<16x16xi1>
    %704 = arith.select %703, %676, %701 : vector<16x16xi1>, vector<16x16xf32>
    %705 = vector.extract_strided_slice %673 {offsets = [0, 12], sizes = [16, 4], strides = [1, 1]} : vector<16x16xf32> to vector<16x4xf32>
    %706 = vector.extract_strided_slice %673 {offsets = [0, 0], sizes = [16, 12], strides = [1, 1]} : vector<16x16xf32> to vector<16x12xf32>
    %707 = tpu.concatenate %705, %706 in 1 : vector<16x4xf32>, vector<16x12xf32> -> vector<16x16xf32>
    %708 = tpu.iota {dimensions = array<i32: 1>} : vector<1x16xi32>
    %c3_i32_218 = arith.constant 3 : i32
    %709 = vector.broadcast %c3_i32_218 : i32 to vector<1x16xi32>
    %710 = arith.andi %708, %709 : vector<1x16xi32>
    %c2_i32_219 = arith.constant 2 : i32
    %711 = vector.broadcast %c2_i32_219 : i32 to vector<1x16xi32>
    %712 = arith.shrsi %708, %711 : vector<1x16xi32>
    %c-1_i32_220 = arith.constant -1 : i32
    %713 = vector.broadcast %c-1_i32_220 : i32 to vector<1x16xi32>
    %714 = arith.addi %712, %713 : vector<1x16xi32>
    %c0_i32_221 = arith.constant 0 : i32
    %715 = vector.broadcast %c0_i32_221 : i32 to vector<1x16xi32>
    %716 = arith.cmpi sge, %714, %715 : vector<1x16xi32>
    %c-1_i32_222 = arith.constant -1 : i32
    %717 = vector.broadcast %c-1_i32_222 : i32 to vector<1x16xi32>
    %718 = arith.addi %712, %717 : vector<1x16xi32>
    %c4_i32_223 = arith.constant 4 : i32
    %719 = vector.broadcast %c4_i32_223 : i32 to vector<1x16xi32>
    %720 = arith.cmpi slt, %718, %719 : vector<1x16xi32>
    %721 = arith.andi %716, %720 : vector<1x16xi1>
    %c0_i32_224 = arith.constant 0 : i32
    %722 = vector.broadcast %c0_i32_224 : i32 to vector<1x16xi32>
    %723 = arith.addi %710, %722 : vector<1x16xi32>
    %c0_i32_225 = arith.constant 0 : i32
    %724 = vector.broadcast %c0_i32_225 : i32 to vector<1x16xi32>
    %725 = arith.cmpi sge, %723, %724 : vector<1x16xi32>
    %726 = arith.andi %721, %725 : vector<1x16xi1>
    %c0_i32_226 = arith.constant 0 : i32
    %727 = vector.broadcast %c0_i32_226 : i32 to vector<1x16xi32>
    %728 = arith.addi %710, %727 : vector<1x16xi32>
    %c4_i32_227 = arith.constant 4 : i32
    %729 = vector.broadcast %c4_i32_227 : i32 to vector<1x16xi32>
    %730 = arith.cmpi slt, %728, %729 : vector<1x16xi32>
    %731 = arith.andi %726, %730 : vector<1x16xi1>
    %cst_228 = arith.constant 0.000000e+00 : f32
    %732 = vector.broadcast %cst_228 : f32 to vector<16x16xf32>
    %733 = vector.shape_cast %731 : vector<1x16xi1> to vector<1x16xi1>
    %734 = vector.broadcast %733 : vector<1x16xi1> to vector<16x16xi1>
    %735 = arith.select %734, %707, %732 : vector<16x16xi1>, vector<16x16xf32>
    %736 = vector.extract_strided_slice %673 {offsets = [0, 13], sizes = [16, 3], strides = [1, 1]} : vector<16x16xf32> to vector<16x3xf32>
    %737 = vector.extract_strided_slice %673 {offsets = [0, 0], sizes = [16, 13], strides = [1, 1]} : vector<16x16xf32> to vector<16x13xf32>
    %738 = tpu.concatenate %736, %737 in 1 : vector<16x3xf32>, vector<16x13xf32> -> vector<16x16xf32>
    %739 = tpu.iota {dimensions = array<i32: 1>} : vector<1x16xi32>
    %c3_i32_229 = arith.constant 3 : i32
    %740 = vector.broadcast %c3_i32_229 : i32 to vector<1x16xi32>
    %741 = arith.andi %739, %740 : vector<1x16xi32>
    %c2_i32_230 = arith.constant 2 : i32
    %742 = vector.broadcast %c2_i32_230 : i32 to vector<1x16xi32>
    %743 = arith.shrsi %739, %742 : vector<1x16xi32>
    %c-1_i32_231 = arith.constant -1 : i32
    %744 = vector.broadcast %c-1_i32_231 : i32 to vector<1x16xi32>
    %745 = arith.addi %743, %744 : vector<1x16xi32>
    %c0_i32_232 = arith.constant 0 : i32
    %746 = vector.broadcast %c0_i32_232 : i32 to vector<1x16xi32>
    %747 = arith.cmpi sge, %745, %746 : vector<1x16xi32>
    %c-1_i32_233 = arith.constant -1 : i32
    %748 = vector.broadcast %c-1_i32_233 : i32 to vector<1x16xi32>
    %749 = arith.addi %743, %748 : vector<1x16xi32>
    %c4_i32_234 = arith.constant 4 : i32
    %750 = vector.broadcast %c4_i32_234 : i32 to vector<1x16xi32>
    %751 = arith.cmpi slt, %749, %750 : vector<1x16xi32>
    %752 = arith.andi %747, %751 : vector<1x16xi1>
    %c1_i32_235 = arith.constant 1 : i32
    %753 = vector.broadcast %c1_i32_235 : i32 to vector<1x16xi32>
    %754 = arith.addi %741, %753 : vector<1x16xi32>
    %c0_i32_236 = arith.constant 0 : i32
    %755 = vector.broadcast %c0_i32_236 : i32 to vector<1x16xi32>
    %756 = arith.cmpi sge, %754, %755 : vector<1x16xi32>
    %757 = arith.andi %752, %756 : vector<1x16xi1>
    %c1_i32_237 = arith.constant 1 : i32
    %758 = vector.broadcast %c1_i32_237 : i32 to vector<1x16xi32>
    %759 = arith.addi %741, %758 : vector<1x16xi32>
    %c4_i32_238 = arith.constant 4 : i32
    %760 = vector.broadcast %c4_i32_238 : i32 to vector<1x16xi32>
    %761 = arith.cmpi slt, %759, %760 : vector<1x16xi32>
    %762 = arith.andi %757, %761 : vector<1x16xi1>
    %cst_239 = arith.constant 0.000000e+00 : f32
    %763 = vector.broadcast %cst_239 : f32 to vector<16x16xf32>
    %764 = vector.shape_cast %762 : vector<1x16xi1> to vector<1x16xi1>
    %765 = vector.broadcast %764 : vector<1x16xi1> to vector<16x16xi1>
    %766 = arith.select %765, %738, %763 : vector<16x16xi1>, vector<16x16xf32>
    %767 = vector.extract_strided_slice %673 {offsets = [0, 15], sizes = [16, 1], strides = [1, 1]} : vector<16x16xf32> to vector<16x1xf32>
    %768 = vector.extract_strided_slice %673 {offsets = [0, 0], sizes = [16, 15], strides = [1, 1]} : vector<16x16xf32> to vector<16x15xf32>
    %769 = tpu.concatenate %767, %768 in 1 : vector<16x1xf32>, vector<16x15xf32> -> vector<16x16xf32>
    %770 = tpu.iota {dimensions = array<i32: 1>} : vector<1x16xi32>
    %c3_i32_240 = arith.constant 3 : i32
    %771 = vector.broadcast %c3_i32_240 : i32 to vector<1x16xi32>
    %772 = arith.andi %770, %771 : vector<1x16xi32>
    %c2_i32_241 = arith.constant 2 : i32
    %773 = vector.broadcast %c2_i32_241 : i32 to vector<1x16xi32>
    %774 = arith.shrsi %770, %773 : vector<1x16xi32>
    %c0_i32_242 = arith.constant 0 : i32
    %775 = vector.broadcast %c0_i32_242 : i32 to vector<1x16xi32>
    %776 = arith.addi %774, %775 : vector<1x16xi32>
    %c0_i32_243 = arith.constant 0 : i32
    %777 = vector.broadcast %c0_i32_243 : i32 to vector<1x16xi32>
    %778 = arith.cmpi sge, %776, %777 : vector<1x16xi32>
    %c0_i32_244 = arith.constant 0 : i32
    %779 = vector.broadcast %c0_i32_244 : i32 to vector<1x16xi32>
    %780 = arith.addi %774, %779 : vector<1x16xi32>
    %c4_i32_245 = arith.constant 4 : i32
    %781 = vector.broadcast %c4_i32_245 : i32 to vector<1x16xi32>
    %782 = arith.cmpi slt, %780, %781 : vector<1x16xi32>
    %783 = arith.andi %778, %782 : vector<1x16xi1>
    %c-1_i32_246 = arith.constant -1 : i32
    %784 = vector.broadcast %c-1_i32_246 : i32 to vector<1x16xi32>
    %785 = arith.addi %772, %784 : vector<1x16xi32>
    %c0_i32_247 = arith.constant 0 : i32
    %786 = vector.broadcast %c0_i32_247 : i32 to vector<1x16xi32>
    %787 = arith.cmpi sge, %785, %786 : vector<1x16xi32>
    %788 = arith.andi %783, %787 : vector<1x16xi1>
    %c-1_i32_248 = arith.constant -1 : i32
    %789 = vector.broadcast %c-1_i32_248 : i32 to vector<1x16xi32>
    %790 = arith.addi %772, %789 : vector<1x16xi32>
    %c4_i32_249 = arith.constant 4 : i32
    %791 = vector.broadcast %c4_i32_249 : i32 to vector<1x16xi32>
    %792 = arith.cmpi slt, %790, %791 : vector<1x16xi32>
    %793 = arith.andi %788, %792 : vector<1x16xi1>
    %cst_250 = arith.constant 0.000000e+00 : f32
    %794 = vector.broadcast %cst_250 : f32 to vector<16x16xf32>
    %795 = vector.shape_cast %793 : vector<1x16xi1> to vector<1x16xi1>
    %796 = vector.broadcast %795 : vector<1x16xi1> to vector<16x16xi1>
    %797 = arith.select %796, %769, %794 : vector<16x16xi1>, vector<16x16xf32>
    %798 = vector.extract_strided_slice %673 {offsets = [0, 1], sizes = [16, 15], strides = [1, 1]} : vector<16x16xf32> to vector<16x15xf32>
    %799 = vector.extract_strided_slice %673 {offsets = [0, 0], sizes = [16, 1], strides = [1, 1]} : vector<16x16xf32> to vector<16x1xf32>
    %800 = tpu.concatenate %798, %799 in 1 : vector<16x15xf32>, vector<16x1xf32> -> vector<16x16xf32>
    %801 = tpu.iota {dimensions = array<i32: 1>} : vector<1x16xi32>
    %c3_i32_251 = arith.constant 3 : i32
    %802 = vector.broadcast %c3_i32_251 : i32 to vector<1x16xi32>
    %803 = arith.andi %801, %802 : vector<1x16xi32>
    %c2_i32_252 = arith.constant 2 : i32
    %804 = vector.broadcast %c2_i32_252 : i32 to vector<1x16xi32>
    %805 = arith.shrsi %801, %804 : vector<1x16xi32>
    %c0_i32_253 = arith.constant 0 : i32
    %806 = vector.broadcast %c0_i32_253 : i32 to vector<1x16xi32>
    %807 = arith.addi %805, %806 : vector<1x16xi32>
    %c0_i32_254 = arith.constant 0 : i32
    %808 = vector.broadcast %c0_i32_254 : i32 to vector<1x16xi32>
    %809 = arith.cmpi sge, %807, %808 : vector<1x16xi32>
    %c0_i32_255 = arith.constant 0 : i32
    %810 = vector.broadcast %c0_i32_255 : i32 to vector<1x16xi32>
    %811 = arith.addi %805, %810 : vector<1x16xi32>
    %c4_i32_256 = arith.constant 4 : i32
    %812 = vector.broadcast %c4_i32_256 : i32 to vector<1x16xi32>
    %813 = arith.cmpi slt, %811, %812 : vector<1x16xi32>
    %814 = arith.andi %809, %813 : vector<1x16xi1>
    %c1_i32_257 = arith.constant 1 : i32
    %815 = vector.broadcast %c1_i32_257 : i32 to vector<1x16xi32>
    %816 = arith.addi %803, %815 : vector<1x16xi32>
    %c0_i32_258 = arith.constant 0 : i32
    %817 = vector.broadcast %c0_i32_258 : i32 to vector<1x16xi32>
    %818 = arith.cmpi sge, %816, %817 : vector<1x16xi32>
    %819 = arith.andi %814, %818 : vector<1x16xi1>
    %c1_i32_259 = arith.constant 1 : i32
    %820 = vector.broadcast %c1_i32_259 : i32 to vector<1x16xi32>
    %821 = arith.addi %803, %820 : vector<1x16xi32>
    %c4_i32_260 = arith.constant 4 : i32
    %822 = vector.broadcast %c4_i32_260 : i32 to vector<1x16xi32>
    %823 = arith.cmpi slt, %821, %822 : vector<1x16xi32>
    %824 = arith.andi %819, %823 : vector<1x16xi1>
    %cst_261 = arith.constant 0.000000e+00 : f32
    %825 = vector.broadcast %cst_261 : f32 to vector<16x16xf32>
    %826 = vector.shape_cast %824 : vector<1x16xi1> to vector<1x16xi1>
    %827 = vector.broadcast %826 : vector<1x16xi1> to vector<16x16xi1>
    %828 = arith.select %827, %800, %825 : vector<16x16xi1>, vector<16x16xf32>
    %829 = vector.extract_strided_slice %673 {offsets = [0, 3], sizes = [16, 13], strides = [1, 1]} : vector<16x16xf32> to vector<16x13xf32>
    %830 = vector.extract_strided_slice %673 {offsets = [0, 0], sizes = [16, 3], strides = [1, 1]} : vector<16x16xf32> to vector<16x3xf32>
    %831 = tpu.concatenate %829, %830 in 1 : vector<16x13xf32>, vector<16x3xf32> -> vector<16x16xf32>
    %832 = tpu.iota {dimensions = array<i32: 1>} : vector<1x16xi32>
    %c3_i32_262 = arith.constant 3 : i32
    %833 = vector.broadcast %c3_i32_262 : i32 to vector<1x16xi32>
    %834 = arith.andi %832, %833 : vector<1x16xi32>
    %c2_i32_263 = arith.constant 2 : i32
    %835 = vector.broadcast %c2_i32_263 : i32 to vector<1x16xi32>
    %836 = arith.shrsi %832, %835 : vector<1x16xi32>
    %c1_i32_264 = arith.constant 1 : i32
    %837 = vector.broadcast %c1_i32_264 : i32 to vector<1x16xi32>
    %838 = arith.addi %836, %837 : vector<1x16xi32>
    %c0_i32_265 = arith.constant 0 : i32
    %839 = vector.broadcast %c0_i32_265 : i32 to vector<1x16xi32>
    %840 = arith.cmpi sge, %838, %839 : vector<1x16xi32>
    %c1_i32_266 = arith.constant 1 : i32
    %841 = vector.broadcast %c1_i32_266 : i32 to vector<1x16xi32>
    %842 = arith.addi %836, %841 : vector<1x16xi32>
    %c4_i32_267 = arith.constant 4 : i32
    %843 = vector.broadcast %c4_i32_267 : i32 to vector<1x16xi32>
    %844 = arith.cmpi slt, %842, %843 : vector<1x16xi32>
    %845 = arith.andi %840, %844 : vector<1x16xi1>
    %c-1_i32_268 = arith.constant -1 : i32
    %846 = vector.broadcast %c-1_i32_268 : i32 to vector<1x16xi32>
    %847 = arith.addi %834, %846 : vector<1x16xi32>
    %c0_i32_269 = arith.constant 0 : i32
    %848 = vector.broadcast %c0_i32_269 : i32 to vector<1x16xi32>
    %849 = arith.cmpi sge, %847, %848 : vector<1x16xi32>
    %850 = arith.andi %845, %849 : vector<1x16xi1>
    %c-1_i32_270 = arith.constant -1 : i32
    %851 = vector.broadcast %c-1_i32_270 : i32 to vector<1x16xi32>
    %852 = arith.addi %834, %851 : vector<1x16xi32>
    %c4_i32_271 = arith.constant 4 : i32
    %853 = vector.broadcast %c4_i32_271 : i32 to vector<1x16xi32>
    %854 = arith.cmpi slt, %852, %853 : vector<1x16xi32>
    %855 = arith.andi %850, %854 : vector<1x16xi1>
    %cst_272 = arith.constant 0.000000e+00 : f32
    %856 = vector.broadcast %cst_272 : f32 to vector<16x16xf32>
    %857 = vector.shape_cast %855 : vector<1x16xi1> to vector<1x16xi1>
    %858 = vector.broadcast %857 : vector<1x16xi1> to vector<16x16xi1>
    %859 = arith.select %858, %831, %856 : vector<16x16xi1>, vector<16x16xf32>
    %860 = vector.extract_strided_slice %673 {offsets = [0, 4], sizes = [16, 12], strides = [1, 1]} : vector<16x16xf32> to vector<16x12xf32>
    %861 = vector.extract_strided_slice %673 {offsets = [0, 0], sizes = [16, 4], strides = [1, 1]} : vector<16x16xf32> to vector<16x4xf32>
    %862 = tpu.concatenate %860, %861 in 1 : vector<16x12xf32>, vector<16x4xf32> -> vector<16x16xf32>
    %863 = tpu.iota {dimensions = array<i32: 1>} : vector<1x16xi32>
    %c3_i32_273 = arith.constant 3 : i32
    %864 = vector.broadcast %c3_i32_273 : i32 to vector<1x16xi32>
    %865 = arith.andi %863, %864 : vector<1x16xi32>
    %c2_i32_274 = arith.constant 2 : i32
    %866 = vector.broadcast %c2_i32_274 : i32 to vector<1x16xi32>
    %867 = arith.shrsi %863, %866 : vector<1x16xi32>
    %c1_i32_275 = arith.constant 1 : i32
    %868 = vector.broadcast %c1_i32_275 : i32 to vector<1x16xi32>
    %869 = arith.addi %867, %868 : vector<1x16xi32>
    %c0_i32_276 = arith.constant 0 : i32
    %870 = vector.broadcast %c0_i32_276 : i32 to vector<1x16xi32>
    %871 = arith.cmpi sge, %869, %870 : vector<1x16xi32>
    %c1_i32_277 = arith.constant 1 : i32
    %872 = vector.broadcast %c1_i32_277 : i32 to vector<1x16xi32>
    %873 = arith.addi %867, %872 : vector<1x16xi32>
    %c4_i32_278 = arith.constant 4 : i32
    %874 = vector.broadcast %c4_i32_278 : i32 to vector<1x16xi32>
    %875 = arith.cmpi slt, %873, %874 : vector<1x16xi32>
    %876 = arith.andi %871, %875 : vector<1x16xi1>
    %c0_i32_279 = arith.constant 0 : i32
    %877 = vector.broadcast %c0_i32_279 : i32 to vector<1x16xi32>
    %878 = arith.addi %865, %877 : vector<1x16xi32>
    %c0_i32_280 = arith.constant 0 : i32
    %879 = vector.broadcast %c0_i32_280 : i32 to vector<1x16xi32>
    %880 = arith.cmpi sge, %878, %879 : vector<1x16xi32>
    %881 = arith.andi %876, %880 : vector<1x16xi1>
    %c0_i32_281 = arith.constant 0 : i32
    %882 = vector.broadcast %c0_i32_281 : i32 to vector<1x16xi32>
    %883 = arith.addi %865, %882 : vector<1x16xi32>
    %c4_i32_282 = arith.constant 4 : i32
    %884 = vector.broadcast %c4_i32_282 : i32 to vector<1x16xi32>
    %885 = arith.cmpi slt, %883, %884 : vector<1x16xi32>
    %886 = arith.andi %881, %885 : vector<1x16xi1>
    %cst_283 = arith.constant 0.000000e+00 : f32
    %887 = vector.broadcast %cst_283 : f32 to vector<16x16xf32>
    %888 = vector.shape_cast %886 : vector<1x16xi1> to vector<1x16xi1>
    %889 = vector.broadcast %888 : vector<1x16xi1> to vector<16x16xi1>
    %890 = arith.select %889, %862, %887 : vector<16x16xi1>, vector<16x16xf32>
    %891 = vector.extract_strided_slice %673 {offsets = [0, 5], sizes = [16, 11], strides = [1, 1]} : vector<16x16xf32> to vector<16x11xf32>
    %892 = vector.extract_strided_slice %673 {offsets = [0, 0], sizes = [16, 5], strides = [1, 1]} : vector<16x16xf32> to vector<16x5xf32>
    %893 = tpu.concatenate %891, %892 in 1 : vector<16x11xf32>, vector<16x5xf32> -> vector<16x16xf32>
    %894 = tpu.iota {dimensions = array<i32: 1>} : vector<1x16xi32>
    %c3_i32_284 = arith.constant 3 : i32
    %895 = vector.broadcast %c3_i32_284 : i32 to vector<1x16xi32>
    %896 = arith.andi %894, %895 : vector<1x16xi32>
    %c2_i32_285 = arith.constant 2 : i32
    %897 = vector.broadcast %c2_i32_285 : i32 to vector<1x16xi32>
    %898 = arith.shrsi %894, %897 : vector<1x16xi32>
    %c1_i32_286 = arith.constant 1 : i32
    %899 = vector.broadcast %c1_i32_286 : i32 to vector<1x16xi32>
    %900 = arith.addi %898, %899 : vector<1x16xi32>
    %c0_i32_287 = arith.constant 0 : i32
    %901 = vector.broadcast %c0_i32_287 : i32 to vector<1x16xi32>
    %902 = arith.cmpi sge, %900, %901 : vector<1x16xi32>
    %c1_i32_288 = arith.constant 1 : i32
    %903 = vector.broadcast %c1_i32_288 : i32 to vector<1x16xi32>
    %904 = arith.addi %898, %903 : vector<1x16xi32>
    %c4_i32_289 = arith.constant 4 : i32
    %905 = vector.broadcast %c4_i32_289 : i32 to vector<1x16xi32>
    %906 = arith.cmpi slt, %904, %905 : vector<1x16xi32>
    %907 = arith.andi %902, %906 : vector<1x16xi1>
    %c1_i32_290 = arith.constant 1 : i32
    %908 = vector.broadcast %c1_i32_290 : i32 to vector<1x16xi32>
    %909 = arith.addi %896, %908 : vector<1x16xi32>
    %c0_i32_291 = arith.constant 0 : i32
    %910 = vector.broadcast %c0_i32_291 : i32 to vector<1x16xi32>
    %911 = arith.cmpi sge, %909, %910 : vector<1x16xi32>
    %912 = arith.andi %907, %911 : vector<1x16xi1>
    %c1_i32_292 = arith.constant 1 : i32
    %913 = vector.broadcast %c1_i32_292 : i32 to vector<1x16xi32>
    %914 = arith.addi %896, %913 : vector<1x16xi32>
    %c4_i32_293 = arith.constant 4 : i32
    %915 = vector.broadcast %c4_i32_293 : i32 to vector<1x16xi32>
    %916 = arith.cmpi slt, %914, %915 : vector<1x16xi32>
    %917 = arith.andi %912, %916 : vector<1x16xi1>
    %cst_294 = arith.constant 0.000000e+00 : f32
    %918 = vector.broadcast %cst_294 : f32 to vector<16x16xf32>
    %919 = vector.shape_cast %917 : vector<1x16xi1> to vector<1x16xi1>
    %920 = vector.broadcast %919 : vector<1x16xi1> to vector<16x16xi1>
    %921 = arith.select %920, %893, %918 : vector<16x16xi1>, vector<16x16xf32>
    %922 = tpu.iota {dimensions = array<i32: 0>} : vector<8x16xi32>
    %c0_i32_295 = arith.constant 0 : i32
    %923 = vector.broadcast %c0_i32_295 : i32 to vector<8x16xi32>
    %924 = arith.cmpi eq, %922, %923 : vector<8x16xi32>
    %925 = arith.extui %924 : vector<8x16xi1> to vector<8x16xi32>
    %926 = arith.sitofp %925 : vector<8x16xi32> to vector<8x16xf32>
    %927 = tpu.concatenate %704, %735, %766, %797, %673, %828, %859, %890, %921, %926 in 0 : vector<16x16xf32>, vector<16x16xf32>, vector<16x16xf32>, vector<16x16xf32>, vector<16x16xf32>, vector<16x16xf32>, vector<16x16xf32>, vector<16x16xf32>, vector<16x16xf32>, vector<8x16xf32> -> vector<152x16xf32>
    %c0_296 = arith.constant 0 : index
    %c0_297 = arith.constant 0 : index
    %928 = vector.load %arg10[%c0_296, %c0_297] : memref<32x152xbf16, #tpu.memory_space<vmem>>, vector<32x152xbf16>
    %929 = arith.truncf %927 : vector<152x16xf32> to vector<152x16xbf16>
    %cst_298 = arith.constant dense<0.000000e+00> : vector<32x16xf32>
    %930 = tpu.matmul %928, %929, %cst_298 {dimension_numbers = #tpu.dot_dimension_numbers<[1], [0], [0], [1], [0, 0, 1, 1], [], []>} : vector<32x152xbf16>, vector<152x16xbf16>, vector<32x16xf32> -> vector<32x16xf32>
    %cst_299 = arith.constant 0.000000e+00 : f32
    %931 = vector.broadcast %cst_299 : f32 to vector<32x16xf32>
    %932 = arith.maximumf %930, %931 : vector<32x16xf32>
    %933 = vector.extract_strided_slice %932 {offsets = [0, 11], sizes = [32, 5], strides = [1, 1]} : vector<32x16xf32> to vector<32x5xf32>
    %934 = vector.extract_strided_slice %932 {offsets = [0, 0], sizes = [32, 11], strides = [1, 1]} : vector<32x16xf32> to vector<32x11xf32>
    %935 = tpu.concatenate %933, %934 in 1 : vector<32x5xf32>, vector<32x11xf32> -> vector<32x16xf32>
    %cst_300 = arith.constant 0.000000e+00 : f32
    %936 = vector.broadcast %cst_300 : f32 to vector<32x16xf32>
    %937 = vector.shape_cast %700 : vector<1x16xi1> to vector<1x16xi1>
    %938 = vector.broadcast %937 : vector<1x16xi1> to vector<32x16xi1>
    %939 = arith.select %938, %935, %936 : vector<32x16xi1>, vector<32x16xf32>
    %940 = vector.extract_strided_slice %932 {offsets = [0, 12], sizes = [32, 4], strides = [1, 1]} : vector<32x16xf32> to vector<32x4xf32>
    %941 = vector.extract_strided_slice %932 {offsets = [0, 0], sizes = [32, 12], strides = [1, 1]} : vector<32x16xf32> to vector<32x12xf32>
    %942 = tpu.concatenate %940, %941 in 1 : vector<32x4xf32>, vector<32x12xf32> -> vector<32x16xf32>
    %cst_301 = arith.constant 0.000000e+00 : f32
    %943 = vector.broadcast %cst_301 : f32 to vector<32x16xf32>
    %944 = vector.shape_cast %731 : vector<1x16xi1> to vector<1x16xi1>
    %945 = vector.broadcast %944 : vector<1x16xi1> to vector<32x16xi1>
    %946 = arith.select %945, %942, %943 : vector<32x16xi1>, vector<32x16xf32>
    %947 = vector.extract_strided_slice %932 {offsets = [0, 13], sizes = [32, 3], strides = [1, 1]} : vector<32x16xf32> to vector<32x3xf32>
    %948 = vector.extract_strided_slice %932 {offsets = [0, 0], sizes = [32, 13], strides = [1, 1]} : vector<32x16xf32> to vector<32x13xf32>
    %949 = tpu.concatenate %947, %948 in 1 : vector<32x3xf32>, vector<32x13xf32> -> vector<32x16xf32>
    %cst_302 = arith.constant 0.000000e+00 : f32
    %950 = vector.broadcast %cst_302 : f32 to vector<32x16xf32>
    %951 = vector.shape_cast %762 : vector<1x16xi1> to vector<1x16xi1>
    %952 = vector.broadcast %951 : vector<1x16xi1> to vector<32x16xi1>
    %953 = arith.select %952, %949, %950 : vector<32x16xi1>, vector<32x16xf32>
    %954 = vector.extract_strided_slice %932 {offsets = [0, 15], sizes = [32, 1], strides = [1, 1]} : vector<32x16xf32> to vector<32x1xf32>
    %955 = vector.extract_strided_slice %932 {offsets = [0, 0], sizes = [32, 15], strides = [1, 1]} : vector<32x16xf32> to vector<32x15xf32>
    %956 = tpu.concatenate %954, %955 in 1 : vector<32x1xf32>, vector<32x15xf32> -> vector<32x16xf32>
    %cst_303 = arith.constant 0.000000e+00 : f32
    %957 = vector.broadcast %cst_303 : f32 to vector<32x16xf32>
    %958 = vector.shape_cast %793 : vector<1x16xi1> to vector<1x16xi1>
    %959 = vector.broadcast %958 : vector<1x16xi1> to vector<32x16xi1>
    %960 = arith.select %959, %956, %957 : vector<32x16xi1>, vector<32x16xf32>
    %961 = vector.extract_strided_slice %932 {offsets = [0, 1], sizes = [32, 15], strides = [1, 1]} : vector<32x16xf32> to vector<32x15xf32>
    %962 = vector.extract_strided_slice %932 {offsets = [0, 0], sizes = [32, 1], strides = [1, 1]} : vector<32x16xf32> to vector<32x1xf32>
    %963 = tpu.concatenate %961, %962 in 1 : vector<32x15xf32>, vector<32x1xf32> -> vector<32x16xf32>
    %cst_304 = arith.constant 0.000000e+00 : f32
    %964 = vector.broadcast %cst_304 : f32 to vector<32x16xf32>
    %965 = vector.shape_cast %824 : vector<1x16xi1> to vector<1x16xi1>
    %966 = vector.broadcast %965 : vector<1x16xi1> to vector<32x16xi1>
    %967 = arith.select %966, %963, %964 : vector<32x16xi1>, vector<32x16xf32>
    %968 = vector.extract_strided_slice %932 {offsets = [0, 3], sizes = [32, 13], strides = [1, 1]} : vector<32x16xf32> to vector<32x13xf32>
    %969 = vector.extract_strided_slice %932 {offsets = [0, 0], sizes = [32, 3], strides = [1, 1]} : vector<32x16xf32> to vector<32x3xf32>
    %970 = tpu.concatenate %968, %969 in 1 : vector<32x13xf32>, vector<32x3xf32> -> vector<32x16xf32>
    %cst_305 = arith.constant 0.000000e+00 : f32
    %971 = vector.broadcast %cst_305 : f32 to vector<32x16xf32>
    %972 = vector.shape_cast %855 : vector<1x16xi1> to vector<1x16xi1>
    %973 = vector.broadcast %972 : vector<1x16xi1> to vector<32x16xi1>
    %974 = arith.select %973, %970, %971 : vector<32x16xi1>, vector<32x16xf32>
    %975 = vector.extract_strided_slice %932 {offsets = [0, 4], sizes = [32, 12], strides = [1, 1]} : vector<32x16xf32> to vector<32x12xf32>
    %976 = vector.extract_strided_slice %932 {offsets = [0, 0], sizes = [32, 4], strides = [1, 1]} : vector<32x16xf32> to vector<32x4xf32>
    %977 = tpu.concatenate %975, %976 in 1 : vector<32x12xf32>, vector<32x4xf32> -> vector<32x16xf32>
    %cst_306 = arith.constant 0.000000e+00 : f32
    %978 = vector.broadcast %cst_306 : f32 to vector<32x16xf32>
    %979 = vector.shape_cast %886 : vector<1x16xi1> to vector<1x16xi1>
    %980 = vector.broadcast %979 : vector<1x16xi1> to vector<32x16xi1>
    %981 = arith.select %980, %977, %978 : vector<32x16xi1>, vector<32x16xf32>
    %982 = vector.extract_strided_slice %932 {offsets = [0, 5], sizes = [32, 11], strides = [1, 1]} : vector<32x16xf32> to vector<32x11xf32>
    %983 = vector.extract_strided_slice %932 {offsets = [0, 0], sizes = [32, 5], strides = [1, 1]} : vector<32x16xf32> to vector<32x5xf32>
    %984 = tpu.concatenate %982, %983 in 1 : vector<32x11xf32>, vector<32x5xf32> -> vector<32x16xf32>
    %cst_307 = arith.constant 0.000000e+00 : f32
    %985 = vector.broadcast %cst_307 : f32 to vector<32x16xf32>
    %986 = vector.shape_cast %917 : vector<1x16xi1> to vector<1x16xi1>
    %987 = vector.broadcast %986 : vector<1x16xi1> to vector<32x16xi1>
    %988 = arith.select %987, %984, %985 : vector<32x16xi1>, vector<32x16xf32>
    %989 = tpu.concatenate %939, %946, %953, %960, %932, %967, %974, %981, %988, %926 in 0 : vector<32x16xf32>, vector<32x16xf32>, vector<32x16xf32>, vector<32x16xf32>, vector<32x16xf32>, vector<32x16xf32>, vector<32x16xf32>, vector<32x16xf32>, vector<32x16xf32>, vector<8x16xf32> -> vector<296x16xf32>
    %c0_308 = arith.constant 0 : index
    %c0_309 = arith.constant 0 : index
    %990 = vector.load %arg11[%c0_308, %c0_309] : memref<32x296xbf16, #tpu.memory_space<vmem>>, vector<32x296xbf16>
    %991 = arith.truncf %989 : vector<296x16xf32> to vector<296x16xbf16>
    %cst_310 = arith.constant dense<0.000000e+00> : vector<32x16xf32>
    %992 = tpu.matmul %990, %991, %cst_310 {dimension_numbers = #tpu.dot_dimension_numbers<[1], [0], [0], [1], [0, 0, 1, 1], [], []>} : vector<32x296xbf16>, vector<296x16xbf16>, vector<32x16xf32> -> vector<32x16xf32>
    %cst_311 = arith.constant 0.000000e+00 : f32
    %993 = vector.broadcast %cst_311 : f32 to vector<32x16xf32>
    %994 = arith.maximumf %992, %993 : vector<32x16xf32>
    %995 = arith.truncf %994 : vector<32x16xf32> to vector<32x16xbf16>
    %c0_312 = arith.constant 0 : index
    %c0_313 = arith.constant 0 : index
    %996 = vector.load %arg4[%c0_312, %c0_313] : memref<16x64xbf16, #tpu.memory_space<vmem>>, vector<16x64xbf16>
    %cst_314 = arith.constant dense<0.000000e+00> : vector<32x64xf32>
    %997 = tpu.matmul %995, %996, %cst_314 {dimension_numbers = #tpu.dot_dimension_numbers<[1], [0], [0], [1], [0, 0, 1, 1], [], []>} : vector<32x16xbf16>, vector<16x64xbf16>, vector<32x64xf32> -> vector<32x64xf32>
    %998 = vector.extract_strided_slice %997 {offsets = [0, 55], sizes = [32, 9], strides = [1, 1]} : vector<32x64xf32> to vector<32x9xf32>
    %999 = vector.extract_strided_slice %997 {offsets = [0, 0], sizes = [32, 55], strides = [1, 1]} : vector<32x64xf32> to vector<32x55xf32>
    %1000 = tpu.concatenate %998, %999 in 1 : vector<32x9xf32>, vector<32x55xf32> -> vector<32x64xf32>
    %cst_315 = arith.constant 0.000000e+00 : f32
    %1001 = vector.broadcast %cst_315 : f32 to vector<32x64xf32>
    %1002 = vector.shape_cast %364 : vector<1x64xi1> to vector<1x64xi1>
    %1003 = vector.broadcast %1002 : vector<1x64xi1> to vector<32x64xi1>
    %1004 = arith.select %1003, %1000, %1001 : vector<32x64xi1>, vector<32x64xf32>
    %1005 = vector.extract_strided_slice %997 {offsets = [0, 56], sizes = [32, 8], strides = [1, 1]} : vector<32x64xf32> to vector<32x8xf32>
    %1006 = vector.extract_strided_slice %997 {offsets = [0, 0], sizes = [32, 56], strides = [1, 1]} : vector<32x64xf32> to vector<32x56xf32>
    %1007 = tpu.concatenate %1005, %1006 in 1 : vector<32x8xf32>, vector<32x56xf32> -> vector<32x64xf32>
    %cst_316 = arith.constant 0.000000e+00 : f32
    %1008 = vector.broadcast %cst_316 : f32 to vector<32x64xf32>
    %1009 = vector.shape_cast %395 : vector<1x64xi1> to vector<1x64xi1>
    %1010 = vector.broadcast %1009 : vector<1x64xi1> to vector<32x64xi1>
    %1011 = arith.select %1010, %1007, %1008 : vector<32x64xi1>, vector<32x64xf32>
    %1012 = vector.extract_strided_slice %997 {offsets = [0, 57], sizes = [32, 7], strides = [1, 1]} : vector<32x64xf32> to vector<32x7xf32>
    %1013 = vector.extract_strided_slice %997 {offsets = [0, 0], sizes = [32, 57], strides = [1, 1]} : vector<32x64xf32> to vector<32x57xf32>
    %1014 = tpu.concatenate %1012, %1013 in 1 : vector<32x7xf32>, vector<32x57xf32> -> vector<32x64xf32>
    %cst_317 = arith.constant 0.000000e+00 : f32
    %1015 = vector.broadcast %cst_317 : f32 to vector<32x64xf32>
    %1016 = vector.shape_cast %426 : vector<1x64xi1> to vector<1x64xi1>
    %1017 = vector.broadcast %1016 : vector<1x64xi1> to vector<32x64xi1>
    %1018 = arith.select %1017, %1014, %1015 : vector<32x64xi1>, vector<32x64xf32>
    %1019 = vector.extract_strided_slice %997 {offsets = [0, 63], sizes = [32, 1], strides = [1, 1]} : vector<32x64xf32> to vector<32x1xf32>
    %1020 = vector.extract_strided_slice %997 {offsets = [0, 0], sizes = [32, 63], strides = [1, 1]} : vector<32x64xf32> to vector<32x63xf32>
    %1021 = tpu.concatenate %1019, %1020 in 1 : vector<32x1xf32>, vector<32x63xf32> -> vector<32x64xf32>
    %cst_318 = arith.constant 0.000000e+00 : f32
    %1022 = vector.broadcast %cst_318 : f32 to vector<32x64xf32>
    %1023 = vector.shape_cast %457 : vector<1x64xi1> to vector<1x64xi1>
    %1024 = vector.broadcast %1023 : vector<1x64xi1> to vector<32x64xi1>
    %1025 = arith.select %1024, %1021, %1022 : vector<32x64xi1>, vector<32x64xf32>
    %1026 = vector.extract_strided_slice %997 {offsets = [0, 1], sizes = [32, 63], strides = [1, 1]} : vector<32x64xf32> to vector<32x63xf32>
    %1027 = vector.extract_strided_slice %997 {offsets = [0, 0], sizes = [32, 1], strides = [1, 1]} : vector<32x64xf32> to vector<32x1xf32>
    %1028 = tpu.concatenate %1026, %1027 in 1 : vector<32x63xf32>, vector<32x1xf32> -> vector<32x64xf32>
    %cst_319 = arith.constant 0.000000e+00 : f32
    %1029 = vector.broadcast %cst_319 : f32 to vector<32x64xf32>
    %1030 = vector.shape_cast %488 : vector<1x64xi1> to vector<1x64xi1>
    %1031 = vector.broadcast %1030 : vector<1x64xi1> to vector<32x64xi1>
    %1032 = arith.select %1031, %1028, %1029 : vector<32x64xi1>, vector<32x64xf32>
    %1033 = vector.extract_strided_slice %997 {offsets = [0, 7], sizes = [32, 57], strides = [1, 1]} : vector<32x64xf32> to vector<32x57xf32>
    %1034 = vector.extract_strided_slice %997 {offsets = [0, 0], sizes = [32, 7], strides = [1, 1]} : vector<32x64xf32> to vector<32x7xf32>
    %1035 = tpu.concatenate %1033, %1034 in 1 : vector<32x57xf32>, vector<32x7xf32> -> vector<32x64xf32>
    %cst_320 = arith.constant 0.000000e+00 : f32
    %1036 = vector.broadcast %cst_320 : f32 to vector<32x64xf32>
    %1037 = vector.shape_cast %519 : vector<1x64xi1> to vector<1x64xi1>
    %1038 = vector.broadcast %1037 : vector<1x64xi1> to vector<32x64xi1>
    %1039 = arith.select %1038, %1035, %1036 : vector<32x64xi1>, vector<32x64xf32>
    %1040 = vector.extract_strided_slice %997 {offsets = [0, 8], sizes = [32, 56], strides = [1, 1]} : vector<32x64xf32> to vector<32x56xf32>
    %1041 = vector.extract_strided_slice %997 {offsets = [0, 0], sizes = [32, 8], strides = [1, 1]} : vector<32x64xf32> to vector<32x8xf32>
    %1042 = tpu.concatenate %1040, %1041 in 1 : vector<32x56xf32>, vector<32x8xf32> -> vector<32x64xf32>
    %cst_321 = arith.constant 0.000000e+00 : f32
    %1043 = vector.broadcast %cst_321 : f32 to vector<32x64xf32>
    %1044 = vector.shape_cast %550 : vector<1x64xi1> to vector<1x64xi1>
    %1045 = vector.broadcast %1044 : vector<1x64xi1> to vector<32x64xi1>
    %1046 = arith.select %1045, %1042, %1043 : vector<32x64xi1>, vector<32x64xf32>
    %1047 = vector.extract_strided_slice %997 {offsets = [0, 9], sizes = [32, 55], strides = [1, 1]} : vector<32x64xf32> to vector<32x55xf32>
    %1048 = vector.extract_strided_slice %997 {offsets = [0, 0], sizes = [32, 9], strides = [1, 1]} : vector<32x64xf32> to vector<32x9xf32>
    %1049 = tpu.concatenate %1047, %1048 in 1 : vector<32x55xf32>, vector<32x9xf32> -> vector<32x64xf32>
    %cst_322 = arith.constant 0.000000e+00 : f32
    %1050 = vector.broadcast %cst_322 : f32 to vector<32x64xf32>
    %1051 = vector.shape_cast %581 : vector<1x64xi1> to vector<1x64xi1>
    %1052 = vector.broadcast %1051 : vector<1x64xi1> to vector<32x64xi1>
    %1053 = arith.select %1052, %1049, %1050 : vector<32x64xi1>, vector<32x64xf32>
    %1054 = tpu.concatenate %1004, %1011, %1018, %1025, %997, %1032, %1039, %1046, %1053, %590 in 0 : vector<32x64xf32>, vector<32x64xf32>, vector<32x64xf32>, vector<32x64xf32>, vector<32x64xf32>, vector<32x64xf32>, vector<32x64xf32>, vector<32x64xf32>, vector<32x64xf32>, vector<8x64xf32> -> vector<296x64xf32>
    %c0_323 = arith.constant 0 : index
    %c0_324 = arith.constant 0 : index
    %1055 = vector.load %arg12[%c0_323, %c0_324] : memref<16x296xbf16, #tpu.memory_space<vmem>>, vector<16x296xbf16>
    %1056 = arith.truncf %1054 : vector<296x64xf32> to vector<296x64xbf16>
    %cst_325 = arith.constant dense<0.000000e+00> : vector<16x64xf32>
    %1057 = tpu.matmul %1055, %1056, %cst_325 {dimension_numbers = #tpu.dot_dimension_numbers<[1], [0], [0], [1], [0, 0, 1, 1], [], []>} : vector<16x296xbf16>, vector<296x64xbf16>, vector<16x64xf32> -> vector<16x64xf32>
    %cst_326 = arith.constant 0.000000e+00 : f32
    %1058 = vector.broadcast %cst_326 : f32 to vector<16x64xf32>
    %1059 = arith.maximumf %1057, %1058 : vector<16x64xf32>
    %1060 = tpu.concatenate %658, %1059 in 0 : vector<16x64xf32>, vector<16x64xf32> -> vector<32x64xf32>
    %1061 = vector.extract_strided_slice %1060 {offsets = [0, 55], sizes = [32, 9], strides = [1, 1]} : vector<32x64xf32> to vector<32x9xf32>
    %1062 = vector.extract_strided_slice %1060 {offsets = [0, 0], sizes = [32, 55], strides = [1, 1]} : vector<32x64xf32> to vector<32x55xf32>
    %1063 = tpu.concatenate %1061, %1062 in 1 : vector<32x9xf32>, vector<32x55xf32> -> vector<32x64xf32>
    %cst_327 = arith.constant 0.000000e+00 : f32
    %1064 = vector.broadcast %cst_327 : f32 to vector<32x64xf32>
    %1065 = vector.shape_cast %364 : vector<1x64xi1> to vector<1x64xi1>
    %1066 = vector.broadcast %1065 : vector<1x64xi1> to vector<32x64xi1>
    %1067 = arith.select %1066, %1063, %1064 : vector<32x64xi1>, vector<32x64xf32>
    %1068 = vector.extract_strided_slice %1060 {offsets = [0, 56], sizes = [32, 8], strides = [1, 1]} : vector<32x64xf32> to vector<32x8xf32>
    %1069 = vector.extract_strided_slice %1060 {offsets = [0, 0], sizes = [32, 56], strides = [1, 1]} : vector<32x64xf32> to vector<32x56xf32>
    %1070 = tpu.concatenate %1068, %1069 in 1 : vector<32x8xf32>, vector<32x56xf32> -> vector<32x64xf32>
    %cst_328 = arith.constant 0.000000e+00 : f32
    %1071 = vector.broadcast %cst_328 : f32 to vector<32x64xf32>
    %1072 = vector.shape_cast %395 : vector<1x64xi1> to vector<1x64xi1>
    %1073 = vector.broadcast %1072 : vector<1x64xi1> to vector<32x64xi1>
    %1074 = arith.select %1073, %1070, %1071 : vector<32x64xi1>, vector<32x64xf32>
    %1075 = vector.extract_strided_slice %1060 {offsets = [0, 57], sizes = [32, 7], strides = [1, 1]} : vector<32x64xf32> to vector<32x7xf32>
    %1076 = vector.extract_strided_slice %1060 {offsets = [0, 0], sizes = [32, 57], strides = [1, 1]} : vector<32x64xf32> to vector<32x57xf32>
    %1077 = tpu.concatenate %1075, %1076 in 1 : vector<32x7xf32>, vector<32x57xf32> -> vector<32x64xf32>
    %cst_329 = arith.constant 0.000000e+00 : f32
    %1078 = vector.broadcast %cst_329 : f32 to vector<32x64xf32>
    %1079 = vector.shape_cast %426 : vector<1x64xi1> to vector<1x64xi1>
    %1080 = vector.broadcast %1079 : vector<1x64xi1> to vector<32x64xi1>
    %1081 = arith.select %1080, %1077, %1078 : vector<32x64xi1>, vector<32x64xf32>
    %1082 = vector.extract_strided_slice %1060 {offsets = [0, 63], sizes = [32, 1], strides = [1, 1]} : vector<32x64xf32> to vector<32x1xf32>
    %1083 = vector.extract_strided_slice %1060 {offsets = [0, 0], sizes = [32, 63], strides = [1, 1]} : vector<32x64xf32> to vector<32x63xf32>
    %1084 = tpu.concatenate %1082, %1083 in 1 : vector<32x1xf32>, vector<32x63xf32> -> vector<32x64xf32>
    %cst_330 = arith.constant 0.000000e+00 : f32
    %1085 = vector.broadcast %cst_330 : f32 to vector<32x64xf32>
    %1086 = vector.shape_cast %457 : vector<1x64xi1> to vector<1x64xi1>
    %1087 = vector.broadcast %1086 : vector<1x64xi1> to vector<32x64xi1>
    %1088 = arith.select %1087, %1084, %1085 : vector<32x64xi1>, vector<32x64xf32>
    %1089 = vector.extract_strided_slice %1060 {offsets = [0, 1], sizes = [32, 63], strides = [1, 1]} : vector<32x64xf32> to vector<32x63xf32>
    %1090 = vector.extract_strided_slice %1060 {offsets = [0, 0], sizes = [32, 1], strides = [1, 1]} : vector<32x64xf32> to vector<32x1xf32>
    %1091 = tpu.concatenate %1089, %1090 in 1 : vector<32x63xf32>, vector<32x1xf32> -> vector<32x64xf32>
    %cst_331 = arith.constant 0.000000e+00 : f32
    %1092 = vector.broadcast %cst_331 : f32 to vector<32x64xf32>
    %1093 = vector.shape_cast %488 : vector<1x64xi1> to vector<1x64xi1>
    %1094 = vector.broadcast %1093 : vector<1x64xi1> to vector<32x64xi1>
    %1095 = arith.select %1094, %1091, %1092 : vector<32x64xi1>, vector<32x64xf32>
    %1096 = vector.extract_strided_slice %1060 {offsets = [0, 7], sizes = [32, 57], strides = [1, 1]} : vector<32x64xf32> to vector<32x57xf32>
    %1097 = vector.extract_strided_slice %1060 {offsets = [0, 0], sizes = [32, 7], strides = [1, 1]} : vector<32x64xf32> to vector<32x7xf32>
    %1098 = tpu.concatenate %1096, %1097 in 1 : vector<32x57xf32>, vector<32x7xf32> -> vector<32x64xf32>
    %cst_332 = arith.constant 0.000000e+00 : f32
    %1099 = vector.broadcast %cst_332 : f32 to vector<32x64xf32>
    %1100 = vector.shape_cast %519 : vector<1x64xi1> to vector<1x64xi1>
    %1101 = vector.broadcast %1100 : vector<1x64xi1> to vector<32x64xi1>
    %1102 = arith.select %1101, %1098, %1099 : vector<32x64xi1>, vector<32x64xf32>
    %1103 = vector.extract_strided_slice %1060 {offsets = [0, 8], sizes = [32, 56], strides = [1, 1]} : vector<32x64xf32> to vector<32x56xf32>
    %1104 = vector.extract_strided_slice %1060 {offsets = [0, 0], sizes = [32, 8], strides = [1, 1]} : vector<32x64xf32> to vector<32x8xf32>
    %1105 = tpu.concatenate %1103, %1104 in 1 : vector<32x56xf32>, vector<32x8xf32> -> vector<32x64xf32>
    %cst_333 = arith.constant 0.000000e+00 : f32
    %1106 = vector.broadcast %cst_333 : f32 to vector<32x64xf32>
    %1107 = vector.shape_cast %550 : vector<1x64xi1> to vector<1x64xi1>
    %1108 = vector.broadcast %1107 : vector<1x64xi1> to vector<32x64xi1>
    %1109 = arith.select %1108, %1105, %1106 : vector<32x64xi1>, vector<32x64xf32>
    %1110 = vector.extract_strided_slice %1060 {offsets = [0, 9], sizes = [32, 55], strides = [1, 1]} : vector<32x64xf32> to vector<32x55xf32>
    %1111 = vector.extract_strided_slice %1060 {offsets = [0, 0], sizes = [32, 9], strides = [1, 1]} : vector<32x64xf32> to vector<32x9xf32>
    %1112 = tpu.concatenate %1110, %1111 in 1 : vector<32x55xf32>, vector<32x9xf32> -> vector<32x64xf32>
    %cst_334 = arith.constant 0.000000e+00 : f32
    %1113 = vector.broadcast %cst_334 : f32 to vector<32x64xf32>
    %1114 = vector.shape_cast %581 : vector<1x64xi1> to vector<1x64xi1>
    %1115 = vector.broadcast %1114 : vector<1x64xi1> to vector<32x64xi1>
    %1116 = arith.select %1115, %1112, %1113 : vector<32x64xi1>, vector<32x64xf32>
    %1117 = tpu.concatenate %1067, %1074, %1081, %1088, %1060, %1095, %1102, %1109, %1116, %590 in 0 : vector<32x64xf32>, vector<32x64xf32>, vector<32x64xf32>, vector<32x64xf32>, vector<32x64xf32>, vector<32x64xf32>, vector<32x64xf32>, vector<32x64xf32>, vector<32x64xf32>, vector<8x64xf32> -> vector<296x64xf32>
    %c0_335 = arith.constant 0 : index
    %c0_336 = arith.constant 0 : index
    %1118 = vector.load %arg13[%c0_335, %c0_336] : memref<16x296xbf16, #tpu.memory_space<vmem>>, vector<16x296xbf16>
    %1119 = arith.truncf %1117 : vector<296x64xf32> to vector<296x64xbf16>
    %cst_337 = arith.constant dense<0.000000e+00> : vector<16x64xf32>
    %1120 = tpu.matmul %1118, %1119, %cst_337 {dimension_numbers = #tpu.dot_dimension_numbers<[1], [0], [0], [1], [0, 0, 1, 1], [], []>} : vector<16x296xbf16>, vector<296x64xbf16>, vector<16x64xf32> -> vector<16x64xf32>
    %cst_338 = arith.constant 0.000000e+00 : f32
    %1121 = vector.broadcast %cst_338 : f32 to vector<16x64xf32>
    %1122 = arith.maximumf %1120, %1121 : vector<16x64xf32>
    %1123 = vector.extract_strided_slice %1122 {offsets = [0, 55], sizes = [16, 9], strides = [1, 1]} : vector<16x64xf32> to vector<16x9xf32>
    %1124 = vector.extract_strided_slice %1122 {offsets = [0, 0], sizes = [16, 55], strides = [1, 1]} : vector<16x64xf32> to vector<16x55xf32>
    %1125 = tpu.concatenate %1123, %1124 in 1 : vector<16x9xf32>, vector<16x55xf32> -> vector<16x64xf32>
    %cst_339 = arith.constant 0.000000e+00 : f32
    %1126 = vector.broadcast %cst_339 : f32 to vector<16x64xf32>
    %1127 = vector.shape_cast %364 : vector<1x64xi1> to vector<1x64xi1>
    %1128 = vector.broadcast %1127 : vector<1x64xi1> to vector<16x64xi1>
    %1129 = arith.select %1128, %1125, %1126 : vector<16x64xi1>, vector<16x64xf32>
    %1130 = vector.extract_strided_slice %1122 {offsets = [0, 56], sizes = [16, 8], strides = [1, 1]} : vector<16x64xf32> to vector<16x8xf32>
    %1131 = vector.extract_strided_slice %1122 {offsets = [0, 0], sizes = [16, 56], strides = [1, 1]} : vector<16x64xf32> to vector<16x56xf32>
    %1132 = tpu.concatenate %1130, %1131 in 1 : vector<16x8xf32>, vector<16x56xf32> -> vector<16x64xf32>
    %cst_340 = arith.constant 0.000000e+00 : f32
    %1133 = vector.broadcast %cst_340 : f32 to vector<16x64xf32>
    %1134 = vector.shape_cast %395 : vector<1x64xi1> to vector<1x64xi1>
    %1135 = vector.broadcast %1134 : vector<1x64xi1> to vector<16x64xi1>
    %1136 = arith.select %1135, %1132, %1133 : vector<16x64xi1>, vector<16x64xf32>
    %1137 = vector.extract_strided_slice %1122 {offsets = [0, 57], sizes = [16, 7], strides = [1, 1]} : vector<16x64xf32> to vector<16x7xf32>
    %1138 = vector.extract_strided_slice %1122 {offsets = [0, 0], sizes = [16, 57], strides = [1, 1]} : vector<16x64xf32> to vector<16x57xf32>
    %1139 = tpu.concatenate %1137, %1138 in 1 : vector<16x7xf32>, vector<16x57xf32> -> vector<16x64xf32>
    %cst_341 = arith.constant 0.000000e+00 : f32
    %1140 = vector.broadcast %cst_341 : f32 to vector<16x64xf32>
    %1141 = vector.shape_cast %426 : vector<1x64xi1> to vector<1x64xi1>
    %1142 = vector.broadcast %1141 : vector<1x64xi1> to vector<16x64xi1>
    %1143 = arith.select %1142, %1139, %1140 : vector<16x64xi1>, vector<16x64xf32>
    %1144 = vector.extract_strided_slice %1122 {offsets = [0, 63], sizes = [16, 1], strides = [1, 1]} : vector<16x64xf32> to vector<16x1xf32>
    %1145 = vector.extract_strided_slice %1122 {offsets = [0, 0], sizes = [16, 63], strides = [1, 1]} : vector<16x64xf32> to vector<16x63xf32>
    %1146 = tpu.concatenate %1144, %1145 in 1 : vector<16x1xf32>, vector<16x63xf32> -> vector<16x64xf32>
    %cst_342 = arith.constant 0.000000e+00 : f32
    %1147 = vector.broadcast %cst_342 : f32 to vector<16x64xf32>
    %1148 = vector.shape_cast %457 : vector<1x64xi1> to vector<1x64xi1>
    %1149 = vector.broadcast %1148 : vector<1x64xi1> to vector<16x64xi1>
    %1150 = arith.select %1149, %1146, %1147 : vector<16x64xi1>, vector<16x64xf32>
    %1151 = vector.extract_strided_slice %1122 {offsets = [0, 1], sizes = [16, 63], strides = [1, 1]} : vector<16x64xf32> to vector<16x63xf32>
    %1152 = vector.extract_strided_slice %1122 {offsets = [0, 0], sizes = [16, 1], strides = [1, 1]} : vector<16x64xf32> to vector<16x1xf32>
    %1153 = tpu.concatenate %1151, %1152 in 1 : vector<16x63xf32>, vector<16x1xf32> -> vector<16x64xf32>
    %cst_343 = arith.constant 0.000000e+00 : f32
    %1154 = vector.broadcast %cst_343 : f32 to vector<16x64xf32>
    %1155 = vector.shape_cast %488 : vector<1x64xi1> to vector<1x64xi1>
    %1156 = vector.broadcast %1155 : vector<1x64xi1> to vector<16x64xi1>
    %1157 = arith.select %1156, %1153, %1154 : vector<16x64xi1>, vector<16x64xf32>
    %1158 = vector.extract_strided_slice %1122 {offsets = [0, 7], sizes = [16, 57], strides = [1, 1]} : vector<16x64xf32> to vector<16x57xf32>
    %1159 = vector.extract_strided_slice %1122 {offsets = [0, 0], sizes = [16, 7], strides = [1, 1]} : vector<16x64xf32> to vector<16x7xf32>
    %1160 = tpu.concatenate %1158, %1159 in 1 : vector<16x57xf32>, vector<16x7xf32> -> vector<16x64xf32>
    %cst_344 = arith.constant 0.000000e+00 : f32
    %1161 = vector.broadcast %cst_344 : f32 to vector<16x64xf32>
    %1162 = vector.shape_cast %519 : vector<1x64xi1> to vector<1x64xi1>
    %1163 = vector.broadcast %1162 : vector<1x64xi1> to vector<16x64xi1>
    %1164 = arith.select %1163, %1160, %1161 : vector<16x64xi1>, vector<16x64xf32>
    %1165 = vector.extract_strided_slice %1122 {offsets = [0, 8], sizes = [16, 56], strides = [1, 1]} : vector<16x64xf32> to vector<16x56xf32>
    %1166 = vector.extract_strided_slice %1122 {offsets = [0, 0], sizes = [16, 8], strides = [1, 1]} : vector<16x64xf32> to vector<16x8xf32>
    %1167 = tpu.concatenate %1165, %1166 in 1 : vector<16x56xf32>, vector<16x8xf32> -> vector<16x64xf32>
    %cst_345 = arith.constant 0.000000e+00 : f32
    %1168 = vector.broadcast %cst_345 : f32 to vector<16x64xf32>
    %1169 = vector.shape_cast %550 : vector<1x64xi1> to vector<1x64xi1>
    %1170 = vector.broadcast %1169 : vector<1x64xi1> to vector<16x64xi1>
    %1171 = arith.select %1170, %1167, %1168 : vector<16x64xi1>, vector<16x64xf32>
    %1172 = vector.extract_strided_slice %1122 {offsets = [0, 9], sizes = [16, 55], strides = [1, 1]} : vector<16x64xf32> to vector<16x55xf32>
    %1173 = vector.extract_strided_slice %1122 {offsets = [0, 0], sizes = [16, 9], strides = [1, 1]} : vector<16x64xf32> to vector<16x9xf32>
    %1174 = tpu.concatenate %1172, %1173 in 1 : vector<16x55xf32>, vector<16x9xf32> -> vector<16x64xf32>
    %cst_346 = arith.constant 0.000000e+00 : f32
    %1175 = vector.broadcast %cst_346 : f32 to vector<16x64xf32>
    %1176 = vector.shape_cast %581 : vector<1x64xi1> to vector<1x64xi1>
    %1177 = vector.broadcast %1176 : vector<1x64xi1> to vector<16x64xi1>
    %1178 = arith.select %1177, %1174, %1175 : vector<16x64xi1>, vector<16x64xf32>
    %1179 = tpu.concatenate %1129, %1136, %1143, %1150, %1122, %1157, %1164, %1171, %1178, %590 in 0 : vector<16x64xf32>, vector<16x64xf32>, vector<16x64xf32>, vector<16x64xf32>, vector<16x64xf32>, vector<16x64xf32>, vector<16x64xf32>, vector<16x64xf32>, vector<16x64xf32>, vector<8x64xf32> -> vector<152x64xf32>
    %c0_347 = arith.constant 0 : index
    %c0_348 = arith.constant 0 : index
    %1180 = vector.load %arg14[%c0_347, %c0_348] : memref<16x152xbf16, #tpu.memory_space<vmem>>, vector<16x152xbf16>
    %1181 = arith.truncf %1179 : vector<152x64xf32> to vector<152x64xbf16>
    %cst_349 = arith.constant dense<0.000000e+00> : vector<16x64xf32>
    %1182 = tpu.matmul %1180, %1181, %cst_349 {dimension_numbers = #tpu.dot_dimension_numbers<[1], [0], [0], [1], [0, 0, 1, 1], [], []>} : vector<16x152xbf16>, vector<152x64xbf16>, vector<16x64xf32> -> vector<16x64xf32>
    %cst_350 = arith.constant 0.000000e+00 : f32
    %1183 = vector.broadcast %cst_350 : f32 to vector<16x64xf32>
    %1184 = arith.maximumf %1182, %1183 : vector<16x64xf32>
    %1185 = arith.truncf %1184 : vector<16x64xf32> to vector<16x64xbf16>
    %c0_351 = arith.constant 0 : index
    %c0_352 = arith.constant 0 : index
    %1186 = vector.load %arg5[%c0_351, %c0_352] : memref<64x256xbf16, #tpu.memory_space<vmem>>, vector<64x256xbf16>
    %cst_353 = arith.constant dense<0.000000e+00> : vector<16x256xf32>
    %1187 = tpu.matmul %1185, %1186, %cst_353 {dimension_numbers = #tpu.dot_dimension_numbers<[1], [0], [0], [1], [0, 0, 1, 1], [], []>} : vector<16x64xbf16>, vector<64x256xbf16>, vector<16x256xf32> -> vector<16x256xf32>
    %1188 = vector.extract_strided_slice %1187 {offsets = [0, 239], sizes = [16, 17], strides = [1, 1]} : vector<16x256xf32> to vector<16x17xf32>
    %1189 = vector.extract_strided_slice %1187 {offsets = [0, 0], sizes = [16, 239], strides = [1, 1]} : vector<16x256xf32> to vector<16x239xf32>
    %1190 = tpu.concatenate %1188, %1189 in 1 : vector<16x17xf32>, vector<16x239xf32> -> vector<16x256xf32>
    %cst_354 = arith.constant 0.000000e+00 : f32
    %1191 = vector.broadcast %cst_354 : f32 to vector<16x256xf32>
    %1192 = vector.shape_cast %28 : vector<1x256xi1> to vector<1x256xi1>
    %1193 = vector.broadcast %1192 : vector<1x256xi1> to vector<16x256xi1>
    %1194 = arith.select %1193, %1190, %1191 : vector<16x256xi1>, vector<16x256xf32>
    %1195 = vector.extract_strided_slice %1187 {offsets = [0, 240], sizes = [16, 16], strides = [1, 1]} : vector<16x256xf32> to vector<16x16xf32>
    %1196 = vector.extract_strided_slice %1187 {offsets = [0, 0], sizes = [16, 240], strides = [1, 1]} : vector<16x256xf32> to vector<16x240xf32>
    %1197 = tpu.concatenate %1195, %1196 in 1 : vector<16x16xf32>, vector<16x240xf32> -> vector<16x256xf32>
    %cst_355 = arith.constant 0.000000e+00 : f32
    %1198 = vector.broadcast %cst_355 : f32 to vector<16x256xf32>
    %1199 = vector.shape_cast %59 : vector<1x256xi1> to vector<1x256xi1>
    %1200 = vector.broadcast %1199 : vector<1x256xi1> to vector<16x256xi1>
    %1201 = arith.select %1200, %1197, %1198 : vector<16x256xi1>, vector<16x256xf32>
    %1202 = vector.extract_strided_slice %1187 {offsets = [0, 241], sizes = [16, 15], strides = [1, 1]} : vector<16x256xf32> to vector<16x15xf32>
    %1203 = vector.extract_strided_slice %1187 {offsets = [0, 0], sizes = [16, 241], strides = [1, 1]} : vector<16x256xf32> to vector<16x241xf32>
    %1204 = tpu.concatenate %1202, %1203 in 1 : vector<16x15xf32>, vector<16x241xf32> -> vector<16x256xf32>
    %cst_356 = arith.constant 0.000000e+00 : f32
    %1205 = vector.broadcast %cst_356 : f32 to vector<16x256xf32>
    %1206 = vector.shape_cast %90 : vector<1x256xi1> to vector<1x256xi1>
    %1207 = vector.broadcast %1206 : vector<1x256xi1> to vector<16x256xi1>
    %1208 = arith.select %1207, %1204, %1205 : vector<16x256xi1>, vector<16x256xf32>
    %1209 = vector.extract_strided_slice %1187 {offsets = [0, 255], sizes = [16, 1], strides = [1, 1]} : vector<16x256xf32> to vector<16x1xf32>
    %1210 = vector.extract_strided_slice %1187 {offsets = [0, 0], sizes = [16, 255], strides = [1, 1]} : vector<16x256xf32> to vector<16x255xf32>
    %1211 = tpu.concatenate %1209, %1210 in 1 : vector<16x1xf32>, vector<16x255xf32> -> vector<16x256xf32>
    %cst_357 = arith.constant 0.000000e+00 : f32
    %1212 = vector.broadcast %cst_357 : f32 to vector<16x256xf32>
    %1213 = vector.shape_cast %121 : vector<1x256xi1> to vector<1x256xi1>
    %1214 = vector.broadcast %1213 : vector<1x256xi1> to vector<16x256xi1>
    %1215 = arith.select %1214, %1211, %1212 : vector<16x256xi1>, vector<16x256xf32>
    %1216 = vector.extract_strided_slice %1187 {offsets = [0, 1], sizes = [16, 255], strides = [1, 1]} : vector<16x256xf32> to vector<16x255xf32>
    %1217 = vector.extract_strided_slice %1187 {offsets = [0, 0], sizes = [16, 1], strides = [1, 1]} : vector<16x256xf32> to vector<16x1xf32>
    %1218 = tpu.concatenate %1216, %1217 in 1 : vector<16x255xf32>, vector<16x1xf32> -> vector<16x256xf32>
    %cst_358 = arith.constant 0.000000e+00 : f32
    %1219 = vector.broadcast %cst_358 : f32 to vector<16x256xf32>
    %1220 = vector.shape_cast %152 : vector<1x256xi1> to vector<1x256xi1>
    %1221 = vector.broadcast %1220 : vector<1x256xi1> to vector<16x256xi1>
    %1222 = arith.select %1221, %1218, %1219 : vector<16x256xi1>, vector<16x256xf32>
    %1223 = vector.extract_strided_slice %1187 {offsets = [0, 15], sizes = [16, 241], strides = [1, 1]} : vector<16x256xf32> to vector<16x241xf32>
    %1224 = vector.extract_strided_slice %1187 {offsets = [0, 0], sizes = [16, 15], strides = [1, 1]} : vector<16x256xf32> to vector<16x15xf32>
    %1225 = tpu.concatenate %1223, %1224 in 1 : vector<16x241xf32>, vector<16x15xf32> -> vector<16x256xf32>
    %cst_359 = arith.constant 0.000000e+00 : f32
    %1226 = vector.broadcast %cst_359 : f32 to vector<16x256xf32>
    %1227 = vector.shape_cast %183 : vector<1x256xi1> to vector<1x256xi1>
    %1228 = vector.broadcast %1227 : vector<1x256xi1> to vector<16x256xi1>
    %1229 = arith.select %1228, %1225, %1226 : vector<16x256xi1>, vector<16x256xf32>
    %1230 = vector.extract_strided_slice %1187 {offsets = [0, 16], sizes = [16, 240], strides = [1, 1]} : vector<16x256xf32> to vector<16x240xf32>
    %1231 = vector.extract_strided_slice %1187 {offsets = [0, 0], sizes = [16, 16], strides = [1, 1]} : vector<16x256xf32> to vector<16x16xf32>
    %1232 = tpu.concatenate %1230, %1231 in 1 : vector<16x240xf32>, vector<16x16xf32> -> vector<16x256xf32>
    %cst_360 = arith.constant 0.000000e+00 : f32
    %1233 = vector.broadcast %cst_360 : f32 to vector<16x256xf32>
    %1234 = vector.shape_cast %214 : vector<1x256xi1> to vector<1x256xi1>
    %1235 = vector.broadcast %1234 : vector<1x256xi1> to vector<16x256xi1>
    %1236 = arith.select %1235, %1232, %1233 : vector<16x256xi1>, vector<16x256xf32>
    %1237 = vector.extract_strided_slice %1187 {offsets = [0, 17], sizes = [16, 239], strides = [1, 1]} : vector<16x256xf32> to vector<16x239xf32>
    %1238 = vector.extract_strided_slice %1187 {offsets = [0, 0], sizes = [16, 17], strides = [1, 1]} : vector<16x256xf32> to vector<16x17xf32>
    %1239 = tpu.concatenate %1237, %1238 in 1 : vector<16x239xf32>, vector<16x17xf32> -> vector<16x256xf32>
    %cst_361 = arith.constant 0.000000e+00 : f32
    %1240 = vector.broadcast %cst_361 : f32 to vector<16x256xf32>
    %1241 = vector.shape_cast %245 : vector<1x256xi1> to vector<1x256xi1>
    %1242 = vector.broadcast %1241 : vector<1x256xi1> to vector<16x256xi1>
    %1243 = arith.select %1242, %1239, %1240 : vector<16x256xi1>, vector<16x256xf32>
    %1244 = tpu.concatenate %1194, %1201, %1208, %1215, %1187, %1222, %1229, %1236, %1243, %254 in 0 : vector<16x256xf32>, vector<16x256xf32>, vector<16x256xf32>, vector<16x256xf32>, vector<16x256xf32>, vector<16x256xf32>, vector<16x256xf32>, vector<16x256xf32>, vector<16x256xf32>, vector<8x256xf32> -> vector<152x256xf32>
    %c0_362 = arith.constant 0 : index
    %c0_363 = arith.constant 0 : index
    %1245 = vector.load %arg15[%c0_362, %c0_363] : memref<8x152xbf16, #tpu.memory_space<vmem>>, vector<8x152xbf16>
    %1246 = arith.truncf %1244 : vector<152x256xf32> to vector<152x256xbf16>
    %cst_364 = arith.constant dense<0.000000e+00> : vector<8x256xf32>
    %1247 = tpu.matmul %1245, %1246, %cst_364 {dimension_numbers = #tpu.dot_dimension_numbers<[1], [0], [0], [1], [0, 0, 1, 1], [], []>} : vector<8x152xbf16>, vector<152x256xbf16>, vector<8x256xf32> -> vector<8x256xf32>
    %cst_365 = arith.constant 0.000000e+00 : f32
    %1248 = vector.broadcast %cst_365 : f32 to vector<8x256xf32>
    %1249 = arith.maximumf %1247, %1248 : vector<8x256xf32>
    %1250 = tpu.concatenate %322, %1249 in 0 : vector<8x256xf32>, vector<8x256xf32> -> vector<16x256xf32>
    %1251 = vector.extract_strided_slice %1250 {offsets = [0, 239], sizes = [16, 17], strides = [1, 1]} : vector<16x256xf32> to vector<16x17xf32>
    %1252 = vector.extract_strided_slice %1250 {offsets = [0, 0], sizes = [16, 239], strides = [1, 1]} : vector<16x256xf32> to vector<16x239xf32>
    %1253 = tpu.concatenate %1251, %1252 in 1 : vector<16x17xf32>, vector<16x239xf32> -> vector<16x256xf32>
    %cst_366 = arith.constant 0.000000e+00 : f32
    %1254 = vector.broadcast %cst_366 : f32 to vector<16x256xf32>
    %1255 = vector.shape_cast %28 : vector<1x256xi1> to vector<1x256xi1>
    %1256 = vector.broadcast %1255 : vector<1x256xi1> to vector<16x256xi1>
    %1257 = arith.select %1256, %1253, %1254 : vector<16x256xi1>, vector<16x256xf32>
    %1258 = vector.extract_strided_slice %1250 {offsets = [0, 240], sizes = [16, 16], strides = [1, 1]} : vector<16x256xf32> to vector<16x16xf32>
    %1259 = vector.extract_strided_slice %1250 {offsets = [0, 0], sizes = [16, 240], strides = [1, 1]} : vector<16x256xf32> to vector<16x240xf32>
    %1260 = tpu.concatenate %1258, %1259 in 1 : vector<16x16xf32>, vector<16x240xf32> -> vector<16x256xf32>
    %cst_367 = arith.constant 0.000000e+00 : f32
    %1261 = vector.broadcast %cst_367 : f32 to vector<16x256xf32>
    %1262 = vector.shape_cast %59 : vector<1x256xi1> to vector<1x256xi1>
    %1263 = vector.broadcast %1262 : vector<1x256xi1> to vector<16x256xi1>
    %1264 = arith.select %1263, %1260, %1261 : vector<16x256xi1>, vector<16x256xf32>
    %1265 = vector.extract_strided_slice %1250 {offsets = [0, 241], sizes = [16, 15], strides = [1, 1]} : vector<16x256xf32> to vector<16x15xf32>
    %1266 = vector.extract_strided_slice %1250 {offsets = [0, 0], sizes = [16, 241], strides = [1, 1]} : vector<16x256xf32> to vector<16x241xf32>
    %1267 = tpu.concatenate %1265, %1266 in 1 : vector<16x15xf32>, vector<16x241xf32> -> vector<16x256xf32>
    %cst_368 = arith.constant 0.000000e+00 : f32
    %1268 = vector.broadcast %cst_368 : f32 to vector<16x256xf32>
    %1269 = vector.shape_cast %90 : vector<1x256xi1> to vector<1x256xi1>
    %1270 = vector.broadcast %1269 : vector<1x256xi1> to vector<16x256xi1>
    %1271 = arith.select %1270, %1267, %1268 : vector<16x256xi1>, vector<16x256xf32>
    %1272 = vector.extract_strided_slice %1250 {offsets = [0, 255], sizes = [16, 1], strides = [1, 1]} : vector<16x256xf32> to vector<16x1xf32>
    %1273 = vector.extract_strided_slice %1250 {offsets = [0, 0], sizes = [16, 255], strides = [1, 1]} : vector<16x256xf32> to vector<16x255xf32>
    %1274 = tpu.concatenate %1272, %1273 in 1 : vector<16x1xf32>, vector<16x255xf32> -> vector<16x256xf32>
    %cst_369 = arith.constant 0.000000e+00 : f32
    %1275 = vector.broadcast %cst_369 : f32 to vector<16x256xf32>
    %1276 = vector.shape_cast %121 : vector<1x256xi1> to vector<1x256xi1>
    %1277 = vector.broadcast %1276 : vector<1x256xi1> to vector<16x256xi1>
    %1278 = arith.select %1277, %1274, %1275 : vector<16x256xi1>, vector<16x256xf32>
    %1279 = vector.extract_strided_slice %1250 {offsets = [0, 1], sizes = [16, 255], strides = [1, 1]} : vector<16x256xf32> to vector<16x255xf32>
    %1280 = vector.extract_strided_slice %1250 {offsets = [0, 0], sizes = [16, 1], strides = [1, 1]} : vector<16x256xf32> to vector<16x1xf32>
    %1281 = tpu.concatenate %1279, %1280 in 1 : vector<16x255xf32>, vector<16x1xf32> -> vector<16x256xf32>
    %cst_370 = arith.constant 0.000000e+00 : f32
    %1282 = vector.broadcast %cst_370 : f32 to vector<16x256xf32>
    %1283 = vector.shape_cast %152 : vector<1x256xi1> to vector<1x256xi1>
    %1284 = vector.broadcast %1283 : vector<1x256xi1> to vector<16x256xi1>
    %1285 = arith.select %1284, %1281, %1282 : vector<16x256xi1>, vector<16x256xf32>
    %1286 = vector.extract_strided_slice %1250 {offsets = [0, 15], sizes = [16, 241], strides = [1, 1]} : vector<16x256xf32> to vector<16x241xf32>
    %1287 = vector.extract_strided_slice %1250 {offsets = [0, 0], sizes = [16, 15], strides = [1, 1]} : vector<16x256xf32> to vector<16x15xf32>
    %1288 = tpu.concatenate %1286, %1287 in 1 : vector<16x241xf32>, vector<16x15xf32> -> vector<16x256xf32>
    %cst_371 = arith.constant 0.000000e+00 : f32
    %1289 = vector.broadcast %cst_371 : f32 to vector<16x256xf32>
    %1290 = vector.shape_cast %183 : vector<1x256xi1> to vector<1x256xi1>
    %1291 = vector.broadcast %1290 : vector<1x256xi1> to vector<16x256xi1>
    %1292 = arith.select %1291, %1288, %1289 : vector<16x256xi1>, vector<16x256xf32>
    %1293 = vector.extract_strided_slice %1250 {offsets = [0, 16], sizes = [16, 240], strides = [1, 1]} : vector<16x256xf32> to vector<16x240xf32>
    %1294 = vector.extract_strided_slice %1250 {offsets = [0, 0], sizes = [16, 16], strides = [1, 1]} : vector<16x256xf32> to vector<16x16xf32>
    %1295 = tpu.concatenate %1293, %1294 in 1 : vector<16x240xf32>, vector<16x16xf32> -> vector<16x256xf32>
    %cst_372 = arith.constant 0.000000e+00 : f32
    %1296 = vector.broadcast %cst_372 : f32 to vector<16x256xf32>
    %1297 = vector.shape_cast %214 : vector<1x256xi1> to vector<1x256xi1>
    %1298 = vector.broadcast %1297 : vector<1x256xi1> to vector<16x256xi1>
    %1299 = arith.select %1298, %1295, %1296 : vector<16x256xi1>, vector<16x256xf32>
    %1300 = vector.extract_strided_slice %1250 {offsets = [0, 17], sizes = [16, 239], strides = [1, 1]} : vector<16x256xf32> to vector<16x239xf32>
    %1301 = vector.extract_strided_slice %1250 {offsets = [0, 0], sizes = [16, 17], strides = [1, 1]} : vector<16x256xf32> to vector<16x17xf32>
    %1302 = tpu.concatenate %1300, %1301 in 1 : vector<16x239xf32>, vector<16x17xf32> -> vector<16x256xf32>
    %cst_373 = arith.constant 0.000000e+00 : f32
    %1303 = vector.broadcast %cst_373 : f32 to vector<16x256xf32>
    %1304 = vector.shape_cast %245 : vector<1x256xi1> to vector<1x256xi1>
    %1305 = vector.broadcast %1304 : vector<1x256xi1> to vector<16x256xi1>
    %1306 = arith.select %1305, %1302, %1303 : vector<16x256xi1>, vector<16x256xf32>
    %1307 = tpu.concatenate %1257, %1264, %1271, %1278, %1250, %1285, %1292, %1299, %1306, %254 in 0 : vector<16x256xf32>, vector<16x256xf32>, vector<16x256xf32>, vector<16x256xf32>, vector<16x256xf32>, vector<16x256xf32>, vector<16x256xf32>, vector<16x256xf32>, vector<16x256xf32>, vector<8x256xf32> -> vector<152x256xf32>
    %c0_374 = arith.constant 0 : index
    %c0_375 = arith.constant 0 : index
    %1308 = vector.load %arg16[%c0_374, %c0_375] : memref<8x152xbf16, #tpu.memory_space<vmem>>, vector<8x152xbf16>
    %1309 = arith.truncf %1307 : vector<152x256xf32> to vector<152x256xbf16>
    %cst_376 = arith.constant dense<0.000000e+00> : vector<8x256xf32>
    %1310 = tpu.matmul %1308, %1309, %cst_376 {dimension_numbers = #tpu.dot_dimension_numbers<[1], [0], [0], [1], [0, 0, 1, 1], [], []>} : vector<8x152xbf16>, vector<152x256xbf16>, vector<8x256xf32> -> vector<8x256xf32>
    %cst_377 = arith.constant 0.000000e+00 : f32
    %1311 = vector.broadcast %cst_377 : f32 to vector<8x256xf32>
    %1312 = arith.maximumf %1310, %1311 : vector<8x256xf32>
    %1313 = vector.extract_strided_slice %1312 {offsets = [0, 239], sizes = [8, 17], strides = [1, 1]} : vector<8x256xf32> to vector<8x17xf32>
    %1314 = vector.extract_strided_slice %1312 {offsets = [0, 0], sizes = [8, 239], strides = [1, 1]} : vector<8x256xf32> to vector<8x239xf32>
    %1315 = tpu.concatenate %1313, %1314 in 1 : vector<8x17xf32>, vector<8x239xf32> -> vector<8x256xf32>
    %cst_378 = arith.constant 0.000000e+00 : f32
    %1316 = vector.broadcast %cst_378 : f32 to vector<8x256xf32>
    %1317 = vector.shape_cast %28 : vector<1x256xi1> to vector<1x256xi1>
    %1318 = vector.broadcast %1317 : vector<1x256xi1> to vector<8x256xi1>
    %1319 = arith.select %1318, %1315, %1316 : vector<8x256xi1>, vector<8x256xf32>
    %1320 = vector.extract_strided_slice %1312 {offsets = [0, 240], sizes = [8, 16], strides = [1, 1]} : vector<8x256xf32> to vector<8x16xf32>
    %1321 = vector.extract_strided_slice %1312 {offsets = [0, 0], sizes = [8, 240], strides = [1, 1]} : vector<8x256xf32> to vector<8x240xf32>
    %1322 = tpu.concatenate %1320, %1321 in 1 : vector<8x16xf32>, vector<8x240xf32> -> vector<8x256xf32>
    %cst_379 = arith.constant 0.000000e+00 : f32
    %1323 = vector.broadcast %cst_379 : f32 to vector<8x256xf32>
    %1324 = vector.shape_cast %59 : vector<1x256xi1> to vector<1x256xi1>
    %1325 = vector.broadcast %1324 : vector<1x256xi1> to vector<8x256xi1>
    %1326 = arith.select %1325, %1322, %1323 : vector<8x256xi1>, vector<8x256xf32>
    %1327 = vector.extract_strided_slice %1312 {offsets = [0, 241], sizes = [8, 15], strides = [1, 1]} : vector<8x256xf32> to vector<8x15xf32>
    %1328 = vector.extract_strided_slice %1312 {offsets = [0, 0], sizes = [8, 241], strides = [1, 1]} : vector<8x256xf32> to vector<8x241xf32>
    %1329 = tpu.concatenate %1327, %1328 in 1 : vector<8x15xf32>, vector<8x241xf32> -> vector<8x256xf32>
    %cst_380 = arith.constant 0.000000e+00 : f32
    %1330 = vector.broadcast %cst_380 : f32 to vector<8x256xf32>
    %1331 = vector.shape_cast %90 : vector<1x256xi1> to vector<1x256xi1>
    %1332 = vector.broadcast %1331 : vector<1x256xi1> to vector<8x256xi1>
    %1333 = arith.select %1332, %1329, %1330 : vector<8x256xi1>, vector<8x256xf32>
    %1334 = vector.extract_strided_slice %1312 {offsets = [0, 255], sizes = [8, 1], strides = [1, 1]} : vector<8x256xf32> to vector<8x1xf32>
    %1335 = vector.extract_strided_slice %1312 {offsets = [0, 0], sizes = [8, 255], strides = [1, 1]} : vector<8x256xf32> to vector<8x255xf32>
    %1336 = tpu.concatenate %1334, %1335 in 1 : vector<8x1xf32>, vector<8x255xf32> -> vector<8x256xf32>
    %cst_381 = arith.constant 0.000000e+00 : f32
    %1337 = vector.broadcast %cst_381 : f32 to vector<8x256xf32>
    %1338 = vector.shape_cast %121 : vector<1x256xi1> to vector<1x256xi1>
    %1339 = vector.broadcast %1338 : vector<1x256xi1> to vector<8x256xi1>
    %1340 = arith.select %1339, %1336, %1337 : vector<8x256xi1>, vector<8x256xf32>
    %1341 = vector.extract_strided_slice %1312 {offsets = [0, 1], sizes = [8, 255], strides = [1, 1]} : vector<8x256xf32> to vector<8x255xf32>
    %1342 = vector.extract_strided_slice %1312 {offsets = [0, 0], sizes = [8, 1], strides = [1, 1]} : vector<8x256xf32> to vector<8x1xf32>
    %1343 = tpu.concatenate %1341, %1342 in 1 : vector<8x255xf32>, vector<8x1xf32> -> vector<8x256xf32>
    %cst_382 = arith.constant 0.000000e+00 : f32
    %1344 = vector.broadcast %cst_382 : f32 to vector<8x256xf32>
    %1345 = vector.shape_cast %152 : vector<1x256xi1> to vector<1x256xi1>
    %1346 = vector.broadcast %1345 : vector<1x256xi1> to vector<8x256xi1>
    %1347 = arith.select %1346, %1343, %1344 : vector<8x256xi1>, vector<8x256xf32>
    %1348 = vector.extract_strided_slice %1312 {offsets = [0, 15], sizes = [8, 241], strides = [1, 1]} : vector<8x256xf32> to vector<8x241xf32>
    %1349 = vector.extract_strided_slice %1312 {offsets = [0, 0], sizes = [8, 15], strides = [1, 1]} : vector<8x256xf32> to vector<8x15xf32>
    %1350 = tpu.concatenate %1348, %1349 in 1 : vector<8x241xf32>, vector<8x15xf32> -> vector<8x256xf32>
    %cst_383 = arith.constant 0.000000e+00 : f32
    %1351 = vector.broadcast %cst_383 : f32 to vector<8x256xf32>
    %1352 = vector.shape_cast %183 : vector<1x256xi1> to vector<1x256xi1>
    %1353 = vector.broadcast %1352 : vector<1x256xi1> to vector<8x256xi1>
    %1354 = arith.select %1353, %1350, %1351 : vector<8x256xi1>, vector<8x256xf32>
    %1355 = vector.extract_strided_slice %1312 {offsets = [0, 16], sizes = [8, 240], strides = [1, 1]} : vector<8x256xf32> to vector<8x240xf32>
    %1356 = vector.extract_strided_slice %1312 {offsets = [0, 0], sizes = [8, 16], strides = [1, 1]} : vector<8x256xf32> to vector<8x16xf32>
    %1357 = tpu.concatenate %1355, %1356 in 1 : vector<8x240xf32>, vector<8x16xf32> -> vector<8x256xf32>
    %cst_384 = arith.constant 0.000000e+00 : f32
    %1358 = vector.broadcast %cst_384 : f32 to vector<8x256xf32>
    %1359 = vector.shape_cast %214 : vector<1x256xi1> to vector<1x256xi1>
    %1360 = vector.broadcast %1359 : vector<1x256xi1> to vector<8x256xi1>
    %1361 = arith.select %1360, %1357, %1358 : vector<8x256xi1>, vector<8x256xf32>
    %1362 = vector.extract_strided_slice %1312 {offsets = [0, 17], sizes = [8, 239], strides = [1, 1]} : vector<8x256xf32> to vector<8x239xf32>
    %1363 = vector.extract_strided_slice %1312 {offsets = [0, 0], sizes = [8, 17], strides = [1, 1]} : vector<8x256xf32> to vector<8x17xf32>
    %1364 = tpu.concatenate %1362, %1363 in 1 : vector<8x239xf32>, vector<8x17xf32> -> vector<8x256xf32>
    %cst_385 = arith.constant 0.000000e+00 : f32
    %1365 = vector.broadcast %cst_385 : f32 to vector<8x256xf32>
    %1366 = vector.shape_cast %245 : vector<1x256xi1> to vector<1x256xi1>
    %1367 = vector.broadcast %1366 : vector<1x256xi1> to vector<8x256xi1>
    %1368 = arith.select %1367, %1364, %1365 : vector<8x256xi1>, vector<8x256xf32>
    %1369 = tpu.concatenate %1319, %1326, %1333, %1340, %1312, %1347, %1354, %1361, %1368, %254 in 0 : vector<8x256xf32>, vector<8x256xf32>, vector<8x256xf32>, vector<8x256xf32>, vector<8x256xf32>, vector<8x256xf32>, vector<8x256xf32>, vector<8x256xf32>, vector<8x256xf32>, vector<8x256xf32> -> vector<80x256xf32>
    %c0_386 = arith.constant 0 : index
    %c0_387 = arith.constant 0 : index
    %1370 = vector.load %arg17[%c0_386, %c0_387] : memref<8x80xbf16, #tpu.memory_space<vmem>>, vector<8x80xbf16>
    %1371 = arith.truncf %1369 : vector<80x256xf32> to vector<80x256xbf16>
    %cst_388 = arith.constant dense<0.000000e+00> : vector<8x256xf32>
    %1372 = tpu.matmul %1370, %1371, %cst_388 {dimension_numbers = #tpu.dot_dimension_numbers<[1], [0], [0], [1], [0, 0, 1, 1], [], []>} : vector<8x80xbf16>, vector<80x256xbf16>, vector<8x256xf32> -> vector<8x256xf32>
    %cst_389 = arith.constant 0.000000e+00 : f32
    %1373 = vector.broadcast %cst_389 : f32 to vector<8x256xf32>
    %1374 = arith.maximumf %1372, %1373 : vector<8x256xf32>
    %1375 = tpu.concatenate %1374, %254 in 0 : vector<8x256xf32>, vector<8x256xf32> -> vector<16x256xf32>
    %c0_390 = arith.constant 0 : index
    %c0_391 = arith.constant 0 : index
    %1376 = vector.load %arg18[%c0_390, %c0_391] : memref<1x16xbf16, #tpu.memory_space<vmem>>, vector<1x16xbf16>
    %1377 = arith.truncf %1375 : vector<16x256xf32> to vector<16x256xbf16>
    %cst_392 = arith.constant dense<0.000000e+00> : vector<1x256xf32>
    %1378 = tpu.matmul %1376, %1377, %cst_392 {dimension_numbers = #tpu.dot_dimension_numbers<[1], [0], [0], [1], [0, 0, 1, 1], [], []>} : vector<1x16xbf16>, vector<16x256xbf16>, vector<1x256xf32> -> vector<1x256xf32>
    %cst_393 = arith.constant 0.000000e+00 : f32
    %1379 = vector.broadcast %cst_393 : f32 to vector<1x256xf32>
    %1380 = arith.subf %1379, %1378 : vector<1x256xf32>
    %1381 = math.exp %1380 : vector<1x256xf32>
    %cst_394 = arith.constant 1.000000e+00 : f32
    %1382 = vector.broadcast %cst_394 : f32 to vector<1x256xf32>
    %1383 = arith.addf %1382, %1381 : vector<1x256xf32>
    %cst_395 = arith.constant 1.000000e+00 : f32
    %1384 = vector.broadcast %cst_395 : f32 to vector<1x256xf32>
    %1385 = arith.divf %1384, %1383 : vector<1x256xf32>
    %1386 = vector.shape_cast %1385 : vector<1x256xf32> to vector<1x1x256xf32>
    %c0_396 = arith.constant 0 : index
    %c0_397 = arith.constant 0 : index
    %c0_398 = arith.constant 0 : index
    %1387 = vector.load %arg19[%c0_396, %c0_397, %c0_398] : memref<1x1x256xf32, #tpu.memory_space<vmem>>, vector<1x1x256xf32>
    tpu.vector_store %arg19[%c0_396, %c0_397, %c0_398], %1386 {strides = array<i32>} : memref<1x1x256xf32, #tpu.memory_space<vmem>>, vector<1x1x256xf32>,
    return
  }
  func.func @transform_0(%arg0: i32) -> (i32, i32, i32) {
    %c0_i32 = arith.constant 0 : i32
    %c0_i32_0 = arith.constant 0 : i32
    %c0_i32_1 = arith.constant 0 : i32
    return %arg0, %c0_i32, %c0_i32_0 : i32, i32, i32
  }
  func.func @transform_1(%arg0: i32) -> (i32, i32) {
    %c0_i32 = arith.constant 0 : i32
    %c0_i32_0 = arith.constant 0 : i32
    %c0_i32_1 = arith.constant 0 : i32
    return %c0_i32, %c0_i32_0 : i32, i32
  }
  func.func @transform_2(%arg0: i32) -> (i32, i32) {
    %c0_i32 = arith.constant 0 : i32
    %c0_i32_0 = arith.constant 0 : i32
    %c0_i32_1 = arith.constant 0 : i32
    return %c0_i32, %c0_i32_0 : i32, i32
  }
  func.func @transform_3(%arg0: i32) -> (i32, i32) {
    %c0_i32 = arith.constant 0 : i32
    %c0_i32_0 = arith.constant 0 : i32
    %c0_i32_1 = arith.constant 0 : i32
    return %c0_i32, %c0_i32_0 : i32, i32
  }
  func.func @transform_4(%arg0: i32) -> (i32, i32) {
    %c0_i32 = arith.constant 0 : i32
    %c0_i32_0 = arith.constant 0 : i32
    %c0_i32_1 = arith.constant 0 : i32
    return %c0_i32, %c0_i32_0 : i32, i32
  }
  func.func @transform_5(%arg0: i32) -> (i32, i32) {
    %c0_i32 = arith.constant 0 : i32
    %c0_i32_0 = arith.constant 0 : i32
    %c0_i32_1 = arith.constant 0 : i32
    return %c0_i32, %c0_i32_0 : i32, i32
  }
  func.func @transform_6(%arg0: i32) -> (i32, i32) {
    %c0_i32 = arith.constant 0 : i32
    %c0_i32_0 = arith.constant 0 : i32
    %c0_i32_1 = arith.constant 0 : i32
    return %c0_i32, %c0_i32_0 : i32, i32
  }
  func.func @transform_7(%arg0: i32) -> (i32, i32) {
    %c0_i32 = arith.constant 0 : i32
    %c0_i32_0 = arith.constant 0 : i32
    %c0_i32_1 = arith.constant 0 : i32
    return %c0_i32, %c0_i32_0 : i32, i32
  }
  func.func @transform_8(%arg0: i32) -> (i32, i32) {
    %c0_i32 = arith.constant 0 : i32
    %c0_i32_0 = arith.constant 0 : i32
    %c0_i32_1 = arith.constant 0 : i32
    return %c0_i32, %c0_i32_0 : i32, i32
  }
  func.func @transform_9(%arg0: i32) -> (i32, i32) {
    %c0_i32 = arith.constant 0 : i32
    %c0_i32_0 = arith.constant 0 : i32
    %c0_i32_1 = arith.constant 0 : i32
    return %c0_i32, %c0_i32_0 : i32, i32
  }
  func.func @transform_10(%arg0: i32) -> (i32, i32) {
    %c0_i32 = arith.constant 0 : i32
    %c0_i32_0 = arith.constant 0 : i32
    %c0_i32_1 = arith.constant 0 : i32
    return %c0_i32, %c0_i32_0 : i32, i32
  }
  func.func @transform_11(%arg0: i32) -> (i32, i32) {
    %c0_i32 = arith.constant 0 : i32
    %c0_i32_0 = arith.constant 0 : i32
    %c0_i32_1 = arith.constant 0 : i32
    return %c0_i32, %c0_i32_0 : i32, i32
  }
  func.func @transform_12(%arg0: i32) -> (i32, i32) {
    %c0_i32 = arith.constant 0 : i32
    %c0_i32_0 = arith.constant 0 : i32
    %c0_i32_1 = arith.constant 0 : i32
    return %c0_i32, %c0_i32_0 : i32, i32
  }
  func.func @transform_13(%arg0: i32) -> (i32, i32) {
    %c0_i32 = arith.constant 0 : i32
    %c0_i32_0 = arith.constant 0 : i32
    %c0_i32_1 = arith.constant 0 : i32
    return %c0_i32, %c0_i32_0 : i32, i32
  }
  func.func @transform_14(%arg0: i32) -> (i32, i32) {
    %c0_i32 = arith.constant 0 : i32
    %c0_i32_0 = arith.constant 0 : i32
    %c0_i32_1 = arith.constant 0 : i32
    return %c0_i32, %c0_i32_0 : i32, i32
  }
  func.func @transform_15(%arg0: i32) -> (i32, i32) {
    %c0_i32 = arith.constant 0 : i32
    %c0_i32_0 = arith.constant 0 : i32
    %c0_i32_1 = arith.constant 0 : i32
    return %c0_i32, %c0_i32_0 : i32, i32
  }
  func.func @transform_16(%arg0: i32) -> (i32, i32) {
    %c0_i32 = arith.constant 0 : i32
    %c0_i32_0 = arith.constant 0 : i32
    %c0_i32_1 = arith.constant 0 : i32
    return %c0_i32, %c0_i32_0 : i32, i32
  }
  func.func @transform_17(%arg0: i32) -> (i32, i32) {
    %c0_i32 = arith.constant 0 : i32
    %c0_i32_0 = arith.constant 0 : i32
    %c0_i32_1 = arith.constant 0 : i32
    return %c0_i32, %c0_i32_0 : i32, i32
  }
  func.func @transform_18(%arg0: i32) -> (i32, i32, i32) {
    %c0_i32 = arith.constant 0 : i32
    %c0_i32_0 = arith.constant 0 : i32
    %c0_i32_1 = arith.constant 0 : i32
    return %arg0, %c0_i32, %c0_i32_0 : i32, i32, i32
  }
}

</mosaic_0001>

<bundles_post_ra>
// kernel: unet1_forward.1
= control target key start
LH: loop header
LB: loop body
LE: loop exit
PB: predicated region body
PF: predicated region fallthrough
CT: control target
= control target key end

     0   :  { %s6210_s27 = smov 0   ;;  %s8133_s0 = inlined_call_operand.vmem [shape: f32[2,8,256], index: 0, kind: input, shape index: {}]   ;;  %s8134_s1 = inlined_call_operand.vmem [shape: bf16[256,64], index: 1, kind: input, shape index: {}]   ;;  %s8135_s2 = inlined_call_operand.vmem [shape: bf16[64,16], index: 2, kind: input, shape index: {}]   ;;  %s8136_s3 = inlined_call_operand.vmem [shape: bf16[16,64], index: 3, kind: input, shape index: {}]   ;;  %s8137_s4 = inlined_call_operand.vmem [shape: bf16[64,256], index: 4, kind: input, shape index: {}]   ;;  %s8138_s5 = inlined_call_operand.vmem [shape: bf16[8,80], index: 5, kind: input, shape index: {}]   ;;  %s8139_s6 = inlined_call_operand.vmem [shape: bf16[8,80], index: 6, kind: input, shape index: {}]   ;;  %s8140_s7 = inlined_call_operand.vmem [shape: bf16[16,80], index: 7, kind: input, shape index: {}]   ;;  %s8141_s8 = inlined_call_operand.vmem [shape: bf16[16,152], index: 8, kind: input, shape index: {}]   ;;  %s8142_s9 = inlined_call_operand.vmem [shape: bf16[32,152], index: 9, kind: input, shape index: {}]   ;;  %s8143_s10 = inlined_call_operand.vmem [shape: bf16[32,296], index: 10, kind: input, shape index: {}]   ;;  %s8144_s11 = inlined_call_operand.vmem [shape: bf16[16,296], index: 11, kind: input, shape index: {}]   ;;  %s8145_s12 = inlined_call_operand.vmem [shape: bf16[16,296], index: 12, kind: input, shape index: {}]   ;;  %s8146_s13 = inlined_call_operand.vmem [shape: bf16[16,152], index: 13, kind: input, shape index: {}]   ;;  %s8147_s14 = inlined_call_operand.vmem [shape: bf16[8,152], index: 14, kind: input, shape index: {}]   ;;  %s8148_s15 = inlined_call_operand.vmem [shape: bf16[8,152], index: 15, kind: input, shape index: {}]   ;;  %s8149_s16 = inlined_call_operand.vmem [shape: bf16[8,80], index: 16, kind: input, shape index: {}]   ;;  %s8150_s17 = inlined_call_operand.vmem [shape: bf16[1,16], index: 17, kind: input, shape index: {}]   ;;  %s8151_s18 = inlined_call_operand.vmem [shape: f32[2,1,256], index: 18, kind: output, shape index: {}]  }
   0x1   :  { %8385 = sst [smem:[#allocation38_spill]] %s8133_s0 }
   0x2   :  { %8386 = sst [smem:[#allocation39_spill]] %s8134_s1 }
   0x3   :  { %8387 = sst [smem:[#allocation40_spill]] %s8135_s2 }
   0x4   :  { %8388 = sst [smem:[#allocation41_spill]] %s8137_s4 }
   0x5   :  { %8389 = sst [smem:[#allocation42_spill]] %s8138_s5 }
   0x6   :  { %8390 = sst [smem:[#allocation43_spill]] %s8139_s6 }
   0x7   :  { %8391 = sst [smem:[#allocation44_spill]] %s8140_s7 }
   0x8   :  { %8392 = sst [smem:[#allocation45_spill]] %s8141_s8 }
   0x9   :  { %8393 = sst [smem:[#allocation46_spill]] %s8142_s9 }
   0xa   :  { %8394 = sst [smem:[#allocation47_spill]] %s8147_s14 }
   0xb   :  { %8395 = sst [smem:[#allocation48_spill]] %s8148_s15 }
   0xc   :  { %8396 = sst [smem:[#allocation49_spill]] %s8149_s16 }
   0xd   :  { %8397 = sst [smem:[#allocation50_spill]] %s8150_s17 }
   0xe   :  { %8398 = sst [smem:[#allocation51_spill]] %s8151_s18 }
   0xf LB: > { %8399 = sst [smem:[#allocation2_spill]] %s6073_s27  ;;  %s4251_s28 = sadd.s32 4294967295, %s6073_s27   ;;  %s6073_s27 = sphi %s6210_s27, %s28_s27  }
  0x10   : > { %p4255_p0 = scmp.ge.s32.totalorder %s6073_s27, 1  ;;  %p512_p1 = scmp.lt.s32.totalorder %s6073_s27, 3 }
  0x12   : > { %p513_p2 = pnand %p4255_p0, %p512_p1 }
  0x14   : > { %516 = sbr.rel (%p513_p2) target bundleno = 5930 (0x172a), region = 92 }
  0x1b   : > { %p565_p3 = scmp.lt.s32.totalorder %s4251_s28, 1  ;;  %s8401_s19 = sld [smem:[#allocation38_spill]]  ;;  %v8267_v4 = vmov 0   ;;  %v8256_v5 = vlaneseq  ;;  %v8402_v16 = vmov 0  ;;  %v8405_v17 = vmov 0 }
  0x1c   : > { %s8201_s20 = smov 15   ;;  %s8199_s21 = smov 17   ;;  %836 = vmatprep.mubr.bf16.mxu0 %v8267_v4  ;;  %983 = vmatprep.mubr.bf16.mxu1 %v8267_v4  ;;  %v8408_v19 = vmov 0  ;;  %v8410_v20 = vmov 0  ;;  %v8412_v22 = vmov 0  ;;  %v8415_v25 = vmov 0 }
  0x1d   : > { %s8967_s28 = smov (!%p565_p3, %s4251_s28), 1  ;;  %s8205_s22 = smov 1   ;;  %v6243_v6 = vand.u32 127, %v8256_v5  ;;  %v8420_v27 = vmov 0  ;;  %v8423_v33 = vmov 0  ;;  %v8426_v34 = vmov 0 }
  0x1e   : > { %8400 = sst [smem:[#allocation3_spill]] %s8967_s28  ;;  %s4760_s29 = sshll.u32 %s8967_s28, 4  ;;  %v8430_v37 = vmov 0  ;;  %v8434_v43 = vmov 0  ;;  %v8437_v46 = vmov 0  ;;  %v8444_v51 = vmov 0 }
  0x1f   : > { %s8197_s2 = smov 16   ;;  %s8215_s23 = smov 127   ;;  %v591_v7 = vadd.s32 128, %v6243_v6  ;;  %v594_v9 = vshra.s32 %v6243_v6, 4  ;;  %v592_v12 = vand.u32 15, %v6243_v6  ;;  %v8449_v57 = vmov 0 }
  0x20   : > { %s8203_s24 = smov 113   ;;  %s8209_s25 = smov 112   ;;  %v8453_v63 = vmov 0  ;;  %v8469_v26 = vmov 0 }
  0x21   : > { %s569_s1 = scalar_lea.vmem %s8401_s19, %s4760_s29  ;;  %s8207_s26 = smov 111   ;;  %v595_v8 = vshra.s32 %v591_v7, 4  ;;  %v593_v10 = vand.u32 15, %v591_v7  ;;  %v596_v13 = vadd.s32 4294967295, %v594_v9  ;;  %v6250_v15 = vadd.s32 4294967295, %v592_v12 }
  0x22   : > { %v6224_v0 = vld [vmem:[%s569_s1] sm:$0xff]  ;;  %v6226_v1 = vld [vmem:[%s569_s1 + $0x8] sm:$0xff]  ;;  %v6280_v21 = vadd.s32 1, %v592_v12  ;;  %vm680_vm14 = vcmp.ge.s32.totalorder %v594_v9, 0  ;;  %vm682_vm15 = vcmp.lt.s32.totalorder %v594_v9, 16  ;;  %v726_v38 = vadd.s32 1, %v594_v9 }
  0x23   : > { %v5003_v2 = vpack.i.bf16 %v6224_v0, %v6226_v1  ;;  %v5013_v3 = vpack.i.bf16 %v6226_v1, %v6224_v0  ;;  %v597_v11 = vadd.s32 4294967295, %v595_v8  ;;  %v6248_v14 = vadd.s32 4294967295, %v593_v10  ;;  %s8508_s5 = sld [smem:[#allocation42_spill]]  ;;  %s8525_s6 = sld [smem:[#allocation43_spill]] }
  0x24   : > { %vm598_vm2 = vcmp.ge.s32.totalorder %v596_v13, 0  ;;  %vm600_vm3 = vcmp.lt.s32.totalorder %v596_v13, 16  ;;  %vm8154_vm7 = vcmp.ge.s32.totalorder %v6250_v15, 0  ;;  %v6262_v18 = vadd.s32 1, %v593_v10  ;;  %s8527_s30 = sld [smem:[#allocation39_spill]]  ;;  %s8254_s0 = smov 72  }
  0x25   : > { %5004 = vrot.lane.b32.xlu1 %v5003_v2, %s8201_s20  ;;  %4994 = vrot.lane.b32.xlu0 %v5003_v2, %s8199_s21  ;;  %vm599_vm0 = vcmp.ge.s32.totalorder %v597_v11, 0  ;;  %vm601_vm1 = vcmp.lt.s32.totalorder %v597_v11, 16  ;;  %vm8155_vm5 = vcmp.ge.s32.totalorder %v6248_v14, 0  ;;  %vm6257_vm6 = vmand %vm598_vm2, %vm600_vm3  ;;  %vm681_vm10 = vcmp.ge.s32.totalorder %v595_v8, 0  ;;  %s8219_s19 = smov 7   ;;  %s8213_s1 = smov 65  }
  0x26   : > { %vm6252_vm4 = vmand %vm599_vm0, %vm601_vm1  ;;  %v8406_v17 = vsel %vm6257_vm6, 4294967295, %v8405_v17  ;;  %vm683_vm11 = vcmp.lt.s32.totalorder %v595_v8, 16  ;;  %vm8158_vm12 = vcmp.lt.s32.totalorder %v6262_v18, 16  ;;  %v727_v28 = vadd.s32 1, %v595_v8  ;;  %s8217_s29 = smov 63   ;;  %s8568_s7 = sld [smem:[#allocation44_spill]] }
  0x27   : > { %v8403_v16 = vsel %vm6252_vm4, 4294967295, %v8402_v16  ;;  %8407 = vst [vmem:[#allocation5_spill] sm:$0xff] %v8406_v17  ;;  %vm6268_vm8 = vmand %vm6252_vm4, %vm8155_vm5  ;;  %vm8169_vm5 = vcmask 138240   ;;  %v8462_v8 = vmov 0  ;;  %v6399_v9 = vshrl.u32 %v8256_v5, 7  ;;  %s8580_s8 = sld [smem:[#allocation45_spill]] }
  0x28   : > { %8404 = vst [vmem:[#allocation4_spill] sm:$0xff] %v8403_v16  ;;  %v8409_v19 = vsel %vm6268_vm8, 4294967295, %v8408_v19  ;;  %vm6276_vm9 = vmand %vm6257_vm6, %vm8154_vm7  ;;  %vm731_vm3 = vcmp.lt.s32.totalorder %v727_v28, 16  ;;  %s8612_s27 = sld [smem:[#allocation40_spill]]  ;;  %s8286_s17 = smov 115  }
  0x29   : > { %5009 = vrot.lane.b32.xlu1 %v5003_v2, %s8205_s22  ;;  %4999 = vrot.lane.b32.xlu0 %v5003_v2, %s8197_s2  ;;  %v8411_v20 = vsel %vm6276_vm9, 4294967295, %v8410_v20  ;;  %vm6287_vm13 = vmpackc.low %vm6252_vm4, %vm6268_vm8  ;;  %8465 = vst [vmem:[#allocation18_spill] sm:$0xff] %v6399_v9  ;;  %s8618_s28 = smov 113   ;;  %s8620_s9 = sld [smem:[#allocation46_spill]] }
  0x2a   : > { %v8413_v22 = vsel %vm6287_vm13, 4294967295, %v8412_v22  ;;  %vm6295_vm0 = vmpackc.low %vm6257_vm6, %vm6276_vm9  ;;  %s8656_s16 = smov 5   ;;  %s8663_s15 = smov 124  }
  0x2b   : > { %8414 = vst [vmem:[#allocation6_spill] sm:$0xff] %v8413_v22  ;;  %v8416_v25 = vsel %vm6295_vm0, 4294967295, %v8415_v25  ;;  %vm6299_vm1 = vmand %vm681_vm10, %vm683_vm11  ;;  %vm8165_vm10 = vcmask 121856   ;;  %s8664_s14 = smov 11   ;;  %s8701_s4 = smov 72  }
  0x2c   : > { %8417 = vst [vmem:[#allocation7_spill] sm:$0xff] %v8416_v25  ;;  %vm6307_vm2 = vmand %vm6252_vm4, %vm8158_vm12  ;;  %vm8425_vm12 = vcmp.ge.s32.totalorder %v6248_v14, 0 }
  0x2d   : > { %5014 = vrot.lane.b32.xlu0 %v5013_v3, %s8215_s23  ;;  %5019 = vrot.lane.b32.xlu1 %v5013_v3, %s8203_s24  ;;  %v8421_v27 = vsel %vm6307_vm2, 4294967295, %v8420_v27  ;;  %vm6312_vm7 = vmand %vm680_vm14, %vm682_vm15  ;;  %vm8429_vm14 = vcmp.lt.s32.totalorder %v6280_v21, 16 }
  0x2e   : > { %8422 = vst [vmem:[#allocation8_spill] sm:$0xff] %v8421_v27  ;;  %v8424_v33 = vsel %vm6312_vm7, 4294967295, %v8423_v33  ;;  %vm6320_vm4 = vmand %vm6299_vm1, %vm8425_vm12  ;;  %vm8433_vm12 = vcmp.ge.s32.totalorder %v6250_v15, 0  ;;  %s8613_s18 = smov %s8612_s27 }
  0x2f   : > { %v8427_v34 = vsel %vm6320_vm4, 4294967295, %v8426_v34  ;;  %vm6328_vm15 = vmand %vm6257_vm6, %vm8429_vm14  ;;  %vm8440_vm6 = vcmask 7168  }
  0x30   : > { %8428 = vst [vmem:[#allocation9_spill] sm:$0xff] %v8427_v34  ;;  %v8431_v37 = vsel %vm6328_vm15, 4294967295, %v8430_v37  ;;  %vm6336_vm11 = vmand %vm6312_vm7, %vm8433_vm12  ;;  %vm8441_vm12 = vcmask 130048  }
  0x31   : > { %5024 = vrot.lane.b32.xlu0 %v5013_v3, %s8209_s25  ;;  %5029 = vrot.lane.b32.xlu1 %v5013_v3, %s8207_s26  ;;  %8432 = vst [vmem:[#allocation10_spill] sm:$0xff] %v8431_v37  ;;  %v8435_v43 = vsel %vm6336_vm11, 4294967295, %v8434_v43  ;;  %vm6346_vm14 = vmpackc.low %vm6320_vm4, %vm6307_vm2  ;;  %vm8447_vm4 = vcmask 121856   ;;  %v8456_v3 = vmov 0  ;;  %vm8491_vm2 = vcmp.lt.s32.totalorder %v6262_v18, 16 }
  0x32   : > { %8436 = vst [vmem:[#allocation11_spill] sm:$0xff] %v8435_v43  ;;  %v8438_v46 = vsel %vm6346_vm14, 4294967295, %v8437_v46  ;;  %vm8442_vm8 = vmmov %vm8441_vm12 }
  0x33   : > { %8439 = vst [vmem:[#allocation12_spill] sm:$0xff] %v8438_v46  ;;  %vm8448_vm9 = vmmov %vm8440_vm6 }
  0x97   : > { %v5005_v23 = vpop.permute.xlu1 %5004  ;;  %v4995_v24 = vpop.permute.xlu0 %4994 }
  0x98   : > { %v5007_v29 = vunpack.i.h.bf16 %v5005_v23  ;;  %v5006_v30 = vunpack.i.l.bf16 %v5005_v23  ;;  %v4997_v31 = vunpack.i.h.bf16 %v4995_v24  ;;  %v4996_v32 = vunpack.i.l.bf16 %v4995_v24 }
  0x9a   : > { %v650_v44 = vsel %vm8165_vm10, %v5007_v29, %v5006_v30  ;;  %v585_v45 = vsel %vm8169_vm5, %v4997_v31, %v4996_v32  ;;  %v588_v49 = vsel %vm8169_vm5, %v4996_v32, %v4997_v31  ;;  %vm8443_vm10 = vcmp.lt.s32.totalorder %v6262_v18, 16 }
  0x9b   : > { %v5010_v35 = vpop.permute.xlu1 %5009  ;;  %v5000_v36 = vpop.permute.xlu0 %4999  ;;  %vm6358_vm7 = vmand %vm6299_vm1, %vm8443_vm10  ;;  %v653_v52 = vsel %vm8447_vm4, %v5006_v30, %v5007_v29  ;;  %vm8452_vm4 = vcmp.ge.s32.totalorder %v727_v28, 0  ;;  %vm8460_vm5 = vcmp.lt.s32.totalorder %v6280_v21, 16  ;;  %vm8467_vm10 = vcmask 924672  }
  0x9c   : > { %v5012_v39 = vunpack.i.h.bf16 %v5010_v35  ;;  %v5011_v40 = vunpack.i.l.bf16 %v5010_v35  ;;  %v5002_v41 = vunpack.i.h.bf16 %v5000_v36  ;;  %v5001_v42 = vunpack.i.l.bf16 %v5000_v36 }
  0x9d   : > { %v8445_v51 = vsel %vm6358_vm7, 4294967295, %v8444_v51  ;;  %v8473_v32 = vmov 0  ;;  %v8481_v35 = vmov 0 }
  0x9e   : > { %v676_v47 = vsel %vm8440_vm6, %v5012_v39, %v5011_v40  ;;  %v626_v48 = vsel %vm8441_vm12, %v5002_v41, %v5001_v42  ;;  %v629_v50 = vsel %vm8442_vm8, %v5001_v42, %v5002_v41  ;;  %8446 = vst [vmem:[#allocation13_spill] sm:$0xff] %v8445_v51  ;;  %v679_v53 = vsel %vm8448_vm9, %v5011_v40, %v5012_v39  ;;  %vm6368_vm6 = vmpackc.low %vm6336_vm11, %vm6328_vm15 }
  0x9f   : > { %v4261_v54 = vpack.c.bf16 %v626_v48, %v585_v45  ;;  %v4264_v55 = vpack.c.bf16 %v629_v50, %v588_v49  ;;  %v5015_v56 = vpop.permute.xlu0 %5014  ;;  %v8450_v57 = vsel %vm6368_vm6, 4294967295, %v8449_v57  ;;  %v5020_v58 = vpop.permute.xlu1 %5019  ;;  %vm6374_vm8 = vmand %vm8452_vm4, %vm731_vm3  ;;  %v4267_v2 = vpack.c.bf16 %v676_v47, %v650_v44  ;;  %v789_v50 = vld [vmem:[%s8508_s5] sm:$0xf]  ;;  %s8579_s5 = smov 119  }
  0xa0   : > { %8451 = vst [vmem:[#allocation14_spill] sm:$0xff] %v8450_v57  ;;  %v5017_v59 = vunpack.i.h.bf16 %v5015_v56  ;;  %v5016_v60 = vunpack.i.l.bf16 %v5015_v56  ;;  %v5022_v61 = vunpack.i.h.bf16 %v5020_v58  ;;  %v5021_v62 = vunpack.i.l.bf16 %v5020_v58 }
  0xa1   : > { %v8454_v63 = vsel %vm6374_vm8, 4294967295, %v8453_v63  ;;  %4262 = vmatprep.subr.msk.bf16.mxu0 %vm6287_vm13, %v4261_v54  ;;  %vm8174_vm9 = vmmov 1   ;;  %vm730_vm12 = vcmp.lt.s32.totalorder %v726_v38, 16  ;;  %vm8459_vm3 = vcmask 1039360  }
  0xa2   : > { %8455 = vst [vmem:[#allocation15_spill] sm:$0xff] %v8454_v63  ;;  %vm6383_vm1 = vmpackc.low %vm6358_vm7, %vm8174_vm9  ;;  %4265 = vmatpush1.bf16.msk.msra.mxu0 %vm6295_vm0, %v4264_v55  ;;  %v705_v7 = vsel %vm8459_vm3, %v5017_v59, %v5016_v60  ;;  %vm8461_vm11 = vnez %v8424_v33  ;;  %v4270_v11 = vpack.c.bf16 %v679_v53, %v653_v52  ;;  %v725_v12 = vsel %vm8467_vm10, %v5022_v61, %v5021_v62 }
  0xa3   : > { %v8457_v3 = vsel %vm6383_vm1, 4294967295, %v8456_v3  ;;  %vm6394_vm15 = vmand %vm8461_vm11, %vm8460_vm5  ;;  %4268 = vmatprep.subr.msk.bf16.mxu0 %vm6346_vm14, %v4267_v2  ;;  %v5025_v13 = vpop.permute.xlu0 %5024  ;;  %v4273_v23 = vpack.c.bf16 %v705_v7, %v6226_v1  ;;  %v5030_v24 = vpop.permute.xlu1 %5029  ;;  %vm8468_vm5 = vcmp.ge.s32.totalorder %v6248_v14, 0  ;;  %vm8476_vm10 = vmmov 1  }
  0xa4   : > { %8458 = vst [vmem:[#allocation16_spill] sm:$0xff] %v8457_v3  ;;  %v8463_v8 = vsel %vm6394_vm15, 4294967295, %v8462_v8  ;;  %vm8466_vm9 = vmmov %vm8459_vm3  ;;  %v5027_v28 = vunpack.i.h.bf16 %v5025_v13  ;;  %v5026_v29 = vunpack.i.l.bf16 %v5025_v13  ;;  %v5032_v30 = vunpack.i.h.bf16 %v5030_v24 }
  0xa5   : > { %8464 = vst [vmem:[#allocation17_spill] sm:$0xff] %v8463_v8  ;;  %v701_v10 = vsel %vm8466_vm9, %v5016_v60, %v5017_v59  ;;  %vm6410_vm11 = vmand %vm6374_vm8, %vm8468_vm5  ;;  %v5031_v31 = vunpack.i.l.bf16 %v5030_v24  ;;  %vm8472_vm9 = vcmp.ge.s32.totalorder %v726_v38, 0  ;;  %v8477_v1 = vmov 0 }
  0xa6   : > { %v8470_v26 = vsel %vm6410_vm11, 4294967295, %v8469_v26  ;;  %vm6416_vm3 = vmand %vm8472_vm9, %vm730_vm12  ;;  %4271 = vmatpush1.bf16.msk.msra.mxu0 %vm6368_vm6, %v4270_v11  ;;  %vm8480_vm7 = vcmask 916480   ;;  %v4276_v33 = vpack.c.bf16 %v701_v10, %v6224_v0  ;;  %vm8484_vm9 = vcmask 924672  }
  0xa7   : > { %8471 = vst [vmem:[#allocation19_spill] sm:$0xff] %v8470_v26  ;;  %v8474_v32 = vsel %vm6416_vm3, 4294967295, %v8473_v32  ;;  %vm6423_vm4 = vmpackc.low %vm6394_vm15, %vm8476_vm10  ;;  %v753_v14 = vsel %vm8480_vm7, %v5027_v28, %v5026_v29  ;;  %v721_v36 = vsel %vm8484_vm9, %v5021_v62, %v5022_v61  ;;  %4274 = vmatprep.subr.msk.bf16.mxu0 %vm6383_vm1, %v4273_v23  ;;  %v8487_v0 = vmov 0 }
  0xa8   : > { %8475 = vst [vmem:[#allocation20_spill] sm:$0xff] %v8474_v32  ;;  %v8478_v1 = vsel %vm6423_vm4, 4294967295, %v8477_v1  ;;  %vm6435_vm12 = vmpackc.low %vm6374_vm8, %vm6410_vm11  ;;  %v4279_v39 = vpack.c.bf16 %v753_v14, %v725_v12  ;;  %vm8490_vm11 = vcmask 908288   ;;  %v8492_v41 = vmov 0 }
  0xa9   : > { %8479 = vst [vmem:[#allocation21_spill] sm:$0xff] %v8478_v1  ;;  %v8482_v35 = vsel %vm6435_vm12, 4294967295, %v8481_v35  ;;  %vm8485_vm15 = vmmov %vm8480_vm7  ;;  %vm8486_vm7 = vcmp.ge.s32.totalorder %v6250_v15, 0  ;;  %v773_v40 = vsel %vm8490_vm11, %v5032_v30, %v5031_v31  ;;  %v8495_v15 = vmov 0 }
  0xaa   : > { %8483 = vst [vmem:[#allocation22_spill] sm:$0xff] %v8482_v35  ;;  %v749_v38 = vsel %vm8485_vm15, %v5026_v29, %v5027_v28  ;;  %vm6447_vm5 = vmand %vm6416_vm3, %vm8486_vm7  ;;  %vm8188_vm15 = vcmp.eq.s32.totalorder %v6399_v9, 0  ;;  %4277 = vmatpush1.bf16.msk.msra.mxu0 %vm6423_vm4, %v4276_v33  ;;  %v769_v42 = vsel %vm8490_vm11, %v5031_v31, %v5032_v30  ;;  %v8498_v44 = vmov 0 }
  0xab   : > { %v8488_v0 = vsel %vm6447_vm5, 4294967295, %v8487_v0  ;;  %vm6456_vm9 = vmand %vm6374_vm8, %vm8491_vm2  ;;  %v4282_v18 = vpack.c.bf16 %v749_v38, %v721_v36  ;;  %4280 = vmatprep.subr.msk.bf16.mxu0 %vm6435_vm12, %v4279_v39  ;;  %v8263_v45 = vmov 1.0   ;;  %vm8501_vm8 = vcmp.lt.s32.totalorder %v6280_v21, 16 }
  0xac   : > { %8489 = vst [vmem:[#allocation23_spill] sm:$0xff] %v8488_v0  ;;  %v8493_v41 = vsel %vm6456_vm9, 4294967295, %v8492_v41  ;;  %vm6467_vm7 = vmpackc.low %vm6416_vm3, %vm6447_vm5  ;;  %v4285_v47 = vpack.c.bf16 %v8263_v45, %v773_v40  ;;  %v8502_v48 = vmov 0  ;;  %v4288_v49 = vpack.c.bf16 %v8263_v45, %v769_v42 }
  0xad   : > { %8494 = vst [vmem:[#allocation24_spill] sm:$0xff] %v8493_v41  ;;  %v8496_v15 = vsel %vm6467_vm7, 4294967295, %v8495_v15  ;;  %vm6478_vm2 = vmpackc.low %vm8188_vm15, %vm6456_vm9  ;;  %v8505_v21 = vmov 0 }
  0xae   : > { %8497 = vst [vmem:[#allocation25_spill] sm:$0xff] %v8496_v15  ;;  %v8499_v44 = vsel %vm6478_vm2, 4294967295, %v8498_v44  ;;  %vm6487_vm5 = vmand %vm6416_vm3, %vm8501_vm8  ;;  %4283 = vmatpush1.bf16.msk.msra.mxu0 %vm6467_vm7, %v4282_v18  ;;  %vm8189_vm8 = vcmask 654336   ;;  %vm8513_vm3 = vcmask 7168  }
  0xaf   : > { %8500 = vst [vmem:[#allocation26_spill] sm:$0xff] %v8499_v44  ;;  %v8503_v48 = vsel %vm6487_vm5, 4294967295, %v8502_v48  ;;  %4286 = vmatprep.subr.msk.bf16.mxu0 %vm6478_vm2, %v4285_v47  ;;  %vm6500_vm11 = vmpackc.low %vm8188_vm15, %vm6487_vm5  ;;  %vm8509_vm15 = vcmask 138240  }
  0xb0   : > { %8504 = vst [vmem:[#allocation27_spill] sm:$0xff] %v8503_v48  ;;  %v8506_v21 = vsel %vm6500_vm11, 4294967295, %v8505_v21  ;;  %vm8511_vm5 = vmmov %vm8509_vm15 }
  0xb1   : > { %8507 = vst [vmem:[#allocation28_spill] sm:$0xff] %v8506_v21 }
  0xb2   : > { %4289 = vmatpush1.bf16.msk.msra.mxu0 %vm6500_vm11, %v4288_v49 }
  0xb5   : > { %4290 = vmatmul.mubr.msk.bf16.vlgmr.msra.gmra.mrb[0].mxu0 %vm8189_vm8, %v789_v50  ;;  %vm8510_vm8 = vcmask 130048  }
  0xb6   : > { %vm8512_vm9 = vmmov %vm8510_vm8 }
 0x188   : > { %v838_v52 = vpop.f32.mrb[0].mxu0 }
 0x189   : > { %v6510_v53 = vmax.f32 %v838_v52, 0.0  ;;  %v840_v54 = vpop.f32.mrb[1].mxu0 }
 0x18a   : > { %v846_v55 = vmax.f32 %v840_v54, 0.0  ;;  %v842_v56 = vpop.f32.mrb[2].mxu0 }
 0x18b   : > { %v843_v58 = vpop.f32.mrb[3].mxu0 }
 0x18c   : > { %v5038_v59 = vpack.i.bf16 %v6510_v53, %v846_v55  ;;  %v5058_v60 = vpack.i.bf16 %v846_v55, %v6510_v53 }
 0x18e   : > { %5039 = vrot.lane.b32.xlu1 %v5038_v59, %s8197_s2  ;;  %5034 = vrot.lane.b32.xlu0 %v5038_v59, %s8199_s21  ;;  %s8531_s21 = smov 111   ;;  %s8248_s2 = smov 73  }
 0x192   : > { %5049 = vrot.lane.b32.xlu1 %v5038_v59, %s8205_s22  ;;  %5044 = vrot.lane.b32.xlu0 %v5038_v59, %s8201_s20  ;;  %s8250_s20 = smov 9   ;;  %s8211_s22 = smov 71  }
 0x196   : > { %5059 = vrot.lane.b32.xlu1 %v5058_v60, %s8203_s24  ;;  %5054 = vrot.lane.b32.xlu0 %v5058_v60, %s8215_s23  ;;  %s8252_s24 = smov 8  }
 0x19a   : > { %5069 = vrot.lane.b32.xlu1 %v5058_v60, %s8207_s26  ;;  %5064 = vrot.lane.b32.xlu0 %v5058_v60, %s8209_s25  ;;  %s8543_s26 = smov 1  }
 0x200   : > { %v5040_v61 = vpop.permute.xlu1 %5039  ;;  %v5035_v62 = vpop.permute.xlu0 %5034 }
 0x201   : > { %v5042_v2 = vunpack.i.h.bf16 %v5040_v61  ;;  %v5041_v7 = vunpack.i.l.bf16 %v5040_v61  ;;  %v5037_v10 = vunpack.i.h.bf16 %v5035_v62  ;;  %v5036_v11 = vunpack.i.l.bf16 %v5035_v62 }
 0x203   : > { %v854_v12 = vsel %vm8509_vm15, %v5037_v10, %v5036_v11  ;;  %v865_v13 = vsel %vm8510_vm8, %v5042_v2, %v5041_v7  ;;  %v857_v23 = vsel %vm8511_vm5, %v5036_v11, %v5037_v10  ;;  %v868_v24 = vsel %vm8512_vm9, %v5041_v7, %v5042_v2  ;;  %vm8514_vm15 = vmmov %vm8513_vm3 }
 0x204   : > { %v5050_v28 = vpop.permute.xlu1 %5049  ;;  %v5045_v29 = vpop.permute.xlu0 %5044  ;;  %v4292_v30 = vpack.c.bf16 %v865_v13, %v854_v12  ;;  %v4295_v31 = vpack.c.bf16 %v868_v24, %v857_v23  ;;  %vm8515_vm8 = vcmask 121856  }
 0x205   : > { %v5052_v14 = vunpack.i.h.bf16 %v5050_v28  ;;  %v5051_v33 = vunpack.i.l.bf16 %v5050_v28  ;;  %v5047_v36 = vunpack.i.h.bf16 %v5045_v29  ;;  %v5046_v38 = vunpack.i.l.bf16 %v5045_v29  ;;  %vm8516_vm5 = vmmov %vm8515_vm8 }
 0x206   : > { %4293 = vmatprep.subr.msk.bf16.mxu1 %vm6287_vm13, %v4292_v30 }
 0x207   : > { %v887_v39 = vsel %vm8513_vm3, %v5052_v14, %v5051_v33  ;;  %v890_v40 = vsel %vm8514_vm15, %v5051_v33, %v5052_v14  ;;  %v876_v18 = vsel %vm8515_vm8, %v5047_v36, %v5046_v38  ;;  %v879_v42 = vsel %vm8516_vm5, %v5046_v38, %v5047_v36  ;;  %4296 = vmatpush1.bf16.msk.msra.mxu1 %vm6295_vm0, %v4295_v31  ;;  %v937_v38 = vld [vmem:[%s8525_s6] sm:$0xf]  ;;  %s8276_s6 = smov 117  }
 0x208   : > { %v5060_v47 = vpop.permute.xlu1 %5059  ;;  %v5055_v49 = vpop.permute.xlu0 %5054  ;;  %v4298_v50 = vpack.c.bf16 %v887_v39, %v876_v18  ;;  %v4301_v52 = vpack.c.bf16 %v890_v40, %v879_v42  ;;  %vm8517_vm3 = vcmask 1039360   ;;  %vm8519_vm15 = vcmask 924672   ;;  %v5993_v40 = vld [vmem:[%s8527_s30 + $0x40] sm:$0xff]   ;;  %v5995_v42 = vld [vmem:[%s8527_s30 + $0x48] sm:$0xff]  }
 0x209   : > { %v5057_v54 = vunpack.i.h.bf16 %v5055_v49  ;;  %v5056_v56 = vunpack.i.l.bf16 %v5055_v49  ;;  %v5062_v58 = vunpack.i.h.bf16 %v5060_v47  ;;  %v5061_v59 = vunpack.i.l.bf16 %v5060_v47  ;;  %vm8518_vm9 = vmmov %vm8517_vm3  ;;  %v5994_v18 = vld [vmem:[%s8527_s30] sm:$0xff]   ;;  %4761 = vmatprep.subr.bf16.mxu0 %v5993_v40  ;;  %v5996_v47 = vld [vmem:[%s8527_s30 + $0x8] sm:$0xff]  }
 0x20a   : > { %4299 = vmatprep.subr.msk.bf16.mxu1 %vm6346_vm14, %v4298_v50  ;;  %vm8520_vm8 = vmmov %vm8519_vm15  ;;  %vm8521_vm5 = vcmask 908288   ;;  %v8265_v39 = vmov 0.0   ;;  %4762 = vmatpush3.bf16.msra.mxu0 %v5994_v18  ;;  %v5997_v49 = vld [vmem:[%s8527_s30 + $0x50] sm:$0xff]  }
 0x20b   : > { %v897_v60 = vsel %vm8517_vm3, %v5056_v56, %v5057_v54  ;;  %v901_v61 = vsel %vm8518_vm9, %v5057_v54, %v5056_v56  ;;  %4302 = vmatpush1.bf16.msk.msra.mxu1 %vm6368_vm6, %v4301_v52  ;;  %v908_v24 = vsel %vm8519_vm15, %v5061_v59, %v5062_v58  ;;  %v912_v28 = vsel %vm8520_vm8, %v5062_v58, %v5061_v59  ;;  %vm8524_vm6 = vmmov %vm8521_vm5  ;;  %v5998_v50 = vld [vmem:[%s8527_s30 + $0x10] sm:$0xff]   ;;  %v5999_v52 = vld [vmem:[%s8527_s30 + $0x58] sm:$0xff]  }
 0x20c   : > { %v5070_v62 = vpop.permute.xlu1 %5069  ;;  %v5065_v2 = vpop.permute.xlu0 %5064  ;;  %v4304_v7 = vpack.c.bf16 %v901_v61, %v846_v55  ;;  %v4307_v10 = vpack.c.bf16 %v897_v60, %v6510_v53  ;;  %vm8522_vm3 = vcmask 916480   ;;  %4763 = vmatprep.subr.bf16.mxu0 %v5995_v42  ;;  %v6000_v54 = vld [vmem:[%s8527_s30 + $0x18] sm:$0xff]   ;;  %v6001_v56 = vld [vmem:[%s8527_s30 + $0x60] sm:$0xff]   ;;  %v6003_v59 = vld [vmem:[%s8527_s30 + $0x68] sm:$0xff]   ;;  %vm8532_vm15 = vcmask 1039360  }
 0x20d   : > { %v5072_v11 = vunpack.i.h.bf16 %v5070_v62  ;;  %v5071_v12 = vunpack.i.l.bf16 %v5070_v62  ;;  %v5067_v13 = vunpack.i.h.bf16 %v5065_v2  ;;  %v5066_v23 = vunpack.i.l.bf16 %v5065_v2  ;;  %vm8523_vm9 = vmmov %vm8522_vm3  ;;  %v6002_v58 = vld [vmem:[%s8527_s30 + $0x20] sm:$0xff]   ;;  %v6004_v60 = vld [vmem:[%s8527_s30 + $0x28] sm:$0xff]  }
 0x20e   : > { %4305 = vmatprep.subr.msk.bf16.mxu1 %vm6383_vm1, %v4304_v7  ;;  %4764 = vmatpush3.bf16.msra.mxu0 %v5996_v47  ;;  %v6005_v61 = vld [vmem:[%s8527_s30 + $0x70] sm:$0xff]   ;;  %v6007_v2 = vld [vmem:[%s8527_s30 + $0x78] sm:$0xff]   ;;  %vm8534_vm8 = vmmov %vm8532_vm15 }
 0x20f   : > { %v934_v29 = vsel %vm8521_vm5, %v5072_v11, %v5071_v12  ;;  %v919_v30 = vsel %vm8522_vm3, %v5066_v23, %v5067_v13  ;;  %v923_v31 = vsel %vm8523_vm9, %v5067_v13, %v5066_v23  ;;  %4308 = vmatpush1.bf16.msk.msra.mxu1 %vm6423_vm4, %v4307_v10  ;;  %v930_v14 = vsel %vm8524_vm6, %v5071_v12, %v5072_v11  ;;  %v6006_v62 = vld [vmem:[%s8527_s30 + $0x30] sm:$0xff]   ;;  %v6008_v7 = vld [vmem:[%s8527_s30 + $0x38] sm:$0xff]   ;;  %vm8536_vm5 = vmmov %vm8522_vm3  ;;  %s8278_s30 = smov 5  }
 0x210   : > { %v4310_v53 = vpack.c.bf16 %v923_v31, %v912_v28  ;;  %v4313_v55 = vpack.c.bf16 %v919_v30, %v908_v24  ;;  %v4316_v33 = vpack.c.bf16 %v8263_v45, %v934_v29  ;;  %v4319_v36 = vpack.c.bf16 %v8263_v45, %v930_v14  ;;  %4765 = vmatprep.subr.bf16.mxu0 %v5997_v49 }
 0x211   : > { %vm8526_vm6 = vcmask 654336   ;;  %vm8539_vm9 = vcmask 908288  }
 0x212   : > { %4311 = vmatprep.subr.msk.bf16.mxu1 %vm6435_vm12, %v4310_v53  ;;  %4766 = vmatpush3.bf16.msra.mxu0 %v5998_v50 }
 0x213   : > { %4314 = vmatpush1.bf16.msk.msra.mxu1 %vm6467_vm7, %v4313_v55  ;;  %4767 = vmatprep.subr.bf16.mxu0 %v5999_v52 }
 0x214   : > { %4317 = vmatprep.subr.msk.bf16.mxu1 %vm6478_vm2, %v4316_v33 }
 0x216   : > { %4768 = vmatpush3.bf16.msra.mxu0 %v6000_v54 }
 0x217   : > { %4320 = vmatpush1.bf16.msk.msra.mxu1 %vm6500_vm11, %v4319_v36  ;;  %4769 = vmatprep.subr.bf16.mxu0 %v6001_v56 }
 0x218   : > { %4882 = vmatprep.subr.bf16.mxu1 %v8265_v39 }
 0x21a   : > { %4321 = vmatmul.mubr.msk.bf16.vlgmr.msra.gmra.mrb[0].mxu1 %vm8526_vm6, %v937_v38  ;;  %4770 = vmatpush3.bf16.msra.mxu0 %v6002_v58  ;;  %vm8541_vm6 = vmmov %vm8539_vm9 }
 0x21b   : > { %4771 = vmatprep.subr.bf16.mxu0 %v6003_v59 }
 0x21e   : > { %4772 = vmatpush3.bf16.msra.mxu0 %v6004_v60 }
 0x21f   : > { %4773 = vmatprep.subr.bf16.mxu0 %v6005_v61 }
 0x222   : > { %4774 = vmatpush3.bf16.msra.mxu0 %v6006_v62 }
 0x223   : > { %4775 = vmatprep.subr.bf16.mxu0 %v6007_v2 }
 0x226   : > { %4776 = vmatpush3.bf16.msra.mxu0 %v6008_v7 }
 0x227   : > { %4896 = vmatprep.subr.bf16.mxu0 %v8265_v39 }
 0x2ed   : > { %v985_v10 = vpop.f32.mrb[0].mxu1 }
 0x2ee   : > { %v6614_v11 = vmax.f32 %v985_v10, 0.0  ;;  %v987_v12 = vpop.f32.mrb[1].mxu1 }
 0x2ef   : > { %v6616_v13 = vmax.f32 %v987_v12, 0.0  ;;  %v989_v23 = vpop.f32.mrb[2].mxu1 }
 0x2f0   : > { %8528 = vst [vmem:[#allocation29_spill] sm:$0xff] %v6614_v11  ;;  %v990_v24 = vpop.f32.mrb[3].mxu1 }
 0x2f1   : > { %8529 = vst [vmem:[#allocation30_spill] sm:$0xff] %v6616_v13  ;;  %v6620_v28 = vpack.i.bf16 %v6616_v13, %v6614_v11  ;;  %v1209_v24 = vshra.s32 %v6243_v6, 3 }
 0x2f3   : > { %8530 = vst [vmem:[#allocation31_spill] sm:$0xff] %v6620_v28  ;;  %5079 = vrot.lane.b32.xlu1 %v6620_v28, %s8209_s25  ;;  %5074 = vrot.lane.b32.xlu0 %v6620_v28, %s8215_s23  ;;  %s8258_s25 = smov 57   ;;  %vm1260_vm2 = vcmp.ge.s32.totalorder %v1209_v24, 0 }
 0x2f7   : > { %5084 = vrot.lane.b32.xlu0 %v6620_v28, %s8531_s21  ;;  %s8665_s21 = smov 123  }
 0x365   : > { %v5080_v29 = vpop.permute.xlu1 %5079  ;;  %v5075_v30 = vpop.permute.xlu0 %5074 }
 0x366   : > { %v5082_v31 = vunpack.i.h.bf16 %v5080_v29  ;;  %v5081_v53 = vunpack.i.l.bf16 %v5080_v29  ;;  %v5077_v55 = vunpack.i.h.bf16 %v5075_v30  ;;  %v5076_v14 = vunpack.i.l.bf16 %v5075_v30 }
 0x367   : > { %v1208_v29 = vand.u32 7, %v6243_v6  ;;  %v1210_v30 = vadd.s32 4294967295, %v1209_v24 }
 0x368   : > { %v6630_v33 = vsel %vm8532_vm15, %v5076_v14, %v5077_v55  ;;  %v6633_v36 = vsel %vm8534_vm8, %v5077_v55, %v5076_v14  ;;  %v6640_v42 = vsel %vm8536_vm5, %v5081_v53, %v5082_v31  ;;  %v6643_v50 = vsel %vm8522_vm3, %v5082_v31, %v5081_v53 }
 0x369   : > { %8533 = vst [vmem:[#allocation32_spill] sm:$0xff] %v6630_v33  ;;  %8535 = vst [vmem:[#allocation33_spill] sm:$0xff] %v6633_v36  ;;  %v1005_v38 = vmax.f32 %v6614_v11, %v6630_v33  ;;  %v5085_v40 = vpop.permute.xlu0 %5084  ;;  %v1006_v18 = vmax.f32 %v6616_v13, %v6633_v36  ;;  %vm8221_vm15 = vmmov 0   ;;  %v1214_v31 = vadd.s32 4294967295, %v1208_v29 }
 0x36a   : > { %8537 = vst [vmem:[#allocation34_spill] sm:$0xff] %v6640_v42  ;;  %v5087_v47 = vunpack.i.h.bf16 %v5085_v40  ;;  %v5086_v49 = vunpack.i.l.bf16 %v5085_v40  ;;  %8538 = vst [vmem:[#allocation35_spill] sm:$0xff] %v6643_v50  ;;  %4892 = vmatprep.mubr.msk.bf16.mxu1 %vm8221_vm15, %v8265_v39  ;;  %vm1211_vm8 = vcmp.ge.s32.totalorder %v1210_v30, 0  ;;  %vm1212_vm5 = vcmp.lt.s32.totalorder %v1210_v30, 8 }
 0x36b   : > { %v1017_v52 = vmax.f32 %v1006_v18, %v6643_v50  ;;  %v1016_v54 = vmax.f32 %v1005_v38, %v6640_v42  ;;  %vm6695_vm3 = vmand %vm1211_vm8, %vm1212_vm5  ;;  %v1245_v40 = vadd.s32 1, %v1208_v29  ;;  %vm1261_vm8 = vcmp.lt.s32.totalorder %v1209_v24, 8 }
 0x36c   : > { %v6648_v56 = vsel %vm8539_vm9, %v5086_v49, %v5087_v47  ;;  %v6651_v58 = vsel %vm8541_vm6, %v5087_v47, %v5086_v49  ;;  %vm8226_vm9 = vcmp.ge.s32.totalorder %v1214_v31, 0  ;;  %vm8228_vm6 = vcmask 72704  }
 0x36d   : > { %8540 = vst [vmem:[#allocation36_spill] sm:$0xff] %v6648_v56  ;;  %8542 = vst [vmem:[#allocation37_spill] sm:$0xff] %v6651_v58  ;;  %v1028_v59 = vmax.f32 %v1017_v52, %v6651_v58  ;;  %v1027_v60 = vmax.f32 %v1016_v54, %v6648_v56  ;;  %vm8230_vm7 = vcmp.lt.s32.totalorder %v1245_v40, 8  ;;  %vm8552_vm12 = vcmp.ge.s32.totalorder %v1214_v31, 0 }
 0x36e   : > { %vm6702_vm11 = vmand %vm6695_vm3, %vm8226_vm9  ;;  %vm8556_vm4 = vcmp.lt.s32.totalorder %v1245_v40, 8 }
 0x36f   : > { %v1030_v61 = vpack.c.bf16 %v1028_v59, %v1028_v59  ;;  %v1029_v62 = vpack.c.bf16 %v1027_v60, %v1027_v60  ;;  %vm4339_vm5 = vmpackc.low %vm6695_vm3, %vm6702_vm11 }
 0x370   : > { %vm6712_vm9 = vmand %vm1260_vm2, %vm1261_vm8  ;;  %vm8555_vm8 = vcmask 7168  }
 0x371   : > { %1191 = vmatprep.mubr.bf16.mxu0 %v1030_v61  ;;  %vm6727_vm2 = vmand %vm6712_vm9, %vm8552_vm12 }
 0x372   : > { %1192 = vmatmul.mubr.bf16.vlgmr.msra.gmra.mrb[4].mxu0 %v1029_v62  ;;  %vm6740_vm12 = vmand %vm6712_vm9, %vm8556_vm4  ;;  %vm8237_vm4 = vcmask 465920   ;;  %vm8236_vm9 = vcmask 457728   ;;  %v8593_v62 = vmov 0 }
 0x373   : > { %4904 = vmatprep.mubr.msk.bf16.mxu0 %vm8221_vm15, %v8265_v39  ;;  %vm8227_vm15 = vcmask 64512  }
 0x445   : > { %v4777_v2 = vpop.f32.mrb[4].mxu0 }
 0x446   : > { %v4778_v7 = vpop.f32.mrb[5].mxu0 }
 0x447   : > { %v6655_v10 = vadd.f32 %v4778_v7, %v4777_v2  ;;  %v4780_v12 = vpop.f32.mrb[6].mxu0 }
 0x448   : > { %v4781_v23 = vpop.f32.mrb[7].mxu0 }
 0x449   : > { %1203 = vrot.lane.b32.xlu0 %v6655_v10, %s8250_s20  ;;  %1200 = vrot.lane.b32.xlu1 %v6655_v10, %s8248_s2  ;;  %v1289_v23 = vadd.s32 1, %v1209_v24 }
 0x44b   : > { %vm1291_vm1 = vcmp.lt.s32.totalorder %v1289_v23, 8 }
 0x44d   : > { %1225 = vrot.lane.b32.xlu0 %v6655_v10, %s8252_s24  ;;  %1222 = vrot.lane.b32.xlu1 %v6655_v10, %s8254_s0 }
 0x451   : > { %1240 = vrot.lane.b32.xlu0 %v6655_v10, %s8219_s19  ;;  %1237 = vrot.lane.b32.xlu1 %v6655_v10, %s8211_s22  ;;  %s8246_s22 = smov 121   ;;  %s8238_s19 = smov 119  }
 0x455   : > { %1256 = vrot.lane.b32.xlu0 %v6655_v10, %s8543_s26  ;;  %1253 = vrot.lane.b32.xlu1 %v6655_v10, %s8213_s1  ;;  %s8244_s1 = smov 56  }
 0x459   : > { %1271 = vrot.lane.b32.xlu0 %v6655_v10, %s8217_s29  ;;  %1268 = vrot.lane.b32.xlu1 %v6655_v10, %s8215_s23  ;;  %s8242_s23 = smov 120   ;;  %s8240_s29 = smov 55  }
 0x45d   : > { %1284 = vrot.lane.b32.xlu0 %v6655_v10, %s8258_s25  ;;  %1281 = vrot.lane.b32.xlu1 %v6655_v10, %s8246_s22  ;;  %s8574_s22 = smov 127  }
 0x461   : > { %1301 = vrot.lane.b32.xlu0 %v6655_v10, %s8244_s1  ;;  %1298 = vrot.lane.b32.xlu1 %v6655_v10, %s8242_s23  ;;  %s8572_s23 = smov 65   ;;  %s8573_s1 = smov 63  }
 0x465   : > { %1314 = vrot.lane.b32.xlu0 %v6655_v10, %s8240_s29  ;;  %1311 = vrot.lane.b32.xlu1 %v6655_v10, %s8238_s19  ;;  %s8570_s19 = smov 7   ;;  %s8571_s29 = smov 71  }
 0x4bb   : > { %v1204_v55 = vpop.permute.xlu0 %1203  ;;  %v1201_v14 = vpop.permute.xlu1 %1200 }
 0x4bc   : > { %v1207_v49 = vsel %vm8228_vm6, %v1201_v14, %v1204_v55  ;;  %vm8232_vm6 = vcmask 56320   ;;  %v8603_v14 = vmov 0 }
 0x4bf   : > { %v1226_v18 = vpop.permute.xlu0 %1225  ;;  %v1223_v47 = vpop.permute.xlu1 %1222 }
 0x4c0   : > { %v1229_v52 = vsel %vm8227_vm15, %v1223_v47, %v1226_v18  ;;  %vm6720_vm15 = vmand %vm6695_vm3, %vm8230_vm7  ;;  %vm8235_vm7 = vcmask 515072  }
 0x4c1   : > { %v4340_v54 = vpack.c.bf16 %v1229_v52, %v1207_v49  ;;  %v8610_v52 = vmov 0 }
 0x4c3   : > { %v1241_v60 = vpop.permute.xlu0 %1240  ;;  %4883 = vmatpush3.bf16.msk.msra.mxu1 %vm4339_vm5, %v4340_v54  ;;  %v1238_v61 = vpop.permute.xlu1 %1237  ;;  %vm4342_vm5 = vmpackc.low %vm6727_vm2, %vm6720_vm15 }
 0x4c4   : > { %4884 = vmatprep.subr.bf16.mxu1 %v8265_v39  ;;  %v1244_v29 = vsel %vm8232_vm6, %v1238_v61, %v1241_v60  ;;  %vm1290_vm6 = vcmp.ge.s32.totalorder %v1289_v23, 0  ;;  %v8607_v60 = vmov 0 }
 0x4c5   : > { %vm6750_vm14 = vmand %vm1290_vm6, %vm1291_vm1  ;;  %vm8290_vm6 = vcmask 449536  }
 0x4c7   : > { %v1257_v7 = vpop.permute.xlu0 %1256  ;;  %v1254_v12 = vpop.permute.xlu1 %1253 }
 0x4c8   : > { %v1259_v30 = vsel %vm8555_vm8, %v1254_v12, %v1257_v7  ;;  %vm4345_vm8 = vmpackc.low %vm6740_vm12, %vm8476_vm10  ;;  %vm8302_vm10 = vcmask 39936  }
 0x4c9   : > { %v4343_v55 = vpack.c.bf16 %v1259_v30, %v1244_v29 }
 0x4cb   : > { %v1272_v18 = vpop.permute.xlu0 %1271  ;;  %4885 = vmatpush3.bf16.msk.msra.mxu1 %vm4342_vm5, %v4343_v55  ;;  %v1269_v24 = vpop.permute.xlu1 %1268  ;;  %vm8561_vm5 = vcmp.ge.s32.totalorder %v1214_v31, 0  ;;  %v6012_v31 = vld [vmem:[%s8580_s8] ss:$8 sps:$4 sm:$0xff]  }
 0x4cc   : > { %v1275_v47 = vsel %vm8235_vm7, %v1269_v24, %v1272_v18  ;;  %4886 = vmatprep.subr.bf16.mxu1 %v8265_v39  ;;  %vm6758_vm7 = vmand %vm6750_vm14, %vm8561_vm5  ;;  %v6009_v18 = vld [vmem:[%s8568_s7] sm:$0xff]   ;;  %s8280_s7 = smov 4  }
 0x4cd   : > { %v4346_v49 = vpack.c.bf16 %v1275_v47, %v6655_v10  ;;  %vm4348_vm1 = vmpackc.low %vm6750_vm14, %vm6758_vm7 }
 0x4cf   : > { %v1285_v54 = vpop.permute.xlu0 %1284  ;;  %4887 = vmatpush3.bf16.msk.msra.mxu1 %vm4345_vm8, %v4346_v49  ;;  %v1282_v59 = vpop.permute.xlu1 %1281  ;;  %vm8564_vm8 = vcmp.lt.s32.totalorder %v1245_v40, 8 }
 0x4d0   : > { %4888 = vmatprep.subr.bf16.mxu1 %v8265_v39  ;;  %v1288_v7 = vsel %vm8237_vm4, %v1282_v59, %v1285_v54  ;;  %vm6771_vm5 = vmand %vm6750_vm14, %vm8564_vm8  ;;  %vm8583_vm8 = vcmask 72704  }
 0x4d3   : > { %v1302_v61 = vpop.permute.xlu0 %1301  ;;  %v1299_v10 = vpop.permute.xlu1 %1298 }
 0x4d4   : > { %v1305_v12 = vsel %vm8236_vm9, %v1299_v10, %v1302_v61  ;;  %vm8567_vm9 = vcmp.eq.s32.totalorder %v6399_v9, 0 }
 0x4d5   : > { %v4349_v23 = vpack.c.bf16 %v1305_v12, %v1288_v7  ;;  %vm4351_vm4 = vmpackc.low %vm8567_vm9, %vm6771_vm5  ;;  %v6010_v12 = vld [vmem:[%s8580_s8 + $0x4] ss:$8 sps:$4 sm:$0xff]   ;;  %s8322_s8 = smov 123  }
 0x4d6   : > { %vm6812_vm9 = vmpackc.low %vm6702_vm11, %vm6702_vm11 }
 0x4d7   : > { %v1315_v29 = vpop.permute.xlu0 %1314  ;;  %4889 = vmatpush3.bf16.msk.msra.mxu1 %vm4348_vm1, %v4349_v23  ;;  %v1312_v30 = vpop.permute.xlu1 %1311  ;;  %vm8569_vm1 = vcmask 654336  }
 0x4d8   : > { %v1318_v55 = vsel %vm8290_vm6, %v1312_v30, %v1315_v29  ;;  %4890 = vmatprep.subr.bf16.mxu1 %v8265_v39 }
 0x4d9   : > { %v4352_v40 = vpack.c.bf16 %v8263_v45, %v1318_v55 }
 0x4db   : > { %4891 = vmatpush3.bf16.msk.msra.mxu1 %vm4351_vm4, %v4352_v40  ;;  %vm8257_vm4 = vcmask 195584  }
 0x4dc   : > { %1541 = vmatprep.subr.bf16.mxu1 %v8267_v4 }
 0x4de   : > { %4893 = vmatmul.mubr.msk.bf16.vlgmr.msra.gmra.mrb[4].mxu1 %vm8569_vm1, %v6009_v18  ;;  %vm8584_vm1 = vmmov %vm8583_vm8 }
 0x4df   : > { %4381 = vmatprep.mubr.msk.bf16.mxu1 %vm8257_vm4, %v6010_v12  ;;  %vm8585_vm4 = vcmask 64512  }
 0x4e0   : > { %vm8586_vm11 = vmmov %vm8585_vm4 }
 0x5b1   : > { %v1373_v24 = vpop.f32.mrb[4].mxu1 }
 0x5b2   : > { %v4894_v47 = vpop.f32.mrb[5].mxu1  ;;  %v1380_v54 = vmax.f32 %v1373_v24, 0.0 }
 0x5b3   : > { %v1376_v49 = vpop.f32.mrb[6].mxu1 }
 0x5b4   : > { %v1381_v59 = vmax.f32 %v1376_v49, 0.0  ;;  %v4895_v61 = vpop.f32.mrb[7].mxu1 }
 0x5b6   : > { %v5093_v10 = vpack.i.bf16 %v1381_v59, %v1380_v54  ;;  %v6789_v7 = vpack.c.bf16 %v1381_v59, %v1380_v54 }
 0x5b8   : > { %5094 = vrot.lane.b32.xlu0 %v5093_v10, %s8250_s20  ;;  %5089 = vrot.lane.b32.xlu1 %v5093_v10, %s8248_s2  ;;  %s8575_s2 = smov 121   ;;  %s8576_s20 = smov 56  }
 0x5bc   : > { %5104 = vrot.lane.b32.xlu0 %v5093_v10, %s8252_s24  ;;  %5099 = vrot.lane.b32.xlu1 %v5093_v10, %s8254_s0  ;;  %s8577_s24 = smov 120   ;;  %s8578_s0 = smov 55  }
 0x5c0   : > { %5114 = vrot.lane.b32.xlu0 %v5093_v10, %s8570_s19  ;;  %5109 = vrot.lane.b32.xlu1 %v5093_v10, %s8571_s29 }
 0x5c4   : > { %5124 = vrot.lane.b32.xlu0 %v5093_v10, %s8543_s26  ;;  %5119 = vrot.lane.b32.xlu1 %v5093_v10, %s8572_s23 }
 0x5c8   : > { %5134 = vrot.lane.b32.xlu0 %v5093_v10, %s8573_s1  ;;  %5129 = vrot.lane.b32.xlu1 %v5093_v10, %s8574_s22 }
 0x5cc   : > { %5144 = vrot.lane.b32.xlu0 %v5093_v10, %s8258_s25  ;;  %5139 = vrot.lane.b32.xlu1 %v5093_v10, %s8575_s2  ;;  %s8282_s25 = smov 116  }
 0x5d0   : > { %5154 = vrot.lane.b32.xlu0 %v5093_v10, %s8576_s20  ;;  %5149 = vrot.lane.b32.xlu1 %v5093_v10, %s8577_s24 }
 0x5d4   : > { %5164 = vrot.lane.b32.xlu0 %v5093_v10, %s8578_s0  ;;  %5159 = vrot.lane.b32.xlu1 %v5093_v10, %s8579_s5 }
 0x62a   : > { %v5095_v23 = vpop.permute.xlu0 %5094  ;;  %v5090_v29 = vpop.permute.xlu1 %5089 }
 0x62b   : > { %v5097_v30 = vunpack.i.h.bf16 %v5095_v23  ;;  %v5096_v55 = vunpack.i.l.bf16 %v5095_v23  ;;  %v5092_v40 = vunpack.i.h.bf16 %v5090_v29  ;;  %v5091_v18 = vunpack.i.l.bf16 %v5090_v29 }
 0x62d   : > { %v1397_v47 = vsel %vm8583_vm8, %v5092_v40, %v5097_v30  ;;  %v1396_v49 = vsel %vm8584_vm1, %v5091_v18, %v5096_v55  ;;  %vm6826_vm8 = vmpackc.low %vm6695_vm3, %vm6695_vm3  ;;  %vm8591_vm3 = vcmask 56320  }
 0x62e   : > { %v4358_v54 = vpack.c.bf16 %v1397_v47, %v1396_v49  ;;  %v5105_v59 = vpop.permute.xlu0 %5104  ;;  %v5100_v61 = vpop.permute.xlu1 %5099  ;;  %vm8592_vm1 = vmmov %vm8591_vm3 }
 0x62f   : > { %v5107_v10 = vunpack.i.h.bf16 %v5105_v59  ;;  %v5106_v12 = vunpack.i.l.bf16 %v5105_v59  ;;  %v5102_v5 = vunpack.i.h.bf16 %v5100_v61  ;;  %v5101_v23 = vunpack.i.l.bf16 %v5100_v61 }
 0x630   : > { %4359 = vmatpush1.bf16.msk.msra.mxu1 %vm6812_vm9, %v4358_v54 }
 0x631   : > { %v1413_v38 = vsel %vm8585_vm4, %v5102_v5, %v5107_v10  ;;  %v1412_v29 = vsel %vm8586_vm11, %v5101_v23, %v5106_v12  ;;  %1543 = vmatprep.subr.bf16.mxu1 %v8267_v4  ;;  %vm6835_vm4 = vmpackc.low %vm6720_vm15, %vm6720_vm15  ;;  %v8589_v5 = vmov 0  ;;  %vm8595_vm11 = vcmask 7168  }
 0x632   : > { %v4361_v55 = vpack.c.bf16 %v1413_v38, %v1412_v29  ;;  %v5115_v40 = vpop.permute.xlu0 %5114  ;;  %v5110_v18 = vpop.permute.xlu1 %5109  ;;  %v8590_v5 = vsel %vm6835_vm4, 4294967295, %v8589_v5  ;;  %vm6847_vm15 = vmpackc.low %vm6727_vm2, %vm6727_vm2  ;;  %vm8597_vm2 = vcmask 515072  }
 0x633   : > { %v5117_v47 = vunpack.i.h.bf16 %v5115_v40  ;;  %v5116_v49 = vunpack.i.l.bf16 %v5115_v40  ;;  %v5112_v59 = vunpack.i.h.bf16 %v5110_v18  ;;  %v5111_v54 = vunpack.i.l.bf16 %v5110_v18 }
 0x634   : > { %4362 = vmatpush1.bf16.msk.msra.mxu1 %vm6826_vm8, %v4361_v55  ;;  %v8594_v62 = vsel %vm6847_vm15, 4294967295, %v8593_v62 }
 0x635   : > { %v1429_v53 = vsel %vm8591_vm3, %v5112_v59, %v5117_v47  ;;  %v1428_v61 = vsel %vm8592_vm1, %v5111_v54, %v5116_v49  ;;  %1545 = vmatprep.subr.bf16.mxu1 %v8267_v4  ;;  %vm8596_vm3 = vmmov %vm8595_vm11 }
 0x636   : > { %v4364_v10 = vpack.c.bf16 %v1429_v53, %v1428_v61  ;;  %v5125_v12 = vpop.permute.xlu0 %5124  ;;  %v5120_v23 = vpop.permute.xlu1 %5119  ;;  %vm8598_vm1 = vmmov %vm8597_vm2 }
 0x637   : > { %v5127_v38 = vunpack.i.h.bf16 %v5125_v12  ;;  %v5126_v29 = vunpack.i.l.bf16 %v5125_v12  ;;  %v5122_v40 = vunpack.i.h.bf16 %v5120_v23  ;;  %v5121_v55 = vunpack.i.l.bf16 %v5120_v23 }
 0x638   : > { %4365 = vmatpush1.bf16.msk.msra.mxu1 %vm6835_vm4, %v4364_v10 }
 0x639   : > { %v1445_v18 = vsel %vm8595_vm11, %v5122_v40, %v5127_v38  ;;  %v1444_v47 = vsel %vm8596_vm3, %v5121_v55, %v5126_v29  ;;  %1547 = vmatprep.subr.bf16.mxu1 %v8267_v4  ;;  %vm6863_vm11 = vmpackc.low %vm6740_vm12, %vm6740_vm12  ;;  %vm8601_vm3 = vcmask 465920  }
 0x63a   : > { %v4367_v49 = vpack.c.bf16 %v1445_v18, %v1444_v47  ;;  %v5135_v59 = vpop.permute.xlu0 %5134  ;;  %v5130_v54 = vpop.permute.xlu1 %5129  ;;  %vm6875_vm12 = vmpackc.low %vm6758_vm7, %vm6758_vm7 }
 0x63b   : > { %v5137_v53 = vunpack.i.h.bf16 %v5135_v59  ;;  %v5136_v61 = vunpack.i.l.bf16 %v5135_v59  ;;  %v5132_v12 = vunpack.i.h.bf16 %v5130_v54  ;;  %v5131_v10 = vunpack.i.l.bf16 %v5130_v54  ;;  %vm6888_vm7 = vmpackc.low %vm6750_vm14, %vm6750_vm14 }
 0x63c   : > { %4368 = vmatpush1.bf16.msk.msra.mxu1 %vm6847_vm15, %v4367_v49  ;;  %v8604_v14 = vsel %vm6875_vm12, 4294967295, %v8603_v14  ;;  %v8608_v60 = vsel %vm6888_vm7, 4294967295, %v8607_v60  ;;  %vm6904_vm14 = vmpackc.low %vm6771_vm5, %vm6771_vm5  ;;  %vm8614_vm5 = vcmask 515072  }
 0x63d   : > { %1549 = vmatprep.subr.bf16.mxu1 %v8267_v4  ;;  %v1461_v2 = vsel %vm8597_vm2, %v5132_v12, %v5137_v53  ;;  %v1460_v23 = vsel %vm8598_vm1, %v5131_v10, %v5136_v61  ;;  %vm8602_vm2 = vmmov %vm8601_vm3  ;;  %vm8605_vm1 = vcmask 457728   ;;  %v8611_v52 = vsel %vm6904_vm14, 4294967295, %v8610_v52 }
 0x63e   : > { %v5145_v38 = vpop.permute.xlu0 %5144  ;;  %v5140_v29 = vpop.permute.xlu1 %5139  ;;  %v4370_v49 = vpack.c.bf16 %v1461_v2, %v1460_v23 }
 0x63f   : > { %v5147_v40 = vunpack.i.h.bf16 %v5145_v38  ;;  %v5146_v55 = vunpack.i.l.bf16 %v5145_v38  ;;  %v5142_v18 = vunpack.i.h.bf16 %v5140_v29  ;;  %v5141_v47 = vunpack.i.l.bf16 %v5140_v29 }
 0x640   : > { %1550 = vmatpush1.bf16.msra.mxu1 %v6789_v7 }
 0x641   : > { %1551 = vmatprep.subr.bf16.mxu1 %v8267_v4  ;;  %v1477_v54 = vsel %vm8601_vm3, %v5142_v18, %v5147_v40  ;;  %v1476_v53 = vsel %vm8602_vm2, %v5141_v47, %v5146_v55  ;;  %vm8606_vm3 = vmmov %vm8605_vm1  ;;  %vm8609_vm2 = vcmp.eq.s32.totalorder %v6399_v9, 0 }
 0x642   : > { %v5155_v61 = vpop.permute.xlu0 %5154  ;;  %v5150_v12 = vpop.permute.xlu1 %5149  ;;  %v4373_v2 = vpack.c.bf16 %v1477_v54, %v1476_v53  ;;  %v4259_v54 = vsel %vm8609_vm2, 1.0, %v8265_v39  ;;  %vm8616_vm2 = vcmask 457728  }
 0x643   : > { %v5157_v10 = vunpack.i.h.bf16 %v5155_v61  ;;  %v5156_v38 = vunpack.i.l.bf16 %v5155_v61  ;;  %v5152_v29 = vunpack.i.h.bf16 %v5150_v12  ;;  %v5151_v7 = vunpack.i.l.bf16 %v5150_v12 }
 0x644   : > { %4371 = vmatpush1.bf16.msk.msra.mxu1 %vm6863_vm11, %v4370_v49 }
 0x645   : > { %1553 = vmatprep.subr.bf16.mxu1 %v8267_v4  ;;  %v1493_v23 = vsel %vm8605_vm1, %v5152_v29, %v5157_v10  ;;  %v1492_v40 = vsel %vm8606_vm3, %v5151_v7, %v5156_v38  ;;  %v6899_v29 = vpack.c.bf16 %v4259_v54, %v4259_v54  ;;  %vm8272_vm1 = vcmask 1043456   ;;  %v6015_v54 = vld [vmem:[%s8613_s18 + $0x10] sm:$0xff]   ;;  %vm8615_vm3 = vmmov %vm8614_vm5 }
 0x646   : > { %v5165_v55 = vpop.permute.xlu0 %5164  ;;  %v5160_v18 = vpop.permute.xlu1 %5159  ;;  %v4376_v53 = vpack.c.bf16 %v1493_v23, %v1492_v40  ;;  %v6013_v23 = vld [vmem:[%s8612_s27] sm:$0xff]   ;;  %s8284_s27 = smov 3  }
 0x647   : > { %v5167_v47 = vunpack.i.h.bf16 %v5165_v55  ;;  %v5166_v61 = vunpack.i.l.bf16 %v5165_v55  ;;  %v5162_v12 = vunpack.i.h.bf16 %v5160_v18  ;;  %v5161_v49 = vunpack.i.l.bf16 %v5160_v18  ;;  %4897 = vmatpush3.bf16.msra.mxu0 %v6013_v23  ;;  %v6014_v55 = vld [vmem:[%s8613_s18 + $0x8] sm:$0xff]  }
 0x648   : > { %4374 = vmatpush1.bf16.msk.msra.mxu1 %vm6875_vm12, %v4373_v2  ;;  %v6914_v2 = vsel %vm8272_vm1, %v6899_v29, 0  ;;  %4898 = vmatprep.subr.bf16.mxu0 %v8265_v39  ;;  %vm8617_vm1 = vmmov %vm8616_vm2 }
 0x649   : > { %1555 = vmatprep.subr.bf16.mxu1 %v8267_v4  ;;  %v1509_v10 = vsel %vm8290_vm6, %v5162_v12, %v5167_v47  ;;  %v1508_v38 = vsel %vm8290_vm6, %v5161_v49, %v5166_v61 }
 0x64a   : > { %v4379_v7 = vpack.c.bf16 %v1509_v10, %v1508_v38  ;;  %v6016_v10 = vld [vmem:[%s8613_s18 + $0x18] sm:$0xff]   ;;  %s8661_s18 = smov 115  }
 0x64b   : > { %4899 = vmatpush3.bf16.msra.mxu0 %v6014_v55 }
 0x64c   : > { %4377 = vmatpush1.bf16.msk.msra.mxu1 %vm6888_vm7, %v4376_v53  ;;  %4900 = vmatprep.subr.bf16.mxu0 %v8265_v39 }
 0x64d   : > { %1557 = vmatprep.subr.bf16.mxu1 %v8267_v4 }
 0x64f   : > { %4901 = vmatpush3.bf16.msra.mxu0 %v6015_v54 }
 0x650   : > { %4380 = vmatpush1.bf16.msk.msra.mxu1 %vm6904_vm14, %v4379_v7  ;;  %4902 = vmatprep.subr.bf16.mxu0 %v8265_v39 }
 0x651   : > { %1559 = vmatprep.subr.bf16.mxu1 %v8267_v4 }
 0x653   : > { %4903 = vmatpush3.bf16.msra.mxu0 %v6016_v10 }
 0x654   : > { %1560 = vmatpush1.bf16.msra.mxu1 %v6914_v2  ;;  %1938 = vmatprep.subr.bf16.mxu0 %v8267_v4 }
 0x657   : > { %1574 = vmatmul.mubr.bf16.vlgmr.msra.gmra.mrb[8].mxu1 %v6012_v31 }
 0x72a   : > { %v1575_v40 = vpop.f32.mrb[8].mxu1 }
 0x72b   : > { %v1577_v18 = vpop.f32.mrb[9].mxu1  ;;  %v6927_v61 = vmax.f32 %v1575_v40, 0.0 }
 0x72c   : > { %v1578_v47 = vpop.f32.mrb[10].mxu1 }
 0x72d   : > { %v6929_v12 = vmax.f32 %v1578_v47, 0.0  ;;  %v1580_v49 = vpop.f32.mrb[11].mxu1 }
 0x72f   : > { %v6937_v53 = vpack.i.bf16 %v6929_v12, %v6927_v61 }
 0x731   : > { %5174 = vrot.lane.b32.xlu0 %v6937_v53, %s8573_s1  ;;  %5169 = vrot.lane.b32.xlu1 %v6937_v53, %s8574_s22 }
 0x735   : > { %5184 = vrot.lane.b32.xlu0 %v6937_v53, %s8576_s20  ;;  %5179 = vrot.lane.b32.xlu1 %v6937_v53, %s8577_s24 }
 0x739   : > { %5194 = vrot.lane.b32.xlu0 %v6937_v53, %s8578_s0  ;;  %5189 = vrot.lane.b32.xlu1 %v6937_v53, %s8579_s5 }
 0x7a3   : > { %v5175_v38 = vpop.permute.xlu0 %5174  ;;  %v5170_v7 = vpop.permute.xlu1 %5169 }
 0x7a4   : > { %v5177_v31 = vunpack.i.h.bf16 %v5175_v38  ;;  %v5176_v23 = vunpack.i.l.bf16 %v5175_v38  ;;  %v5172_v40 = vunpack.i.h.bf16 %v5170_v7  ;;  %v5171_v55 = vunpack.i.l.bf16 %v5170_v7 }
 0x7a6   : > { %v6957_v18 = vsel %vm8614_vm5, %v5172_v40, %v5177_v31  ;;  %v6960_v47 = vsel %vm8615_vm3, %v5171_v55, %v5176_v23  ;;  %vm8621_vm5 = vcmask 195584  }
 0x7a7   : > { %v5185_v49 = vpop.permute.xlu0 %5184  ;;  %v5180_v54 = vpop.permute.xlu1 %5179  ;;  %v1601_v7 = vmax.f32 %v6929_v12, %v6957_v18  ;;  %v1600_v31 = vmax.f32 %v6927_v61, %v6960_v47 }
 0x7a8   : > { %v5187_v45 = vunpack.i.h.bf16 %v5185_v49  ;;  %v5186_v39 = vunpack.i.l.bf16 %v5185_v49  ;;  %v5182_v4 = vunpack.i.h.bf16 %v5180_v54  ;;  %v5181_v9 = vunpack.i.l.bf16 %v5180_v54 }
 0x7aa   : > { %v6965_v21 = vsel %vm8616_vm2, %v5182_v4, %v5187_v45  ;;  %v6968_v38 = vsel %vm8617_vm1, %v5181_v9, %v5186_v39  ;;  %vm8289_vm1 = vcmask 523264  }
 0x7ab   : > { %v5195_v23 = vpop.permute.xlu0 %5194  ;;  %v5190_v40 = vpop.permute.xlu1 %5189  ;;  %v1616_v4 = vmax.f32 %v1600_v31, %v6968_v38  ;;  %v1617_v9 = vmax.f32 %v1601_v7, %v6965_v21 }
 0x7ac   : > { %v5197_v49 = vunpack.i.h.bf16 %v5195_v23  ;;  %v5196_v10 = vunpack.i.l.bf16 %v5195_v23  ;;  %v5192_v54 = vunpack.i.h.bf16 %v5190_v40  ;;  %v5191_v44 = vunpack.i.l.bf16 %v5190_v40 }
 0x7ae   : > { %v6979_v45 = vsel %vm8290_vm6, %v5192_v54, %v5197_v49  ;;  %v6982_v39 = vsel %vm8290_vm6, %v5191_v44, %v5196_v10  ;;  %v1730_v10 = vshra.s32 %v6243_v6, 2  ;;  %v1729_v54 = vand.u32 3, %v6243_v6 }
 0x7af   : > { %v1632_v15 = vmax.f32 %v1616_v4, %v6982_v39  ;;  %v1633_v35 = vmax.f32 %v1617_v9, %v6979_v45 }
 0x7b0   : > { %v1731_v4 = vadd.s32 4294967295, %v1730_v10  ;;  %v7019_v9 = vadd.s32 4294967295, %v1729_v54  ;;  %v7030_v6 = vadd.s32 1, %v1729_v54  ;;  %vm1806_vm13 = vcmp.lt.s32.totalorder %v1730_v10, 4 }
 0x7b1   : > { %v1634_v23 = vpack.c.bf16 %v1633_v35, %v1632_v15  ;;  %v6017_v15 = vld [vmem:[%s8620_s9 + $0x4] ss:$8 sps:$4 sm:$0xff]  }
 0x7b2   : > { %vm1732_vm3 = vcmp.ge.s32.totalorder %v1731_v4, 0  ;;  %vm1733_vm2 = vcmp.lt.s32.totalorder %v1731_v4, 4  ;;  %vm8297_vm6 = vcmp.ge.s32.totalorder %v7019_v9, 0  ;;  %vm8641_vm7 = vcmp.lt.s32.totalorder %v7030_v6, 4 }
 0x7b3   : > { %4905 = vmatmul.mubr.msk.bf16.vlgmr.msra.gmra.mrb[8].mxu0 %vm8289_vm1, %v1634_v23  ;;  %vm7021_vm1 = vmand %vm1732_vm3, %vm1733_vm2  ;;  %vm8303_vm2 = vcmask 31744  }
 0x7b4   : > { %4415 = vmatprep.mubr.msk.bf16.mxu0 %vm8621_vm5, %v6017_v15  ;;  %vm1737_vm5 = vmand %vm7021_vm1, %vm8297_vm6  ;;  %vm8314_vm6 = vcmp.lt.s32.totalorder %v7030_v6, 4 }
 0x7b5   : > { %vm7034_vm3 = vmpackc.low %vm1737_vm5, %vm1737_vm5 }
 0x7b6   : > { %vm7047_vm5 = vmpackc.low %vm7021_vm1, %vm7021_vm1 }
 0x7b7   : > { %vm1786_vm0 = vmand %vm7021_vm1, %vm8314_vm6  ;;  %vm1846_vm6 = vcmask 105472  }
 0x7b8   : > { %vm7065_vm14 = vmpackc.low %vm1786_vm0, %vm1786_vm0  ;;  %vm8635_vm0 = vcmask 7168  }
 0x886   : > { %v6989_v31 = vpop.f32.mrb[8].mxu0 }
 0x887   : > { %v4906_v7 = vpop.f32.mrb[9].mxu0 }
 0x888   : > { %v6991_v40 = vpop.f32.mrb[10].mxu0 }
 0x889   : > { %v4907_v49 = vpop.f32.mrb[11].mxu0  ;;  %v5203_v44 = vpack.i.bf16 %v6991_v40, %v6989_v31 }
 0x88b   : > { %5204 = vrot.lane.b32.xlu0 %v5203_v44, %s8278_s30  ;;  %5199 = vrot.lane.b32.xlu1 %v5203_v44, %s8276_s6  ;;  %s8619_s6 = smov 15   ;;  %s6108_s30 = smov 13  }
 0x88f   : > { %5214 = vrot.lane.b32.xlu0 %v5203_v44, %s8280_s7  ;;  %5209 = vrot.lane.b32.xlu1 %v5203_v44, %s8282_s25  ;;  %s6109_s7 = smov 125   ;;  %s8328_s25 = smov 12  }
 0x893   : > { %5224 = vrot.lane.b32.xlu0 %v5203_v44, %s8284_s27  ;;  %5219 = vrot.lane.b32.xlu1 %v5203_v44, %s8286_s17  ;;  %s8326_s27 = smov 124   ;;  %s8324_s17 = smov 11  }
 0x897   : > { %5234 = vrot.lane.b32.xlu0 %v5203_v44, %s8543_s26  ;;  %5229 = vrot.lane.b32.xlu1 %v5203_v44, %s8618_s28 }
 0x89b   : > { %5244 = vrot.lane.b32.xlu0 %v5203_v44, %s8619_s6  ;;  %5239 = vrot.lane.b32.xlu1 %v5203_v44, %s8574_s22 }
 0x89f   : > { %5254 = vrot.lane.b32.xlu0 %v5203_v44, %s6108_s30  ;;  %5249 = vrot.lane.b32.xlu1 %v5203_v44, %s6109_s7 }
 0x8a3   : > { %5264 = vrot.lane.b32.xlu0 %v5203_v44, %s8328_s25  ;;  %5259 = vrot.lane.b32.xlu1 %v5203_v44, %s8326_s27  ;;  %s8658_s25 = smov 4   ;;  %s8659_s27 = smov 116  }
 0x8a7   : > { %5274 = vrot.lane.b32.xlu0 %v5203_v44, %s8324_s17  ;;  %5269 = vrot.lane.b32.xlu1 %v5203_v44, %s8322_s8  ;;  %s8657_s8 = smov 117   ;;  %s8660_s17 = smov 3  }
 0x8fd   : > { %v5205_v7 = vpop.permute.xlu0 %5204  ;;  %v5200_v49 = vpop.permute.xlu1 %5199 }
 0x8fe   : > { %v5207_v44 = vunpack.i.h.bf16 %v5205_v7  ;;  %v5206_v15 = vunpack.i.l.bf16 %v5205_v7  ;;  %v5202_v55 = vunpack.i.h.bf16 %v5200_v49  ;;  %v5201_v4 = vunpack.i.l.bf16 %v5200_v49 }
 0x900   : > { %v1728_v35 = vsel %vm8302_vm10, %v5202_v55, %v5207_v44  ;;  %v1727_v1 = vsel %vm8302_vm10, %v5201_v4, %v5206_v15  ;;  %v8626_v44 = vmov 0   ;;  %vm8309_vm10 = vcmask 23552  }
 0x901   : > { %v4392_v57 = vpack.c.bf16 %v1728_v35, %v1727_v1  ;;  %v5215_v46 = vpop.permute.xlu0 %5214  ;;  %v5210_v25 = vpop.permute.xlu1 %5209 }
 0x902   : > { %v5217_v54 = vunpack.i.h.bf16 %v5215_v46  ;;  %v5216_v22 = vunpack.i.l.bf16 %v5215_v46  ;;  %v5212_v56 = vunpack.i.h.bf16 %v5210_v25  ;;  %v5211_v7 = vunpack.i.l.bf16 %v5210_v25 }
 0x903   : > { %4393 = vmatpush1.bf16.msk.msra.mxu0 %vm7034_vm3, %v4392_v57 }
 0x904   : > { %v1758_v55 = vsel %vm8303_vm2, %v5212_v56, %v5217_v54  ;;  %v1757_v49 = vsel %vm8303_vm2, %v5211_v7, %v5216_v22  ;;  %1940 = vmatprep.subr.bf16.mxu0 %v8626_v44  ;;  %vm8629_vm2 = vcmp.ge.s32.totalorder %v1730_v10, 0 }
 0x905   : > { %v4395_v46 = vpack.c.bf16 %v1758_v55, %v1757_v49  ;;  %v5225_v25 = vpop.permute.xlu0 %5224  ;;  %v5220_v35 = vpop.permute.xlu1 %5219  ;;  %vm7056_vm15 = vmand %vm8629_vm2, %vm1806_vm13  ;;  %vm8634_vm13 = vcmp.ge.s32.totalorder %v7019_v9, 0 }
 0x906   : > { %v5227_v57 = vunpack.i.h.bf16 %v5225_v25  ;;  %v5226_v22 = vunpack.i.l.bf16 %v5225_v25  ;;  %v5222_v56 = vunpack.i.h.bf16 %v5220_v35  ;;  %v5221_v15 = vunpack.i.l.bf16 %v5220_v35  ;;  %vm1808_vm1 = vmand %vm7056_vm15, %vm8634_vm13 }
 0x907   : > { %4396 = vmatpush1.bf16.msk.msra.mxu0 %vm7047_vm5, %v4395_v46  ;;  %vm8636_vm2 = vmmov %vm8635_vm0 }
 0x908   : > { %v1781_v54 = vsel %vm8309_vm10, %v5222_v56, %v5227_v57  ;;  %v1780_v7 = vsel %vm8309_vm10, %v5221_v15, %v5226_v22  ;;  %1942 = vmatprep.subr.bf16.mxu0 %v8626_v44  ;;  %v1849_v22 = vadd.s32 1, %v1730_v10  ;;  %vm7078_vm10 = vmpackc.low %vm1808_vm1, %vm1808_vm1 }
 0x909   : > { %v4398_v55 = vpack.c.bf16 %v1781_v54, %v1780_v7  ;;  %v5235_v49 = vpop.permute.xlu0 %5234  ;;  %v5230_v25 = vpop.permute.xlu1 %5229  ;;  %vm1829_vm4 = vmand %vm7056_vm15, %vm8641_vm7  ;;  %vm8321_vm15 = vcmask 97280   ;;  %vm8647_vm7 = vcmp.ge.s32.totalorder %v7019_v9, 0  ;;  %v6028_v54 = vld [vmem:[%s8143_s10 + $0x18] ss:$12 sps:$4 sm:$0xff]  }
 0x90a   : > { %v5237_v35 = vunpack.i.h.bf16 %v5235_v49  ;;  %v5236_v46 = vunpack.i.l.bf16 %v5235_v49  ;;  %v5232_v58 = vunpack.i.h.bf16 %v5230_v25  ;;  %v5231_v57 = vunpack.i.l.bf16 %v5230_v25 }
 0x90b   : > { %4399 = vmatpush1.bf16.msk.msra.mxu0 %vm7065_vm14, %v4398_v55  ;;  %vm1850_vm13 = vcmp.ge.s32.totalorder %v1849_v22, 0 }
 0x90c   : > { %v1804_v56 = vsel %vm8635_vm0, %v5232_v58, %v5237_v35  ;;  %v1803_v15 = vsel %vm8636_vm2, %v5231_v57, %v5236_v46  ;;  %1944 = vmatprep.subr.bf16.mxu0 %v8626_v44  ;;  %vm1851_vm0 = vcmp.lt.s32.totalorder %v1849_v22, 4  ;;  %vm8639_vm2 = vcmask 121856   ;;  %v6020_v22 = vld [vmem:[%s8620_s9 + $0x14] ss:$8 sps:$4 sm:$0xff]  }
 0x90d   : > { %v4401_v7 = vpack.c.bf16 %v1804_v56, %v1803_v15  ;;  %v5245_v42 = vpop.permute.xlu0 %5244  ;;  %v5240_v50 = vpop.permute.xlu1 %5239  ;;  %vm8640_vm1 = vmmov %vm8639_vm2  ;;  %v8644_v56 = vpack.c.bf16 %v6991_v40, %v6989_v31 }
 0x90e   : > { %v5247_v49 = vunpack.i.h.bf16 %v5245_v42  ;;  %v5246_v33 = vunpack.i.l.bf16 %v5245_v42  ;;  %v5242_v25 = vunpack.i.h.bf16 %v5240_v50  ;;  %v5241_v36 = vunpack.i.l.bf16 %v5240_v50  ;;  %vm7091_vm12 = vmand %vm1850_vm13, %vm1851_vm0 }
 0x90f   : > { %4402 = vmatpush1.bf16.msk.msra.mxu0 %vm7078_vm10, %v4401_v7  ;;  %vm1853_vm13 = vmand %vm7091_vm12, %vm8647_vm7  ;;  %vm8365_vm0 = vcmask 89088   ;;  %vm8652_vm7 = vcmp.lt.s32.totalorder %v7030_v6, 4  ;;  %v6019_v6 = vld [vmem:[%s8620_s9] ss:$8 sps:$4 sm:$0xff]  }
 0x910   : > { %1946 = vmatprep.subr.bf16.mxu0 %v8626_v44  ;;  %v1827_v58 = vsel %vm8639_vm2, %v5242_v25, %v5247_v49  ;;  %v1826_v10 = vsel %vm8640_vm1, %v5241_v36, %v5246_v33  ;;  %vm7099_vm2 = vmpackc.low %vm1829_vm4, %vm1829_vm4 }
 0x911   : > { %v5255_v55 = vpop.permute.xlu0 %5254  ;;  %v5250_v35 = vpop.permute.xlu1 %5249  ;;  %v4404_v36 = vpack.c.bf16 %v1827_v58, %v1826_v10  ;;  %vm7112_vm4 = vmpackc.low %vm1853_vm13, %vm1853_vm13 }
 0x912   : > { %v5257_v42 = vunpack.i.h.bf16 %v5255_v55  ;;  %v5256_v50 = vunpack.i.l.bf16 %v5255_v55  ;;  %v5252_v46 = vunpack.i.h.bf16 %v5250_v35  ;;  %v5251_v57 = vunpack.i.l.bf16 %v5250_v35  ;;  %vm7124_vm1 = vmpackc.low %vm7091_vm12, %vm7091_vm12 }
 0x913   : > { %1947 = vmatpush1.bf16.msra.mxu0 %v8644_v56  ;;  %vm1896_vm13 = vmand %vm7091_vm12, %vm8652_vm7  ;;  %vm8655_vm12 = vcmask 195584   ;;  %vm8364_vm7 = vcmask 326656  }
 0x914   : > { %1948 = vmatprep.subr.bf16.mxu0 %v8626_v44  ;;  %v1848_v4 = vsel %vm1846_vm6, %v5252_v46, %v5257_v42  ;;  %v1847_v15 = vsel %vm1846_vm6, %v5251_v57, %v5256_v50 }
 0x915   : > { %v5265_v7 = vpop.permute.xlu0 %5264  ;;  %v5260_v49 = vpop.permute.xlu1 %5259  ;;  %v4407_v10 = vpack.c.bf16 %v1848_v4, %v1847_v15 }
 0x916   : > { %v5267_v31 = vunpack.i.h.bf16 %v5265_v7  ;;  %v5266_v40 = vunpack.i.l.bf16 %v5265_v7  ;;  %v5262_v25 = vunpack.i.h.bf16 %v5260_v49  ;;  %v5261_v55 = vunpack.i.l.bf16 %v5260_v49 }
 0x917   : > { %4405 = vmatpush1.bf16.msk.msra.mxu0 %vm7099_vm2, %v4404_v36 }
 0x918   : > { %1950 = vmatprep.subr.bf16.mxu0 %v8626_v44  ;;  %v1873_v35 = vsel %vm8321_vm15, %v5262_v25, %v5267_v31  ;;  %v1872_v9 = vsel %vm8321_vm15, %v5261_v55, %v5266_v40  ;;  %vm7137_vm15 = vmpackc.low %vm1896_vm13, %vm1896_vm13  ;;  %v6022_v25 = vld [vmem:[%s8620_s9 + $0x10] ss:$8 sps:$4 sm:$0xff]   ;;  %s8662_s9 = smov 12   ;;  %vm8666_vm13 = vcmask 39936   ;;  %v6031_v31 = vld [vmem:[%s8136_s3] sm:$0xff]  }
 0x919   : > { %v5275_v42 = vpop.permute.xlu0 %5274  ;;  %v5270_v50 = vpop.permute.xlu1 %5269  ;;  %v4410_v4 = vpack.c.bf16 %v1873_v35, %v1872_v9 }
 0x91a   : > { %v5277_v46 = vunpack.i.h.bf16 %v5275_v42  ;;  %v5276_v57 = vunpack.i.l.bf16 %v5275_v42  ;;  %v5272_v56 = vunpack.i.h.bf16 %v5270_v50  ;;  %v5271_v7 = vunpack.i.l.bf16 %v5270_v50 }
 0x91b   : > { %4408 = vmatpush1.bf16.msk.msra.mxu0 %vm7112_vm4, %v4407_v10 }
 0x91c   : > { %1952 = vmatprep.subr.bf16.mxu0 %v8626_v44  ;;  %v1894_v15 = vsel %vm8365_vm0, %v5272_v56, %v5277_v46  ;;  %v1893_v49 = vsel %vm8365_vm0, %v5271_v7, %v5276_v57 }
 0x91d   : > { %v4413_v40 = vpack.c.bf16 %v1894_v15, %v1893_v49 }
 0x91f   : > { %4411 = vmatpush1.bf16.msk.msra.mxu0 %vm7124_vm1, %v4410_v4 }
 0x920   : > { %1954 = vmatprep.subr.bf16.mxu0 %v8626_v44 }
 0x923   : > { %4414 = vmatpush1.bf16.msk.msra.mxu0 %vm7137_vm15, %v4413_v40 }
 0x924   : > { %1956 = vmatprep.subr.bf16.mxu0 %v8626_v44 }
 0x927   : > { %1957 = vmatpush1.bf16.msra.mxu0 %v6914_v2 }
 0x92a   : > { %1971 = vmatmul.mubr.bf16.vlgmr.msra.gmra.mrb[12].mxu0 %v6019_v6 }
 0x92b   : > { %4416 = vmatprep.mubr.msk.bf16.mxu0 %vm8655_vm12, %v6020_v22  ;;  %vm8667_vm12 = vmmov %vm8666_vm13 }
 0x932   : > { %1979 = vmatmul.mubr.bf16.gmra.mrb[16].mxu0 %v6022_v25  ;;  %v6025_v25 = vld [vmem:[%s8143_s10 + $0x4] ss:$12 sps:$4 sm:$0xff]  }
 0x933   : > { %2346 = vmatprep.mubr.bf16.mxu1 %v6025_v25 }
 0x9fd   : > { %v1972_v55 = vpop.f32.mrb[12].mxu0 }
 0x9fe   : > { %v1974_v10 = vpop.f32.mrb[13].mxu0  ;;  %v1987_v9 = vmax.f32 %v1972_v55, 0.0  ;;  %v6029_v55 = vld [vmem:[%s8143_s10 + $0x8] ss:$12 sps:$4 sm:$0xff]  }
 0x9ff   : > { %v1975_v35 = vpop.f32.mrb[14].mxu0  ;;  %4914 = vmatprep.mubr.msk.bf16.mxu0 %vm8364_vm7, %v6029_v55  ;;  %vm8670_vm7 = vcmask 31744  }
 0xa00   : > { %v1988_v42 = vmax.f32 %v1975_v35, 0.0  ;;  %v1977_v50 = vpop.f32.mrb[15].mxu0 }
 0xa02   : > { %v5283_v46 = vpack.i.bf16 %v1988_v42, %v1987_v9  ;;  %v2267_v57 = vpack.c.bf16 %v1988_v42, %v1987_v9 }
 0xa04   : > { %5284 = vrot.lane.b32.xlu0 %v5283_v46, %s8656_s16  ;;  %5279 = vrot.lane.b32.xlu1 %v5283_v46, %s8657_s8 }
 0xa05   : > { %4794 = vmatprep.subr.bf16.mxu1 %v2267_v57  ;;  %v1980_v56 = vpop.f32.mrb[16].mxu0 }
 0xa06   : > { %v1989_v7 = vmax.f32 %v1980_v56, 0.0  ;;  %v1982_v4 = vpop.f32.mrb[17].mxu0 }
 0xa07   : > { %v1983_v15 = vpop.f32.mrb[18].mxu0 }
 0xa08   : > { %5294 = vrot.lane.b32.xlu0 %v5283_v46, %s8619_s6  ;;  %5289 = vrot.lane.b32.xlu1 %v5283_v46, %s8574_s22  ;;  %v1990_v49 = vmax.f32 %v1983_v15, 0.0  ;;  %v1985_v40 = vpop.f32.mrb[19].mxu0 }
 0xa0a   : > { %v5363_v6 = vpack.i.bf16 %v1990_v49, %v1989_v7  ;;  %v2268_v22 = vpack.c.bf16 %v1990_v49, %v1989_v7 }
 0xa0c   : > { %5304 = vrot.lane.b32.xlu0 %v5283_v46, %s8658_s25  ;;  %5299 = vrot.lane.b32.xlu1 %v5283_v46, %s8659_s27 }
 0xa10   : > { %5314 = vrot.lane.b32.xlu0 %v5283_v46, %s6108_s30  ;;  %5309 = vrot.lane.b32.xlu1 %v5283_v46, %s6109_s7 }
 0xa14   : > { %5324 = vrot.lane.b32.xlu0 %v5283_v46, %s8660_s17  ;;  %5319 = vrot.lane.b32.xlu1 %v5283_v46, %s8661_s18 }
 0xa18   : > { %5334 = vrot.lane.b32.xlu0 %v5283_v46, %s8662_s9  ;;  %5329 = vrot.lane.b32.xlu1 %v5283_v46, %s8663_s15 }
 0xa1c   : > { %5344 = vrot.lane.b32.xlu0 %v5283_v46, %s8543_s26  ;;  %5339 = vrot.lane.b32.xlu1 %v5283_v46, %s8618_s28 }
 0xa20   : > { %5354 = vrot.lane.b32.xlu0 %v5283_v46, %s8664_s14  ;;  %5349 = vrot.lane.b32.xlu1 %v5283_v46, %s8665_s21 }
 0xa24   : > { %5364 = vrot.lane.b32.xlu0 %v5363_v6, %s8656_s16  ;;  %5359 = vrot.lane.b32.xlu1 %v5363_v6, %s8657_s8  ;;  %s8698_s16 = smov 9   ;;  %s8700_s8 = smov 8  }
 0xa28   : > { %5374 = vrot.lane.b32.xlu0 %v5363_v6, %s8619_s6  ;;  %5369 = vrot.lane.b32.xlu1 %v5363_v6, %s8574_s22 }
 0xa2c   : > { %5384 = vrot.lane.b32.xlu0 %v5363_v6, %s8658_s25  ;;  %5379 = vrot.lane.b32.xlu1 %v5363_v6, %s8659_s27 }
 0xa30   : > { %5394 = vrot.lane.b32.xlu0 %v5363_v6, %s6108_s30  ;;  %5389 = vrot.lane.b32.xlu1 %v5363_v6, %s6109_s7  ;;  %s8699_s30 = smov 73   ;;  %s8788_s7 = smov 17  }
 0xa34   : > { %5404 = vrot.lane.b32.xlu0 %v5363_v6, %s8660_s17  ;;  %5399 = vrot.lane.b32.xlu1 %v5363_v6, %s8661_s18  ;;  %s8963_s17 = sld [smem:[#allocation51_spill]] }
 0xa38   : > { %5414 = vrot.lane.b32.xlu0 %v5363_v6, %s8662_s9  ;;  %5409 = vrot.lane.b32.xlu1 %v5363_v6, %s8663_s15  ;;  %s8702_s9 = smov 57  }
 0xa3c   : > { %5424 = vrot.lane.b32.xlu0 %v5363_v6, %s8543_s26  ;;  %5419 = vrot.lane.b32.xlu1 %v5363_v6, %s8618_s28 }
 0xa40   : > { %5434 = vrot.lane.b32.xlu0 %v5363_v6, %s8664_s14  ;;  %5429 = vrot.lane.b32.xlu1 %v5363_v6, %s8665_s21 }
 0xa76   : > { %v5285_v10 = vpop.permute.xlu0 %5284  ;;  %v5280_v35 = vpop.permute.xlu1 %5279 }
 0xa77   : > { %v5287_v9 = vunpack.i.h.bf16 %v5285_v10  ;;  %v5286_v42 = vunpack.i.l.bf16 %v5285_v10  ;;  %v5282_v50 = vunpack.i.h.bf16 %v5280_v35  ;;  %v5281_v46 = vunpack.i.l.bf16 %v5280_v35 }
 0xa79   : > { %v2020_v57 = vsel %vm8666_vm13, %v5282_v50, %v5287_v9  ;;  %v2019_v56 = vsel %vm8667_vm12, %v5281_v46, %v5286_v42  ;;  %vm8668_vm13 = vcmask 121856  }
 0xa7a   : > { %v4424_v7 = vpack.c.bf16 %v2020_v57, %v2019_v56  ;;  %v5295_v4 = vpop.permute.xlu0 %5294  ;;  %v5290_v15 = vpop.permute.xlu1 %5289  ;;  %vm8669_vm12 = vmmov %vm8668_vm13 }
 0xa7b   : > { %v5297_v46 = vunpack.i.h.bf16 %v5295_v4  ;;  %v5296_v57 = vunpack.i.l.bf16 %v5295_v4  ;;  %v5291_v56 = vunpack.i.l.bf16 %v5290_v15 }
 0xa7c   : > { %4795 = vmatpush3.bf16.msk.msra.mxu1 %vm7034_vm3, %v4424_v7 }
 0xa7d   : > { %4796 = vmatprep.subr.bf16.mxu1 %v2268_v22  ;;  %v5292_v22 = vunpack.i.h.bf16 %v5290_v15  ;;  %v2147_v63 = vsel %vm8669_vm12, %v5291_v56, %v5296_v57  ;;  %vm8672_vm12 = vcmask 39936  }
 0xa7e   : > { %v5305_v49 = vpop.permute.xlu0 %5304  ;;  %v5300_v40 = vpop.permute.xlu1 %5299 }
 0xa7f   : > { %v2148_v32 = vsel %vm8668_vm13, %v5292_v22, %v5297_v46  ;;  %v5307_v0 = vunpack.i.h.bf16 %v5305_v49  ;;  %v5302_v26 = vunpack.i.h.bf16 %v5300_v40  ;;  %v5306_v8 = vunpack.i.l.bf16 %v5305_v49  ;;  %vm8671_vm13 = vmmov %vm8670_vm7 }
 0xa80   : > { %v5301_v51 = vunpack.i.l.bf16 %v5300_v40  ;;  %v4448_v46 = vpack.c.bf16 %v2148_v32, %v2147_v63 }
 0xa82   : > { %v7198_v6 = vpop.permute.xlu0 %5314  ;;  %v5310_v25 = vpop.permute.xlu1 %5309  ;;  %v2051_v49 = vsel %vm8671_vm13, %v5301_v51, %v5306_v8 }
 0xa83   : > { %v5317_v40 = vunpack.i.h.bf16 %v7198_v6 }
 0xa86   : > { %v7200_v55 = vpop.permute.xlu0 %5324  ;;  %v7202_v10 = vpop.permute.xlu1 %5319 }
 0xa87   : > { %v5327_v8 = vunpack.i.h.bf16 %v7200_v55 }
 0xa8a   : > { %v7204_v35 = vpop.permute.xlu0 %5334  ;;  %v7206_v9 = vpop.permute.xlu1 %5329 }
 0xa8e   : > { %v7208_v42 = vpop.permute.xlu0 %5344  ;;  %v7210_v50 = vpop.permute.xlu1 %5339 }
 0xa92   : > { %v5355_v7 = vpop.permute.xlu0 %5354  ;;  %v5350_v28 = vpop.permute.xlu1 %5349 }
 0xa93   : > { %v5357_v13 = vunpack.i.h.bf16 %v5355_v7  ;;  %v5356_v11 = vunpack.i.l.bf16 %v5355_v7  ;;  %v5352_v48 = vunpack.i.h.bf16 %v5350_v28  ;;  %v5351_v41 = vunpack.i.l.bf16 %v5350_v28 }
 0xa94   : > { %v2052_v28 = vsel %vm8670_vm7, %v5302_v26, %v5307_v0 }
 0xa95   : > { %v2244_v43 = vsel %vm8365_vm0, %v5352_v48, %v5357_v13  ;;  %v2243_v4 = vsel %vm8365_vm0, %v5351_v41, %v5356_v11  ;;  %vm8673_vm0 = vmmov %vm8672_vm12  ;;  %v5311_v11 = vunpack.i.l.bf16 %v5310_v25 }
 0xa96   : > { %v5365_v34 = vpop.permute.xlu0 %5364  ;;  %v5360_v15 = vpop.permute.xlu1 %5359  ;;  %v4466_v37 = vpack.c.bf16 %v2244_v43, %v2243_v4  ;;  %v5312_v43 = vunpack.i.h.bf16 %v5310_v25  ;;  %v4430_v25 = vpack.c.bf16 %v2052_v28, %v2051_v49  ;;  %v5336_v28 = vunpack.i.l.bf16 %v7204_v35 }
 0xa97   : > { %v5367_v27 = vunpack.i.h.bf16 %v5365_v34  ;;  %v5366_v17 = vunpack.i.l.bf16 %v5365_v34  ;;  %v5362_v7 = vunpack.i.h.bf16 %v5360_v15  ;;  %v5361_v16 = vunpack.i.l.bf16 %v5360_v15 }
 0xa98   : > { %4908 = vmatprep.subr.msk.bf16.mxu0 %vm7137_vm15, %v4466_v37  ;;  %v5316_v34 = vunpack.i.l.bf16 %v7198_v6  ;;  %v2180_v22 = vsel %vm1846_vm6, %v5312_v43, %v5317_v40  ;;  %v5331_v49 = vunpack.i.l.bf16 %v7206_v9 }
 0xa99   : > { %v2022_v48 = vsel %vm8672_vm12, %v5362_v7, %v5367_v27  ;;  %v2021_v41 = vsel %vm8673_vm0, %v5361_v16, %v5366_v17  ;;  %4909 = vmatpush3.bf16.msk.msra.mxu0 %vm7137_vm15, %v4466_v37  ;;  %v5326_v27 = vunpack.i.l.bf16 %v7200_v55  ;;  %v5322_v16 = vunpack.i.h.bf16 %v7202_v10 }
 0xa9a   : > { %v4427_v26 = vpack.c.bf16 %v2022_v48, %v2021_v41  ;;  %v5375_v0 = vpop.permute.xlu0 %5374  ;;  %v5370_v13 = vpop.permute.xlu1 %5369  ;;  %v5321_v17 = vunpack.i.l.bf16 %v7202_v10  ;;  %vm8674_vm0 = vcmask 121856   ;;  %v2179_v56 = vsel %vm1846_vm6, %v5311_v11, %v5316_v34 }
 0xa9b   : > { %v5377_v57 = vunpack.i.h.bf16 %v5375_v0  ;;  %v5376_v63 = vunpack.i.l.bf16 %v5375_v0  ;;  %v5372_v32 = vunpack.i.h.bf16 %v5370_v13  ;;  %v5371_v51 = vunpack.i.l.bf16 %v5370_v13  ;;  %vm8675_vm7 = vmmov %vm8674_vm0 }
 0xa9c   : > { %4797 = vmatpush3.bf16.msk.msra.mxu1 %vm7034_vm3, %v4427_v26  ;;  %vm8676_vm3 = vcmask 23552   ;;  %v5337_v0 = vunpack.i.h.bf16 %v7204_v35  ;;  %vm8678_vm12 = vcmask 31744  }
 0xa9d   : > { %v2150_v37 = vsel %vm8674_vm0, %v5372_v32, %v5377_v57  ;;  %v2149_v6 = vsel %vm8675_vm7, %v5371_v51, %v5376_v63  ;;  %4798 = vmatprep.subr.msk.bf16.mxu1 %vm7099_vm2, %v4448_v46  ;;  %v2084_v41 = vsel %vm8676_vm3, %v5322_v16, %v5327_v8  ;;  %vm8677_vm13 = vmmov %vm8676_vm3  ;;  %v5332_v46 = vunpack.i.h.bf16 %v7206_v9 }
 0xa9e   : > { %v5385_v55 = vpop.permute.xlu0 %5384  ;;  %v5380_v4 = vpop.permute.xlu1 %5379  ;;  %v4451_v15 = vpack.c.bf16 %v2150_v37, %v2149_v6  ;;  %v2083_v26 = vsel %vm8677_vm13, %v5321_v17, %v5326_v27  ;;  %vm8679_vm0 = vmmov %vm8678_vm12  ;;  %v4454_v57 = vpack.c.bf16 %v2180_v22, %v2179_v56  ;;  %vm8680_vm7 = vcmask 97280  }
 0xa9f   : > { %v5387_v7 = vunpack.i.h.bf16 %v5385_v55  ;;  %v5386_v10 = vunpack.i.l.bf16 %v5385_v55  ;;  %v5382_v48 = vunpack.i.h.bf16 %v5380_v4  ;;  %v5381_v3 = vunpack.i.l.bf16 %v5380_v4  ;;  %vm8681_vm3 = vmmov %vm8680_vm7 }
 0xaa0   : > { %4799 = vmatpush3.bf16.msk.msra.mxu1 %vm7047_vm5, %v4430_v25  ;;  %v4436_v27 = vpack.c.bf16 %v2084_v41, %v2083_v26  ;;  %v2212_v35 = vsel %vm8680_vm7, %v5332_v46, %v5337_v0  ;;  %v2211_v9 = vsel %vm8681_vm3, %v5331_v49, %v5336_v28  ;;  %v5347_v16 = vunpack.i.h.bf16 %v7208_v42 }
 0xaa1   : > { %v2054_v40 = vsel %vm8678_vm12, %v5382_v48, %v5387_v7  ;;  %v2053_v34 = vsel %vm8679_vm0, %v5381_v3, %v5386_v10  ;;  %4800 = vmatprep.subr.msk.bf16.mxu1 %vm7099_vm2, %v4451_v15  ;;  %v5346_v37 = vunpack.i.l.bf16 %v7208_v42  ;;  %v5342_v6 = vunpack.i.h.bf16 %v7210_v50  ;;  %vm8686_vm12 = vmmov %vm8681_vm3 }
 0xaa2   : > { %v4433_v43 = vpack.c.bf16 %v2054_v40, %v2053_v34  ;;  %v5395_v11 = vpop.permute.xlu0 %5394  ;;  %v5390_v13 = vpop.permute.xlu1 %5389  ;;  %v5341_v25 = vunpack.i.l.bf16 %v7210_v50  ;;  %vm8684_vm2 = vcmask 7168   ;;  %v4460_v0 = vpack.c.bf16 %v2212_v35, %v2211_v9  ;;  %vm8687_vm0 = vmmov %vm8681_vm3 }
 0xaa3   : > { %v5397_v63 = vunpack.i.h.bf16 %v5395_v11  ;;  %v5396_v32 = vunpack.i.l.bf16 %v5395_v11  ;;  %v5392_v51 = vunpack.i.h.bf16 %v5390_v13  ;;  %v5391_v8 = vunpack.i.l.bf16 %v5390_v13 }
 0xaa4   : > { %4801 = vmatpush3.bf16.msk.msra.mxu1 %vm7047_vm5, %v4433_v43  ;;  %v2116_v42 = vsel %vm8684_vm2, %v5342_v6, %v5347_v16  ;;  %vm8690_vm7 = vcmask 89088   ;;  %vm8692_vm3 = vcmask 1043456  }
 0xaa5   : > { %v2182_v33 = vsel %vm1846_vm6, %v5392_v51, %v5397_v63  ;;  %v2181_v17 = vsel %vm1846_vm6, %v5391_v8, %v5396_v32  ;;  %4802 = vmatprep.subr.msk.bf16.mxu1 %vm7112_vm4, %v4454_v57  ;;  %vm8682_vm6 = vmmov %vm8677_vm13 }
 0xaa6   : > { %v5405_v22 = vpop.permute.xlu0 %5404  ;;  %v5400_v1 = vpop.permute.xlu1 %5399  ;;  %v4457_v56 = vpack.c.bf16 %v2182_v33, %v2181_v17  ;;  %vm8683_vm5 = vmmov %vm8682_vm6 }
 0xaa7   : > { %v5407_v55 = vunpack.i.h.bf16 %v5405_v22  ;;  %v5406_v4 = vunpack.i.l.bf16 %v5405_v22  ;;  %v5402_v15 = vunpack.i.h.bf16 %v5400_v1  ;;  %v5401_v7 = vunpack.i.l.bf16 %v5400_v1  ;;  %vm8685_vm13 = vmmov %vm8684_vm2  ;;  %v6026_v22 = vld [vmem:[%s8143_s10 + $0x1c] ss:$12 sps:$4 sm:$0xff]  }
 0xaa8   : > { %4803 = vmatpush3.bf16.msk.msra.mxu1 %vm7065_vm14, %v4436_v27  ;;  %v2115_v50 = vsel %vm8685_vm13, %v5341_v25, %v5346_v37  ;;  %v6023_v25 = vld [vmem:[%s8143_s10] ss:$12 sps:$4 sm:$0xff]  }
 0xaa9   : > { %v2086_v10 = vsel %vm8682_vm6, %v5402_v15, %v5407_v55  ;;  %v2085_v48 = vsel %vm8683_vm5, %v5401_v7, %v5406_v4  ;;  %4804 = vmatprep.subr.msk.bf16.mxu1 %vm7112_vm4, %v4457_v56  ;;  %v4442_v43 = vpack.c.bf16 %v2116_v42, %v2115_v50  ;;  %vm8688_vm4 = vmmov %vm8684_vm2  ;;  %v6030_v55 = vld [vmem:[%s8143_s10 + $0x20] ss:$12 sps:$4 sm:$0xff]   ;;  %v8694_v4 = vmov 0.0  }
 0xaaa   : > { %v4439_v3 = vpack.c.bf16 %v2086_v10, %v2085_v48  ;;  %v5415_v41 = vpop.permute.xlu0 %5414  ;;  %v5410_v26 = vpop.permute.xlu1 %5409  ;;  %vm8697_vm5 = vmmov 0  }
 0xaab   : > { %v5417_v46 = vunpack.i.h.bf16 %v5415_v41  ;;  %v5416_v28 = vunpack.i.l.bf16 %v5415_v41  ;;  %v5412_v49 = vunpack.i.h.bf16 %v5410_v26  ;;  %v5411_v40 = vunpack.i.l.bf16 %v5410_v26 }
 0xaac   : > { %4805 = vmatpush3.bf16.msk.msra.mxu1 %vm7065_vm14, %v4439_v3  ;;  %vm8689_vm14 = vmmov %vm8684_vm2  ;;  %vm8703_vm2 = vcmask 72704  }
 0xaad   : > { %v2214_v34 = vsel %vm8686_vm12, %v5412_v49, %v5417_v46  ;;  %v2213_v58 = vsel %vm8687_vm0, %v5411_v40, %v5416_v28  ;;  %4806 = vmatprep.subr.msk.bf16.mxu1 %vm7124_vm1, %v4460_v0  ;;  %vm8704_vm13 = vmmov %vm8703_vm2 }
 0xaae   : > { %v5425_v11 = vpop.permute.xlu0 %5424  ;;  %v5420_v13 = vpop.permute.xlu1 %5419  ;;  %v4463_v57 = vpack.c.bf16 %v2214_v34, %v2213_v58  ;;  %vm8705_vm12 = vmmov %vm8703_vm2 }
 0xaaf   : > { %v5427_v63 = vunpack.i.h.bf16 %v5425_v11  ;;  %v5426_v32 = vunpack.i.l.bf16 %v5425_v11  ;;  %v5422_v51 = vunpack.i.h.bf16 %v5420_v13  ;;  %v5421_v8 = vunpack.i.l.bf16 %v5420_v13  ;;  %vm8706_vm0 = vmmov %vm8703_vm2 }
 0xab0   : > { %4807 = vmatpush3.bf16.msk.msra.mxu1 %vm7078_vm10, %v4442_v43 }
 0xab1   : > { %v2118_v23 = vsel %vm8688_vm4, %v5422_v51, %v5427_v63  ;;  %v2117_v27 = vsel %vm8689_vm14, %v5421_v8, %v5426_v32  ;;  %4808 = vmatprep.subr.msk.bf16.mxu1 %vm7124_vm1, %v4463_v57  ;;  %vm8691_vm1 = vmmov %vm8690_vm7  ;;  %vm8707_vm4 = vcmask 515072  }
 0xab2   : > { %v4445_v35 = vpack.c.bf16 %v2118_v23, %v2117_v27  ;;  %v5435_v9 = vpop.permute.xlu0 %5434  ;;  %v5430_v16 = vpop.permute.xlu1 %5429  ;;  %vm8708_vm14 = vmmov %vm8707_vm4 }
 0xab3   : > { %v5437_v33 = vunpack.i.h.bf16 %v5435_v9  ;;  %v5436_v17 = vunpack.i.l.bf16 %v5435_v9  ;;  %v5432_v37 = vunpack.i.h.bf16 %v5430_v16  ;;  %v5431_v6 = vunpack.i.l.bf16 %v5430_v16 }
 0xab4   : > { %4809 = vmatpush3.bf16.msk.msra.mxu1 %vm7078_vm10, %v4445_v35  ;;  %vm8693_vm10 = vcmask 326656  }
 0xab5   : > { %v2246_v36 = vsel %vm8690_vm7, %v5432_v37, %v5437_v33  ;;  %v2245_v1 = vsel %vm8691_vm1, %v5431_v6, %v5436_v17  ;;  %4918 = vmatprep.subr.bf16.mxu1 %v6031_v31  ;;  %vm8709_vm7 = vmmov %vm8707_vm4 }
 0xab6   : > { %v4469_v56 = vpack.c.bf16 %v2246_v36, %v2245_v1  ;;  %vm8710_vm1 = vmmov %vm8707_vm4 }
 0xab7   : > { %2347 = vmatmul.mubr.bf16.vlgmr.msra.gmra.mrb[12].mxu1 %v6023_v25 }
 0xab8   : > { %4910 = vmatprep.subr.msk.bf16.mxu0 %vm7137_vm15, %v4469_v56  ;;  %2354 = vmatprep.mubr.bf16.mxu1 %v6026_v22  ;;  %v6034_v22 = vld [vmem:[%s8144_s11 + $0x4] ss:$12 sps:$4 sm:$0xff]  }
 0xab9   : > { %4911 = vmatpush3.bf16.msk.msra.mxu0 %vm7137_vm15, %v4469_v56  ;;  %4919 = vmatpush3.bf16.msra.mxu1 %v6031_v31  ;;  %vm8695_vm15 = vcmask 130048  }
 0xaba   : > { %4944 = vmatprep.subr.msk.bf16.mxu0 %vm8692_vm3, %v6899_v29  ;;  %4924 = vmatprep.subr.bf16.mxu1 %v8694_v4  ;;  %vm8696_vm6 = vmmov %vm8695_vm15  ;;  %vm8711_vm3 = vcmask 64512  }
 0xabd   : > { %4913 = vmatpush3.bf16.msra.mxu0 %v6914_v2 }
 0xabf   : > { %2355 = vmatmul.mubr.bf16.gmra.mrb[16].mxu1 %v6028_v54 }
 0xac0   : > { %4915 = vmatmul.mubr.msk.bf16.vlgmr.msra.gmra.mrb[20].mxu0 %vm8693_vm10, %v6030_v55  ;;  %vm8712_vm10 = vmmov %vm8711_vm3 }
 0xac1   : > { %2813 = vmatprep.mubr.bf16.mxu0 %v6034_v22 }
 0xb8a   : > { %v4810_v15 = vpop.f32.mrb[12].mxu1 }
 0xb8b   : > { %v4811_v7 = vpop.f32.mrb[13].mxu1 }
 0xb8c   : > { %v4812_v10 = vadd.f32 %v4811_v7, %v4810_v15  ;;  %v4813_v48 = vpop.f32.mrb[14].mxu1 }
 0xb8d   : > { %v4814_v42 = vpop.f32.mrb[15].mxu1 }
 0xb8e   : > { %v4815_v50 = vadd.f32 %v4814_v42, %v4813_v48 }
 0xb92   : > { %v4816_v3 = vpop.f32.mrb[16].mxu1 }
 0xb93   : > { %v4817_v41 = vpop.f32.mrb[17].mxu1  ;;  %v4916_v26 = vpop.f32.mrb[20].mxu0 }
 0xb94   : > { %v4818_v0 = vadd.f32 %v4817_v41, %v4816_v3  ;;  %v4819_v46 = vpop.f32.mrb[18].mxu1  ;;  %v2397_v28 = vpop.f32.mrb[21].mxu0 }
 0xb95   : > { %v2398_v49 = vadd.f32 %v4812_v10, %v2397_v28  ;;  %v4820_v40 = vpop.f32.mrb[19].mxu1  ;;  %v4917_v34 = vpop.f32.mrb[22].mxu0 }
 0xb96   : > { %v2406_v58 = vadd.f32 %v4916_v26, %v4818_v0  ;;  %v4821_v43 = vadd.f32 %v4820_v40, %v4819_v46  ;;  %v2400_v11 = vpop.f32.mrb[23].mxu0 }
 0xb97   : > { %v2401_v13 = vadd.f32 %v4815_v50, %v2400_v11  ;;  %v2412_v63 = vmax.f32 %v2398_v49, 0.0 }
 0xb98   : > { %v2409_v57 = vadd.f32 %v4917_v34, %v4821_v43  ;;  %v2414_v51 = vmax.f32 %v2406_v58, 0.0 }
 0xb99   : > { %v2413_v32 = vmax.f32 %v2401_v13, 0.0 }
 0xb9a   : > { %v2415_v8 = vmax.f32 %v2409_v57, 0.0 }
 0xb9b   : > { %v2416_v23 = vpack.c.bf16 %v2413_v32, %v2412_v63 }
 0xb9c   : > { %v2417_v27 = vpack.c.bf16 %v2415_v8, %v2414_v51 }
 0xb9d   : > { %4920 = vmatprep.mubr.msk.bf16.mxu1 %vm8695_vm15, %v2416_v23  ;;  %vm8713_vm15 = vmmov %vm8711_vm3 }
 0xb9e   : > { %4921 = vmatmul.mubr.msk.bf16.vlgmr.msra.gmra.mrb[20].mxu1 %vm8696_vm6, %v2417_v27  ;;  %vm8714_vm6 = vmmov %vm8711_vm3 }
 0xb9f   : > { %4930 = vmatprep.mubr.msk.bf16.mxu1 %vm8697_vm5, %v8694_v4 }
 0xc71   : > { %v7314_v35 = vpop.f32.mrb[20].mxu1 }
 0xc72   : > { %v2466_v9 = vpop.f32.mrb[21].mxu1 }
 0xc73   : > { %v7316_v16 = vpop.f32.mrb[22].mxu1 }
 0xc74   : > { %v2469_v33 = vpop.f32.mrb[23].mxu1  ;;  %v5443_v17 = vpack.i.bf16 %v7316_v16, %v7314_v35  ;;  %v2754_v25 = vpack.c.bf16 %v7316_v16, %v7314_v35 }
 0xc75   : > { %v2753_v37 = vpack.c.bf16 %v2469_v33, %v2466_v9  ;;  %v5513_v6 = vpack.i.bf16 %v2469_v33, %v2466_v9 }
 0xc76   : > { %5444 = vrot.lane.b32.xlu0 %v5443_v17, %s8698_s16  ;;  %5439 = vrot.lane.b32.xlu1 %v5443_v17, %s8699_s30 }
 0xc77   : > { %4830 = vmatprep.subr.bf16.mxu0 %v2753_v37 }
 0xc7a   : > { %5454 = vrot.lane.b32.xlu0 %v5443_v17, %s8573_s1  ;;  %5449 = vrot.lane.b32.xlu1 %v5443_v17, %s8574_s22 }
 0xc7e   : > { %5464 = vrot.lane.b32.xlu0 %v5443_v17, %s8700_s8  ;;  %5459 = vrot.lane.b32.xlu1 %v5443_v17, %s8701_s4 }
 0xc82   : > { %5474 = vrot.lane.b32.xlu0 %v5443_v17, %s8702_s9  ;;  %5469 = vrot.lane.b32.xlu1 %v5443_v17, %s8575_s2 }
 0xc86   : > { %5484 = vrot.lane.b32.xlu0 %v5443_v17, %s8570_s19  ;;  %5479 = vrot.lane.b32.xlu1 %v5443_v17, %s8571_s29 }
 0xc8a   : > { %5494 = vrot.lane.b32.xlu0 %v5443_v17, %s8576_s20  ;;  %5489 = vrot.lane.b32.xlu1 %v5443_v17, %s8577_s24 }
 0xc8e   : > { %5504 = vrot.lane.b32.xlu0 %v5443_v17, %s8578_s0  ;;  %5499 = vrot.lane.b32.xlu1 %v5443_v17, %s8579_s5 }
 0xc92   : > { %5514 = vrot.lane.b32.xlu0 %v5513_v6, %s8698_s16  ;;  %5509 = vrot.lane.b32.xlu1 %v5513_v6, %s8699_s30 }
 0xc96   : > { %5524 = vrot.lane.b32.xlu0 %v5513_v6, %s8573_s1  ;;  %5519 = vrot.lane.b32.xlu1 %v5513_v6, %s8574_s22 }
 0xc9a   : > { %5534 = vrot.lane.b32.xlu0 %v5513_v6, %s8700_s8  ;;  %5529 = vrot.lane.b32.xlu1 %v5513_v6, %s8701_s4 }
 0xc9e   : > { %5544 = vrot.lane.b32.xlu0 %v5513_v6, %s8702_s9  ;;  %5539 = vrot.lane.b32.xlu1 %v5513_v6, %s8575_s2 }
 0xca2   : > { %5554 = vrot.lane.b32.xlu0 %v5513_v6, %s8570_s19  ;;  %5549 = vrot.lane.b32.xlu1 %v5513_v6, %s8571_s29 }
 0xca6   : > { %5564 = vrot.lane.b32.xlu0 %v5513_v6, %s8576_s20  ;;  %5559 = vrot.lane.b32.xlu1 %v5513_v6, %s8577_s24 }
 0xcaa   : > { %5574 = vrot.lane.b32.xlu0 %v5513_v6, %s8578_s0  ;;  %5569 = vrot.lane.b32.xlu1 %v5513_v6, %s8579_s5 }
 0xcae   : > { %5589 = vrot.lane.b32.xlu0 %v5513_v6, %s8543_s26  ;;  %5579 = vrot.lane.b32.xlu1 %v5513_v6, %s8572_s23 }
 0xcb2   : > { %5594 = vrot.lane.b32.xlu0 %v5443_v17, %s8543_s26  ;;  %5584 = vrot.lane.b32.xlu1 %v5443_v17, %s8572_s23 }
 0xcb6   : > { %5604 = vrot.lane.b32.xlu0 %v6937_v53, %s8698_s16  ;;  %5599 = vrot.lane.b32.xlu1 %v6937_v53, %s8699_s30 }
 0xcba   : > { %5614 = vrot.lane.b32.xlu0 %v6937_v53, %s8700_s8  ;;  %5609 = vrot.lane.b32.xlu1 %v6937_v53, %s8701_s4 }
 0xcbe   : > { %5624 = vrot.lane.b32.xlu0 %v6937_v53, %s8702_s9  ;;  %5619 = vrot.lane.b32.xlu1 %v6937_v53, %s8575_s2 }
 0xcc2   : > { %5634 = vrot.lane.b32.xlu0 %v6937_v53, %s8570_s19  ;;  %5629 = vrot.lane.b32.xlu1 %v6937_v53, %s8571_s29 }
 0xcc6   : > { %5644 = vrot.lane.b32.xlu0 %v6937_v53, %s8543_s26  ;;  %5639 = vrot.lane.b32.xlu1 %v6937_v53, %s8572_s23 }
 0xce8   : > { %v5445_v36 = vpop.permute.xlu0 %5444  ;;  %v5440_v1 = vpop.permute.xlu1 %5439 }
 0xce9   : > { %v5447_v41 = vunpack.i.h.bf16 %v5445_v36  ;;  %v5446_v26 = vunpack.i.l.bf16 %v5445_v36  ;;  %v5442_v0 = vunpack.i.h.bf16 %v5440_v1  ;;  %v5441_v46 = vunpack.i.l.bf16 %v5440_v1 }
 0xceb   : > { %v2512_v8 = vsel %vm8705_vm12, %v5442_v0, %v5447_v41  ;;  %v2511_v23 = vsel %vm8706_vm0, %v5441_v46, %v5446_v26 }
 0xcec   : > { %v5455_v56 = vpop.permute.xlu0 %5454  ;;  %v5450_v54 = vpop.permute.xlu1 %5449  ;;  %v4483_v46 = vpack.c.bf16 %v2512_v8, %v2511_v23 }
 0xced   : > { %v5457_v11 = vunpack.i.h.bf16 %v5455_v56  ;;  %v5456_v13 = vunpack.i.l.bf16 %v5455_v56  ;;  %v5452_v57 = vunpack.i.h.bf16 %v5450_v54  ;;  %v5451_v63 = vunpack.i.l.bf16 %v5450_v54 }
 0xcef   : > { %v2640_v36 = vsel %vm8707_vm4, %v5452_v57, %v5457_v11  ;;  %v2639_v1 = vsel %vm8708_vm14, %v5451_v63, %v5456_v13  ;;  %vm8719_vm4 = vcmask 56320  }
 0xcf0   : > { %v5465_v55 = vpop.permute.xlu0 %5464  ;;  %v5460_v31 = vpop.permute.xlu1 %5459  ;;  %vm8720_vm14 = vmmov %vm8719_vm4 }
 0xcf1   : > { %v5467_v56 = vunpack.i.h.bf16 %v5465_v55  ;;  %v5462_v54 = vunpack.i.h.bf16 %v5460_v31  ;;  %v5461_v41 = vunpack.i.l.bf16 %v5460_v31 }
 0xcf3   : > { %v2544_v57 = vsel %vm8711_vm3, %v5462_v54, %v5467_v56  ;;  %vm8723_vm3 = vnez %v8604_v14  ;;  %v6042_v14 = vld [vmem:[%s8146_s13] ss:$8 sps:$4 sm:$0xff]  }
 0xcf4   : > { %v7377_v15 = vpop.permute.xlu0 %5474  ;;  %v7379_v7 = vpop.permute.xlu1 %5469 }
 0xcf5   : > { %v5477_v63 = vunpack.i.h.bf16 %v7377_v15 }
 0xcf8   : > { %v7381_v10 = vpop.permute.xlu0 %5484  ;;  %v7383_v48 = vpop.permute.xlu1 %5479 }
 0xcfc   : > { %v7385_v42 = vpop.permute.xlu0 %5494  ;;  %v7387_v50 = vpop.permute.xlu1 %5489 }
 0xd00   : > { %v7389_v3 = vpop.permute.xlu0 %5504  ;;  %v7391_v53 = vpop.permute.xlu1 %5499 }
 0xd04   : > { %v5515_v28 = vpop.permute.xlu0 %5514  ;;  %v5510_v49 = vpop.permute.xlu1 %5509 }
 0xd05   : > { %v5517_v40 = vunpack.i.h.bf16 %v5515_v28  ;;  %v5516_v34 = vunpack.i.l.bf16 %v5515_v28  ;;  %v5512_v58 = vunpack.i.h.bf16 %v5510_v49  ;;  %v5511_v43 = vunpack.i.l.bf16 %v5510_v49 }
 0xd06   : > { %v5466_v28 = vunpack.i.l.bf16 %v5465_v55  ;;  %v4507_v55 = vpack.c.bf16 %v2640_v36, %v2639_v1  ;;  %v5481_v36 = vunpack.i.l.bf16 %v7383_v48 }
 0xd07   : > { %v2510_v32 = vsel %vm8703_vm2, %v5512_v58, %v5517_v40  ;;  %v2509_v51 = vsel %vm8704_vm13, %v5511_v43, %v5516_v34  ;;  %vm8715_vm2 = vcmask 465920  }
 0xd08   : > { %v4480_v27 = vpack.c.bf16 %v2510_v32, %v2509_v51  ;;  %v5525_v9 = vpop.permute.xlu0 %5524  ;;  %v5520_v33 = vpop.permute.xlu1 %5519  ;;  %v2543_v31 = vsel %vm8712_vm10, %v5461_v41, %v5466_v28  ;;  %v5472_v32 = vunpack.i.h.bf16 %v7379_v7  ;;  %v5471_v51 = vunpack.i.l.bf16 %v7379_v7  ;;  %vm8716_vm13 = vmmov %vm8715_vm2 }
 0xd09   : > { %v5527_v17 = vunpack.i.h.bf16 %v5525_v9  ;;  %v5526_v37 = vunpack.i.l.bf16 %v5525_v9  ;;  %v5522_v6 = vunpack.i.h.bf16 %v5520_v33  ;;  %v5521_v22 = vunpack.i.l.bf16 %v5520_v33  ;;  %vm8717_vm12 = vmmov %vm8715_vm2 }
 0xd0a   : > { %4831 = vmatpush3.bf16.msk.msra.mxu0 %vm6812_vm9, %v4480_v27  ;;  %v4489_v56 = vpack.c.bf16 %v2544_v57, %v2543_v31  ;;  %v2672_v54 = vsel %vm8717_vm12, %v5472_v32, %v5477_v63  ;;  %vm8718_vm0 = vmmov %vm8715_vm2  ;;  %v5497_v32 = vunpack.i.h.bf16 %v7385_v42  ;;  %vm8724_vm10 = vnez %v8590_v5 }
 0xd0b   : > { %v2638_v26 = vsel %vm8709_vm7, %v5522_v6, %v5527_v17  ;;  %v2637_v0 = vsel %vm8710_vm1, %v5521_v22, %v5526_v37  ;;  %4832 = vmatprep.subr.bf16.mxu0 %v2754_v25  ;;  %v5476_v25 = vunpack.i.l.bf16 %v7377_v15  ;;  %v5487_v6 = vunpack.i.h.bf16 %v7381_v10  ;;  %vm8721_vm7 = vmmov %vm8719_vm4 }
 0xd0c   : > { %v4504_v49 = vpack.c.bf16 %v2638_v26, %v2637_v0  ;;  %v5535_v40 = vpop.permute.xlu0 %5534  ;;  %v5530_v34 = vpop.permute.xlu1 %5529  ;;  %v5486_v22 = vunpack.i.l.bf16 %v7381_v10  ;;  %v5482_v15 = vunpack.i.h.bf16 %v7383_v48  ;;  %vm8722_vm1 = vmmov %vm8719_vm4 }
 0xd0d   : > { %v5537_v58 = vunpack.i.h.bf16 %v5535_v40  ;;  %v5536_v43 = vunpack.i.l.bf16 %v5535_v40  ;;  %v5532_v11 = vunpack.i.h.bf16 %v5530_v34  ;;  %v5531_v13 = vunpack.i.l.bf16 %v5530_v34 }
 0xd0e   : > { %4833 = vmatpush3.bf16.msk.msra.mxu0 %vm6812_vm9, %v4483_v46  ;;  %v2671_v28 = vsel %vm8718_vm0, %v5471_v51, %v5476_v25  ;;  %v2576_v48 = vsel %vm8719_vm4, %v5482_v15, %v5487_v6  ;;  %v2575_v34 = vsel %vm8720_vm14, %v5481_v36, %v5486_v22  ;;  %v5496_v51 = vunpack.i.l.bf16 %v7385_v42 }
 0xd0f   : > { %v2542_v35 = vsel %vm8713_vm15, %v5532_v11, %v5537_v58  ;;  %v2541_v16 = vsel %vm8714_vm6, %v5531_v13, %v5536_v43  ;;  %4834 = vmatprep.subr.msk.bf16.mxu0 %vm6863_vm11, %v4504_v49  ;;  %v4495_v25 = vpack.c.bf16 %v2576_v48, %v2575_v34  ;;  %vm8725_vm15 = vcmask 457728  }
 0xd10   : > { %v4486_v8 = vpack.c.bf16 %v2542_v35, %v2541_v16  ;;  %v5545_v23 = vpop.permute.xlu0 %5544  ;;  %v5540_v27 = vpop.permute.xlu1 %5539  ;;  %vm8726_vm6 = vmmov %vm8725_vm15  ;;  %v5502_v42 = vunpack.i.h.bf16 %v7391_v53  ;;  %vm8730_vm0 = vnez %v8608_v60 }
 0xd11   : > { %v5547_v9 = vunpack.i.h.bf16 %v5545_v23  ;;  %v5546_v33 = vunpack.i.l.bf16 %v5545_v23  ;;  %v5542_v17 = vunpack.i.h.bf16 %v5540_v27  ;;  %v5541_v37 = vunpack.i.l.bf16 %v5540_v27 }
 0xd12   : > { %4835 = vmatpush3.bf16.msk.msra.mxu0 %vm6826_vm8, %v4486_v8  ;;  %v5492_v8 = vunpack.i.h.bf16 %v7387_v50  ;;  %v5491_v23 = vunpack.i.l.bf16 %v7387_v50  ;;  %v5507_v27 = vunpack.i.h.bf16 %v7389_v3 }
 0xd13   : > { %v2670_v7 = vsel %vm8715_vm2, %v5542_v17, %v5547_v9  ;;  %v2669_v1 = vsel %vm8716_vm13, %v5541_v37, %v5546_v33  ;;  %4836 = vmatprep.subr.msk.bf16.mxu0 %vm6863_vm11, %v4507_v55  ;;  %v4513_v55 = vpack.c.bf16 %v2672_v54, %v2671_v28  ;;  %v5506_v17 = vunpack.i.l.bf16 %v7389_v3  ;;  %vm8727_vm2 = vmmov %vm8726_vm6 }
 0xd14   : > { %v4510_v10 = vpack.c.bf16 %v2670_v7, %v2669_v1  ;;  %v5555_v41 = vpop.permute.xlu0 %5554  ;;  %v5550_v26 = vpop.permute.xlu1 %5549  ;;  %v5501_v37 = vunpack.i.l.bf16 %v7391_v53  ;;  %vm8728_vm13 = vcmask 449536   ;;  %vm8731_vm4 = vmmov %vm8727_vm2 }
 0xd15   : > { %v5557_v0 = vunpack.i.h.bf16 %v5555_v41  ;;  %v5556_v46 = vunpack.i.l.bf16 %v5555_v41  ;;  %v5552_v49 = vunpack.i.h.bf16 %v5550_v26  ;;  %v5551_v40 = vunpack.i.l.bf16 %v5550_v26  ;;  %vm8729_vm12 = vmmov %vm8728_vm13 }
 0xd16   : > { %4837 = vmatpush3.bf16.msk.msra.mxu0 %vm6826_vm8, %v4489_v56  ;;  %v2704_v56 = vsel %vm8727_vm2, %v5492_v8, %v5497_v32  ;;  %v2703_v53 = vsel %vm8731_vm4, %v5491_v23, %v5496_v51  ;;  %vm8732_vm14 = vmmov %vm8729_vm12  ;;  %vm8737_vm2 = vnez %v8594_v62  ;;  %vm8740_vm4 = vcmask 72704  }
 0xd17   : > { %v2574_v58 = vsel %vm8721_vm7, %v5552_v49, %v5557_v0  ;;  %v2573_v43 = vsel %vm8722_vm1, %v5551_v40, %v5556_v46  ;;  %4838 = vmatprep.subr.msk.bf16.mxu0 %vm8723_vm3, %v4510_v10  ;;  %v2736_v28 = vsel %vm8732_vm14, %v5502_v42, %v5507_v27  ;;  %vm8733_vm7 = vmmov %vm8729_vm12  ;;  %vm8734_vm1 = vnez %v8611_v52 }
 0xd18   : > { %v4492_v11 = vpack.c.bf16 %v2574_v58, %v2573_v43  ;;  %v5565_v13 = vpop.permute.xlu0 %5564  ;;  %v5560_v57 = vpop.permute.xlu1 %5559  ;;  %v2735_v10 = vsel %vm8733_vm7, %v5501_v37, %v5506_v17  ;;  %v3093_v27 = vpack.c.bf16 %v6929_v12, %v6927_v61  ;;  %v6032_v37 = vld [vmem:[%s8144_s11] ss:$12 sps:$4 sm:$0xff]   ;;  %vm8741_vm14 = vmmov %vm8740_vm4  ;;  %vm8742_vm7 = vcmask 326656  }
 0xd19   : > { %v5567_v31 = vunpack.i.h.bf16 %v5565_v13  ;;  %v5566_v63 = vunpack.i.l.bf16 %v5565_v13  ;;  %v5562_v35 = vunpack.i.h.bf16 %v5560_v57  ;;  %v5561_v16 = vunpack.i.l.bf16 %v5560_v57 }
 0xd1a   : > { %4839 = vmatpush3.bf16.msk.msra.mxu0 %vm8724_vm10, %v4492_v11  ;;  %v4525_v43 = vpack.c.bf16 %v2736_v28, %v2735_v10 }
 0xd1b   : > { %v2702_v9 = vsel %vm8725_vm15, %v5562_v35, %v5567_v31  ;;  %v2701_v33 = vsel %vm8726_vm6, %v5561_v16, %v5566_v63  ;;  %4840 = vmatprep.subr.msk.bf16.mxu0 %vm8723_vm3, %v4513_v55  ;;  %vm8735_vm15 = vcmask 7168   ;;  %v4519_v55 = vpack.c.bf16 %v2704_v56, %v2703_v53 }
 0xd1c   : > { %v4516_v6 = vpack.c.bf16 %v2702_v9, %v2701_v33  ;;  %v5575_v22 = vpop.permute.xlu0 %5574  ;;  %v5570_v15 = vpop.permute.xlu1 %5569  ;;  %vm8736_vm6 = vmmov %vm8735_vm15 }
 0xd1d   : > { %v5577_v36 = vunpack.i.h.bf16 %v5575_v22  ;;  %v5576_v50 = vunpack.i.l.bf16 %v5575_v22  ;;  %v5572_v7 = vunpack.i.h.bf16 %v5570_v15  ;;  %v5571_v1 = vunpack.i.l.bf16 %v5570_v15 }
 0xd1e   : > { %4841 = vmatpush3.bf16.msk.msra.mxu0 %vm8724_vm10, %v4495_v25  ;;  %v8743_v15 = vpack.c.bf16 %v6979_v45, %v6982_v39 }
 0xd1f   : > { %v2734_v54 = vsel %vm8728_vm13, %v5572_v7, %v5577_v36  ;;  %v2733_v3 = vsel %vm8729_vm12, %v5571_v1, %v5576_v50  ;;  %4842 = vmatprep.subr.msk.bf16.mxu0 %vm8730_vm0, %v4516_v6  ;;  %vm8738_vm13 = vmmov %vm8736_vm6  ;;  %v6035_v6 = vld [vmem:[%s8144_s11 + $0x8] ss:$12 sps:$4 sm:$0xff]  }
 0xd20   : > { %v4522_v41 = vpack.c.bf16 %v2734_v54, %v2733_v3  ;;  %v5590_v26 = vpop.permute.xlu0 %5589  ;;  %v5580_v0 = vpop.permute.xlu1 %5579  ;;  %vm8739_vm12 = vmmov %vm8736_vm6 }
 0xd21   : > { %v5592_v46 = vunpack.i.h.bf16 %v5590_v26  ;;  %v5591_v49 = vunpack.i.l.bf16 %v5590_v26  ;;  %v5582_v40 = vunpack.i.h.bf16 %v5580_v0  ;;  %v5581_v48 = vunpack.i.l.bf16 %v5580_v0 }
 0xd22   : > { %4925 = vmatpush3.bf16.msk.msra.mxu1 %vm8734_vm1, %v4522_v41 }
 0xd23   : > { %v2606_v34 = vsel %vm8735_vm15, %v5582_v40, %v5592_v46  ;;  %v2605_v58 = vsel %vm8736_vm6, %v5581_v48, %v5591_v49  ;;  %4926 = vmatprep.subr.bf16.mxu1 %v8694_v4  ;;  %v6038_v49 = vld [vmem:[%s8145_s12 + $0x4] ss:$12 sps:$4 sm:$0xff]   ;;  %vm8746_vm6 = vmmov %vm8740_vm4 }
 0xd24   : > { %v4498_v11 = vpack.c.bf16 %v2606_v34, %v2605_v58  ;;  %v5595_v13 = vpop.permute.xlu0 %5594  ;;  %v5585_v57 = vpop.permute.xlu1 %5584 }
 0xd25   : > { %v5597_v31 = vunpack.i.h.bf16 %v5595_v13  ;;  %v5596_v63 = vunpack.i.l.bf16 %v5595_v13  ;;  %v5587_v35 = vunpack.i.h.bf16 %v5585_v57  ;;  %v5586_v16 = vunpack.i.l.bf16 %v5585_v57 }
 0xd26   : > { %4843 = vmatpush3.bf16.msk.msra.mxu0 %vm8737_vm2, %v4498_v11  ;;  %4927 = vmatpush3.bf16.msk.msra.mxu1 %vm8734_vm1, %v4525_v43 }
 0xd27   : > { %v2608_v25 = vsel %vm8738_vm13, %v5587_v35, %v5597_v31  ;;  %v2607_v32 = vsel %vm8739_vm12, %v5586_v16, %v5596_v63  ;;  %4844 = vmatprep.subr.msk.bf16.mxu0 %vm8730_vm0, %v4519_v55  ;;  %4928 = vmatprep.subr.bf16.mxu1 %v8694_v4  ;;  %vm8747_vm13 = vmmov %vm8740_vm4  ;;  %vm8748_vm12 = vcmask 465920  }
 0xd28   : > { %v4501_v51 = vpack.c.bf16 %v2608_v25, %v2607_v32  ;;  %v5605_v8 = vpop.permute.xlu0 %5604  ;;  %v5600_v23 = vpop.permute.xlu1 %5599 }
 0xd29   : > { %v5607_v9 = vunpack.i.h.bf16 %v5605_v8  ;;  %v5606_v33 = vunpack.i.l.bf16 %v5605_v8  ;;  %v5602_v17 = vunpack.i.h.bf16 %v5600_v23  ;;  %v5601_v42 = vunpack.i.l.bf16 %v5600_v23 }
 0xd2a   : > { %4845 = vmatpush3.bf16.msk.msra.mxu0 %vm8737_vm2, %v4501_v51  ;;  %4929 = vmatpush3.bf16.msra.mxu1 %v6914_v2 }
 0xd2b   : > { %v2892_v22 = vsel %vm8740_vm4, %v5602_v17, %v5607_v9  ;;  %v2891_v61 = vsel %vm8741_vm14, %v5601_v42, %v5606_v33  ;;  %4856 = vmatprep.subr.bf16.mxu1 %v3093_v27  ;;  %4934 = vmatprep.subr.bf16.mxu0 %v8694_v4  ;;  %vm8749_vm4 = vmmov %vm8748_vm12  ;;  %vm8750_vm14 = vcmask 515072  }
 0xd2c   : > { %v4532_v12 = vpack.c.bf16 %v2892_v22, %v2891_v61  ;;  %v5615_v40 = vpop.permute.xlu0 %5614  ;;  %v5610_v48 = vpop.permute.xlu1 %5609 }
 0xd2d   : > { %2814 = vmatmul.mubr.bf16.vlgmr.msra.gmra.mrb[24].mxu0 %v6032_v37  ;;  %4931 = vmatmul.mubr.msk.bf16.vlgmr.msra.gmra.mrb[24].mxu1 %vm8742_vm7, %v6035_v6  ;;  %v5617_v55 = vunpack.i.h.bf16 %v5615_v40  ;;  %v5616_v31 = vunpack.i.l.bf16 %v5615_v40  ;;  %v5612_v63 = vunpack.i.h.bf16 %v5610_v48  ;;  %v5611_v35 = vunpack.i.l.bf16 %v5610_v48  ;;  %vm8751_vm7 = vmmov %vm8750_vm14 }
 0xd2e   : > { %4857 = vmatpush3.bf16.msk.msra.mxu1 %vm6812_vm9, %v4532_v12  ;;  %4935 = vmatpush3.bf16.msk.msra.mxu0 %vm8734_vm1, %v8743_v15 }
 0xd2f   : > { %4936 = vmatprep.subr.bf16.mxu0 %v8694_v4  ;;  %4940 = vmatprep.mubr.msk.bf16.mxu0 %vm8697_vm5, %v8694_v4  ;;  %vm8744_vm5 = vcmask 64512  }
 0xd30   : > { %3153 = vmatprep.mubr.bf16.mxu1 %v6038_v49  ;;  %v5625_v34 = vpop.permute.xlu0 %5624  ;;  %v5620_v58 = vpop.permute.xlu1 %5619  ;;  %v2924_v27 = vsel %vm8744_vm5, %v5612_v63, %v5617_v55  ;;  %vm8745_vm15 = vmmov %vm8744_vm5 }
 0xd31   : > { %v2923_v9 = vsel %vm8745_vm15, %v5611_v35, %v5616_v31  ;;  %v5627_v33 = vunpack.i.h.bf16 %v5625_v34  ;;  %v5622_v17 = vunpack.i.h.bf16 %v5620_v58  ;;  %v5626_v42 = vunpack.i.l.bf16 %v5625_v34  ;;  %vm8753_vm15 = vmmov %vm8744_vm5 }
 0xd32   : > { %v5621_v37 = vunpack.i.l.bf16 %v5620_v58 }
 0xd34   : > { %v5635_v43 = vpop.permute.xlu0 %5634  ;;  %v5630_v11 = vpop.permute.xlu1 %5629 }
 0xd38   : > { %v7520_v13 = vpop.permute.xlu0 %5644  ;;  %v7522_v57 = vpop.permute.xlu1 %5639 }
 0xe00   : > { %v4846_v36 = vpop.f32.mrb[24].mxu0  ;;  %v2856_v50 = vpop.f32.mrb[24].mxu1 }
 0xe01   : > { %v4847_v7 = vpop.f32.mrb[25].mxu0  ;;  %v4932_v1 = vpop.f32.mrb[25].mxu1 }
 0xe02   : > { %v4848_v56 = vadd.f32 %v4847_v7, %v4846_v36  ;;  %v4849_v54 = vpop.f32.mrb[26].mxu0  ;;  %v2859_v3 = vpop.f32.mrb[26].mxu1 }
 0xe03   : > { %v4850_v53 = vpop.f32.mrb[27].mxu0  ;;  %v4933_v28 = vpop.f32.mrb[27].mxu1 }
 0xe04   : > { %v2857_v10 = vadd.f32 %v4848_v56, %v2856_v50  ;;  %v4851_v41 = vadd.f32 %v4850_v53, %v4849_v54  ;;  %v4538_v56 = vpack.c.bf16 %v2924_v27, %v2923_v9  ;;  %v3038_v54 = vsel %vm8748_vm12, %v5622_v17, %v5627_v33  ;;  %vm8756_vm12 = vmmov %vm8749_vm4 }
 0xe05   : > { %v5637_v53 = vunpack.i.h.bf16 %v5635_v43  ;;  %v5646_v33 = vunpack.i.l.bf16 %v7520_v13  ;;  %v5642_v17 = vunpack.i.h.bf16 %v7522_v57 }
 0xe06   : > { %v2860_v45 = vadd.f32 %v4851_v41, %v2859_v3  ;;  %v2863_v39 = vmax.f32 %v2857_v10, 0.0  ;;  %v3037_v3 = vsel %vm8749_vm4, %v5621_v37, %v5626_v42  ;;  %v8752_v41 = vpack.c.bf16 %v6957_v18, %v6960_v47 }
 0xe07   : > { %v4562_v47 = vpack.c.bf16 %v3038_v54, %v3037_v3  ;;  %v5641_v42 = vunpack.i.l.bf16 %v7522_v57 }
 0xe08   : > { %v2864_v26 = vmax.f32 %v2860_v45, 0.0  ;;  %v5636_v45 = vunpack.i.l.bf16 %v5635_v43 }
 0xe0a   : > { %v5653_v0 = vpack.i.bf16 %v2864_v26, %v2863_v39  ;;  %v3094_v46 = vpack.c.bf16 %v2864_v26, %v2863_v39  ;;  %v5632_v39 = vunpack.i.h.bf16 %v5630_v11  ;;  %v5631_v26 = vunpack.i.l.bf16 %v5630_v11 }
 0xe0c   : > { %5654 = vrot.lane.b32.xlu0 %v5653_v0, %s8698_s16  ;;  %5649 = vrot.lane.b32.xlu1 %v5653_v0, %s8699_s30 }
 0xe0d   : > { %4858 = vmatprep.subr.bf16.mxu1 %v3094_v46 }
 0xe10   : > { %5664 = vrot.lane.b32.xlu0 %v5653_v0, %s8573_s1  ;;  %5659 = vrot.lane.b32.xlu1 %v5653_v0, %s8574_s22 }
 0xe14   : > { %5674 = vrot.lane.b32.xlu0 %v5653_v0, %s8700_s8  ;;  %5669 = vrot.lane.b32.xlu1 %v5653_v0, %s8701_s4 }
 0xe18   : > { %5684 = vrot.lane.b32.xlu0 %v5653_v0, %s8702_s9  ;;  %5679 = vrot.lane.b32.xlu1 %v5653_v0, %s8575_s2 }
 0xe1c   : > { %5694 = vrot.lane.b32.xlu0 %v5653_v0, %s8570_s19  ;;  %5689 = vrot.lane.b32.xlu1 %v5653_v0, %s8571_s29 }
 0xe20   : > { %5704 = vrot.lane.b32.xlu0 %v5653_v0, %s8576_s20  ;;  %5699 = vrot.lane.b32.xlu1 %v5653_v0, %s8577_s24 }
 0xe24   : > { %5714 = vrot.lane.b32.xlu0 %v5653_v0, %s8578_s0  ;;  %5709 = vrot.lane.b32.xlu1 %v5653_v0, %s8579_s5 }
 0xe28   : > { %5724 = vrot.lane.b32.xlu0 %v5653_v0, %s8543_s26  ;;  %5719 = vrot.lane.b32.xlu1 %v5653_v0, %s8572_s23 }
 0xe7e   : > { %v5655_v16 = vpop.permute.xlu0 %5654  ;;  %v5650_v25 = vpop.permute.xlu1 %5649 }
 0xe7f   : > { %v5657_v32 = vunpack.i.h.bf16 %v5655_v16  ;;  %v5656_v51 = vunpack.i.l.bf16 %v5655_v16  ;;  %v5652_v8 = vunpack.i.h.bf16 %v5650_v25  ;;  %v5651_v23 = vunpack.i.l.bf16 %v5650_v25 }
 0xe81   : > { %v2894_v6 = vsel %vm8746_vm6, %v5652_v8, %v5657_v32  ;;  %v2893_v22 = vsel %vm8747_vm13, %v5651_v23, %v5656_v51  ;;  %vm8754_vm6 = vcmask 56320   ;;  %v5647_v23 = vunpack.i.h.bf16 %v7520_v13 }
 0xe82   : > { %v4535_v61 = vpack.c.bf16 %v2894_v6, %v2893_v22  ;;  %v5665_v12 = vpop.permute.xlu0 %5664  ;;  %v5660_v15 = vpop.permute.xlu1 %5659  ;;  %v2956_v43 = vsel %vm8754_vm6, %v5632_v39, %v5637_v53  ;;  %vm8755_vm13 = vmmov %vm8754_vm6  ;;  %v8763_v39 = vpack.c.bf16 %v6965_v21, %v6968_v38 }
 0xe83   : > { %v5667_v36 = vunpack.i.h.bf16 %v5665_v12  ;;  %v5666_v50 = vunpack.i.l.bf16 %v5665_v12  ;;  %v5662_v7 = vunpack.i.h.bf16 %v5660_v15  ;;  %v5661_v1 = vunpack.i.l.bf16 %v5660_v15 }
 0xe84   : > { %4859 = vmatpush3.bf16.msk.msra.mxu1 %vm6812_vm9, %v4535_v61  ;;  %v2955_v11 = vsel %vm8755_vm13, %v5631_v26, %v5636_v45 }
 0xe85   : > { %v3008_v28 = vsel %vm8750_vm14, %v5662_v7, %v5667_v36  ;;  %v3007_v10 = vsel %vm8751_vm7, %v5661_v1, %v5666_v50  ;;  %4860 = vmatprep.subr.msk.bf16.mxu1 %vm6863_vm11, %v8752_v41  ;;  %v4544_v8 = vpack.c.bf16 %v2956_v43, %v2955_v11  ;;  %vm8757_vm14 = vmmov %vm8754_vm6 }
 0xe86   : > { %v4559_v0 = vpack.c.bf16 %v3008_v28, %v3007_v10  ;;  %v5675_v46 = vpop.permute.xlu0 %5674  ;;  %v5670_v49 = vpop.permute.xlu1 %5669  ;;  %vm8758_vm7 = vmmov %vm8754_vm6  ;;  %vm8761_vm6 = vcmask 457728  }
 0xe87   : > { %v5677_v40 = vunpack.i.h.bf16 %v5675_v46  ;;  %v5676_v48 = vunpack.i.l.bf16 %v5675_v46  ;;  %v5672_v34 = vunpack.i.h.bf16 %v5670_v49  ;;  %v5671_v58 = vunpack.i.l.bf16 %v5670_v49  ;;  %vm8762_vm13 = vmmov %vm8761_vm6 }
 0xe88   : > { %4861 = vmatpush3.bf16.msk.msra.mxu1 %vm6826_vm8, %v4538_v56 }
 0xe89   : > { %v2926_v55 = vsel %vm8744_vm5, %v5672_v34, %v5677_v40  ;;  %v2925_v18 = vsel %vm8753_vm15, %v5671_v58, %v5676_v48  ;;  %4862 = vmatprep.subr.msk.bf16.mxu1 %vm6863_vm11, %v4559_v0  ;;  %vm8759_vm5 = vcmask 7168  }
 0xe8a   : > { %v4541_v31 = vpack.c.bf16 %v2926_v55, %v2925_v18  ;;  %v5685_v63 = vpop.permute.xlu0 %5684  ;;  %v5680_v35 = vpop.permute.xlu1 %5679  ;;  %v2988_v13 = vsel %vm8759_vm5, %v5642_v17, %v5647_v23  ;;  %vm8760_vm15 = vmmov %vm8759_vm5 }
 0xe8b   : > { %v5687_v16 = vunpack.i.h.bf16 %v5685_v63  ;;  %v5686_v25 = vunpack.i.l.bf16 %v5685_v63  ;;  %v5682_v32 = vunpack.i.h.bf16 %v5680_v35  ;;  %v5681_v51 = vunpack.i.l.bf16 %v5680_v35 }
 0xe8c   : > { %4863 = vmatpush3.bf16.msk.msra.mxu1 %vm6826_vm8, %v4541_v31  ;;  %v2987_v57 = vsel %vm8760_vm15, %v5641_v42, %v5646_v33  ;;  %vm8769_vm15 = vcmask 195584  }
 0xe8d   : > { %v3040_v27 = vsel %vm8756_vm12, %v5682_v32, %v5687_v16  ;;  %v3039_v9 = vsel %vm8749_vm4, %v5681_v51, %v5686_v25  ;;  %4864 = vmatprep.subr.msk.bf16.mxu1 %vm8723_vm3, %v4562_v47  ;;  %v4550_v26 = vpack.c.bf16 %v2988_v13, %v2987_v57  ;;  %vm8764_vm12 = vcmask 449536   ;;  %v6036_v32 = vld [vmem:[%s8145_s12] ss:$12 sps:$4 sm:$0xff]   ;;  %v6039_v51 = vld [vmem:[%s8145_s12 + $0x8] ss:$12 sps:$4 sm:$0xff]  }
 0xe8e   : > { %v4565_v37 = vpack.c.bf16 %v3040_v27, %v3039_v9  ;;  %v5695_v6 = vpop.permute.xlu0 %5694  ;;  %v5690_v22 = vpop.permute.xlu1 %5689  ;;  %vm8765_vm4 = vmmov %vm8764_vm12 }
 0xe8f   : > { %v5697_v61 = vunpack.i.h.bf16 %v5695_v6  ;;  %v5696_v12 = vunpack.i.l.bf16 %v5695_v6  ;;  %v5692_v15 = vunpack.i.h.bf16 %v5690_v22  ;;  %v5691_v36 = vunpack.i.l.bf16 %v5690_v22 }
 0xe90   : > { %4865 = vmatpush3.bf16.msk.msra.mxu1 %vm8724_vm10, %v4544_v8 }
 0xe91   : > { %v2958_v50 = vsel %vm8757_vm14, %v5692_v15, %v5697_v61  ;;  %v2957_v7 = vsel %vm8758_vm7, %v5691_v36, %v5696_v12  ;;  %4866 = vmatprep.subr.msk.bf16.mxu1 %vm8723_vm3, %v4565_v37  ;;  %vm8766_vm14 = vmmov %vm8759_vm5 }
 0xe92   : > { %v4547_v1 = vpack.c.bf16 %v2958_v50, %v2957_v7  ;;  %v5705_v56 = vpop.permute.xlu0 %5704  ;;  %v5700_v54 = vpop.permute.xlu1 %5699  ;;  %vm8767_vm7 = vmmov %vm8759_vm5  ;;  %vm8768_vm5 = vcmask 326656   ;;  %v6040_v7 = vld [vmem:[%s8146_s13 + $0x4] ss:$8 sps:$4 sm:$0xff]  }
 0xe93   : > { %v5707_v3 = vunpack.i.h.bf16 %v5705_v56  ;;  %v5706_v53 = vunpack.i.l.bf16 %v5705_v56  ;;  %v5702_v28 = vunpack.i.h.bf16 %v5700_v54  ;;  %v5701_v10 = vunpack.i.l.bf16 %v5700_v54 }
 0xe94   : > { %4867 = vmatpush3.bf16.msk.msra.mxu1 %vm8724_vm10, %v4547_v1 }
 0xe95   : > { %v3058_v41 = vsel %vm8761_vm6, %v5702_v28, %v5707_v3  ;;  %v3057_v45 = vsel %vm8762_vm13, %v5701_v10, %v5706_v53  ;;  %4868 = vmatprep.subr.msk.bf16.mxu1 %vm8730_vm0, %v8763_v39  ;;  %vm8771_vm6 = vcmask 72704  }
 0xe96   : > { %v4571_v0 = vpack.c.bf16 %v3058_v41, %v3057_v45  ;;  %v5715_v46 = vpop.permute.xlu0 %5714  ;;  %v5710_v49 = vpop.permute.xlu1 %5709  ;;  %vm8772_vm13 = vmmov %vm8771_vm6 }
 0xe97   : > { %v5717_v40 = vunpack.i.h.bf16 %v5715_v46  ;;  %v5716_v48 = vunpack.i.l.bf16 %v5715_v46  ;;  %v5712_v34 = vunpack.i.h.bf16 %v5710_v49  ;;  %v5711_v58 = vunpack.i.l.bf16 %v5710_v49 }
 0xe98   : > { %4869 = vmatpush3.bf16.msk.msra.mxu1 %vm8737_vm2, %v4550_v26 }
 0xe99   : > { %v3076_v55 = vsel %vm8764_vm12, %v5712_v34, %v5717_v40  ;;  %v3075_v18 = vsel %vm8765_vm4, %v5711_v58, %v5716_v48  ;;  %4870 = vmatprep.subr.msk.bf16.mxu1 %vm8730_vm0, %v4571_v0  ;;  %vm8773_vm12 = vcmask 64512  }
 0xe9a   : > { %v4577_v21 = vpack.c.bf16 %v3076_v55, %v3075_v18  ;;  %v5725_v38 = vpop.permute.xlu0 %5724  ;;  %v5720_v47 = vpop.permute.xlu1 %5719  ;;  %vm8774_vm4 = vmmov %vm8773_vm12 }
 0xe9b   : > { %v5727_v43 = vunpack.i.h.bf16 %v5725_v38  ;;  %v5726_v11 = vunpack.i.l.bf16 %v5725_v38  ;;  %v5722_v31 = vunpack.i.h.bf16 %v5720_v47  ;;  %v5721_v63 = vunpack.i.l.bf16 %v5720_v47 }
 0xe9c   : > { %4937 = vmatpush3.bf16.msk.msra.mxu0 %vm8734_vm1, %v4577_v21 }
 0xe9d   : > { %v2990_v35 = vsel %vm8766_vm14, %v5722_v31, %v5727_v43  ;;  %v2989_v16 = vsel %vm8767_vm7, %v5721_v63, %v5726_v11  ;;  %4938 = vmatprep.subr.bf16.mxu0 %v8694_v4  ;;  %vm8775_vm14 = vcmask 56320  }
 0xe9e   : > { %v4553_v25 = vpack.c.bf16 %v2990_v35, %v2989_v16  ;;  %vm8776_vm7 = vmmov %vm8775_vm14 }
 0xea0   : > { %4871 = vmatpush3.bf16.msk.msra.mxu1 %vm8737_vm2, %v4553_v25  ;;  %4939 = vmatpush3.bf16.msra.mxu0 %v6914_v2 }
 0xea1   : > { %3358 = vmatprep.subr.bf16.mxu0 %v8626_v44 }
 0xea3   : > { %3154 = vmatmul.mubr.bf16.vlgmr.msra.gmra.mrb[28].mxu1 %v6036_v32  ;;  %4941 = vmatmul.mubr.msk.bf16.vlgmr.msra.gmra.mrb[28].mxu0 %vm8768_vm5, %v6039_v51 }
 0xea4   : > { %3485 = vmatprep.mubr.bf16.mxu1 %v8626_v44  ;;  %4606 = vmatprep.mubr.msk.bf16.mxu0 %vm8769_vm15, %v6040_v7  ;;  %vm8781_vm15 = vcmask 465920  }
 0xf76   : > { %v4872_v4 = vpop.f32.mrb[28].mxu1  ;;  %v3196_v8 = vpop.f32.mrb[28].mxu0 }
 0xf77   : > { %v4873_v23 = vpop.f32.mrb[29].mxu1  ;;  %v4942_v27 = vpop.f32.mrb[29].mxu0 }
 0xf78   : > { %v4874_v9 = vadd.f32 %v4873_v23, %v4872_v4  ;;  %v4875_v33 = vpop.f32.mrb[30].mxu1  ;;  %v3199_v17 = vpop.f32.mrb[30].mxu0 }
 0xf79   : > { %v4876_v42 = vpop.f32.mrb[31].mxu1  ;;  %v4943_v37 = vpop.f32.mrb[31].mxu0 }
 0xf7a   : > { %v3197_v6 = vadd.f32 %v4874_v9, %v3196_v8  ;;  %v4877_v22 = vadd.f32 %v4876_v42, %v4875_v33 }
 0xf7c   : > { %v3200_v61 = vadd.f32 %v4877_v22, %v3199_v17  ;;  %v3203_v12 = vmax.f32 %v3197_v6, 0.0 }
 0xf7e   : > { %v3204_v15 = vmax.f32 %v3200_v61, 0.0 }
 0xf80   : > { %v5733_v36 = vpack.i.bf16 %v3204_v15, %v3203_v12  ;;  %v7599_v50 = vpack.c.bf16 %v3204_v15, %v3203_v12 }
 0xf82   : > { %5734 = vrot.lane.b32.xlu0 %v5733_v36, %s8698_s16  ;;  %5729 = vrot.lane.b32.xlu1 %v5733_v36, %s8699_s30  ;;  %s8770_s16 = sld [smem:[#allocation41_spill]] }
 0xf86   : > { %5744 = vrot.lane.b32.xlu0 %v5733_v36, %s8700_s8  ;;  %5739 = vrot.lane.b32.xlu1 %v5733_v36, %s8701_s4  ;;  %s8960_s8 = sld [smem:[#allocation50_spill]]  ;;  %s8962_s4 = sld [smem:[#allocation3_spill]] }
 0xf88   : > { %v6043_v13 = vld [vmem:[%s8770_s16] ss:$8 sps:$4 sm:$0xff]   ;;  %v6045_v57 = vld [vmem:[%s8770_s16 + $0x4] ss:$8 sps:$4 sm:$0xff]   ;;  %v6048_v1 = vld [vmem:[%s8770_s16 + $0x14] ss:$8 sps:$4 sm:$0xff]  }
 0xf89   : > { %3453 = vmatprep.subr.bf16.mxu1 %v6045_v57  ;;  %v6046_v56 = vld [vmem:[%s8770_s16 + $0x10] ss:$8 sps:$4 sm:$0xff]   ;;  %v6051_v54 = vld [vmem:[%s8770_s16 + $0x24] ss:$8 sps:$4 sm:$0xff]   ;;  %v6049_v3 = vld [vmem:[%s8770_s16 + $0x20] ss:$8 sps:$4 sm:$0xff]  }
 0xf8a   : > { %5754 = vrot.lane.b32.xlu0 %v5733_v36, %s8570_s19  ;;  %5749 = vrot.lane.b32.xlu1 %v5733_v36, %s8571_s29  ;;  %v6052_v60 = vld [vmem:[%s8770_s16 + $0x30] ss:$8 sps:$4 sm:$0xff]   ;;  %s8789_s19 = smov 16   ;;  %s8790_s29 = smov 112  }
 0xf8b   : > { %3454 = vmatpush1.bf16.msra.mxu1 %v6043_v13 }
 0xf8c   : > { %3455 = vmatprep.subr.bf16.mxu1 %v6048_v1 }
 0xf8e   : > { %5764 = vrot.lane.b32.xlu0 %v5733_v36, %s8543_s26  ;;  %5759 = vrot.lane.b32.xlu1 %v5733_v36, %s8572_s23  ;;  %s8791_s23 = smov 111  }
 0xf8f   : > { %3456 = vmatpush1.bf16.msra.mxu1 %v6046_v56 }
 0xf90   : > { %3457 = vmatprep.subr.bf16.mxu1 %v6051_v54 }
 0xf92   : > { %5774 = vrot.lane.b32.xlu0 %v5733_v36, %s8573_s1  ;;  %5769 = vrot.lane.b32.xlu1 %v5733_v36, %s8574_s22 }
 0xf93   : > { %3458 = vmatpush1.bf16.msra.mxu1 %v6049_v3 }
 0xf96   : > { %5784 = vrot.lane.b32.xlu0 %v5733_v36, %s8702_s9  ;;  %5779 = vrot.lane.b32.xlu1 %v5733_v36, %s8575_s2  ;;  %s8792_s2 = sld [smem:[#allocation47_spill]]  ;;  %s4258_s9 = sshll.u32 %s8962_s4, 1 }
 0xf97   : > { %s573_s18 = scalar_lea.vmem %s8963_s17, %s4258_s9 }
 0xf9a   : > { %5794 = vrot.lane.b32.xlu0 %v5733_v36, %s8576_s20  ;;  %5789 = vrot.lane.b32.xlu1 %v5733_v36, %s8577_s24 }
 0xf9e   : > { %5804 = vrot.lane.b32.xlu0 %v5733_v36, %s8578_s0  ;;  %5799 = vrot.lane.b32.xlu1 %v5733_v36, %s8579_s5  ;;  %s8861_s5 = sld [smem:[#allocation48_spill]] }
 0xff4   : > { %v5735_v53 = vpop.permute.xlu0 %5734  ;;  %v5730_v28 = vpop.permute.xlu1 %5729 }
 0xff5   : > { %v5737_v10 = vunpack.i.h.bf16 %v5735_v53  ;;  %v5736_v41 = vunpack.i.l.bf16 %v5735_v53  ;;  %v5732_v45 = vunpack.i.h.bf16 %v5730_v28  ;;  %v5731_v39 = vunpack.i.l.bf16 %v5730_v28 }
 0xff7   : > { %v3220_v26 = vsel %vm8771_vm6, %v5732_v45, %v5737_v10  ;;  %v3219_v0 = vsel %vm8772_vm13, %v5731_v39, %v5736_v41  ;;  %vm8783_vm6 = vcmask 457728  }
 0xff8   : > { %v4583_v46 = vpack.c.bf16 %v3220_v26, %v3219_v0  ;;  %v5745_v49 = vpop.permute.xlu0 %5744  ;;  %v5740_v40 = vpop.permute.xlu1 %5739  ;;  %vm8784_vm13 = vmmov %vm8783_vm6 }
 0xff9   : > { %v5747_v48 = vunpack.i.h.bf16 %v5745_v49  ;;  %v5746_v34 = vunpack.i.l.bf16 %v5745_v49  ;;  %v5742_v58 = vunpack.i.h.bf16 %v5740_v40  ;;  %v5741_v55 = vunpack.i.l.bf16 %v5740_v40 }
 0xffa   : > { %4584 = vmatpush1.bf16.msk.msra.mxu0 %vm6812_vm9, %v4583_v46  ;;  %vm8777_vm9 = vcmask 7168  }
 0xffb   : > { %v3236_v18 = vsel %vm8773_vm12, %v5742_v58, %v5747_v48  ;;  %v3235_v21 = vsel %vm8774_vm4, %v5741_v55, %v5746_v34  ;;  %3360 = vmatprep.subr.bf16.mxu0 %v8626_v44  ;;  %vm8778_vm5 = vmmov %vm8777_vm9 }
 0xffc   : > { %v4586_v38 = vpack.c.bf16 %v3236_v18, %v3235_v21  ;;  %v5755_v47 = vpop.permute.xlu0 %5754  ;;  %v5750_v43 = vpop.permute.xlu1 %5749  ;;  %v6054_v21 = vld [vmem:[%s8770_s16 + $0x34] ss:$8 sps:$4 sm:$0xff]  }
 0xffd   : > { %v5757_v11 = vunpack.i.h.bf16 %v5755_v47  ;;  %v5756_v31 = vunpack.i.l.bf16 %v5755_v47  ;;  %v5752_v63 = vunpack.i.h.bf16 %v5750_v43  ;;  %v5751_v35 = vunpack.i.l.bf16 %v5750_v43  ;;  %3459 = vmatprep.subr.bf16.mxu1 %v6054_v21 }
 0xffe   : > { %4587 = vmatpush1.bf16.msk.msra.mxu0 %vm6826_vm8, %v4586_v38  ;;  %vm8779_vm8 = vcmask 515072   ;;  %3460 = vmatpush1.bf16.msra.mxu1 %v6052_v60  ;;  %v8814_v60 = vld [vmem:[#allocation10_spill] sm:$0xff] }
 0xfff   : > { %v3252_v16 = vsel %vm8775_vm14, %v5752_v63, %v5757_v11  ;;  %v3251_v24 = vsel %vm8776_vm7, %v5751_v35, %v5756_v31  ;;  %3362 = vmatprep.subr.bf16.mxu0 %v8626_v44 }
0x1000   : > { %v4589_v25 = vpack.c.bf16 %v3252_v16, %v3251_v24  ;;  %v5765_v32 = vpop.permute.xlu0 %5764  ;;  %v5760_v51 = vpop.permute.xlu1 %5759 }
0x1001   : > { %v5767_v4 = vunpack.i.h.bf16 %v5765_v32  ;;  %v5766_v8 = vunpack.i.l.bf16 %v5765_v32  ;;  %v5762_v23 = vunpack.i.h.bf16 %v5760_v51  ;;  %v5761_v27 = vunpack.i.l.bf16 %v5760_v51 }
0x1002   : > { %4590 = vmatpush1.bf16.msk.msra.mxu0 %vm8724_vm10, %v4589_v25  ;;  %vm8780_vm10 = vmmov %vm8779_vm8 }
0x1003   : > { %v3268_v9 = vsel %vm8777_vm9, %v5762_v23, %v5767_v4  ;;  %v3267_v30 = vsel %vm8778_vm5, %v5761_v27, %v5766_v8  ;;  %3364 = vmatprep.subr.bf16.mxu0 %v8626_v44  ;;  %vm8798_vm9 = vnez %v8409_v19 }
0x1004   : > { %v4592_v33 = vpack.c.bf16 %v3268_v9, %v3267_v30  ;;  %v5775_v17 = vpop.permute.xlu0 %5774  ;;  %v5770_v42 = vpop.permute.xlu1 %5769  ;;  %v7729_v9 = vld [vmem:[%s8792_s2] sm:$0xff]  ;;  %vm8373_vm5 = vmpackc.low %vm8798_vm9, %vm8798_vm9 }
0x1005   : > { %v5777_v37 = vunpack.i.h.bf16 %v5775_v17  ;;  %v5776_v6 = vunpack.i.l.bf16 %v5775_v17  ;;  %v5772_v22 = vunpack.i.h.bf16 %v5770_v42  ;;  %v5771_v61 = vunpack.i.l.bf16 %v5770_v42 }
0x1006   : > { %4593 = vmatpush1.bf16.msk.msra.mxu0 %vm8737_vm2, %v4592_v33  ;;  %vm8782_vm2 = vmmov %vm8781_vm15  ;;  %v4617_v30 = vcombine.high %v7729_v9, %v7729_v9 }
0x1007   : > { %3366 = vmatprep.subr.bf16.mxu0 %v8626_v44  ;;  %v3284_v5 = vsel %vm8779_vm8, %v5772_v22, %v5777_v37  ;;  %v3283_v12 = vsel %vm8780_vm10, %v5771_v61, %v5776_v6  ;;  %vm8799_vm8 = vnez %v8411_v20 }
0x1008   : > { %v5785_v15 = vpop.permute.xlu0 %5784  ;;  %v5780_v36 = vpop.permute.xlu1 %5779  ;;  %v4595_v56 = vpack.c.bf16 %v3284_v5, %v3283_v12  ;;  %vm8372_vm10 = vmpackc.low %vm8799_vm8, %vm8799_vm8 }
0x1009   : > { %v5787_v7 = vunpack.i.h.bf16 %v5785_v15  ;;  %v5786_v13 = vunpack.i.l.bf16 %v5785_v15  ;;  %v5782_v57 = vunpack.i.h.bf16 %v5780_v36  ;;  %v5781_v1 = vunpack.i.l.bf16 %v5780_v36 }
0x100a   : > { %3367 = vmatpush1.bf16.msra.mxu0 %v7599_v50 }
0x100b   : > { %3368 = vmatprep.subr.bf16.mxu0 %v8626_v44  ;;  %v3300_v62 = vsel %vm8781_vm15, %v5782_v57, %v5787_v7  ;;  %v3299_v54 = vsel %vm8782_vm2, %v5781_v1, %v5786_v13  ;;  %vm8800_vm15 = vcmask 130048  }
0x100c   : > { %v5795_v3 = vpop.permute.xlu0 %5794  ;;  %v5790_v53 = vpop.permute.xlu1 %5789  ;;  %v4598_v39 = vpack.c.bf16 %v3300_v62, %v3299_v54  ;;  %vm8801_vm2 = vmmov %vm8800_vm15 }
0x100d   : > { %v5797_v28 = vunpack.i.h.bf16 %v5795_v3  ;;  %v5796_v10 = vunpack.i.l.bf16 %v5795_v3  ;;  %v5792_v41 = vunpack.i.h.bf16 %v5790_v53  ;;  %v5791_v45 = vunpack.i.l.bf16 %v5790_v53 }
0x100e   : > { %4596 = vmatpush1.bf16.msk.msra.mxu0 %vm6863_vm11, %v4595_v56  ;;  %vm8785_vm11 = vcmask 449536  }
0x100f   : > { %3370 = vmatprep.subr.bf16.mxu0 %v8626_v44  ;;  %v3316_v50 = vsel %vm8783_vm6, %v5792_v41, %v5797_v28  ;;  %v3315_v26 = vsel %vm8784_vm13, %v5791_v45, %v5796_v10  ;;  %vm8786_vm12 = vmmov %vm8785_vm11  ;;  %v8804_v45 = vld [vmem:[#allocation4_spill] sm:$0xff] }
0x1010   : > { %v5805_v0 = vpop.permute.xlu0 %5804  ;;  %v5800_v46 = vpop.permute.xlu1 %5799  ;;  %v4601_v59 = vpack.c.bf16 %v3316_v50, %v3315_v26  ;;  %vm8802_vm6 = vmmov %vm8801_vm2 }
0x1011   : > { %v5807_v49 = vunpack.i.h.bf16 %v5805_v0  ;;  %v5806_v40 = vunpack.i.l.bf16 %v5805_v0  ;;  %v5802_v48 = vunpack.i.h.bf16 %v5800_v46  ;;  %v5801_v34 = vunpack.i.l.bf16 %v5800_v46  ;;  %vm8803_vm13 = vmmov %vm8801_vm2 }
0x1012   : > { %4599 = vmatpush1.bf16.msk.msra.mxu0 %vm8723_vm3, %v4598_v39  ;;  %vm8787_vm3 = vcmask 523264  }
0x1013   : > { %3372 = vmatprep.subr.bf16.mxu0 %v8626_v44  ;;  %v3332_v58 = vsel %vm8785_vm11, %v5802_v48, %v5807_v49  ;;  %v3331_v55 = vsel %vm8786_vm12, %v5801_v34, %v5806_v40  ;;  %vm8805_vm11 = vnez %v8804_v45  ;;  %v8806_v49 = vld [vmem:[#allocation5_spill] sm:$0xff] }
0x1014   : > { %v4604_v18 = vpack.c.bf16 %v3332_v58, %v3331_v55  ;;  %vm8367_vm12 = vmpackc.low %vm8805_vm11, %vm8805_vm11 }
0x1016   : > { %4602 = vmatpush1.bf16.msk.msra.mxu0 %vm8730_vm0, %v4601_v59  ;;  %vm8793_vm0 = vcmask 195584  }
0x1017   : > { %3374 = vmatprep.subr.bf16.mxu0 %v8626_v44 }
0x101a   : > { %4605 = vmatpush1.bf16.msk.msra.mxu0 %vm8734_vm1, %v4604_v18  ;;  %vm8794_vm1 = vcmask 138240  }
0x101b   : > { %3376 = vmatprep.subr.bf16.mxu0 %v8626_v44  ;;  %vm8795_vm4 = vmmov %vm8794_vm1 }
0x101c   : > { %vm8796_vm14 = vmmov %vm8794_vm1 }
0x101d   : > { %vm8797_vm7 = vmmov %vm8794_vm1 }
0x101e   : > { %3377 = vmatpush1.bf16.msra.mxu0 %v6914_v2 }
0x1021   : > { %3391 = vmatmul.mubr.bf16.vlgmr.msra.gmra.mrb[32].mxu0 %v6042_v14  ;;  %v8812_v14 = vld [vmem:[#allocation8_spill] sm:$0xff] }
0x10f4   : > { %v3392_v52 = vpop.f32.mrb[32].mxu0 }
0x10f5   : > { %v3394_v38 = vpop.f32.mrb[33].mxu0  ;;  %v3399_v43 = vmax.f32 %v3392_v52, 0.0 }
0x10f6   : > { %v3395_v47 = vpop.f32.mrb[34].mxu0 }
0x10f7   : > { %v3400_v11 = vmax.f32 %v3395_v47, 0.0  ;;  %v3397_v31 = vpop.f32.mrb[35].mxu0 }
0x10f9   : > { %v3401_v63 = vpack.c.bf16 %v3400_v11, %v3399_v43 }
0x10fb   : > { %4615 = vmatmul.mubr.msk.bf16.vlgmr.msra.gmra.mrb[32].mxu1 %vm8787_vm3, %v3401_v63  ;;  %vm8807_vm3 = vnez %v8806_v49 }
0x10fc   : > { %4667 = vmatprep.mubr.msk.bf16.mxu1 %vm8793_vm0, %v4617_v30  ;;  %vm8366_vm0 = vmpackc.low %vm8807_vm3, %vm8807_vm3  ;;  %v8820_v30 = vld [vmem:[#allocation9_spill] sm:$0xff] }
0x11ce   : > { %v7690_v35 = vpop.f32.mrb[32].mxu1 }
0x11cf   : > { %v7692_v16 = vpop.f32.mrb[33].mxu1 }
0x11d0   : > { %v7694_v24 = vpop.f32.mrb[34].mxu1  ;;  %v5848_v25 = vpack.i.bf16 %v7692_v16, %v7690_v35 }
0x11d1   : > { %v7698_v32 = vpop.f32.mrb[35].mxu1  ;;  %v5808_v51 = vpack.i.bf16 %v7694_v24, %v7690_v35  ;;  %v3685_v27 = vpack.c.bf16 %v7694_v24, %v7690_v35 }
0x11d2   : > { %v5823_v4 = vpack.i.bf16 %v7698_v32, %v7692_v16  ;;  %v5868_v8 = vpack.i.bf16 %v7698_v32, %v7694_v24  ;;  %v3686_v23 = vpack.c.bf16 %v7698_v32, %v7692_v16  ;;  %v8831_v16 = vld [vmem:[#allocation17_spill] sm:$0xff] }
0x11d3   : > { %5809 = vrot.lane.b32.xlu0 %v5808_v51, %s8788_s7 }
0x11d4   : > { %5824 = vrot.lane.b32.xlu1 %v5823_v4, %s8788_s7 }
0x11d7   : > { %5814 = vrot.lane.b32.xlu0 %v5808_v51, %s8789_s19 }
0x11d8   : > { %5829 = vrot.lane.b32.xlu1 %v5823_v4, %s8789_s19 }
0x11db   : > { %5819 = vrot.lane.b32.xlu0 %v5808_v51, %s8619_s6 }
0x11dc   : > { %5834 = vrot.lane.b32.xlu1 %v5823_v4, %s8619_s6 }
0x11df   : > { %5844 = vrot.lane.b32.xlu0 %v5808_v51, %s8543_s26 }
0x11e0   : > { %5839 = vrot.lane.b32.xlu1 %v5823_v4, %s8543_s26 }
0x11e3   : > { %5869 = vrot.lane.b32.xlu0 %v5868_v8, %s8574_s22 }
0x11e4   : > { %5849 = vrot.lane.b32.xlu1 %v5848_v25, %s8574_s22 }
0x11e7   : > { %5874 = vrot.lane.b32.xlu0 %v5868_v8, %s8618_s28 }
0x11e8   : > { %5854 = vrot.lane.b32.xlu1 %v5848_v25, %s8618_s28 }
0x11eb   : > { %5879 = vrot.lane.b32.xlu0 %v5868_v8, %s8790_s29 }
0x11ec   : > { %5859 = vrot.lane.b32.xlu1 %v5848_v25, %s8790_s29 }
0x11ef   : > { %5884 = vrot.lane.b32.xlu0 %v5868_v8, %s8791_s23 }
0x11f0   : > { %5864 = vrot.lane.b32.xlu1 %v5848_v25, %s8791_s23 }
0x1245   : > { %v5810_v33 = vpop.permute.xlu0 %5809 }
0x1246   : > { %v5812_v17 = vunpack.i.h.bf16 %v5810_v33  ;;  %v5811_v42 = vunpack.i.l.bf16 %v5810_v33  ;;  %v5825_v37 = vpop.permute.xlu1 %5824  ;;  %v8822_v33 = vld [vmem:[#allocation11_spill] sm:$0xff] }
0x1247   : > { %v5827_v6 = vunpack.i.h.bf16 %v5825_v37  ;;  %v5826_v22 = vunpack.i.l.bf16 %v5825_v37 }
0x1249   : > { %v3511_v61 = vsel %vm8794_vm1, %v5812_v17, %v5827_v6  ;;  %v3517_v5 = vsel %vm8795_vm4, %v5827_v6, %v5812_v17  ;;  %v3510_v12 = vsel %vm8796_vm14, %v5811_v42, %v5826_v22  ;;  %v3516_v15 = vsel %vm8797_vm7, %v5826_v22, %v5811_v42  ;;  %v5815_v36 = vpop.permute.xlu0 %5814 }
0x124a   : > { %v4619_v7 = vpack.c.bf16 %v3511_v61, %v3510_v12  ;;  %v4622_v13 = vpack.c.bf16 %v3517_v5, %v3516_v15  ;;  %v5817_v57 = vunpack.i.h.bf16 %v5815_v36  ;;  %v5816_v1 = vunpack.i.l.bf16 %v5815_v36  ;;  %v5830_v56 = vpop.permute.xlu1 %5829 }
0x124b   : > { %v5832_v62 = vunpack.i.h.bf16 %v5830_v56  ;;  %v5831_v54 = vunpack.i.l.bf16 %v5830_v56  ;;  %vm8808_vm1 = vcmask 121856  }
0x124c   : > { %4620 = vmatprep.subr.msk.bf16.mxu1 %vm8373_vm5, %v4619_v7  ;;  %vm8809_vm4 = vmmov %vm8808_vm1  ;;  %vm8836_vm5 = vcmask 916480  }
0x124d   : > { %v3533_v3 = vsel %vm8800_vm15, %v5817_v57, %v5832_v62  ;;  %v3539_v53 = vsel %vm8801_vm2, %v5832_v62, %v5817_v57  ;;  %v3532_v28 = vsel %vm8802_vm6, %v5816_v1, %v5831_v54  ;;  %v3538_v10 = vsel %vm8803_vm13, %v5831_v54, %v5816_v1  ;;  %v5820_v41 = vpop.permute.xlu0 %5819  ;;  %4623 = vmatpush1.bf16.msk.msra.mxu1 %vm8372_vm10, %v4622_v13  ;;  %vm8810_vm14 = vmmov %vm8808_vm1  ;;  %v8826_v62 = vld [vmem:[#allocation13_spill] sm:$0xff] }
0x124e   : > { %v4625_v39 = vpack.c.bf16 %v3533_v3, %v3532_v28  ;;  %v4628_v50 = vpack.c.bf16 %v3539_v53, %v3538_v10  ;;  %v5822_v26 = vunpack.i.h.bf16 %v5820_v41  ;;  %v5821_v0 = vunpack.i.l.bf16 %v5820_v41  ;;  %v5835_v46 = vpop.permute.xlu1 %5834  ;;  %vm8811_vm7 = vmmov %vm8808_vm1 }
0x124f   : > { %v5837_v40 = vunpack.i.h.bf16 %v5835_v46  ;;  %v5836_v48 = vunpack.i.l.bf16 %v5835_v46  ;;  %vm8813_vm15 = vnez %v8812_v14  ;;  %vm8815_vm6 = vnez %v8814_v60  ;;  %v8833_v46 = vld [vmem:[#allocation19_spill] sm:$0xff] }
0x1250   : > { %4626 = vmatprep.subr.msk.bf16.mxu1 %vm8367_vm12, %v4625_v39  ;;  %vm8368_vm2 = vmpackc.low %vm8813_vm15, %vm8813_vm15  ;;  %vm8832_vm10 = vnez %v8831_v16 }
0x1251   : > { %v3555_v34 = vsel %vm8808_vm1, %v5822_v26, %v5837_v40  ;;  %v3561_v59 = vsel %vm8809_vm4, %v5837_v40, %v5822_v26  ;;  %v3554_v58 = vsel %vm8810_vm14, %v5821_v0, %v5836_v48  ;;  %v3560_v55 = vsel %vm8811_vm7, %v5836_v48, %v5821_v0  ;;  %v5845_v18 = vpop.permute.xlu0 %5844  ;;  %4629 = vmatpush1.bf16.msk.msra.mxu1 %vm8366_vm0, %v4628_v50  ;;  %vm8370_vm13 = vmpackc.low %vm8815_vm6, %vm8815_vm6 }
0x1252   : > { %v4631_v21 = vpack.c.bf16 %v3555_v34, %v3554_v58  ;;  %v4634_v52 = vpack.c.bf16 %v3561_v59, %v3560_v55  ;;  %v5847_v38 = vunpack.i.h.bf16 %v5845_v18  ;;  %v5846_v47 = vunpack.i.l.bf16 %v5845_v18  ;;  %v5840_v43 = vpop.permute.xlu1 %5839  ;;  %v8839_v59 = vld [vmem:[#allocation23_spill] sm:$0xff] }
0x1253   : > { %v5842_v11 = vunpack.i.h.bf16 %v5840_v43  ;;  %v5841_v31 = vunpack.i.l.bf16 %v5840_v43  ;;  %vm8816_vm1 = vcmask 7168   ;;  %vm8821_vm0 = vnez %v8820_v30 }
0x1254   : > { %4632 = vmatprep.subr.msk.bf16.mxu1 %vm8368_vm2, %v4631_v21  ;;  %vm8817_vm4 = vmmov %vm8816_vm1  ;;  %vm8823_vm2 = vnez %v8822_v33 }
0x1255   : > { %v3577_v63 = vsel %vm8816_vm1, %v5847_v38, %v5842_v11  ;;  %v3583_v25 = vsel %vm8817_vm4, %v5842_v11, %v5847_v38  ;;  %vm8818_vm14 = vmmov %vm8816_vm1  ;;  %v5870_v8 = vpop.permute.xlu0 %5869  ;;  %4635 = vmatpush1.bf16.msk.msra.mxu1 %vm8370_vm13, %v4634_v52  ;;  %vm8824_vm4 = vcmask 1039360   ;;  %vm8829_vm13 = vcmask 924672  }
0x1256   : > { %v3576_v51 = vsel %vm8818_vm14, %v5846_v47, %v5841_v31  ;;  %vm8819_vm7 = vmmov %vm8816_vm1  ;;  %v5872_v37 = vunpack.i.h.bf16 %v5870_v8  ;;  %v5871_v6 = vunpack.i.l.bf16 %v5870_v8  ;;  %v5850_v22 = vpop.permute.xlu1 %5849  ;;  %v8851_v8 = vld [vmem:[#allocation24_spill] sm:$0xff] }
0x1257   : > { %v3582_v4 = vsel %vm8819_vm7, %v5841_v31, %v5846_v47  ;;  %vm8369_vm12 = vmpackc.low %vm8821_vm0, %vm8821_vm0  ;;  %v4637_v17 = vpack.c.bf16 %v3577_v63, %v3576_v51  ;;  %v5852_v61 = vunpack.i.h.bf16 %v5850_v22  ;;  %v5851_v5 = vunpack.i.l.bf16 %v5850_v22  ;;  %v8842_v47 = vld [vmem:[#allocation15_spill] sm:$0xff]  ;;  %v8849_v51 = vld [vmem:[#allocation20_spill] sm:$0xff] }
0x1258   : > { %vm8371_vm1 = vmpackc.low %vm8823_vm2, %vm8823_vm2  ;;  %v4640_v42 = vpack.c.bf16 %v3583_v25, %v3582_v4  ;;  %v3605_v12 = vsel %vm8824_vm4, %v5872_v37, %v5871_v6  ;;  %vm8827_vm7 = vnez %v8826_v62 }
0x1259   : > { %4638 = vmatprep.subr.msk.bf16.mxu1 %vm8369_vm12, %v4637_v17  ;;  %vm8825_vm14 = vmmov %vm8824_vm4  ;;  %v5875_v36 = vpop.permute.xlu0 %5874 }
0x125a   : > { %v3604_v15 = vsel %vm8825_vm14, %v5852_v61, %v5851_v5  ;;  %4641 = vmatpush1.bf16.msk.msra.mxu1 %vm8371_vm1, %v4640_v42  ;;  %v5877_v7 = vunpack.i.h.bf16 %v5875_v36  ;;  %v5876_v13 = vunpack.i.l.bf16 %v5875_v36  ;;  %v5855_v57 = vpop.permute.xlu1 %5854  ;;  %vm8375_vm4 = vmpackc.low %vm8827_vm7, %vm8827_vm7  ;;  %v3597_v54 = vsel %vm8825_vm14, %v5871_v6, %v5872_v37  ;;  %v8855_v6 = vld [vmem:[#allocation27_spill] sm:$0xff] }
0x125b   : > { %3712 = vmatprep.subr.bf16.mxu1 %v3686_v23  ;;  %v5857_v1 = vunpack.i.h.bf16 %v5855_v57  ;;  %v5856_v56 = vunpack.i.l.bf16 %v5855_v57  ;;  %vm8828_vm12 = vmmov %vm8825_vm14  ;;  %v4643_v53 = vpack.c.bf16 %v3605_v12, %v3604_v15  ;;  %vm8840_vm7 = vnez %v8839_v59  ;;  %v8858_v57 = vld [vmem:[#allocation29_spill] sm:$0xff]  ;;  %v8914_v59 = vld [vmem:[#allocation36_spill] sm:$0xff] }
0x125c   : > { %v3596_v3 = vsel %vm8828_vm12, %v5851_v5, %v5852_v61  ;;  %v3627_v28 = vsel %vm8829_vm13, %v5877_v7, %v5876_v13  ;;  %vm8830_vm1 = vmmov %vm8829_vm13  ;;  %vm8834_vm12 = vnez %v8833_v46  ;;  %vm8846_vm13 = vcmask 908288  }
0x125d   : > { %v3626_v10 = vsel %vm8830_vm1, %v5857_v1, %v5856_v56  ;;  %v5880_v41 = vpop.permute.xlu0 %5879  ;;  %v4646_v50 = vpack.c.bf16 %v3597_v54, %v3596_v3  ;;  %v3619_v35 = vsel %vm8830_vm1, %v5876_v13, %v5877_v7  ;;  %vm8835_vm14 = vmmov %vm8830_vm1  ;;  %vm8844_vm1 = vcmask 916480   ;;  %v8860_v3 = vld [vmem:[#allocation31_spill] sm:$0xff] }
0x125e   : > { %3713 = vmatpush1.bf16.msra.mxu1 %v3685_v27  ;;  %v5882_v32 = vunpack.i.h.bf16 %v5880_v41  ;;  %v5881_v23 = vunpack.i.l.bf16 %v5880_v41  ;;  %v5860_v39 = vpop.permute.xlu1 %5859  ;;  %v3618_v24 = vsel %vm8835_vm14, %v5856_v56, %v5857_v1  ;;  %v4649_v27 = vpack.c.bf16 %v3627_v28, %v3626_v10  ;;  %vm8837_vm2 = vmmov %vm8836_vm5  ;;  %v8859_v56 = vld [vmem:[#allocation30_spill] sm:$0xff] }
0x125f   : > { %4644 = vmatprep.subr.msk.bf16.mxu1 %vm8375_vm4, %v4643_v53  ;;  %v5862_v26 = vunpack.i.h.bf16 %v5860_v39  ;;  %v5861_v0 = vunpack.i.l.bf16 %v5860_v39  ;;  %vm8838_vm4 = vmpackc.low %vm8832_vm10, %vm8832_vm10  ;;  %v4652_v21 = vpack.c.bf16 %v3619_v35, %v3618_v24  ;;  %v4616_v61 = vcombine.low %v7729_v9, %v7729_v9  ;;  %v7933_v53 = vld [vmem:[%s8861_s5] sm:$0xff] }
0x1260   : > { %v3649_v40 = vsel %vm8836_vm5, %v5882_v32, %v5881_v23  ;;  %vm8841_vm5 = vmpackc.low %vm8834_vm12, %vm8834_vm12  ;;  %v3641_v43 = vsel %vm8844_vm1, %v5881_v23, %v5882_v32  ;;  %vm8853_vm12 = vcmask 908288   ;;  %v4669_v28 = vcombine.high %v7933_v53, %v7933_v53 }
0x1261   : > { %v3648_v48 = vsel %vm8837_vm2, %v5862_v26, %v5861_v0  ;;  %v5885_v34 = vpop.permute.xlu0 %5884  ;;  %vm8843_vm2 = vnez %v8842_v47  ;;  %vm8845_vm14 = vmmov %vm8844_vm1  ;;  %vm8850_vm1 = vnez %v8849_v51  ;;  %v4668_v51 = vcombine.low %v7933_v53, %v7933_v53 }
0x1262   : > { %4647 = vmatpush1.bf16.msk.msra.mxu1 %vm8838_vm4, %v4646_v50  ;;  %v5887_v58 = vunpack.i.h.bf16 %v5885_v34  ;;  %v5886_v55 = vunpack.i.l.bf16 %v5885_v34  ;;  %v5865_v18 = vpop.permute.xlu1 %5864  ;;  %vm8380_vm4 = vmpackc.low %vm8843_vm2, %vm8843_vm2  ;;  %v3640_v11 = vsel %vm8845_vm14, %v5861_v0, %v5862_v26  ;;  %v4655_v31 = vpack.c.bf16 %v3649_v40, %v3648_v48 }
0x1263   : > { %4650 = vmatprep.subr.msk.bf16.mxu1 %vm8841_vm5, %v4649_v27  ;;  %v5867_v52 = vunpack.i.h.bf16 %v5865_v18  ;;  %v5866_v38 = vunpack.i.l.bf16 %v5865_v18  ;;  %vm8847_vm10 = vmmov %vm8846_vm13  ;;  %v4658_v4 = vpack.c.bf16 %v3641_v43, %v3640_v11 }
0x1264   : > { %v3671_v63 = vsel %vm8846_vm13, %v5887_v58, %v5886_v55  ;;  %vm8848_vm5 = vmpackc.low %vm8840_vm7, %vm8840_vm7  ;;  %vm8852_vm13 = vnez %v8851_v8  ;;  %v3663_v17 = vsel %vm8853_vm12, %v5886_v55, %v5887_v58 }
0x1265   : > { %v3670_v25 = vsel %vm8847_vm10, %v5867_v52, %v5866_v38  ;;  %vm8383_vm14 = vmpackc.low %vm8850_vm1, %vm8850_vm1 }
0x1266   : > { %4653 = vmatpush1.bf16.msk.msra.mxu1 %vm8848_vm5, %v4652_v21  ;;  %vm8382_vm10 = vmpackc.low %vm8852_vm13, %vm8852_vm13  ;;  %v4661_v37 = vpack.c.bf16 %v3671_v63, %v3670_v25  ;;  %vm8856_vm5 = vnez %v8855_v6 }
0x1267   : > { %4656 = vmatprep.subr.msk.bf16.mxu1 %vm8380_vm4, %v4655_v31  ;;  %vm8854_vm0 = vmmov %vm8853_vm12  ;;  %vm8862_vm12 = vcmask 195584  }
0x1268   : > { %v3662_v42 = vsel %vm8854_vm0, %v5866_v38, %v5867_v52  ;;  %vm8381_vm4 = vmpackc.low %vm8856_vm5, %vm8856_vm5  ;;  %vm8857_vm0 = vcmask 1043456   ;;  %4719 = vmatprep.mubr.msk.bf16.mxu0 %vm8862_vm12, %v4669_v28 }
0x1269   : > { %v4664_v22 = vpack.c.bf16 %v3663_v17, %v3662_v42  ;;  %vm8867_vm12 = vmpackc.low %vm8798_vm9, %vm8798_vm9 }
0x126a   : > { %4659 = vmatpush1.bf16.msk.msra.mxu1 %vm8383_vm14, %v4658_v4  ;;  %vm8872_vm5 = vmpackc.low %vm8799_vm8, %vm8799_vm8 }
0x126b   : > { %4662 = vmatprep.subr.msk.bf16.mxu1 %vm8382_vm10, %v4661_v37  ;;  %vm8873_vm9 = vmpackc.low %vm8805_vm11, %vm8805_vm11 }
0x126c   : > { %vm8879_vm11 = vmpackc.low %vm8813_vm15, %vm8813_vm15  ;;  %vm8885_vm15 = vnez %v8820_v30 }
0x126e   : > { %4665 = vmatpush1.bf16.msk.msra.mxu1 %vm8381_vm4, %v4664_v22 }
0x126f   : > { %4666 = vmatprep.subr.msk.bf16.mxu1 %vm8857_vm0, %v6899_v29  ;;  %vm8863_vm0 = vcmask 138240  }
0x1270   : > { %vm8864_vm4 = vmmov %vm8863_vm0 }
0x1271   : > { %vm8865_vm10 = vmmov %vm8863_vm0 }
0x1272   : > { %3723 = vmatpush1.bf16.msra.mxu1 %v6914_v2  ;;  %vm8866_vm14 = vmmov %vm8863_vm0 }
0x1275   : > { %3737 = vmatmul.mubr.bf16.vlgmr.msra.gmra.mrb[36].mxu1 %v4616_v61 }
0x1276   : > { %4105 = vmatprep.mubr.bf16.mxu1 %v8626_v44 }
0x1348   : > { %v3738_v5 = vpop.f32.mrb[36].mxu1 }
0x1349   : > { %v7906_v12 = vmax.f32 %v3738_v5, 0.0  ;;  %v3740_v15 = vpop.f32.mrb[37].mxu1 }
0x134a   : > { %v7908_v36 = vmax.f32 %v3740_v15, 0.0  ;;  %v3742_v7 = vpop.f32.mrb[38].mxu1 }
0x134b   : > { %v3743_v13 = vpop.f32.mrb[39].mxu1  ;;  %v5888_v1 = vpack.i.bf16 %v7906_v12, %v8858_v57 }
0x134c   : > { %v5903_v54 = vpack.i.bf16 %v7908_v36, %v8859_v56  ;;  %v5933_v9 = vpack.i.bf16 %v7908_v36, %v7906_v12 }
0x134d   : > { %5889 = vrot.lane.b32.xlu0 %v5888_v1, %s8788_s7 }
0x134e   : > { %5904 = vrot.lane.b32.xlu1 %v5903_v54, %s8788_s7 }
0x1351   : > { %5894 = vrot.lane.b32.xlu0 %v5888_v1, %s8789_s19 }
0x1352   : > { %5909 = vrot.lane.b32.xlu1 %v5903_v54, %s8789_s19 }
0x1355   : > { %5899 = vrot.lane.b32.xlu0 %v5888_v1, %s8619_s6 }
0x1356   : > { %5914 = vrot.lane.b32.xlu1 %v5903_v54, %s8619_s6 }
0x1359   : > { %5924 = vrot.lane.b32.xlu0 %v5888_v1, %s8543_s26 }
0x135a   : > { %5919 = vrot.lane.b32.xlu1 %v5903_v54, %s8543_s26 }
0x135d   : > { %5929 = vrot.lane.b32.xlu0 %v8860_v3, %s8618_s28 }
0x135e   : > { %5934 = vrot.lane.b32.xlu1 %v5933_v9, %s8574_s22 }
0x1361   : > { %5944 = vrot.lane.b32.xlu0 %v5933_v9, %s8790_s29 }
0x1362   : > { %5939 = vrot.lane.b32.xlu1 %v5933_v9, %s8618_s28 }
0x1366   : > { %5949 = vrot.lane.b32.xlu1 %v5933_v9, %s8791_s23 }
0x13bf   : > { %v5890_v10 = vpop.permute.xlu0 %5889 }
0x13c0   : > { %v5892_v41 = vunpack.i.h.bf16 %v5890_v10  ;;  %v5891_v32 = vunpack.i.l.bf16 %v5890_v10  ;;  %v5905_v23 = vpop.permute.xlu1 %5904 }
0x13c1   : > { %v5907_v39 = vunpack.i.h.bf16 %v5905_v23  ;;  %v5906_v50 = vunpack.i.l.bf16 %v5905_v23 }
0x13c3   : > { %v3760_v26 = vsel %vm8863_vm0, %v5892_v41, %v5907_v39  ;;  %v3766_v0 = vsel %vm8864_vm4, %v5907_v39, %v5892_v41  ;;  %v3759_v35 = vsel %vm8865_vm10, %v5891_v32, %v5906_v50  ;;  %v3765_v24 = vsel %vm8866_vm14, %v5906_v50, %v5891_v32  ;;  %v5895_v27 = vpop.permute.xlu0 %5894 }
0x13c4   : > { %v4671_v40 = vpack.c.bf16 %v3760_v26, %v3759_v35  ;;  %v4674_v48 = vpack.c.bf16 %v3766_v0, %v3765_v24  ;;  %v5897_v34 = vunpack.i.h.bf16 %v5895_v27  ;;  %v5896_v58 = vunpack.i.l.bf16 %v5895_v27  ;;  %v5910_v55 = vpop.permute.xlu1 %5909 }
0x13c5   : > { %v5912_v18 = vunpack.i.h.bf16 %v5910_v55  ;;  %v5911_v21 = vunpack.i.l.bf16 %v5910_v55  ;;  %vm8868_vm0 = vcmask 130048   ;;  %v3908_v0 = vpack.c.bf16 %v7908_v36, %v8859_v56  ;;  %v8891_v56 = vld [vmem:[#allocation33_spill] sm:$0xff] }
0x13c6   : > { %4672 = vmatprep.subr.msk.bf16.mxu0 %vm8867_vm12, %v4671_v40  ;;  %vm8869_vm4 = vmmov %vm8868_vm0  ;;  %vm8874_vm12 = vcmask 121856   ;;  %v3907_v27 = vpack.c.bf16 %v7906_v12, %v8858_v57  ;;  %v8896_v57 = vld [vmem:[#allocation32_spill] sm:$0xff] }
0x13c7   : > { %v3782_v52 = vsel %vm8868_vm0, %v5897_v34, %v5912_v18  ;;  %v3788_v38 = vsel %vm8869_vm4, %v5912_v18, %v5897_v34  ;;  %vm8870_vm10 = vmmov %vm8868_vm0  ;;  %v5900_v31 = vpop.permute.xlu0 %5899  ;;  %4675 = vmatpush1.bf16.msk.msra.mxu0 %vm8872_vm5, %v4674_v48 }
0x13c8   : > { %v3781_v43 = vsel %vm8870_vm10, %v5896_v58, %v5911_v21  ;;  %vm8871_vm14 = vmmov %vm8868_vm0  ;;  %v5902_v19 = vunpack.i.h.bf16 %v5900_v31  ;;  %v5901_v4 = vunpack.i.l.bf16 %v5900_v31  ;;  %v5915_v17 = vpop.permute.xlu1 %5914  ;;  %vm8880_vm10 = vcmask 7168  }
0x13c9   : > { %v3787_v11 = vsel %vm8871_vm14, %v5911_v21, %v5896_v58  ;;  %v4677_v63 = vpack.c.bf16 %v3782_v52, %v3781_v43  ;;  %v5917_v42 = vunpack.i.h.bf16 %v5915_v17  ;;  %v5916_v37 = vunpack.i.l.bf16 %v5915_v17  ;;  %vm8875_vm0 = vmmov %vm8874_vm12 }
0x13ca   : > { %v4680_v25 = vpack.c.bf16 %v3788_v38, %v3787_v11  ;;  %vm8876_vm4 = vmmov %vm8875_vm0 }
0x13cb   : > { %4678 = vmatprep.subr.msk.bf16.mxu0 %vm8873_vm9, %v4677_v63  ;;  %v3804_v22 = vsel %vm8874_vm12, %v5902_v19, %v5917_v42  ;;  %v3810_v61 = vsel %vm8875_vm0, %v5917_v42, %v5902_v19  ;;  %v3803_v20 = vsel %vm8876_vm4, %v5901_v4, %v5916_v37  ;;  %vm8877_vm8 = vmmov %vm8875_vm0  ;;  %v5925_v15 = vpop.permute.xlu0 %5924  ;;  %vm8887_vm4 = vcmask 1039360  }
0x13cc   : > { %v3809_v5 = vsel %vm8877_vm8, %v5916_v37, %v5901_v4  ;;  %vm8878_vm5 = vmpackc.low %vm8807_vm3, %vm8807_vm3  ;;  %v4683_v7 = vpack.c.bf16 %v3804_v22, %v3803_v20  ;;  %v5927_v45 = vunpack.i.h.bf16 %v5925_v15  ;;  %v5926_v1 = vunpack.i.l.bf16 %v5925_v15  ;;  %v5920_v54 = vpop.permute.xlu1 %5919  ;;  %v8905_v4 = vld [vmem:[#allocation35_spill] sm:$0xff]  ;;  %v8911_v22 = vld [vmem:[#allocation37_spill] sm:$0xff] }
0x13cd   : > { %4681 = vmatpush1.bf16.msk.msra.mxu0 %vm8878_vm5, %v4680_v25  ;;  %v4686_v13 = vpack.c.bf16 %v3810_v61, %v3809_v5  ;;  %v5922_v9 = vunpack.i.h.bf16 %v5920_v54  ;;  %v5921_v3 = vunpack.i.l.bf16 %v5920_v54  ;;  %vm8881_vm14 = vmmov %vm8880_vm10  ;;  %vm8888_vm8 = vnez %v8822_v33 }
0x13ce   : > { %4684 = vmatprep.subr.msk.bf16.mxu0 %vm8879_vm11, %v4683_v7  ;;  %vm8882_vm9 = vmmov %vm8880_vm10  ;;  %vm8892_vm11 = vcmask 924672  }
0x13cf   : > { %v3826_v28 = vsel %vm8880_vm10, %v5927_v45, %v5922_v9  ;;  %v3832_v10 = vsel %vm8881_vm14, %v5922_v9, %v5927_v45  ;;  %v3825_v49 = vsel %vm8882_vm9, %v5926_v1, %v5921_v3  ;;  %vm8883_vm3 = vmmov %vm8882_vm9  ;;  %v5930_v32 = vpop.permute.xlu0 %5929  ;;  %vm8893_vm10 = vnez %v8826_v62 }
0x13d0   : > { %v3831_v41 = vsel %vm8883_vm3, %v5921_v3, %v5926_v1  ;;  %vm8884_vm12 = vmpackc.low %vm8815_vm6, %vm8815_vm6  ;;  %v4689_v23 = vpack.c.bf16 %v3826_v28, %v3825_v49  ;;  %v5935_v14 = vpop.permute.xlu1 %5934  ;;  %v5932_v30 = vunpack.i.h.bf16 %v5930_v32  ;;  %v5931_v40 = vunpack.i.l.bf16 %v5930_v32 }
0x13d1   : > { %4687 = vmatpush1.bf16.msk.msra.mxu0 %vm8884_vm12, %v4686_v13  ;;  %v4692_v39 = vpack.c.bf16 %v3832_v10, %v3831_v41  ;;  %v5937_v50 = vunpack.i.h.bf16 %v5935_v14  ;;  %v5936_v26 = vunpack.i.l.bf16 %v5935_v14  ;;  %vm8886_vm0 = vmpackc.low %vm8885_vm15, %vm8885_vm15  ;;  %vm8898_vm12 = vcmask 916480  }
0x13d2   : > { %4690 = vmatprep.subr.msk.bf16.mxu0 %vm8886_vm0, %v4689_v23  ;;  %vm8889_vm6 = vmpackc.low %vm8888_vm8, %vm8888_vm8  ;;  %vm8899_vm15 = vnez %v8831_v16  ;;  %vm8902_vm8 = vnez %v8833_v46  ;;  %v8909_v16 = vld [vmem:[#allocation34_spill] sm:$0xff] }
0x13d3   : > { %v3845_v35 = vsel %vm8887_vm4, %v5937_v50, %v5936_v26  ;;  %v5945_v60 = vpop.permute.xlu0 %5944  ;;  %vm8890_vm5 = vmmov %vm8887_vm4 }
0x13d4   : > { %v5940_v24 = vpop.permute.xlu1 %5939  ;;  %v3841_v36 = vsel %vm8890_vm5, %v5936_v26, %v5937_v50  ;;  %v4695_v58 = vpack.c.bf16 %v3845_v35, %v8891_v56  ;;  %v5947_v55 = vunpack.i.h.bf16 %v5945_v60  ;;  %v5946_v18 = vunpack.i.l.bf16 %v5945_v60  ;;  %vm8894_vm14 = vmpackc.low %vm8893_vm10, %vm8893_vm10 }
0x13d5   : > { %4693 = vmatpush1.bf16.msk.msra.mxu0 %vm8889_vm6, %v4692_v39  ;;  %v5942_v48 = vunpack.i.h.bf16 %v5940_v24  ;;  %v5941_v34 = vunpack.i.l.bf16 %v5940_v24  ;;  %vm8895_vm9 = vmmov %vm8892_vm11  ;;  %v4698_v52 = vpack.c.bf16 %v3841_v36, %v8896_v57  ;;  %v8934_v57 = vld [vmem:[#allocation14_spill] sm:$0xff] }
0x13d6   : > { %3934 = vmatprep.subr.bf16.mxu0 %v3908_v0  ;;  %v3866_v12 = vsel %vm8895_vm9, %v5932_v30, %v5931_v40  ;;  %vm8897_vm3 = vmmov %vm8895_vm9  ;;  %v3880_v11 = vsel %vm8898_vm12, %v5947_v55, %v5946_v18  ;;  %v8922_v0 = vld [vmem:[#allocation6_spill] sm:$0xff] }
0x13d7   : > { %v3867_v33 = vsel %vm8892_vm11, %v5942_v48, %v5941_v34  ;;  %v3859_v38 = vsel %vm8897_vm3, %v5941_v34, %v5942_v48  ;;  %vm8900_vm0 = vmpackc.low %vm8899_vm15, %vm8899_vm15  ;;  %v4707_v17 = vpack.c.bf16 %v3880_v11, %v8905_v4  ;;  %vm8906_vm11 = vcmask 908288   ;;  %v8937_v4 = vld [vmem:[#allocation16_spill] sm:$0xff] }
0x13d8   : > { %v5950_v21 = vpop.permute.xlu1 %5949  ;;  %v4701_v43 = vpack.c.bf16 %v3867_v33, %v3866_v12  ;;  %vm8901_vm4 = vmmov %vm8897_vm3  ;;  %vm8917_vm15 = vcmask 1043456   ;;  %v8930_v33 = vld [vmem:[#allocation12_spill] sm:$0xff] }
0x13d9   : > { %3935 = vmatpush1.bf16.msra.mxu0 %v3907_v27  ;;  %v5952_v31 = vunpack.i.h.bf16 %v5950_v21  ;;  %v5951_v63 = vunpack.i.l.bf16 %v5950_v21  ;;  %v3858_v62 = vsel %vm8901_vm4, %v5931_v40, %v5932_v30  ;;  %vm8903_vm6 = vmpackc.low %vm8902_vm8, %vm8902_vm8  ;;  %vm8923_vm8 = vnez %v8922_v0  ;;  %v8928_v30 = vld [vmem:[#allocation7_spill] sm:$0xff] }
0x13da   : > { %4696 = vmatprep.subr.msk.bf16.mxu0 %vm8894_vm14, %v4695_v58  ;;  %v4704_v25 = vpack.c.bf16 %v3859_v38, %v3858_v62  ;;  %vm8904_vm5 = vmmov %vm8898_vm12 }
0x13db   : > { %v3876_v19 = vsel %vm8904_vm5, %v5946_v18, %v5947_v55  ;;  %v3893_v42 = vsel %vm8906_vm11, %v5952_v31, %v5951_v63  ;;  %vm8907_vm10 = vmpackc.low %vm8840_vm7, %vm8840_vm7 }
0x13dc   : > { %vm8908_vm14 = vmpackc.low %vm8843_vm2, %vm8843_vm2  ;;  %v4710_v46 = vpack.c.bf16 %v3876_v19, %v8909_v16  ;;  %v4713_v61 = vpack.c.bf16 %v3893_v42, %v8911_v22  ;;  %vm8915_vm2 = vnez %v8855_v6 }
0x13dd   : > { %4699 = vmatpush1.bf16.msk.msra.mxu0 %vm8900_vm0, %v4698_v52  ;;  %vm8910_vm9 = vmmov %vm8906_vm11  ;;  %vm8920_vm0 = vcmask 138240   ;;  %vm8926_vm11 = vcmask 121856  }
0x13de   : > { %4702 = vmatprep.subr.msk.bf16.mxu0 %vm8903_vm6, %v4701_v43  ;;  %v3889_v37 = vsel %vm8910_vm9, %v5951_v63, %v5952_v31  ;;  %vm8912_vm3 = vmpackc.low %vm8850_vm1, %vm8850_vm1  ;;  %vm8918_vm1 = vcmask 130048   ;;  %vm8924_vm6 = vcmask 7168   ;;  %vm8931_vm9 = vnez %v8930_v33 }
0x13df   : > { %vm8913_vm7 = vmpackc.low %vm8852_vm13, %vm8852_vm13  ;;  %v4716_v47 = vpack.c.bf16 %v3889_v37, %v8914_v59  ;;  %v8943_v37 = vld [vmem:[#allocation21_spill] sm:$0xff] }
0x13e0   : > { %vm8916_vm12 = vmpackc.low %vm8915_vm2, %vm8915_vm2  ;;  %vm8935_vm2 = vnez %v8934_v57 }
0x13e1   : > { %4705 = vmatpush1.bf16.msk.msra.mxu0 %vm8907_vm10, %v4704_v25  ;;  %vm8919_vm13 = vmmov %vm8918_vm1 }
0x13e2   : > { %4708 = vmatprep.subr.msk.bf16.mxu0 %vm8908_vm14, %v4707_v17  ;;  %vm8921_vm4 = vmmov %vm8920_vm0  ;;  %vm8929_vm14 = vnez %v8928_v30 }
0x13e3   : > { %vm8925_vm5 = vmmov %vm8924_vm6 }
0x13e4   : > { %vm8927_vm10 = vmmov %vm8926_vm11 }
0x13e5   : > { %4711 = vmatpush1.bf16.msk.msra.mxu0 %vm8912_vm3, %v4710_v46  ;;  %vm8932_vm3 = vcmask 1039360  }
0x13e6   : > { %4714 = vmatprep.subr.msk.bf16.mxu0 %vm8913_vm7, %v4713_v61  ;;  %vm8933_vm7 = vmmov %vm8932_vm3 }
0x13e9   : > { %4717 = vmatpush1.bf16.msk.msra.mxu0 %vm8916_vm12, %v4716_v47  ;;  %vm8936_vm12 = vcmask 924672   ;;  %v8946_v47 = vmov 1.0  }
0x13ea   : > { %4718 = vmatprep.subr.msk.bf16.mxu0 %vm8917_vm15, %v6899_v29  ;;  %vm8938_vm15 = vnez %v8937_v4 }
0x13ed   : > { %3945 = vmatpush1.bf16.msra.mxu0 %v6914_v2 }
0x13f0   : > { %3959 = vmatmul.mubr.bf16.vlgmr.msra.gmra.mrb[36].mxu0 %v4668_v51 }
0x13f1   : > { %4154 = vmatprep.mubr.bf16.mxu0 %v8626_v44 }
0x14c3   : > { %v3960_v8 = vpop.f32.mrb[36].mxu0 }
0x14c4   : > { %v8060_v20 = vmax.f32 %v3960_v8, 0.0  ;;  %v3962_v5 = vpop.f32.mrb[37].mxu0  ;;  %v8947_v8 = vld [vmem:[#allocation22_spill] sm:$0xff] }
0x14c5   : > { %v3968_v15 = vmax.f32 %v3962_v5, 0.0  ;;  %v3964_v7 = vpop.f32.mrb[38].mxu0  ;;  %v8951_v5 = vld [vmem:[#allocation26_spill] sm:$0xff] }
0x14c6   : > { %v3965_v6 = vpop.f32.mrb[39].mxu0  ;;  %v8953_v7 = vld [vmem:[#allocation28_spill] sm:$0xff] }
0x14c7   : > { %v5958_v13 = vpack.i.bf16 %v8060_v20, %v3968_v15  ;;  %v5978_v29 = vpack.i.bf16 %v3968_v15, %v8060_v20 }
0x14c9   : > { %5959 = vrot.lane.b32.xlu1 %v5958_v13, %s8789_s19  ;;  %5954 = vrot.lane.b32.xlu0 %v5958_v13, %s8788_s7 }
0x14cd   : > { %5969 = vrot.lane.b32.xlu1 %v5958_v13, %s8543_s26  ;;  %5964 = vrot.lane.b32.xlu0 %v5958_v13, %s8619_s6  ;;  %s8955_s6 = sld [smem:[#allocation49_spill]] }
0x14d1   : > { %5979 = vrot.lane.b32.xlu1 %v5978_v29, %s8618_s28  ;;  %5974 = vrot.lane.b32.xlu0 %v5978_v29, %s8574_s22 }
0x14d3   : > { %v4059_v6 = vld [vmem:[%s8955_s6] sm:$0xf] }
0x14d5   : > { %5989 = vrot.lane.b32.xlu1 %v5978_v29, %s8791_s23  ;;  %5984 = vrot.lane.b32.xlu0 %v5978_v29, %s8790_s29 }
0x153b   : > { %v5960_v2 = vpop.permute.xlu1 %5959  ;;  %v5955_v44 = vpop.permute.xlu0 %5954 }
0x153c   : > { %v5962_v53 = vunpack.i.h.bf16 %v5960_v2  ;;  %v5961_v45 = vunpack.i.l.bf16 %v5960_v2  ;;  %v5957_v1 = vunpack.i.h.bf16 %v5955_v44  ;;  %v5956_v54 = vunpack.i.l.bf16 %v5955_v44 }
0x153e   : > { %v3987_v9 = vsel %vm8918_vm1, %v5962_v53, %v5961_v45  ;;  %v3990_v3 = vsel %vm8919_vm13, %v5961_v45, %v5962_v53  ;;  %v3976_v28 = vsel %vm8920_vm0, %v5957_v1, %v5956_v54  ;;  %v3979_v10 = vsel %vm8921_vm4, %v5956_v54, %v5957_v1  ;;  %vm8939_vm1 = vmmov %vm8936_vm12  ;;  %v8958_v1 = vld [vmem:[#allocation18_spill] sm:$0xff] }
0x153f   : > { %v4721_v49 = vpack.c.bf16 %v3987_v9, %v3976_v28  ;;  %v4724_v41 = vpack.c.bf16 %v3990_v3, %v3979_v10  ;;  %v5970_v32 = vpop.permute.xlu1 %5969  ;;  %v5965_v23 = vpop.permute.xlu0 %5964  ;;  %vm8940_vm13 = vcmask 908288   ;;  %vm8941_vm0 = vcmask 916480   ;;  %v4116_v3 = vld [vmem:[%s8960_s8] sm:$0x1] }
0x1540   : > { %v5972_v39 = vunpack.i.h.bf16 %v5970_v32  ;;  %v5971_v14 = vunpack.i.l.bf16 %v5970_v32  ;;  %v5967_v50 = vunpack.i.h.bf16 %v5965_v23  ;;  %v5966_v26 = vunpack.i.l.bf16 %v5965_v23  ;;  %vm8942_vm4 = vmmov %vm8941_vm0 }
0x1541   : > { %4722 = vmatprep.subr.msk.bf16.mxu1 %vm8923_vm8, %v4721_v49  ;;  %vm8944_vm8 = vnez %v8943_v37 }
0x1542   : > { %v4009_v35 = vsel %vm8924_vm6, %v5972_v39, %v5971_v14  ;;  %v4012_v60 = vsel %vm8925_vm5, %v5971_v14, %v5972_v39  ;;  %v3998_v24 = vsel %vm8926_vm11, %v5967_v50, %v5966_v26  ;;  %v4001_v27 = vsel %vm8927_vm10, %v5966_v26, %v5967_v50  ;;  %4725 = vmatpush1.bf16.msk.msra.mxu1 %vm8929_vm14, %v4724_v41  ;;  %vm8945_vm6 = vmmov %vm8940_vm13 }
0x1543   : > { %v4727_v40 = vpack.c.bf16 %v4009_v35, %v3998_v24  ;;  %v4730_v48 = vpack.c.bf16 %v4012_v60, %v4001_v27  ;;  %v5980_v34 = vpop.permute.xlu1 %5979  ;;  %v5975_v36 = vpop.permute.xlu0 %5974  ;;  %vm8948_vm5 = vnez %v8947_v8  ;;  %vm8952_vm10 = vnez %v8951_v5 }
0x1544   : > { %v5977_v56 = vunpack.i.h.bf16 %v5975_v36  ;;  %v5976_v58 = vunpack.i.l.bf16 %v5975_v36  ;;  %v5982_v55 = vunpack.i.h.bf16 %v5980_v34  ;;  %v5981_v18 = vunpack.i.l.bf16 %v5980_v34 }
0x1545   : > { %4728 = vmatprep.subr.msk.bf16.mxu1 %vm8931_vm9, %v4727_v40  ;;  %vm8954_vm14 = vnez %v8953_v7  ;;  %vm8956_vm9 = vcmask 654336   ;;  %v6114_v60 = vmov 1966171168  }
0x1546   : > { %v4019_v21 = vsel %vm8932_vm3, %v5976_v58, %v5977_v56  ;;  %v4023_v12 = vsel %vm8933_vm7, %v5977_v56, %v5976_v58  ;;  %4731 = vmatpush1.bf16.msk.msra.mxu1 %vm8935_vm2, %v4730_v48  ;;  %v4030_v19 = vsel %vm8936_vm12, %v5981_v18, %v5982_v55  ;;  %v4034_v17 = vsel %vm8939_vm1, %v5982_v55, %v5981_v18 }
0x1547   : > { %v4733_v52 = vpack.c.bf16 %v4023_v12, %v3968_v15  ;;  %v4736_v38 = vpack.c.bf16 %v4019_v21, %v8060_v20  ;;  %v5990_v43 = vpop.permute.xlu1 %5989  ;;  %v5985_v11 = vpop.permute.xlu0 %5984  ;;  %v8949_v20 = vld [vmem:[#allocation25_spill] sm:$0xff]  ;;  %vm8957_vm3 = vmmov 1   ;;  %vm8959_vm7 = vcmp.eq.s32.totalorder %v8958_v1, 0 }
0x1548   : > { %v5992_v31 = vunpack.i.h.bf16 %v5990_v43  ;;  %v5991_v63 = vunpack.i.l.bf16 %v5990_v43  ;;  %v5987_v62 = vunpack.i.h.bf16 %v5985_v11  ;;  %v5986_v25 = vunpack.i.l.bf16 %v5985_v11  ;;  %vm4751_vm2 = vmpackc.low %vm8959_vm7, %vm8957_vm3 }
0x1549   : > { %4734 = vmatprep.subr.msk.bf16.mxu1 %vm8938_vm15, %v4733_v52  ;;  %vm8950_vm11 = vnez %v8949_v20  ;;  %vm8961_vm12 = vcmask 130048   ;;  %v4179_v24 = vunpack.c.l.s4 %v6114_v60  ;;  %v8964_v56 = vlaneseq }
0x154a   : > { %v4056_v42 = vsel %vm8940_vm13, %v5992_v31, %v5991_v63  ;;  %v4041_v16 = vsel %vm8941_vm0, %v5986_v25, %v5987_v62  ;;  %v4045_v46 = vsel %vm8942_vm4, %v5987_v62, %v5986_v25  ;;  %4737 = vmatpush1.bf16.msk.msra.mxu1 %vm8944_vm8, %v4736_v38  ;;  %v4052_v59 = vsel %vm8945_vm6, %v5991_v63, %v5992_v31 }
0x154b   : > { %v4739_v22 = vpack.c.bf16 %v4045_v46, %v4034_v17  ;;  %v4742_v61 = vpack.c.bf16 %v4041_v16, %v4030_v19  ;;  %v4745_v51 = vpack.c.bf16 %v8946_v47, %v4056_v42  ;;  %v4748_v15 = vpack.c.bf16 %v8946_v47, %v4052_v59 }
0x154c   : > { %v4180_v27 = vunpack.c.0.s8 %v4179_v24  ;;  %vm4195_vm15 = vcmp.lt.s32.totalorder %v8964_v56, 256 }
0x154d   : > { %4740 = vmatprep.subr.msk.bf16.mxu1 %vm8948_vm5, %v4739_v22 }
0x154e   : > { %4743 = vmatpush1.bf16.msk.msra.mxu1 %vm8950_vm11, %v4742_v61  ;;  %v4183_v40 = vsub.s32 %v4180_v27, %v8958_v1 }
0x154f   : > { %4746 = vmatprep.subr.msk.bf16.mxu1 %vm8952_vm10, %v4745_v51 }
0x1552   : > { %4749 = vmatpush1.bf16.msk.msra.mxu1 %vm8954_vm14, %v4748_v15 }
0x1555   : > { %4750 = vmatmul.mubr.msk.bf16.vlgmr.msra.gmra.mrb[40].mxu1 %vm8956_vm9, %v4059_v6 }
0x1628   : > { %v4107_v13 = vpop.f32.mrb[40].mxu1 }
0x1629   : > { %v4114_v29 = vmax.f32 %v4107_v13, 0.0  ;;  %v4109_v2 = vpop.f32.mrb[41].mxu1 }
0x162a   : > { %v4115_v44 = vmax.f32 %v4109_v2, 0.0  ;;  %v4111_v53 = vpop.f32.mrb[42].mxu1 }
0x162b   : > { %v4112_v45 = vpop.f32.mrb[43].mxu1  ;;  %v4755_v9 = vpack.c.bf16 %v8946_v47, %v4114_v29 }
0x162c   : > { %v4752_v54 = vpack.c.bf16 %v8946_v47, %v4115_v44 }
0x162e   : > { %4753 = vmatprep.subr.msk.bf16.mxu0 %vm4751_vm2, %v4752_v54 }
0x162f   : > { %4756 = vmatpush1.bf16.msk.msra.mxu0 %vm4751_vm2, %v4755_v9 }
0x1632   : > { %4757 = vmatmul.mubr.msk.bf16.vlgmr.msra.gmra.mrb[40].mxu0 %vm8961_vm12, %v4116_v3 }
0x1705   : > { %v4156_v28 = vpop.f32.mrb[40].mxu0 }
0x1706   : > { %v4163_v10 = vsub.f32 0.0, %v4156_v28  ;;  %v4158_v49 = vpop.f32.mrb[41].mxu0 }
0x1707   : > { %v4164_v41 = vsub.f32 0.0, %v4158_v49  ;;  %v4160_v32 = vpop.f32.mrb[42].mxu0 }
0x1708   : > { %v4165_v23 = vmul.f32 1.442695, %v4163_v10  ;;  %v4161_v39 = vpop.f32.mrb[43].mxu0 }
0x1709   : > { %v4167_v14 = vmul.f32 1.442695, %v4164_v41 }
0x170a   : > { %6059 = vpow2.f32 %v4165_v23 }
0x170b   : > { %6061 = vpow2.f32 %v4167_v14 }
0x1714   : > { %v6060_v50 = vpop.eup %6059 }
0x1715   : > { %v6062_v26 = vpop.eup %6061  ;;  %v4169_v0 = vadd.f32 1.0, %v6060_v50 }
0x1716   : > { %v4170_v35 = vadd.f32 1.0, %v6062_v26 }
0x1717   : > { %6063 = vrcp.f32 %v4169_v0 }
0x1718   : > { %6065 = vrcp.f32 %v4170_v35 }
0x1721   : > { %v6064_v30 = vpop.eup %6063 }
0x1722   : > { %v6066_v48 = vpop.eup %6065 }
0x1723   : > { %v4177_v34 = vcombine.low %v6064_v30, %v6066_v48 }
0x1725   : > { %v4184_v36 = vrot.slane %v4177_v34, %v4183_v40 }
0x1727   : > { %v4191_v58 = vrot.slane %v4184_v36, %v4183_v40 }
0x1729   : > { %4197 = vst.msk [vmem:[%s573_s18] sm:$0x3] %vm4195_vm15, %v4191_v58 }
0x172a PF: > { %s8965_s14 = sld [smem:[#allocation2_spill]] }
0x1730   : > { %s28_s27 = sadd.s32 1, %s8965_s14  }
0x1731   : > { %p25_p4 = scmp.ge.s32.totalorder %s28_s27, 4  }
0x1733   :  { %27 = sbr.rel (!%p25_p4) target bundleno = 15 (0xf), region = 122 }

</bundles_post_ra>
